<compile_context>
chip_gen: v5e
topology: v5e:2x2
jax: 0.10.0
libtpu: 0.0.40
codegen_flags: <defaults>
</compile_context>

<pallas_src>
import functools

import jax
import jax.numpy as jnp
from jax.experimental import pallas as pl
from jax.experimental.pallas import tpu as pltpu

EPS = 1e-5
# Raised scoped-VMEM limit: > default on v5e (16 MiB) / v6e (32 MiB), still
# leaves headroom on v7x's 64 MiB physical VMEM.
VMEM_LIMIT = 48 * 1024 * 1024


def _pick_tile_rows(m, target):
    """Largest divisor of m that is <= target and sublane-friendly."""
    t = min(m, target)
    while t > 1:
        if m % t == 0 and (t % 8 == 0 or t == m):
            return t
        t -= 1
    return m


# ---------------------------------------------------------------------------
# Kernel A: per-channel sum / sum-of-squares of x  (feeds BN1)
#   grid over row tiles (reduction axis, "arbitrary"); stats stay resident.
# ---------------------------------------------------------------------------
def stats_kernel(x_ref, sum_ref, sq_ref):
    @pl.when(pl.program_id(0) == 0)
    def _init():
        sum_ref[...] = jnp.zeros_like(sum_ref)
        sq_ref[...] = jnp.zeros_like(sq_ref)

    x = x_ref[...]
    sum_ref[...] += jnp.sum(x, axis=0, keepdims=True)
    sq_ref[...] += jnp.sum(x * x, axis=0, keepdims=True)


# ---------------------------------------------------------------------------
# Kernel B: BN1 -> ReLU -> conv1 (1x1, bf16 MXU); also accumulates BN2 stats.
#   conv1 bias dropped (cancelled by BN2 mean subtraction).  a1 stored bf16.
# ---------------------------------------------------------------------------
def stage1_kernel(x_ref, s1_ref, q1_ref, g1_ref, b1_ref, w1_ref,
                  a1_ref, s2_ref, q2_ref, *, inv_m):
    @pl.when(pl.program_id(0) == 0)
    def _init():
        s2_ref[...] = jnp.zeros_like(s2_ref)
        q2_ref[...] = jnp.zeros_like(q2_ref)

    x = x_ref[...]
    mu = s1_ref[...] * inv_m
    var = jnp.maximum(q1_ref[...] * inv_m - mu * mu, 0.0)
    scale = g1_ref[...] * jax.lax.rsqrt(var + EPS)
    shift = b1_ref[...] - mu * scale
    h1 = jnp.maximum(x * scale + shift, 0.0)

    acc = jnp.dot(h1.astype(jnp.bfloat16), w1_ref[...],
                  preferred_element_type=jnp.float32)
    s2_ref[...] += jnp.sum(acc, axis=0, keepdims=True)
    q2_ref[...] += jnp.sum(acc * acc, axis=0, keepdims=True)
    a1_ref[...] = acc.astype(a1_ref.dtype)


# ---------------------------------------------------------------------------
# Kernel C: BN2 -> ReLU -> conv2 (3x3) as ONE bf16 MXU matmul via an in-VMEM
#   im2col; the 1-pixel zero halo is built inside the kernel (no XLA pad).
#   One image per grid step; also accumulates BN3 stats.  a2 stored bf16.
#   conv2 bias dropped (cancelled by BN3 mean subtraction).
# ---------------------------------------------------------------------------
def stage2_kernel(a1_ref, s2_ref, q2_ref, g2_ref, b2_ref, w2_ref,
                  a2_ref, s3_ref, q3_ref, pad_ref, col_ref, *, inv_m, hw):
    h_out, w_out = hw
    c = a1_ref.shape[-1]

    @pl.when(pl.program_id(0) == 0)
    def _init():
        s3_ref[...] = jnp.zeros_like(s3_ref)
        q3_ref[...] = jnp.zeros_like(q3_ref)
        # Zero the whole padded scratch once: the border stays zero forever,
        # the interior is fully overwritten every grid step.
        pad_ref[...] = jnp.zeros_like(pad_ref)

    # BN2 (f32 elementwise) -> ReLU -> bf16, written into the interior of the
    # zero-bordered scratch (true zero padding for the conv).
    a1 = a1_ref[...].astype(jnp.float32)                 # (H*W, C_mid)
    mu = s2_ref[...] * inv_m
    var = jnp.maximum(q2_ref[...] * inv_m - mu * mu, 0.0)
    scale = g2_ref[...] * jax.lax.rsqrt(var + EPS)
    shift = b2_ref[...] - mu * scale
    h2 = jnp.maximum(a1 * scale + shift, 0.0).astype(jnp.bfloat16)
    pad_ref[1:h_out + 1, 1:w_out + 1, :] = h2.reshape(h_out, w_out, c)

    # im2col: pack the 9 shifted taps along K -> single matmul, K = 9*C_mid.
    for k in range(9):
        dy, dx = divmod(k, 3)
        col_ref[:, k * c:(k + 1) * c] = (
            pad_ref[dy:dy + h_out, dx:dx + w_out, :].reshape(h_out * w_out, c))

    acc = jnp.dot(col_ref[...], w2_ref[...],
                  preferred_element_type=jnp.float32)    # (H*W, C_mid) f32

    s3_ref[...] += jnp.sum(acc, axis=0, keepdims=True)
    q3_ref[...] += jnp.sum(acc * acc, axis=0, keepdims=True)
    a2_ref[...] = acc.astype(a2_ref.dtype)


# ---------------------------------------------------------------------------
# Kernel D: BN3 -> ReLU -> conv3 (1x1, bf16 MXU) + conv3 bias + residual add.
#   No reduction -> grid axis is "parallel".
# ---------------------------------------------------------------------------
def stage3_kernel(a2_ref, x_ref, s3_ref, q3_ref, g3_ref, b3_ref, w3_ref,
                  c3b_ref, o_ref, *, inv_m):
    a2 = a2_ref[...].astype(jnp.float32)
    mu = s3_ref[...] * inv_m
    var = jnp.maximum(q3_ref[...] * inv_m - mu * mu, 0.0)
    scale = g3_ref[...] * jax.lax.rsqrt(var + EPS)
    shift = b3_ref[...] - mu * scale
    h3 = jnp.maximum(a2 * scale + shift, 0.0)

    a3 = jnp.dot(h3.astype(jnp.bfloat16), w3_ref[...],
                 preferred_element_type=jnp.float32)
    o_ref[...] = a3 + c3b_ref[...] + x_ref[...]


# ---------------------------------------------------------------------------
# Wrapper
# ---------------------------------------------------------------------------
def bottleneck_forward(x_nchw, kp):
    N, C_in, H, W = x_nchw.shape
    C_mid = kp["w1"].shape[1]
    C_out = kp["w3"].shape[1]
    assert C_out == C_in, "downsample=None requires c_in == 4*c_out"
    M = N * H * W
    HW = H * W
    inv_m = 1.0 / M

    # NCHW -> NHWC -> (M, C).  TODO(synk): interface-only layout cost.
    x_flat = jnp.transpose(x_nchw, (0, 2, 3, 1)).reshape(M, C_in)

    tile_a = _pick_tile_rows(M, target=2048)   # pure mem-bound stats pass
    tile_m = _pick_tile_rows(M, target=1024)   # compute stages
    nt_a = M // tile_a
    nt = M // tile_m

    arb = pltpu.CompilerParams(dimension_semantics=("arbitrary",),
                               vmem_limit_bytes=VMEM_LIMIT)
    par = pltpu.CompilerParams(dimension_semantics=("parallel",),
                               vmem_limit_bytes=VMEM_LIMIT)

    # ---- Kernel A: BN1 batch statistics ----------------------------------
    s1, q1 = pl.pallas_call(
        stats_kernel,
        grid=(nt_a,),
        in_specs=[pl.BlockSpec((tile_a, C_in), lambda i: (i, 0))],
        out_specs=[pl.BlockSpec((1, C_in), lambda i: (0, 0)),
                   pl.BlockSpec((1, C_in), lambda i: (0, 0))],
        out_shape=[jax.ShapeDtypeStruct((1, C_in), jnp.float32),
                   jax.ShapeDtypeStruct((1, C_in), jnp.float32)],
        compiler_params=arb,
    )(x_flat)

    # ---- Kernel B: bn1 -> relu -> conv1; accumulate BN2 stats -------------
    a1, s2, q2 = pl.pallas_call(
        functools.partial(stage1_kernel, inv_m=inv_m),
        grid=(nt,),
        in_specs=[
            pl.BlockSpec((tile_m, C_in), lambda i: (i, 0)),
            pl.BlockSpec((1, C_in), lambda i: (0, 0)),
            pl.BlockSpec((1, C_in), lambda i: (0, 0)),
            pl.BlockSpec((1, C_in), lambda i: (0, 0)),
            pl.BlockSpec((1, C_in), lambda i: (0, 0)),
            pl.BlockSpec((C_in, C_mid), lambda i: (0, 0)),
        ],
        out_specs=[
            pl.BlockSpec((tile_m, C_mid), lambda i: (i, 0)),
            pl.BlockSpec((1, C_mid), lambda i: (0, 0)),
            pl.BlockSpec((1, C_mid), lambda i: (0, 0)),
        ],
        out_shape=[
            jax.ShapeDtypeStruct((M, C_mid), jnp.bfloat16),   # bf16 intermediate
            jax.ShapeDtypeStruct((1, C_mid), jnp.float32),
            jax.ShapeDtypeStruct((1, C_mid), jnp.float32),
        ],
        compiler_params=arb,
    )(x_flat, s1, q1, kp["g1"], kp["b1"], kp["w1"])

    # ---- Kernel C: bn2 -> relu -> conv2 (3x3); accumulate BN3 stats --------
    # a1 stays flat (M, C_mid); each grid step reads image n's HW rows and
    # builds the zero halo + im2col entirely in VMEM (no XLA pad round-trip).
    a2, s3, q3 = pl.pallas_call(
        functools.partial(stage2_kernel, inv_m=inv_m, hw=(H, W)),
        grid=(N,),
        in_specs=[
            pl.BlockSpec((HW, C_mid), lambda n: (n, 0)),
            pl.BlockSpec((1, C_mid), lambda n: (0, 0)),
            pl.BlockSpec((1, C_mid), lambda n: (0, 0)),
            pl.BlockSpec((1, C_mid), lambda n: (0, 0)),
            pl.BlockSpec((1, C_mid), lambda n: (0, 0)),
            pl.BlockSpec((9 * C_mid, C_mid), lambda n: (0, 0)),
        ],
        out_specs=[
            pl.BlockSpec((HW, C_mid), lambda n: (n, 0)),
            pl.BlockSpec((1, C_mid), lambda n: (0, 0)),
            pl.BlockSpec((1, C_mid), lambda n: (0, 0)),
        ],
        out_shape=[
            jax.ShapeDtypeStruct((M, C_mid), jnp.bfloat16),   # bf16 intermediate
            jax.ShapeDtypeStruct((1, C_mid), jnp.float32),
            jax.ShapeDtypeStruct((1, C_mid), jnp.float32),
        ],
        scratch_shapes=[
            pltpu.VMEM((H + 2, W + 2, C_mid), jnp.bfloat16),   # zero-halo image
            pltpu.VMEM((HW, 9 * C_mid), jnp.bfloat16),         # im2col buffer
        ],
        compiler_params=arb,
    )(a1, s2, q2, kp["g2"], kp["b2"], kp["w2"])

    # ---- Kernel D: bn3 -> relu -> conv3 (+bias) + residual -----------------
    out_flat = pl.pallas_call(
        functools.partial(stage3_kernel, inv_m=inv_m),
        grid=(nt,),
        in_specs=[
            pl.BlockSpec((tile_m, C_mid), lambda i: (i, 0)),
            pl.BlockSpec((tile_m, C_in), lambda i: (i, 0)),
            pl.BlockSpec((1, C_mid), lambda i: (0, 0)),
            pl.BlockSpec((1, C_mid), lambda i: (0, 0)),
            pl.BlockSpec((1, C_mid), lambda i: (0, 0)),
            pl.BlockSpec((1, C_mid), lambda i: (0, 0)),
            pl.BlockSpec((C_mid, C_out), lambda i: (0, 0)),
            pl.BlockSpec((1, C_out), lambda i: (0, 0)),
        ],
        out_specs=pl.BlockSpec((tile_m, C_out), lambda i: (i, 0)),
        out_shape=jax.ShapeDtypeStruct((M, C_out), jnp.float32),
        compiler_params=par,
    )(a2, x_flat, s3, q3, kp["g3"], kp["b3"], kp["w3"], kp["c3b"])

    # (M, C_out) -> NCHW
    return out_flat.reshape(N, H, W, C_out).transpose(0, 3, 1, 2)


# ---------------------------------------------------------------------------
# Deterministic parameter construction (PyTorch-shaped, then kernel layout)
# ---------------------------------------------------------------------------
def make_params(key, c_in, c_mid):
    c_out = 4 * c_mid
    ks = jax.random.split(key, 12)
    scale = 0.1
    w1_t = scale * jax.random.normal(ks[0], (c_mid, c_in, 1, 1), jnp.float32)
    w2_t = scale * jax.random.normal(ks[1], (c_mid, c_mid, 3, 3), jnp.float32)
    w3_t = scale * jax.random.normal(ks[2], (c_out, c_mid, 1, 1), jnp.float32)
    c1b = scale * jax.random.normal(ks[3], (c_mid,), jnp.float32)
    c2b = scale * jax.random.normal(ks[4], (c_mid,), jnp.float32)
    c3b = scale * jax.random.normal(ks[5], (c_out,), jnp.float32)
    g1 = 1.0 + scale * jax.random.normal(ks[6], (c_in,), jnp.float32)
    b1 = scale * jax.random.normal(ks[7], (c_in,), jnp.float32)
    g2 = 1.0 + scale * jax.random.normal(ks[8], (c_mid,), jnp.float32)
    b2 = scale * jax.random.normal(ks[9], (c_mid,), jnp.float32)
    g3 = 1.0 + scale * jax.random.normal(ks[10], (c_mid,), jnp.float32)
    b3 = scale * jax.random.normal(ks[11], (c_mid,), jnp.float32)

    # kernel layouts: 1x1 weights transposed to (in, out), bf16;
    # 3x3 weight flattened to (9*c_in_mid, c_out_mid) with row = tap*C + c_in,
    # tap = dy*3 + dx  (matches the im2col column ordering in stage2).
    w1_k = w1_t[:, :, 0, 0].T.astype(jnp.bfloat16)
    w3_k = w3_t[:, :, 0, 0].T.astype(jnp.bfloat16)
    w2_taps = jnp.stack([w2_t[:, :, dy, dx].T
                         for dy in range(3) for dx in range(3)], axis=0)
    w2_k = w2_taps.reshape(9 * c_mid, c_mid).astype(jnp.bfloat16)

    torch_params = dict(w1=w1_t, w2=w2_t, w3=w3_t, c1b=c1b, c2b=c2b, c3b=c3b,
                        g1=g1, b1=b1, g2=g2, b2=b2, g3=g3, b3=b3)
    # NOTE: c1b / c2b intentionally omitted (cancelled exactly by BN2 / BN3).
    kernel_params = dict(
        w1=w1_k, w2=w2_k, w3=w3_k,
        c3b=c3b.reshape(1, -1),
        g1=g1.reshape(1, -1), b1=b1.reshape(1, -1),
        g2=g2.reshape(1, -1), b2=b2.reshape(1, -1),
        g3=g3.reshape(1, -1), b3=b3.reshape(1, -1),
    )
    return torch_params, kernel_params


# Plain-JAX reference (NCHW, matches torch semantics) for a sanity check.
def reference_forward(x, tp):
    def bn(h, g, b):
        mu = jnp.mean(h, axis=(0, 2, 3), keepdims=True)
        var = jnp.mean((h - mu) ** 2, axis=(0, 2, 3), keepdims=True)
        return (h - mu) * jax.lax.rsqrt(var + EPS) * g.reshape(1, -1, 1, 1) \
            + b.reshape(1, -1, 1, 1)

    def conv(h, w, b, pad):
        y = jax.lax.conv_general_dilated(
            h, w, window_strides=(1, 1), padding=[(pad, pad), (pad, pad)],
            dimension_numbers=("NCHW", "OIHW", "NCHW"))
        return y + b.reshape(1, -1, 1, 1)

    identity = x
    out = jnp.maximum(bn(x, tp["g1"], tp["b1"]), 0.0)
    out = conv(out, tp["w1"], tp["c1b"], 0)
    out = jnp.maximum(bn(out, tp["g2"], tp["b2"]), 0.0)
    out = conv(out, tp["w2"], tp["c2b"], 1)
    out = jnp.maximum(bn(out, tp["g3"], tp["b3"]), 0.0)
    out = conv(out, tp["w3"], tp["c3b"], 0)
    return out + identity


if __name__ == "__main__":
    key = jax.random.PRNGKey(0)
    k_x, k_p = jax.random.split(key)

    N, C_IN, H, W = 2, 16, 16, 16      # Bottleneck(c_in=16, c_out=4): 16 == 4*4
    C_MID = 4

    x = jax.random.normal(k_x, (N, C_IN, H, W), jnp.float32)
    torch_params, kernel_params = make_params(k_p, C_IN, C_MID)

    out = jax.jit(bottleneck_forward)(x, kernel_params)
    out = jax.block_until_ready(out)

    ref = reference_forward(x, torch_params)
    assert out.shape == (N, C_IN, H, W)
    err = jnp.max(jnp.abs(out - ref))
    # bf16 MXU operands AND bf16-stored a1/a2 intermediates -> looser tolerance
    # than a pure-f32 pipeline.
    assert jnp.allclose(out, ref, atol=5e-2, rtol=5e-2), f"max abs err {err}"

    print("KERNEL_OK")
</pallas_src>

<mosaic_0001>
module attributes {stable_mosaic.version = 11 : i64} {
  func.func @stats_kernel(%arg0: i32, %arg1: memref<512x16xf32, #tpu.memory_space<vmem>>, %arg2: memref<1x16xf32, #tpu.memory_space<vmem>>, %arg3: memref<1x16xf32, #tpu.memory_space<vmem>>) attributes {dimension_semantics = [#tpu.dimension_semantics<arbitrary>], iteration_bounds = array<i64: 1>, scalar_prefetch = 0 : i64, scratch_operands = 0 : i64, tpu.core_type = #tpu.core_type<tc>, window_params = [{transform_indices = @transform_0, window_bounds = array<i64: 512, 16>}, {pipeline_mode = #tpu.pipeline_mode<synchronous>, transform_indices = @transform_1, window_bounds = array<i64: 1, 16>}, {pipeline_mode = #tpu.pipeline_mode<synchronous>, transform_indices = @transform_2, window_bounds = array<i64: 1, 16>}]} {
    %c0_i32 = arith.constant 0 : i32
    %0 = arith.cmpi eq, %arg0, %c0_i32 : i32
    %1 = arith.extui %0 : i1 to i32
    %c0_i32_0 = arith.constant 0 : i32
    %2 = arith.cmpi ne, %1, %c0_i32_0 : i32
    scf.if %2 {
      %cst_11 = arith.constant 0.000000e+00 : f32
      %15 = vector.broadcast %cst_11 : f32 to vector<1x16xf32>
      %c0_12 = arith.constant 0 : index
      %c0_13 = arith.constant 0 : index
      %16 = vector.load %arg2[%c0_12, %c0_13] : memref<1x16xf32, #tpu.memory_space<vmem>>, vector<1x16xf32>
      tpu.vector_store %arg2[%c0_12, %c0_13], %15 {strides = array<i32>} : memref<1x16xf32, #tpu.memory_space<vmem>>, vector<1x16xf32>,
      %cst_14 = arith.constant 0.000000e+00 : f32
      %17 = vector.broadcast %cst_14 : f32 to vector<1x16xf32>
      %c0_15 = arith.constant 0 : index
      %c0_16 = arith.constant 0 : index
      %18 = vector.load %arg3[%c0_15, %c0_16] : memref<1x16xf32, #tpu.memory_space<vmem>>, vector<1x16xf32>
      tpu.vector_store %arg3[%c0_15, %c0_16], %17 {strides = array<i32>} : memref<1x16xf32, #tpu.memory_space<vmem>>, vector<1x16xf32>,
    } else {
    }
    %c0 = arith.constant 0 : index
    %c0_1 = arith.constant 0 : index
    %3 = vector.load %arg1[%c0, %c0_1] : memref<512x16xf32, #tpu.memory_space<vmem>>, vector<512x16xf32>
    %c0_2 = arith.constant 0 : index
    %c0_3 = arith.constant 0 : index
    %4 = vector.load %arg2[%c0_2, %c0_3] : memref<1x16xf32, #tpu.memory_space<vmem>>, vector<1x16xf32>
    %cst = arith.constant dense<0.000000e+00> : vector<16xf32>
    %5 = vector.multi_reduction <add>, %3, %cst [0] : vector<512x16xf32> to vector<16xf32>
    %6 = vector.shape_cast %5 : vector<16xf32> to vector<1x16xf32>
    %7 = arith.addf %4, %6 : vector<1x16xf32>
    %c0_4 = arith.constant 0 : index
    %c0_5 = arith.constant 0 : index
    %8 = vector.load %arg2[%c0_4, %c0_5] : memref<1x16xf32, #tpu.memory_space<vmem>>, vector<1x16xf32>
    tpu.vector_store %arg2[%c0_4, %c0_5], %7 {strides = array<i32>} : memref<1x16xf32, #tpu.memory_space<vmem>>, vector<1x16xf32>,
    %c0_6 = arith.constant 0 : index
    %c0_7 = arith.constant 0 : index
    %9 = vector.load %arg3[%c0_6, %c0_7] : memref<1x16xf32, #tpu.memory_space<vmem>>, vector<1x16xf32>
    %10 = arith.mulf %3, %3 : vector<512x16xf32>
    %cst_8 = arith.constant dense<0.000000e+00> : vector<16xf32>
    %11 = vector.multi_reduction <add>, %10, %cst_8 [0] : vector<512x16xf32> to vector<16xf32>
    %12 = vector.shape_cast %11 : vector<16xf32> to vector<1x16xf32>
    %13 = arith.addf %9, %12 : vector<1x16xf32>
    %c0_9 = arith.constant 0 : index
    %c0_10 = arith.constant 0 : index
    %14 = vector.load %arg3[%c0_9, %c0_10] : memref<1x16xf32, #tpu.memory_space<vmem>>, vector<1x16xf32>
    tpu.vector_store %arg3[%c0_9, %c0_10], %13 {strides = array<i32>} : memref<1x16xf32, #tpu.memory_space<vmem>>, vector<1x16xf32>,
    return
  }
  func.func @transform_0(%arg0: i32) -> (i32, i32) {
    %c0_i32 = arith.constant 0 : i32
    %c0_i32_0 = arith.constant 0 : i32
    return %arg0, %c0_i32 : i32, i32
  }
  func.func @transform_1(%arg0: i32) -> (i32, i32) {
    %c0_i32 = arith.constant 0 : i32
    %c0_i32_0 = arith.constant 0 : i32
    %c0_i32_1 = arith.constant 0 : i32
    return %c0_i32, %c0_i32_0 : i32, i32
  }
  func.func @transform_2(%arg0: i32) -> (i32, i32) {
    %c0_i32 = arith.constant 0 : i32
    %c0_i32_0 = arith.constant 0 : i32
    %c0_i32_1 = arith.constant 0 : i32
    return %c0_i32, %c0_i32_0 : i32, i32
  }
}

module attributes {stable_mosaic.version = 11 : i64} {
  func.func @stage1_kernel(%arg0: i32, %arg1: memref<512x16xf32, #tpu.memory_space<vmem>>, %arg2: memref<1x16xf32, #tpu.memory_space<vmem>>, %arg3: memref<1x16xf32, #tpu.memory_space<vmem>>, %arg4: memref<1x16xf32, #tpu.memory_space<vmem>>, %arg5: memref<1x16xf32, #tpu.memory_space<vmem>>, %arg6: memref<16x4xbf16, #tpu.memory_space<vmem>>, %arg7: memref<512x4xbf16, #tpu.memory_space<vmem>>, %arg8: memref<1x4xf32, #tpu.memory_space<vmem>>, %arg9: memref<1x4xf32, #tpu.memory_space<vmem>>) attributes {dimension_semantics = [#tpu.dimension_semantics<arbitrary>], iteration_bounds = array<i64: 1>, scalar_prefetch = 0 : i64, scratch_operands = 0 : i64, tpu.core_type = #tpu.core_type<tc>, window_params = [{transform_indices = @transform_0, window_bounds = array<i64: 512, 16>}, {pipeline_mode = #tpu.pipeline_mode<synchronous>, transform_indices = @transform_1, window_bounds = array<i64: 1, 16>}, {pipeline_mode = #tpu.pipeline_mode<synchronous>, transform_indices = @transform_2, window_bounds = array<i64: 1, 16>}, {pipeline_mode = #tpu.pipeline_mode<synchronous>, transform_indices = @transform_3, window_bounds = array<i64: 1, 16>}, {pipeline_mode = #tpu.pipeline_mode<synchronous>, transform_indices = @transform_4, window_bounds = array<i64: 1, 16>}, {pipeline_mode = #tpu.pipeline_mode<synchronous>, transform_indices = @transform_5, window_bounds = array<i64: 16, 4>}, {transform_indices = @transform_6, window_bounds = array<i64: 512, 4>}, {pipeline_mode = #tpu.pipeline_mode<synchronous>, transform_indices = @transform_7, window_bounds = array<i64: 1, 4>}, {pipeline_mode = #tpu.pipeline_mode<synchronous>, transform_indices = @transform_8, window_bounds = array<i64: 1, 4>}]} {
    %c0_i32 = arith.constant 0 : i32
    %0 = arith.cmpi eq, %arg0, %c0_i32 : i32
    %1 = arith.extui %0 : i1 to i32
    %c0_i32_0 = arith.constant 0 : i32
    %2 = arith.cmpi ne, %1, %c0_i32_0 : i32
    scf.if %2 {
      %cst_29 = arith.constant 0.000000e+00 : f32
      %44 = vector.broadcast %cst_29 : f32 to vector<1x4xf32>
      %c0_30 = arith.constant 0 : index
      %c0_31 = arith.constant 0 : index
      %45 = vector.load %arg8[%c0_30, %c0_31] : memref<1x4xf32, #tpu.memory_space<vmem>>, vector<1x4xf32>
      tpu.vector_store %arg8[%c0_30, %c0_31], %44 {strides = array<i32>} : memref<1x4xf32, #tpu.memory_space<vmem>>, vector<1x4xf32>,
      %cst_32 = arith.constant 0.000000e+00 : f32
      %46 = vector.broadcast %cst_32 : f32 to vector<1x4xf32>
      %c0_33 = arith.constant 0 : index
      %c0_34 = arith.constant 0 : index
      %47 = vector.load %arg9[%c0_33, %c0_34] : memref<1x4xf32, #tpu.memory_space<vmem>>, vector<1x4xf32>
      tpu.vector_store %arg9[%c0_33, %c0_34], %46 {strides = array<i32>} : memref<1x4xf32, #tpu.memory_space<vmem>>, vector<1x4xf32>,
    } else {
    }
    %c0 = arith.constant 0 : index
    %c0_1 = arith.constant 0 : index
    %3 = vector.load %arg1[%c0, %c0_1] : memref<512x16xf32, #tpu.memory_space<vmem>>, vector<512x16xf32>
    %c0_2 = arith.constant 0 : index
    %c0_3 = arith.constant 0 : index
    %4 = vector.load %arg2[%c0_2, %c0_3] : memref<1x16xf32, #tpu.memory_space<vmem>>, vector<1x16xf32>
    %cst = arith.constant 0.001953125 : f32
    %5 = vector.broadcast %cst : f32 to vector<1x16xf32>
    %6 = arith.mulf %4, %5 : vector<1x16xf32>
    %c0_4 = arith.constant 0 : index
    %c0_5 = arith.constant 0 : index
    %7 = vector.load %arg3[%c0_4, %c0_5] : memref<1x16xf32, #tpu.memory_space<vmem>>, vector<1x16xf32>
    %cst_6 = arith.constant 0.001953125 : f32
    %8 = vector.broadcast %cst_6 : f32 to vector<1x16xf32>
    %9 = arith.mulf %7, %8 : vector<1x16xf32>
    %10 = arith.mulf %6, %6 : vector<1x16xf32>
    %11 = arith.subf %9, %10 : vector<1x16xf32>
    %cst_7 = arith.constant 0.000000e+00 : f32
    %12 = vector.broadcast %cst_7 : f32 to vector<1x16xf32>
    %13 = arith.maximumf %11, %12 : vector<1x16xf32>
    %c0_8 = arith.constant 0 : index
    %c0_9 = arith.constant 0 : index
    %14 = vector.load %arg4[%c0_8, %c0_9] : memref<1x16xf32, #tpu.memory_space<vmem>>, vector<1x16xf32>
    %cst_10 = arith.constant 9.99999974E-6 : f32
    %15 = vector.broadcast %cst_10 : f32 to vector<1x16xf32>
    %16 = arith.addf %13, %15 : vector<1x16xf32>
    %17 = math.rsqrt %16 : vector<1x16xf32>
    %18 = arith.mulf %14, %17 : vector<1x16xf32>
    %c0_11 = arith.constant 0 : index
    %c0_12 = arith.constant 0 : index
    %19 = vector.load %arg5[%c0_11, %c0_12] : memref<1x16xf32, #tpu.memory_space<vmem>>, vector<1x16xf32>
    %20 = arith.mulf %6, %18 : vector<1x16xf32>
    %21 = arith.subf %19, %20 : vector<1x16xf32>
    %22 = vector.broadcast %18 : vector<1x16xf32> to vector<512x16xf32>
    %23 = arith.mulf %3, %22 : vector<512x16xf32>
    %24 = vector.broadcast %21 : vector<1x16xf32> to vector<512x16xf32>
    %25 = arith.addf %23, %24 : vector<512x16xf32>
    %cst_13 = arith.constant 0.000000e+00 : f32
    %26 = vector.broadcast %cst_13 : f32 to vector<512x16xf32>
    %27 = arith.maximumf %25, %26 : vector<512x16xf32>
    %28 = arith.truncf %27 : vector<512x16xf32> to vector<512x16xbf16>
    %c0_14 = arith.constant 0 : index
    %c0_15 = arith.constant 0 : index
    %29 = vector.load %arg6[%c0_14, %c0_15] : memref<16x4xbf16, #tpu.memory_space<vmem>>, vector<16x4xbf16>
    %cst_16 = arith.constant dense<0.000000e+00> : vector<512x4xf32>
    %30 = tpu.matmul %28, %29, %cst_16 {dimension_numbers = #tpu.dot_dimension_numbers<[1], [0], [0], [1], [0, 0, 1, 1], [], []>} : vector<512x16xbf16>, vector<16x4xbf16>, vector<512x4xf32> -> vector<512x4xf32>
    %c0_17 = arith.constant 0 : index
    %c0_18 = arith.constant 0 : index
    %31 = vector.load %arg8[%c0_17, %c0_18] : memref<1x4xf32, #tpu.memory_space<vmem>>, vector<1x4xf32>
    %cst_19 = arith.constant dense<0.000000e+00> : vector<4xf32>
    %32 = vector.multi_reduction <add>, %30, %cst_19 [0] : vector<512x4xf32> to vector<4xf32>
    %33 = vector.shape_cast %32 : vector<4xf32> to vector<1x4xf32>
    %34 = arith.addf %31, %33 : vector<1x4xf32>
    %c0_20 = arith.constant 0 : index
    %c0_21 = arith.constant 0 : index
    %35 = vector.load %arg8[%c0_20, %c0_21] : memref<1x4xf32, #tpu.memory_space<vmem>>, vector<1x4xf32>
    tpu.vector_store %arg8[%c0_20, %c0_21], %34 {strides = array<i32>} : memref<1x4xf32, #tpu.memory_space<vmem>>, vector<1x4xf32>,
    %c0_22 = arith.constant 0 : index
    %c0_23 = arith.constant 0 : index
    %36 = vector.load %arg9[%c0_22, %c0_23] : memref<1x4xf32, #tpu.memory_space<vmem>>, vector<1x4xf32>
    %37 = arith.mulf %30, %30 : vector<512x4xf32>
    %cst_24 = arith.constant dense<0.000000e+00> : vector<4xf32>
    %38 = vector.multi_reduction <add>, %37, %cst_24 [0] : vector<512x4xf32> to vector<4xf32>
    %39 = vector.shape_cast %38 : vector<4xf32> to vector<1x4xf32>
    %40 = arith.addf %36, %39 : vector<1x4xf32>
    %c0_25 = arith.constant 0 : index
    %c0_26 = arith.constant 0 : index
    %41 = vector.load %arg9[%c0_25, %c0_26] : memref<1x4xf32, #tpu.memory_space<vmem>>, vector<1x4xf32>
    tpu.vector_store %arg9[%c0_25, %c0_26], %40 {strides = array<i32>} : memref<1x4xf32, #tpu.memory_space<vmem>>, vector<1x4xf32>,
    %42 = arith.truncf %30 : vector<512x4xf32> to vector<512x4xbf16>
    %c0_27 = arith.constant 0 : index
    %c0_28 = arith.constant 0 : index
    %43 = vector.load %arg7[%c0_27, %c0_28] : memref<512x4xbf16, #tpu.memory_space<vmem>>, vector<512x4xbf16>
    tpu.vector_store %arg7[%c0_27, %c0_28], %42 {strides = array<i32>} : memref<512x4xbf16, #tpu.memory_space<vmem>>, vector<512x4xbf16>,
    return
  }
  func.func @transform_0(%arg0: i32) -> (i32, i32) {
    %c0_i32 = arith.constant 0 : i32
    %c0_i32_0 = arith.constant 0 : i32
    return %arg0, %c0_i32 : i32, i32
  }
  func.func @transform_1(%arg0: i32) -> (i32, i32) {
    %c0_i32 = arith.constant 0 : i32
    %c0_i32_0 = arith.constant 0 : i32
    %c0_i32_1 = arith.constant 0 : i32
    return %c0_i32, %c0_i32_0 : i32, i32
  }
  func.func @transform_2(%arg0: i32) -> (i32, i32) {
    %c0_i32 = arith.constant 0 : i32
    %c0_i32_0 = arith.constant 0 : i32
    %c0_i32_1 = arith.constant 0 : i32
    return %c0_i32, %c0_i32_0 : i32, i32
  }
  func.func @transform_3(%arg0: i32) -> (i32, i32) {
    %c0_i32 = arith.constant 0 : i32
    %c0_i32_0 = arith.constant 0 : i32
    %c0_i32_1 = arith.constant 0 : i32
    return %c0_i32, %c0_i32_0 : i32, i32
  }
  func.func @transform_4(%arg0: i32) -> (i32, i32) {
    %c0_i32 = arith.constant 0 : i32
    %c0_i32_0 = arith.constant 0 : i32
    %c0_i32_1 = arith.constant 0 : i32
    return %c0_i32, %c0_i32_0 : i32, i32
  }
  func.func @transform_5(%arg0: i32) -> (i32, i32) {
    %c0_i32 = arith.constant 0 : i32
    %c0_i32_0 = arith.constant 0 : i32
    %c0_i32_1 = arith.constant 0 : i32
    return %c0_i32, %c0_i32_0 : i32, i32
  }
  func.func @transform_6(%arg0: i32) -> (i32, i32) {
    %c0_i32 = arith.constant 0 : i32
    %c0_i32_0 = arith.constant 0 : i32
    return %arg0, %c0_i32 : i32, i32
  }
  func.func @transform_7(%arg0: i32) -> (i32, i32) {
    %c0_i32 = arith.constant 0 : i32
    %c0_i32_0 = arith.constant 0 : i32
    %c0_i32_1 = arith.constant 0 : i32
    return %c0_i32, %c0_i32_0 : i32, i32
  }
  func.func @transform_8(%arg0: i32) -> (i32, i32) {
    %c0_i32 = arith.constant 0 : i32
    %c0_i32_0 = arith.constant 0 : i32
    %c0_i32_1 = arith.constant 0 : i32
    return %c0_i32, %c0_i32_0 : i32, i32
  }
}

module attributes {stable_mosaic.version = 11 : i64} {
  func.func @stage2_kernel(%arg0: i32, %arg1: memref<256x4xbf16, #tpu.memory_space<vmem>>, %arg2: memref<1x4xf32, #tpu.memory_space<vmem>>, %arg3: memref<1x4xf32, #tpu.memory_space<vmem>>, %arg4: memref<1x4xf32, #tpu.memory_space<vmem>>, %arg5: memref<1x4xf32, #tpu.memory_space<vmem>>, %arg6: memref<36x4xbf16, #tpu.memory_space<vmem>>, %arg7: memref<256x4xbf16, #tpu.memory_space<vmem>>, %arg8: memref<1x4xf32, #tpu.memory_space<vmem>>, %arg9: memref<1x4xf32, #tpu.memory_space<vmem>>, %arg10: memref<18x18x4xbf16, #tpu.memory_space<vmem>>, %arg11: memref<256x36xbf16, #tpu.memory_space<vmem>>) attributes {dimension_semantics = [#tpu.dimension_semantics<arbitrary>], iteration_bounds = array<i64: 2>, scalar_prefetch = 0 : i64, scratch_operands = 2 : i64, tpu.core_type = #tpu.core_type<tc>, window_params = [{transform_indices = @transform_0, window_bounds = array<i64: 256, 4>}, {pipeline_mode = #tpu.pipeline_mode<synchronous>, transform_indices = @transform_1, window_bounds = array<i64: 1, 4>}, {pipeline_mode = #tpu.pipeline_mode<synchronous>, transform_indices = @transform_2, window_bounds = array<i64: 1, 4>}, {pipeline_mode = #tpu.pipeline_mode<synchronous>, transform_indices = @transform_3, window_bounds = array<i64: 1, 4>}, {pipeline_mode = #tpu.pipeline_mode<synchronous>, transform_indices = @transform_4, window_bounds = array<i64: 1, 4>}, {pipeline_mode = #tpu.pipeline_mode<synchronous>, transform_indices = @transform_5, window_bounds = array<i64: 36, 4>}, {transform_indices = @transform_6, window_bounds = array<i64: 256, 4>}, {pipeline_mode = #tpu.pipeline_mode<synchronous>, transform_indices = @transform_7, window_bounds = array<i64: 1, 4>}, {pipeline_mode = #tpu.pipeline_mode<synchronous>, transform_indices = @transform_8, window_bounds = array<i64: 1, 4>}]} {
    %c0_i32 = arith.constant 0 : i32
    %0 = arith.cmpi eq, %arg0, %c0_i32 : i32
    %1 = arith.extui %0 : i1 to i32
    %c0_i32_0 = arith.constant 0 : i32
    %2 = arith.cmpi ne, %1, %c0_i32_0 : i32
    scf.if %2 {
      %cst_69 = arith.constant 0.000000e+00 : f32
      %75 = vector.broadcast %cst_69 : f32 to vector<1x4xf32>
      %c0_70 = arith.constant 0 : index
      %c0_71 = arith.constant 0 : index
      %76 = vector.load %arg8[%c0_70, %c0_71] : memref<1x4xf32, #tpu.memory_space<vmem>>, vector<1x4xf32>
      tpu.vector_store %arg8[%c0_70, %c0_71], %75 {strides = array<i32>} : memref<1x4xf32, #tpu.memory_space<vmem>>, vector<1x4xf32>,
      %cst_72 = arith.constant 0.000000e+00 : f32
      %77 = vector.broadcast %cst_72 : f32 to vector<1x4xf32>
      %c0_73 = arith.constant 0 : index
      %c0_74 = arith.constant 0 : index
      %78 = vector.load %arg9[%c0_73, %c0_74] : memref<1x4xf32, #tpu.memory_space<vmem>>, vector<1x4xf32>
      tpu.vector_store %arg9[%c0_73, %c0_74], %77 {strides = array<i32>} : memref<1x4xf32, #tpu.memory_space<vmem>>, vector<1x4xf32>,
      %cst_75 = arith.constant 0.000000e+00 : bf16
      %79 = vector.broadcast %cst_75 : bf16 to vector<18x18x4xbf16>
      %c0_76 = arith.constant 0 : index
      %c0_77 = arith.constant 0 : index
      %c0_78 = arith.constant 0 : index
      %80 = vector.load %arg10[%c0_76, %c0_77, %c0_78] : memref<18x18x4xbf16, #tpu.memory_space<vmem>>, vector<18x18x4xbf16>
      tpu.vector_store %arg10[%c0_76, %c0_77, %c0_78], %79 {strides = array<i32>} : memref<18x18x4xbf16, #tpu.memory_space<vmem>>, vector<18x18x4xbf16>,
    } else {
    }
    %c0 = arith.constant 0 : index
    %c0_1 = arith.constant 0 : index
    %3 = vector.load %arg1[%c0, %c0_1] : memref<256x4xbf16, #tpu.memory_space<vmem>>, vector<256x4xbf16>
    %4 = arith.extf %3 : vector<256x4xbf16> to vector<256x4xf32>
    %c0_2 = arith.constant 0 : index
    %c0_3 = arith.constant 0 : index
    %5 = vector.load %arg2[%c0_2, %c0_3] : memref<1x4xf32, #tpu.memory_space<vmem>>, vector<1x4xf32>
    %cst = arith.constant 0.001953125 : f32
    %6 = vector.broadcast %cst : f32 to vector<1x4xf32>
    %7 = arith.mulf %5, %6 : vector<1x4xf32>
    %c0_4 = arith.constant 0 : index
    %c0_5 = arith.constant 0 : index
    %8 = vector.load %arg3[%c0_4, %c0_5] : memref<1x4xf32, #tpu.memory_space<vmem>>, vector<1x4xf32>
    %cst_6 = arith.constant 0.001953125 : f32
    %9 = vector.broadcast %cst_6 : f32 to vector<1x4xf32>
    %10 = arith.mulf %8, %9 : vector<1x4xf32>
    %11 = arith.mulf %7, %7 : vector<1x4xf32>
    %12 = arith.subf %10, %11 : vector<1x4xf32>
    %cst_7 = arith.constant 0.000000e+00 : f32
    %13 = vector.broadcast %cst_7 : f32 to vector<1x4xf32>
    %14 = arith.maximumf %12, %13 : vector<1x4xf32>
    %c0_8 = arith.constant 0 : index
    %c0_9 = arith.constant 0 : index
    %15 = vector.load %arg4[%c0_8, %c0_9] : memref<1x4xf32, #tpu.memory_space<vmem>>, vector<1x4xf32>
    %cst_10 = arith.constant 9.99999974E-6 : f32
    %16 = vector.broadcast %cst_10 : f32 to vector<1x4xf32>
    %17 = arith.addf %14, %16 : vector<1x4xf32>
    %18 = math.rsqrt %17 : vector<1x4xf32>
    %19 = arith.mulf %15, %18 : vector<1x4xf32>
    %c0_11 = arith.constant 0 : index
    %c0_12 = arith.constant 0 : index
    %20 = vector.load %arg5[%c0_11, %c0_12] : memref<1x4xf32, #tpu.memory_space<vmem>>, vector<1x4xf32>
    %21 = arith.mulf %7, %19 : vector<1x4xf32>
    %22 = arith.subf %20, %21 : vector<1x4xf32>
    %23 = vector.broadcast %19 : vector<1x4xf32> to vector<256x4xf32>
    %24 = arith.mulf %4, %23 : vector<256x4xf32>
    %25 = vector.broadcast %22 : vector<1x4xf32> to vector<256x4xf32>
    %26 = arith.addf %24, %25 : vector<256x4xf32>
    %cst_13 = arith.constant 0.000000e+00 : f32
    %27 = vector.broadcast %cst_13 : f32 to vector<256x4xf32>
    %28 = arith.maximumf %26, %27 : vector<256x4xf32>
    %29 = arith.truncf %28 : vector<256x4xf32> to vector<256x4xbf16>
    %30 = vector.shape_cast %29 : vector<256x4xbf16> to vector<16x16x4xbf16>
    %c1 = arith.constant 1 : index
    %c1_14 = arith.constant 1 : index
    %c0_15 = arith.constant 0 : index
    %31 = vector.load %arg10[%c1, %c1_14, %c0_15] : memref<18x18x4xbf16, #tpu.memory_space<vmem>>, vector<16x16x4xbf16>
    tpu.vector_store %arg10[%c1, %c1_14, %c0_15], %30 {strides = array<i32>} : memref<18x18x4xbf16, #tpu.memory_space<vmem>>, vector<16x16x4xbf16>,
    %c0_16 = arith.constant 0 : index
    %c0_17 = arith.constant 0 : index
    %c0_18 = arith.constant 0 : index
    %32 = vector.load %arg10[%c0_16, %c0_17, %c0_18] : memref<18x18x4xbf16, #tpu.memory_space<vmem>>, vector<16x16x4xbf16>
    %33 = vector.shape_cast %32 : vector<16x16x4xbf16> to vector<256x4xbf16>
    %c0_19 = arith.constant 0 : index
    %c0_20 = arith.constant 0 : index
    %34 = vector.load %arg11[%c0_19, %c0_20] : memref<256x36xbf16, #tpu.memory_space<vmem>>, vector<256x4xbf16>
    tpu.vector_store %arg11[%c0_19, %c0_20], %33 {strides = array<i32>} : memref<256x36xbf16, #tpu.memory_space<vmem>>, vector<256x4xbf16>,
    %c0_21 = arith.constant 0 : index
    %c1_22 = arith.constant 1 : index
    %c0_23 = arith.constant 0 : index
    %35 = vector.load %arg10[%c0_21, %c1_22, %c0_23] : memref<18x18x4xbf16, #tpu.memory_space<vmem>>, vector<16x16x4xbf16>
    %36 = vector.shape_cast %35 : vector<16x16x4xbf16> to vector<256x4xbf16>
    %c0_24 = arith.constant 0 : index
    %c4 = arith.constant 4 : index
    %37 = vector.load %arg11[%c0_24, %c4] : memref<256x36xbf16, #tpu.memory_space<vmem>>, vector<256x4xbf16>
    tpu.vector_store %arg11[%c0_24, %c4], %36 {strides = array<i32>} : memref<256x36xbf16, #tpu.memory_space<vmem>>, vector<256x4xbf16>,
    %c0_25 = arith.constant 0 : index
    %c2 = arith.constant 2 : index
    %c0_26 = arith.constant 0 : index
    %38 = vector.load %arg10[%c0_25, %c2, %c0_26] : memref<18x18x4xbf16, #tpu.memory_space<vmem>>, vector<16x16x4xbf16>
    %39 = vector.shape_cast %38 : vector<16x16x4xbf16> to vector<256x4xbf16>
    %c0_27 = arith.constant 0 : index
    %c8 = arith.constant 8 : index
    %40 = vector.load %arg11[%c0_27, %c8] : memref<256x36xbf16, #tpu.memory_space<vmem>>, vector<256x4xbf16>
    tpu.vector_store %arg11[%c0_27, %c8], %39 {strides = array<i32>} : memref<256x36xbf16, #tpu.memory_space<vmem>>, vector<256x4xbf16>,
    %c1_28 = arith.constant 1 : index
    %c0_29 = arith.constant 0 : index
    %c0_30 = arith.constant 0 : index
    %41 = vector.load %arg10[%c1_28, %c0_29, %c0_30] : memref<18x18x4xbf16, #tpu.memory_space<vmem>>, vector<16x16x4xbf16>
    %42 = vector.shape_cast %41 : vector<16x16x4xbf16> to vector<256x4xbf16>
    %c0_31 = arith.constant 0 : index
    %c12 = arith.constant 12 : index
    %43 = vector.load %arg11[%c0_31, %c12] : memref<256x36xbf16, #tpu.memory_space<vmem>>, vector<256x4xbf16>
    tpu.vector_store %arg11[%c0_31, %c12], %42 {strides = array<i32>} : memref<256x36xbf16, #tpu.memory_space<vmem>>, vector<256x4xbf16>,
    %c1_32 = arith.constant 1 : index
    %c1_33 = arith.constant 1 : index
    %c0_34 = arith.constant 0 : index
    %44 = vector.load %arg10[%c1_32, %c1_33, %c0_34] : memref<18x18x4xbf16, #tpu.memory_space<vmem>>, vector<16x16x4xbf16>
    %45 = vector.shape_cast %44 : vector<16x16x4xbf16> to vector<256x4xbf16>
    %c0_35 = arith.constant 0 : index
    %c16 = arith.constant 16 : index
    %46 = vector.load %arg11[%c0_35, %c16] : memref<256x36xbf16, #tpu.memory_space<vmem>>, vector<256x4xbf16>
    tpu.vector_store %arg11[%c0_35, %c16], %45 {strides = array<i32>} : memref<256x36xbf16, #tpu.memory_space<vmem>>, vector<256x4xbf16>,
    %c1_36 = arith.constant 1 : index
    %c2_37 = arith.constant 2 : index
    %c0_38 = arith.constant 0 : index
    %47 = vector.load %arg10[%c1_36, %c2_37, %c0_38] : memref<18x18x4xbf16, #tpu.memory_space<vmem>>, vector<16x16x4xbf16>
    %48 = vector.shape_cast %47 : vector<16x16x4xbf16> to vector<256x4xbf16>
    %c0_39 = arith.constant 0 : index
    %c20 = arith.constant 20 : index
    %49 = vector.load %arg11[%c0_39, %c20] : memref<256x36xbf16, #tpu.memory_space<vmem>>, vector<256x4xbf16>
    tpu.vector_store %arg11[%c0_39, %c20], %48 {strides = array<i32>} : memref<256x36xbf16, #tpu.memory_space<vmem>>, vector<256x4xbf16>,
    %c2_40 = arith.constant 2 : index
    %c0_41 = arith.constant 0 : index
    %c0_42 = arith.constant 0 : index
    %50 = vector.load %arg10[%c2_40, %c0_41, %c0_42] : memref<18x18x4xbf16, #tpu.memory_space<vmem>>, vector<16x16x4xbf16>
    %51 = vector.shape_cast %50 : vector<16x16x4xbf16> to vector<256x4xbf16>
    %c0_43 = arith.constant 0 : index
    %c24 = arith.constant 24 : index
    %52 = vector.load %arg11[%c0_43, %c24] : memref<256x36xbf16, #tpu.memory_space<vmem>>, vector<256x4xbf16>
    tpu.vector_store %arg11[%c0_43, %c24], %51 {strides = array<i32>} : memref<256x36xbf16, #tpu.memory_space<vmem>>, vector<256x4xbf16>,
    %c2_44 = arith.constant 2 : index
    %c1_45 = arith.constant 1 : index
    %c0_46 = arith.constant 0 : index
    %53 = vector.load %arg10[%c2_44, %c1_45, %c0_46] : memref<18x18x4xbf16, #tpu.memory_space<vmem>>, vector<16x16x4xbf16>
    %54 = vector.shape_cast %53 : vector<16x16x4xbf16> to vector<256x4xbf16>
    %c0_47 = arith.constant 0 : index
    %c28 = arith.constant 28 : index
    %55 = vector.load %arg11[%c0_47, %c28] : memref<256x36xbf16, #tpu.memory_space<vmem>>, vector<256x4xbf16>
    tpu.vector_store %arg11[%c0_47, %c28], %54 {strides = array<i32>} : memref<256x36xbf16, #tpu.memory_space<vmem>>, vector<256x4xbf16>,
    %c2_48 = arith.constant 2 : index
    %c2_49 = arith.constant 2 : index
    %c0_50 = arith.constant 0 : index
    %56 = vector.load %arg10[%c2_48, %c2_49, %c0_50] : memref<18x18x4xbf16, #tpu.memory_space<vmem>>, vector<16x16x4xbf16>
    %57 = vector.shape_cast %56 : vector<16x16x4xbf16> to vector<256x4xbf16>
    %c0_51 = arith.constant 0 : index
    %c32 = arith.constant 32 : index
    %58 = vector.load %arg11[%c0_51, %c32] : memref<256x36xbf16, #tpu.memory_space<vmem>>, vector<256x4xbf16>
    tpu.vector_store %arg11[%c0_51, %c32], %57 {strides = array<i32>} : memref<256x36xbf16, #tpu.memory_space<vmem>>, vector<256x4xbf16>,
    %c0_52 = arith.constant 0 : index
    %c0_53 = arith.constant 0 : index
    %59 = vector.load %arg11[%c0_52, %c0_53] : memref<256x36xbf16, #tpu.memory_space<vmem>>, vector<256x36xbf16>
    %c0_54 = arith.constant 0 : index
    %c0_55 = arith.constant 0 : index
    %60 = vector.load %arg6[%c0_54, %c0_55] : memref<36x4xbf16, #tpu.memory_space<vmem>>, vector<36x4xbf16>
    %cst_56 = arith.constant dense<0.000000e+00> : vector<256x4xf32>
    %61 = tpu.matmul %59, %60, %cst_56 {dimension_numbers = #tpu.dot_dimension_numbers<[1], [0], [0], [1], [0, 0, 1, 1], [], []>} : vector<256x36xbf16>, vector<36x4xbf16>, vector<256x4xf32> -> vector<256x4xf32>
    %c0_57 = arith.constant 0 : index
    %c0_58 = arith.constant 0 : index
    %62 = vector.load %arg8[%c0_57, %c0_58] : memref<1x4xf32, #tpu.memory_space<vmem>>, vector<1x4xf32>
    %cst_59 = arith.constant dense<0.000000e+00> : vector<4xf32>
    %63 = vector.multi_reduction <add>, %61, %cst_59 [0] : vector<256x4xf32> to vector<4xf32>
    %64 = vector.shape_cast %63 : vector<4xf32> to vector<1x4xf32>
    %65 = arith.addf %62, %64 : vector<1x4xf32>
    %c0_60 = arith.constant 0 : index
    %c0_61 = arith.constant 0 : index
    %66 = vector.load %arg8[%c0_60, %c0_61] : memref<1x4xf32, #tpu.memory_space<vmem>>, vector<1x4xf32>
    tpu.vector_store %arg8[%c0_60, %c0_61], %65 {strides = array<i32>} : memref<1x4xf32, #tpu.memory_space<vmem>>, vector<1x4xf32>,
    %c0_62 = arith.constant 0 : index
    %c0_63 = arith.constant 0 : index
    %67 = vector.load %arg9[%c0_62, %c0_63] : memref<1x4xf32, #tpu.memory_space<vmem>>, vector<1x4xf32>
    %68 = arith.mulf %61, %61 : vector<256x4xf32>
    %cst_64 = arith.constant dense<0.000000e+00> : vector<4xf32>
    %69 = vector.multi_reduction <add>, %68, %cst_64 [0] : vector<256x4xf32> to vector<4xf32>
    %70 = vector.shape_cast %69 : vector<4xf32> to vector<1x4xf32>
    %71 = arith.addf %67, %70 : vector<1x4xf32>
    %c0_65 = arith.constant 0 : index
    %c0_66 = arith.constant 0 : index
    %72 = vector.load %arg9[%c0_65, %c0_66] : memref<1x4xf32, #tpu.memory_space<vmem>>, vector<1x4xf32>
    tpu.vector_store %arg9[%c0_65, %c0_66], %71 {strides = array<i32>} : memref<1x4xf32, #tpu.memory_space<vmem>>, vector<1x4xf32>,
    %73 = arith.truncf %61 : vector<256x4xf32> to vector<256x4xbf16>
    %c0_67 = arith.constant 0 : index
    %c0_68 = arith.constant 0 : index
    %74 = vector.load %arg7[%c0_67, %c0_68] : memref<256x4xbf16, #tpu.memory_space<vmem>>, vector<256x4xbf16>
    tpu.vector_store %arg7[%c0_67, %c0_68], %73 {strides = array<i32>} : memref<256x4xbf16, #tpu.memory_space<vmem>>, vector<256x4xbf16>,
    return
  }
  func.func @transform_0(%arg0: i32) -> (i32, i32) {
    %c0_i32 = arith.constant 0 : i32
    %c0_i32_0 = arith.constant 0 : i32
    return %arg0, %c0_i32 : i32, i32
  }
  func.func @transform_1(%arg0: i32) -> (i32, i32) {
    %c0_i32 = arith.constant 0 : i32
    %c0_i32_0 = arith.constant 0 : i32
    %c0_i32_1 = arith.constant 0 : i32
    return %c0_i32, %c0_i32_0 : i32, i32
  }
  func.func @transform_2(%arg0: i32) -> (i32, i32) {
    %c0_i32 = arith.constant 0 : i32
    %c0_i32_0 = arith.constant 0 : i32
    %c0_i32_1 = arith.constant 0 : i32
    return %c0_i32, %c0_i32_0 : i32, i32
  }
  func.func @transform_3(%arg0: i32) -> (i32, i32) {
    %c0_i32 = arith.constant 0 : i32
    %c0_i32_0 = arith.constant 0 : i32
    %c0_i32_1 = arith.constant 0 : i32
    return %c0_i32, %c0_i32_0 : i32, i32
  }
  func.func @transform_4(%arg0: i32) -> (i32, i32) {
    %c0_i32 = arith.constant 0 : i32
    %c0_i32_0 = arith.constant 0 : i32
    %c0_i32_1 = arith.constant 0 : i32
    return %c0_i32, %c0_i32_0 : i32, i32
  }
  func.func @transform_5(%arg0: i32) -> (i32, i32) {
    %c0_i32 = arith.constant 0 : i32
    %c0_i32_0 = arith.constant 0 : i32
    %c0_i32_1 = arith.constant 0 : i32
    return %c0_i32, %c0_i32_0 : i32, i32
  }
  func.func @transform_6(%arg0: i32) -> (i32, i32) {
    %c0_i32 = arith.constant 0 : i32
    %c0_i32_0 = arith.constant 0 : i32
    return %arg0, %c0_i32 : i32, i32
  }
  func.func @transform_7(%arg0: i32) -> (i32, i32) {
    %c0_i32 = arith.constant 0 : i32
    %c0_i32_0 = arith.constant 0 : i32
    %c0_i32_1 = arith.constant 0 : i32
    return %c0_i32, %c0_i32_0 : i32, i32
  }
  func.func @transform_8(%arg0: i32) -> (i32, i32) {
    %c0_i32 = arith.constant 0 : i32
    %c0_i32_0 = arith.constant 0 : i32
    %c0_i32_1 = arith.constant 0 : i32
    return %c0_i32, %c0_i32_0 : i32, i32
  }
}

module attributes {stable_mosaic.version = 11 : i64} {
  func.func @stage3_kernel(%arg0: i32, %arg1: memref<512x4xbf16, #tpu.memory_space<vmem>>, %arg2: memref<512x16xf32, #tpu.memory_space<vmem>>, %arg3: memref<1x4xf32, #tpu.memory_space<vmem>>, %arg4: memref<1x4xf32, #tpu.memory_space<vmem>>, %arg5: memref<1x4xf32, #tpu.memory_space<vmem>>, %arg6: memref<1x4xf32, #tpu.memory_space<vmem>>, %arg7: memref<4x16xbf16, #tpu.memory_space<vmem>>, %arg8: memref<1x16xf32, #tpu.memory_space<vmem>>, %arg9: memref<512x16xf32, #tpu.memory_space<vmem>>) attributes {dimension_semantics = [#tpu.dimension_semantics<parallel>], iteration_bounds = array<i64: 1>, scalar_prefetch = 0 : i64, scratch_operands = 0 : i64, tpu.core_type = #tpu.core_type<tc>, window_params = [{transform_indices = @transform_0, window_bounds = array<i64: 512, 4>}, {transform_indices = @transform_1, window_bounds = array<i64: 512, 16>}, {pipeline_mode = #tpu.pipeline_mode<synchronous>, transform_indices = @transform_2, window_bounds = array<i64: 1, 4>}, {pipeline_mode = #tpu.pipeline_mode<synchronous>, transform_indices = @transform_3, window_bounds = array<i64: 1, 4>}, {pipeline_mode = #tpu.pipeline_mode<synchronous>, transform_indices = @transform_4, window_bounds = array<i64: 1, 4>}, {pipeline_mode = #tpu.pipeline_mode<synchronous>, transform_indices = @transform_5, window_bounds = array<i64: 1, 4>}, {pipeline_mode = #tpu.pipeline_mode<synchronous>, transform_indices = @transform_6, window_bounds = array<i64: 4, 16>}, {pipeline_mode = #tpu.pipeline_mode<synchronous>, transform_indices = @transform_7, window_bounds = array<i64: 1, 16>}, {transform_indices = @transform_8, window_bounds = array<i64: 512, 16>}]} {
    %c0 = arith.constant 0 : index
    %c0_0 = arith.constant 0 : index
    %0 = vector.load %arg1[%c0, %c0_0] : memref<512x4xbf16, #tpu.memory_space<vmem>>, vector<512x4xbf16>
    %1 = arith.extf %0 : vector<512x4xbf16> to vector<512x4xf32>
    %c0_1 = arith.constant 0 : index
    %c0_2 = arith.constant 0 : index
    %2 = vector.load %arg3[%c0_1, %c0_2] : memref<1x4xf32, #tpu.memory_space<vmem>>, vector<1x4xf32>
    %cst = arith.constant 0.001953125 : f32
    %3 = vector.broadcast %cst : f32 to vector<1x4xf32>
    %4 = arith.mulf %2, %3 : vector<1x4xf32>
    %c0_3 = arith.constant 0 : index
    %c0_4 = arith.constant 0 : index
    %5 = vector.load %arg4[%c0_3, %c0_4] : memref<1x4xf32, #tpu.memory_space<vmem>>, vector<1x4xf32>
    %cst_5 = arith.constant 0.001953125 : f32
    %6 = vector.broadcast %cst_5 : f32 to vector<1x4xf32>
    %7 = arith.mulf %5, %6 : vector<1x4xf32>
    %8 = arith.mulf %4, %4 : vector<1x4xf32>
    %9 = arith.subf %7, %8 : vector<1x4xf32>
    %cst_6 = arith.constant 0.000000e+00 : f32
    %10 = vector.broadcast %cst_6 : f32 to vector<1x4xf32>
    %11 = arith.maximumf %9, %10 : vector<1x4xf32>
    %c0_7 = arith.constant 0 : index
    %c0_8 = arith.constant 0 : index
    %12 = vector.load %arg5[%c0_7, %c0_8] : memref<1x4xf32, #tpu.memory_space<vmem>>, vector<1x4xf32>
    %cst_9 = arith.constant 9.99999974E-6 : f32
    %13 = vector.broadcast %cst_9 : f32 to vector<1x4xf32>
    %14 = arith.addf %11, %13 : vector<1x4xf32>
    %15 = math.rsqrt %14 : vector<1x4xf32>
    %16 = arith.mulf %12, %15 : vector<1x4xf32>
    %c0_10 = arith.constant 0 : index
    %c0_11 = arith.constant 0 : index
    %17 = vector.load %arg6[%c0_10, %c0_11] : memref<1x4xf32, #tpu.memory_space<vmem>>, vector<1x4xf32>
    %18 = arith.mulf %4, %16 : vector<1x4xf32>
    %19 = arith.subf %17, %18 : vector<1x4xf32>
    %20 = vector.broadcast %16 : vector<1x4xf32> to vector<512x4xf32>
    %21 = arith.mulf %1, %20 : vector<512x4xf32>
    %22 = vector.broadcast %19 : vector<1x4xf32> to vector<512x4xf32>
    %23 = arith.addf %21, %22 : vector<512x4xf32>
    %cst_12 = arith.constant 0.000000e+00 : f32
    %24 = vector.broadcast %cst_12 : f32 to vector<512x4xf32>
    %25 = arith.maximumf %23, %24 : vector<512x4xf32>
    %26 = arith.truncf %25 : vector<512x4xf32> to vector<512x4xbf16>
    %c0_13 = arith.constant 0 : index
    %c0_14 = arith.constant 0 : index
    %27 = vector.load %arg7[%c0_13, %c0_14] : memref<4x16xbf16, #tpu.memory_space<vmem>>, vector<4x16xbf16>
    %cst_15 = arith.constant dense<0.000000e+00> : vector<512x16xf32>
    %28 = tpu.matmul %26, %27, %cst_15 {dimension_numbers = #tpu.dot_dimension_numbers<[1], [0], [0], [1], [0, 0, 1, 1], [], []>} : vector<512x4xbf16>, vector<4x16xbf16>, vector<512x16xf32> -> vector<512x16xf32>
    %c0_16 = arith.constant 0 : index
    %c0_17 = arith.constant 0 : index
    %29 = vector.load %arg8[%c0_16, %c0_17] : memref<1x16xf32, #tpu.memory_space<vmem>>, vector<1x16xf32>
    %30 = vector.broadcast %29 : vector<1x16xf32> to vector<512x16xf32>
    %31 = arith.addf %28, %30 : vector<512x16xf32>
    %c0_18 = arith.constant 0 : index
    %c0_19 = arith.constant 0 : index
    %32 = vector.load %arg2[%c0_18, %c0_19] : memref<512x16xf32, #tpu.memory_space<vmem>>, vector<512x16xf32>
    %33 = arith.addf %31, %32 : vector<512x16xf32>
    %c0_20 = arith.constant 0 : index
    %c0_21 = arith.constant 0 : index
    %34 = vector.load %arg9[%c0_20, %c0_21] : memref<512x16xf32, #tpu.memory_space<vmem>>, vector<512x16xf32>
    tpu.vector_store %arg9[%c0_20, %c0_21], %33 {strides = array<i32>} : memref<512x16xf32, #tpu.memory_space<vmem>>, vector<512x16xf32>,
    return
  }
  func.func @transform_0(%arg0: i32) -> (i32, i32) {
    %c0_i32 = arith.constant 0 : i32
    %c0_i32_0 = arith.constant 0 : i32
    return %arg0, %c0_i32 : i32, i32
  }
  func.func @transform_1(%arg0: i32) -> (i32, i32) {
    %c0_i32 = arith.constant 0 : i32
    %c0_i32_0 = arith.constant 0 : i32
    return %arg0, %c0_i32 : i32, i32
  }
  func.func @transform_2(%arg0: i32) -> (i32, i32) {
    %c0_i32 = arith.constant 0 : i32
    %c0_i32_0 = arith.constant 0 : i32
    %c0_i32_1 = arith.constant 0 : i32
    return %c0_i32, %c0_i32_0 : i32, i32
  }
  func.func @transform_3(%arg0: i32) -> (i32, i32) {
    %c0_i32 = arith.constant 0 : i32
    %c0_i32_0 = arith.constant 0 : i32
    %c0_i32_1 = arith.constant 0 : i32
    return %c0_i32, %c0_i32_0 : i32, i32
  }
  func.func @transform_4(%arg0: i32) -> (i32, i32) {
    %c0_i32 = arith.constant 0 : i32
    %c0_i32_0 = arith.constant 0 : i32
    %c0_i32_1 = arith.constant 0 : i32
    return %c0_i32, %c0_i32_0 : i32, i32
  }
  func.func @transform_5(%arg0: i32) -> (i32, i32) {
    %c0_i32 = arith.constant 0 : i32
    %c0_i32_0 = arith.constant 0 : i32
    %c0_i32_1 = arith.constant 0 : i32
    return %c0_i32, %c0_i32_0 : i32, i32
  }
  func.func @transform_6(%arg0: i32) -> (i32, i32) {
    %c0_i32 = arith.constant 0 : i32
    %c0_i32_0 = arith.constant 0 : i32
    %c0_i32_1 = arith.constant 0 : i32
    return %c0_i32, %c0_i32_0 : i32, i32
  }
  func.func @transform_7(%arg0: i32) -> (i32, i32) {
    %c0_i32 = arith.constant 0 : i32
    %c0_i32_0 = arith.constant 0 : i32
    %c0_i32_1 = arith.constant 0 : i32
    return %c0_i32, %c0_i32_0 : i32, i32
  }
  func.func @transform_8(%arg0: i32) -> (i32, i32) {
    %c0_i32 = arith.constant 0 : i32
    %c0_i32_0 = arith.constant 0 : i32
    return %arg0, %c0_i32 : i32, i32
  }
}

</mosaic_0001>

<bundles_post_ra>
// kernel: bottleneck_forward.4
= control target key start
LH: loop header
LB: loop body
LE: loop exit
PB: predicated region body
PF: predicated region fallthrough
CT: control target
= control target key end

     0   :  { %vm14_vm0 = vcmask 122880   ;;  %vm82_vm1 = vcmask 130048   ;;  %v428_v0 = vmov 0.0   ;;  %s786_s0 = inlined_call_operand.vmem [shape: f32[512,16], index: 0, kind: input, shape index: {}]   ;;  %s787_s1 = inlined_call_operand.vmem [shape: f32[1,16], index: 1, kind: output, shape index: {0}]   ;;  %s788_s2 = inlined_call_operand.vmem [shape: f32[1,16], index: 2, kind: output, shape index: {1}]  }
   0x1   :  { %15 = vst.msk [vmem:[%s787_s1] sm:$0x1] %vm14_vm0, %v428_v0  ;;  %v17_v1 = vld [vmem:[%s786_s0] sm:$0xff]  ;;  %v18_v2 = vld [vmem:[%s786_s0 + $0x8] sm:$0xff]  ;;  %v19_v3 = vld [vmem:[%s786_s0 + $0x10] sm:$0xff] }
   0x2   :  { %16 = vst.msk [vmem:[%s788_s2] sm:$0x1] %vm14_vm0, %v428_v0  ;;  %v83_v4 = vsel %vm82_vm1, %v17_v1, 0.0  ;;  %v84_v5 = vsel %vm82_vm1, %v18_v2, 0.0  ;;  %v86_v6 = vsel %vm82_vm1, %v19_v3, 0.0  ;;  %v20_v7 = vld [vmem:[%s786_s0 + $0x18] sm:$0xff]  ;;  %v220_v19 = vmul.f32 %v17_v1, %v17_v1 }
   0x3   :  { %v85_v8 = vadd.f32 %v84_v5, %v83_v4  ;;  %v88_v9 = vsel %vm82_vm1, %v20_v7, 0.0  ;;  %v21_v10 = vld [vmem:[%s786_s0 + $0x20] sm:$0xff]  ;;  %v22_v13 = vld [vmem:[%s786_s0 + $0x28] sm:$0xff]  ;;  %v23_v16 = vld [vmem:[%s786_s0 + $0x30] sm:$0xff]  ;;  %v221_v20 = vmul.f32 %v18_v2, %v18_v2  ;;  %v222_v24 = vmul.f32 %v19_v3, %v19_v3 }
   0x4   :  { %v90_v12 = vsel %vm82_vm1, %v21_v10, 0.0  ;;  %v92_v15 = vsel %vm82_vm1, %v22_v13, 0.0  ;;  %v94_v18 = vsel %vm82_vm1, %v23_v16, 0.0  ;;  %v24_v21 = vld [vmem:[%s786_s0 + $0x38] sm:$0xff]  ;;  %v223_v25 = vmul.f32 %v20_v7, %v20_v7  ;;  %v25_v26 = vld [vmem:[%s786_s0 + $0x40] sm:$0xff]  ;;  %v26_v32 = vld [vmem:[%s786_s0 + $0x48] sm:$0xff] }
   0x5   :  { %v87_v11 = vadd.f32 %v86_v6, %v85_v8  ;;  %v96_v23 = vsel %vm82_vm1, %v24_v21, 0.0  ;;  %v98_v28 = vsel %vm82_vm1, %v25_v26, 0.0  ;;  %v224_v29 = vmul.f32 %v21_v10, %v21_v10  ;;  %v27_v39 = vld [vmem:[%s786_s0 + $0x50] sm:$0xff]  ;;  %v28_v45 = vld [vmem:[%s786_s0 + $0x58] sm:$0xff]  ;;  %v29_v51 = vld [vmem:[%s786_s0 + $0x60] sm:$0xff] }
   0x6   :  { %v284_v30 = vsel %vm82_vm1, %v220_v19, 0.0  ;;  %v285_v31 = vsel %vm82_vm1, %v221_v20, 0.0  ;;  %v100_v35 = vsel %vm82_vm1, %v26_v32, 0.0  ;;  %v225_v36 = vmul.f32 %v22_v13, %v22_v13  ;;  %v30_v57 = vld [vmem:[%s786_s0 + $0x68] sm:$0xff]  ;;  %v31_v63 = vld [vmem:[%s786_s0 + $0x70] sm:$0xff]  ;;  %v32_v5 = vld [vmem:[%s786_s0 + $0x78] sm:$0xff] }
   0x7   :  { %v89_v14 = vadd.f32 %v88_v9, %v87_v11  ;;  %v286_v34 = vadd.f32 %v285_v31, %v284_v30  ;;  %v287_v37 = vsel %vm82_vm1, %v222_v24, 0.0  ;;  %v289_v38 = vsel %vm82_vm1, %v223_v25, 0.0  ;;  %v33_v11 = vld [vmem:[%s786_s0 + $0x80] sm:$0xff] }
   0x8   :  { %v102_v42 = vsel %vm82_vm1, %v27_v39, 0.0  ;;  %v226_v43 = vmul.f32 %v23_v16, %v23_v16  ;;  %v291_v44 = vsel %vm82_vm1, %v224_v29, 0.0  ;;  %v104_v48 = vsel %vm82_vm1, %v28_v45, 0.0  ;;  %v36_v29 = vld [vmem:[%s786_s0 + $0x98] sm:$0xff] }
   0x9   :  { %v91_v17 = vadd.f32 %v90_v12, %v89_v14  ;;  %v288_v41 = vadd.f32 %v287_v37, %v286_v34  ;;  %v227_v49 = vmul.f32 %v24_v21, %v24_v21  ;;  %v293_v50 = vsel %vm82_vm1, %v225_v36, 0.0 }
   0xa   :  { %v106_v54 = vsel %vm82_vm1, %v29_v51, 0.0  ;;  %v228_v55 = vmul.f32 %v25_v26, %v25_v26  ;;  %v295_v56 = vsel %vm82_vm1, %v226_v43, 0.0  ;;  %v108_v60 = vsel %vm82_vm1, %v30_v57, 0.0 }
   0xb   :  { %v93_v22 = vadd.f32 %v92_v15, %v91_v17  ;;  %v290_v47 = vadd.f32 %v289_v38, %v288_v41  ;;  %v229_v61 = vmul.f32 %v26_v32, %v26_v32  ;;  %v297_v62 = vsel %vm82_vm1, %v227_v49, 0.0  ;;  %v34_v17 = vld [vmem:[%s786_s0 + $0x88] sm:$0xff] }
   0xc   :  { %v110_v2 = vsel %vm82_vm1, %v31_v63, 0.0  ;;  %v230_v3 = vmul.f32 %v27_v39, %v27_v39  ;;  %v299_v4 = vsel %vm82_vm1, %v228_v55, 0.0  ;;  %v112_v8 = vsel %vm82_vm1, %v32_v5, 0.0  ;;  %v38_v41 = vld [vmem:[%s786_s0 + $0xa8] sm:$0xff] }
   0xd   :  { %v95_v27 = vadd.f32 %v94_v18, %v93_v22  ;;  %v292_v53 = vadd.f32 %v291_v44, %v290_v47  ;;  %v231_v9 = vmul.f32 %v28_v45, %v28_v45  ;;  %v301_v10 = vsel %vm82_vm1, %v229_v61, 0.0  ;;  %v39_v47 = vld [vmem:[%s786_s0 + $0xb0] sm:$0xff] }
   0xe   :  { %v114_v14 = vsel %vm82_vm1, %v33_v11, 0.0  ;;  %v232_v15 = vmul.f32 %v29_v51, %v29_v51  ;;  %v303_v16 = vsel %vm82_vm1, %v230_v3, 0.0  ;;  %v116_v20 = vsel %vm82_vm1, %v34_v17, 0.0 }
   0xf   :  { %v97_v33 = vadd.f32 %v96_v23, %v95_v27  ;;  %v294_v59 = vadd.f32 %v293_v50, %v292_v53  ;;  %v233_v21 = vmul.f32 %v30_v57, %v30_v57  ;;  %v305_v22 = vsel %vm82_vm1, %v231_v9, 0.0  ;;  %v35_v23 = vld [vmem:[%s786_s0 + $0x90] sm:$0xff]  ;;  %v40_v53 = vld [vmem:[%s786_s0 + $0xb8] sm:$0xff] }
  0x10   :  { %v118_v26 = vsel %vm82_vm1, %v35_v23, 0.0  ;;  %v234_v27 = vmul.f32 %v31_v63, %v31_v63  ;;  %v120_v32 = vsel %vm82_vm1, %v36_v29, 0.0  ;;  %v236_v39 = vmul.f32 %v33_v11, %v33_v11 }
  0x11   :  { %v99_v40 = vadd.f32 %v98_v28, %v97_v33  ;;  %v296_v1 = vadd.f32 %v295_v56, %v294_v59  ;;  %v307_v28 = vsel %vm82_vm1, %v232_v15, 0.0  ;;  %v235_v33 = vmul.f32 %v32_v5, %v32_v5  ;;  %v41_v59 = vld [vmem:[%s786_s0 + $0xc0] sm:$0xff] }
  0x12   :  { %v309_v34 = vsel %vm82_vm1, %v233_v21, 0.0  ;;  %v124_v44 = vsel %vm82_vm1, %v38_v41, 0.0  ;;  %v237_v45 = vmul.f32 %v34_v17, %v34_v17  ;;  %v126_v50 = vsel %vm82_vm1, %v39_v47, 0.0 }
  0x13   :  { %v101_v46 = vadd.f32 %v100_v35, %v99_v40  ;;  %v298_v7 = vadd.f32 %v297_v62, %v296_v1  ;;  %v37_v35 = vld [vmem:[%s786_s0 + $0xa0] sm:$0xff]  ;;  %v311_v40 = vsel %vm82_vm1, %v234_v27, 0.0  ;;  %v238_v51 = vmul.f32 %v35_v23, %v35_v23  ;;  %v42_v1 = vld [vmem:[%s786_s0 + $0xc8] sm:$0xff] }
  0x14   :  { %v122_v38 = vsel %vm82_vm1, %v37_v35, 0.0  ;;  %v128_v56 = vsel %vm82_vm1, %v40_v53, 0.0  ;;  %v239_v57 = vmul.f32 %v36_v29, %v36_v29  ;;  %v130_v62 = vsel %vm82_vm1, %v41_v59, 0.0 }
  0x15   :  { %v103_v52 = vadd.f32 %v102_v42, %v101_v46  ;;  %v300_v13 = vadd.f32 %v299_v4, %v298_v7  ;;  %v313_v46 = vsel %vm82_vm1, %v235_v33, 0.0  ;;  %v240_v63 = vmul.f32 %v37_v35, %v37_v35  ;;  %v43_v7 = vld [vmem:[%s786_s0 + $0xd0] sm:$0xff] }
  0x16   :  { %v132_v4 = vsel %vm82_vm1, %v42_v1, 0.0  ;;  %v241_v5 = vmul.f32 %v38_v41, %v38_v41  ;;  %v242_v11 = vmul.f32 %v39_v47, %v39_v47  ;;  %v243_v17 = vmul.f32 %v40_v53, %v40_v53 }
  0x17   :  { %v105_v58 = vadd.f32 %v104_v48, %v103_v52  ;;  %v302_v19 = vadd.f32 %v301_v10, %v300_v13  ;;  %v315_v52 = vsel %vm82_vm1, %v236_v39, 0.0  ;;  %v134_v10 = vsel %vm82_vm1, %v43_v7, 0.0  ;;  %v44_v13 = vld [vmem:[%s786_s0 + $0xd8] sm:$0xff] }
  0x18   :  { %v244_v23 = vmul.f32 %v41_v59, %v41_v59  ;;  %v245_v29 = vmul.f32 %v42_v1, %v42_v1  ;;  %v246_v35 = vmul.f32 %v43_v7, %v43_v7  ;;  %v247_v41 = vmul.f32 %v44_v13, %v44_v13 }
  0x19   :  { %v107_v0 = vadd.f32 %v106_v54, %v105_v58  ;;  %v304_v25 = vadd.f32 %v303_v16, %v302_v19  ;;  %v317_v58 = vsel %vm82_vm1, %v237_v45, 0.0  ;;  %v136_v16 = vsel %vm82_vm1, %v44_v13, 0.0  ;;  %v45_v19 = vld [vmem:[%s786_s0 + $0xe0] sm:$0xff] }
  0x1a   :  { %v248_v47 = vmul.f32 %v45_v19, %v45_v19 }
  0x1b   :  { %v109_v6 = vadd.f32 %v108_v60, %v107_v0  ;;  %v306_v31 = vadd.f32 %v305_v22, %v304_v25  ;;  %v319_v0 = vsel %vm82_vm1, %v238_v51, 0.0  ;;  %v138_v22 = vsel %vm82_vm1, %v45_v19, 0.0  ;;  %v46_v25 = vld [vmem:[%s786_s0 + $0xe8] sm:$0xff] }
  0x1c   :  { %v249_v53 = vmul.f32 %v46_v25, %v46_v25 }
  0x1d   :  { %v111_v12 = vadd.f32 %v110_v2, %v109_v6  ;;  %v308_v37 = vadd.f32 %v307_v28, %v306_v31  ;;  %v321_v6 = vsel %vm82_vm1, %v239_v57, 0.0  ;;  %v140_v28 = vsel %vm82_vm1, %v46_v25, 0.0  ;;  %v47_v31 = vld [vmem:[%s786_s0 + $0xf0] sm:$0xff] }
  0x1e   :  { %v250_v59 = vmul.f32 %v47_v31, %v47_v31 }
  0x1f   :  { %v113_v18 = vadd.f32 %v112_v8, %v111_v12  ;;  %v310_v43 = vadd.f32 %v309_v34, %v308_v37  ;;  %v323_v12 = vsel %vm82_vm1, %v240_v63, 0.0  ;;  %v142_v34 = vsel %vm82_vm1, %v47_v31, 0.0  ;;  %v48_v37 = vld [vmem:[%s786_s0 + $0xf8] sm:$0xff] }
  0x20   :  { %v251_v1 = vmul.f32 %v48_v37, %v48_v37 }
  0x21   :  { %v115_v24 = vadd.f32 %v114_v14, %v113_v18  ;;  %v312_v49 = vadd.f32 %v311_v40, %v310_v43  ;;  %v325_v18 = vsel %vm82_vm1, %v241_v5, 0.0  ;;  %v144_v40 = vsel %vm82_vm1, %v48_v37, 0.0  ;;  %v49_v43 = vld [vmem:[%s786_s0 + $0x100] sm:$0xff] }
  0x22   :  { %v252_v7 = vmul.f32 %v49_v43, %v49_v43 }
  0x23   :  { %v117_v30 = vadd.f32 %v116_v20, %v115_v24  ;;  %v314_v55 = vadd.f32 %v313_v46, %v312_v49  ;;  %v327_v24 = vsel %vm82_vm1, %v242_v11, 0.0  ;;  %v146_v46 = vsel %vm82_vm1, %v49_v43, 0.0  ;;  %v50_v49 = vld [vmem:[%s786_s0 + $0x108] sm:$0xff] }
  0x24   :  { %v253_v13 = vmul.f32 %v50_v49, %v50_v49 }
  0x25   :  { %v119_v36 = vadd.f32 %v118_v26, %v117_v30  ;;  %v316_v61 = vadd.f32 %v315_v52, %v314_v55  ;;  %v329_v30 = vsel %vm82_vm1, %v243_v17, 0.0  ;;  %v148_v52 = vsel %vm82_vm1, %v50_v49, 0.0  ;;  %v51_v55 = vld [vmem:[%s786_s0 + $0x110] sm:$0xff] }
  0x26   :  { %v254_v19 = vmul.f32 %v51_v55, %v51_v55 }
  0x27   :  { %v121_v42 = vadd.f32 %v120_v32, %v119_v36  ;;  %v318_v3 = vadd.f32 %v317_v58, %v316_v61  ;;  %v331_v36 = vsel %vm82_vm1, %v244_v23, 0.0  ;;  %v150_v58 = vsel %vm82_vm1, %v51_v55, 0.0  ;;  %v52_v61 = vld [vmem:[%s786_s0 + $0x118] sm:$0xff] }
  0x28   :  { %v255_v25 = vmul.f32 %v52_v61, %v52_v61 }
  0x29   :  { %v123_v48 = vadd.f32 %v122_v38, %v121_v42  ;;  %v320_v9 = vadd.f32 %v319_v0, %v318_v3  ;;  %v333_v42 = vsel %vm82_vm1, %v245_v29, 0.0  ;;  %v152_v0 = vsel %vm82_vm1, %v52_v61, 0.0  ;;  %v53_v3 = vld [vmem:[%s786_s0 + $0x120] sm:$0xff] }
  0x2a   :  { %v256_v31 = vmul.f32 %v53_v3, %v53_v3 }
  0x2b   :  { %v125_v54 = vadd.f32 %v124_v44, %v123_v48  ;;  %v322_v15 = vadd.f32 %v321_v6, %v320_v9  ;;  %v335_v48 = vsel %vm82_vm1, %v246_v35, 0.0  ;;  %v154_v6 = vsel %vm82_vm1, %v53_v3, 0.0  ;;  %v54_v9 = vld [vmem:[%s786_s0 + $0x128] sm:$0xff] }
  0x2c   :  { %v257_v37 = vmul.f32 %v54_v9, %v54_v9 }
  0x2d   :  { %v127_v60 = vadd.f32 %v126_v50, %v125_v54  ;;  %v324_v21 = vadd.f32 %v323_v12, %v322_v15  ;;  %v337_v54 = vsel %vm82_vm1, %v247_v41, 0.0  ;;  %v156_v12 = vsel %vm82_vm1, %v54_v9, 0.0  ;;  %v55_v15 = vld [vmem:[%s786_s0 + $0x130] sm:$0xff] }
  0x2e   :  { %v258_v43 = vmul.f32 %v55_v15, %v55_v15 }
  0x2f   :  { %v129_v2 = vadd.f32 %v128_v56, %v127_v60  ;;  %v326_v27 = vadd.f32 %v325_v18, %v324_v21  ;;  %v339_v60 = vsel %vm82_vm1, %v248_v47, 0.0  ;;  %v158_v18 = vsel %vm82_vm1, %v55_v15, 0.0  ;;  %v56_v21 = vld [vmem:[%s786_s0 + $0x138] sm:$0xff] }
  0x30   :  { %v259_v49 = vmul.f32 %v56_v21, %v56_v21 }
  0x31   :  { %v131_v8 = vadd.f32 %v130_v62, %v129_v2  ;;  %v328_v33 = vadd.f32 %v327_v24, %v326_v27  ;;  %v341_v2 = vsel %vm82_vm1, %v249_v53, 0.0  ;;  %v160_v24 = vsel %vm82_vm1, %v56_v21, 0.0  ;;  %v57_v27 = vld [vmem:[%s786_s0 + $0x140] sm:$0xff] }
  0x32   :  { %v260_v55 = vmul.f32 %v57_v27, %v57_v27 }
  0x33   :  { %v133_v14 = vadd.f32 %v132_v4, %v131_v8  ;;  %v330_v39 = vadd.f32 %v329_v30, %v328_v33  ;;  %v343_v8 = vsel %vm82_vm1, %v250_v59, 0.0  ;;  %v162_v30 = vsel %vm82_vm1, %v57_v27, 0.0  ;;  %v58_v33 = vld [vmem:[%s786_s0 + $0x148] sm:$0xff] }
  0x34   :  { %v261_v61 = vmul.f32 %v58_v33, %v58_v33 }
  0x35   :  { %v135_v20 = vadd.f32 %v134_v10, %v133_v14  ;;  %v332_v45 = vadd.f32 %v331_v36, %v330_v39  ;;  %v345_v14 = vsel %vm82_vm1, %v251_v1, 0.0  ;;  %v164_v36 = vsel %vm82_vm1, %v58_v33, 0.0  ;;  %v59_v39 = vld [vmem:[%s786_s0 + $0x150] sm:$0xff] }
  0x36   :  { %v262_v3 = vmul.f32 %v59_v39, %v59_v39 }
  0x37   :  { %v137_v26 = vadd.f32 %v136_v16, %v135_v20  ;;  %v334_v51 = vadd.f32 %v333_v42, %v332_v45  ;;  %v347_v20 = vsel %vm82_vm1, %v252_v7, 0.0  ;;  %v166_v42 = vsel %vm82_vm1, %v59_v39, 0.0  ;;  %v60_v45 = vld [vmem:[%s786_s0 + $0x158] sm:$0xff] }
  0x38   :  { %v263_v9 = vmul.f32 %v60_v45, %v60_v45 }
  0x39   :  { %v139_v32 = vadd.f32 %v138_v22, %v137_v26  ;;  %v336_v57 = vadd.f32 %v335_v48, %v334_v51  ;;  %v349_v26 = vsel %vm82_vm1, %v253_v13, 0.0  ;;  %v168_v48 = vsel %vm82_vm1, %v60_v45, 0.0  ;;  %v61_v51 = vld [vmem:[%s786_s0 + $0x160] sm:$0xff] }
  0x3a   :  { %v264_v15 = vmul.f32 %v61_v51, %v61_v51 }
  0x3b   :  { %v141_v38 = vadd.f32 %v140_v28, %v139_v32  ;;  %v338_v63 = vadd.f32 %v337_v54, %v336_v57  ;;  %v351_v32 = vsel %vm82_vm1, %v254_v19, 0.0  ;;  %v170_v54 = vsel %vm82_vm1, %v61_v51, 0.0  ;;  %v62_v57 = vld [vmem:[%s786_s0 + $0x168] sm:$0xff] }
  0x3c   :  { %v265_v21 = vmul.f32 %v62_v57, %v62_v57 }
  0x3d   :  { %v143_v44 = vadd.f32 %v142_v34, %v141_v38  ;;  %v340_v5 = vadd.f32 %v339_v60, %v338_v63  ;;  %v353_v38 = vsel %vm82_vm1, %v255_v25, 0.0  ;;  %v172_v60 = vsel %vm82_vm1, %v62_v57, 0.0  ;;  %v63_v63 = vld [vmem:[%s786_s0 + $0x170] sm:$0xff] }
  0x3e   :  { %v266_v27 = vmul.f32 %v63_v63, %v63_v63 }
  0x3f   :  { %v145_v50 = vadd.f32 %v144_v40, %v143_v44  ;;  %v342_v11 = vadd.f32 %v341_v2, %v340_v5  ;;  %v355_v44 = vsel %vm82_vm1, %v256_v31, 0.0  ;;  %v174_v2 = vsel %vm82_vm1, %v63_v63, 0.0  ;;  %v64_v5 = vld [vmem:[%s786_s0 + $0x178] sm:$0xff] }
  0x40   :  { %v267_v33 = vmul.f32 %v64_v5, %v64_v5 }
  0x41   :  { %v147_v56 = vadd.f32 %v146_v46, %v145_v50  ;;  %v344_v17 = vadd.f32 %v343_v8, %v342_v11  ;;  %v357_v50 = vsel %vm82_vm1, %v257_v37, 0.0  ;;  %v176_v8 = vsel %vm82_vm1, %v64_v5, 0.0  ;;  %v65_v11 = vld [vmem:[%s786_s0 + $0x180] sm:$0xff] }
  0x42   :  { %v268_v39 = vmul.f32 %v65_v11, %v65_v11 }
  0x43   :  { %v149_v62 = vadd.f32 %v148_v52, %v147_v56  ;;  %v346_v23 = vadd.f32 %v345_v14, %v344_v17  ;;  %v359_v56 = vsel %vm82_vm1, %v258_v43, 0.0  ;;  %v178_v14 = vsel %vm82_vm1, %v65_v11, 0.0  ;;  %v66_v17 = vld [vmem:[%s786_s0 + $0x188] sm:$0xff] }
  0x44   :  { %v269_v45 = vmul.f32 %v66_v17, %v66_v17 }
  0x45   :  { %v151_v4 = vadd.f32 %v150_v58, %v149_v62  ;;  %v348_v29 = vadd.f32 %v347_v20, %v346_v23  ;;  %v361_v62 = vsel %vm82_vm1, %v259_v49, 0.0  ;;  %v180_v20 = vsel %vm82_vm1, %v66_v17, 0.0  ;;  %v67_v23 = vld [vmem:[%s786_s0 + $0x190] sm:$0xff] }
  0x46   :  { %v270_v51 = vmul.f32 %v67_v23, %v67_v23 }
  0x47   :  { %v153_v10 = vadd.f32 %v152_v0, %v151_v4  ;;  %v350_v35 = vadd.f32 %v349_v26, %v348_v29  ;;  %v363_v4 = vsel %vm82_vm1, %v260_v55, 0.0  ;;  %v182_v26 = vsel %vm82_vm1, %v67_v23, 0.0  ;;  %v68_v29 = vld [vmem:[%s786_s0 + $0x198] sm:$0xff] }
  0x48   :  { %v271_v57 = vmul.f32 %v68_v29, %v68_v29 }
  0x49   :  { %v155_v16 = vadd.f32 %v154_v6, %v153_v10  ;;  %v352_v41 = vadd.f32 %v351_v32, %v350_v35  ;;  %v365_v10 = vsel %vm82_vm1, %v261_v61, 0.0  ;;  %v184_v32 = vsel %vm82_vm1, %v68_v29, 0.0  ;;  %v69_v35 = vld [vmem:[%s786_s0 + $0x1a0] sm:$0xff] }
  0x4a   :  { %v272_v63 = vmul.f32 %v69_v35, %v69_v35 }
  0x4b   :  { %v157_v22 = vadd.f32 %v156_v12, %v155_v16  ;;  %v354_v47 = vadd.f32 %v353_v38, %v352_v41  ;;  %v367_v16 = vsel %vm82_vm1, %v262_v3, 0.0  ;;  %v186_v38 = vsel %vm82_vm1, %v69_v35, 0.0  ;;  %v70_v41 = vld [vmem:[%s786_s0 + $0x1a8] sm:$0xff] }
  0x4c   :  { %v273_v5 = vmul.f32 %v70_v41, %v70_v41 }
  0x4d   :  { %v159_v28 = vadd.f32 %v158_v18, %v157_v22  ;;  %v356_v53 = vadd.f32 %v355_v44, %v354_v47  ;;  %v369_v22 = vsel %vm82_vm1, %v263_v9, 0.0  ;;  %v188_v44 = vsel %vm82_vm1, %v70_v41, 0.0  ;;  %v71_v47 = vld [vmem:[%s786_s0 + $0x1b0] sm:$0xff] }
  0x4e   :  { %v274_v11 = vmul.f32 %v71_v47, %v71_v47 }
  0x4f   :  { %v161_v34 = vadd.f32 %v160_v24, %v159_v28  ;;  %v358_v59 = vadd.f32 %v357_v50, %v356_v53  ;;  %v371_v28 = vsel %vm82_vm1, %v264_v15, 0.0  ;;  %v190_v50 = vsel %vm82_vm1, %v71_v47, 0.0  ;;  %v72_v53 = vld [vmem:[%s786_s0 + $0x1b8] sm:$0xff] }
  0x50   :  { %v275_v17 = vmul.f32 %v72_v53, %v72_v53 }
  0x51   :  { %v163_v40 = vadd.f32 %v162_v30, %v161_v34  ;;  %v360_v1 = vadd.f32 %v359_v56, %v358_v59  ;;  %v373_v34 = vsel %vm82_vm1, %v265_v21, 0.0  ;;  %v192_v56 = vsel %vm82_vm1, %v72_v53, 0.0  ;;  %v73_v59 = vld [vmem:[%s786_s0 + $0x1c0] sm:$0xff] }
  0x52   :  { %v276_v23 = vmul.f32 %v73_v59, %v73_v59 }
  0x53   :  { %v165_v46 = vadd.f32 %v164_v36, %v163_v40  ;;  %v362_v7 = vadd.f32 %v361_v62, %v360_v1  ;;  %v375_v40 = vsel %vm82_vm1, %v266_v27, 0.0  ;;  %v194_v62 = vsel %vm82_vm1, %v73_v59, 0.0  ;;  %v74_v1 = vld [vmem:[%s786_s0 + $0x1c8] sm:$0xff] }
  0x54   :  { %v277_v29 = vmul.f32 %v74_v1, %v74_v1 }
  0x55   :  { %v167_v52 = vadd.f32 %v166_v42, %v165_v46  ;;  %v364_v13 = vadd.f32 %v363_v4, %v362_v7  ;;  %v377_v46 = vsel %vm82_vm1, %v267_v33, 0.0  ;;  %v196_v4 = vsel %vm82_vm1, %v74_v1, 0.0  ;;  %v75_v7 = vld [vmem:[%s786_s0 + $0x1d0] sm:$0xff] }
  0x56   :  { %v278_v35 = vmul.f32 %v75_v7, %v75_v7 }
  0x57   :  { %v169_v58 = vadd.f32 %v168_v48, %v167_v52  ;;  %v366_v19 = vadd.f32 %v365_v10, %v364_v13  ;;  %v379_v52 = vsel %vm82_vm1, %v268_v39, 0.0  ;;  %v198_v10 = vsel %vm82_vm1, %v75_v7, 0.0  ;;  %v76_v13 = vld [vmem:[%s786_s0 + $0x1d8] sm:$0xff] }
  0x58   :  { %v279_v41 = vmul.f32 %v76_v13, %v76_v13 }
  0x59   :  { %v171_v0 = vadd.f32 %v170_v54, %v169_v58  ;;  %v368_v25 = vadd.f32 %v367_v16, %v366_v19  ;;  %v381_v58 = vsel %vm82_vm1, %v269_v45, 0.0  ;;  %v200_v16 = vsel %vm82_vm1, %v76_v13, 0.0  ;;  %v77_v19 = vld [vmem:[%s786_s0 + $0x1e0] sm:$0xff] }
  0x5a   :  { %v280_v45 = vmul.f32 %v77_v19, %v77_v19 }
  0x5b   :  { %v173_v6 = vadd.f32 %v172_v60, %v171_v0  ;;  %v370_v31 = vadd.f32 %v369_v22, %v368_v25  ;;  %v383_v0 = vsel %vm82_vm1, %v270_v51, 0.0  ;;  %v202_v22 = vsel %vm82_vm1, %v77_v19, 0.0  ;;  %v78_v25 = vld [vmem:[%s786_s0 + $0x1e8] sm:$0xff] }
  0x5d   :  { %v175_v12 = vadd.f32 %v174_v2, %v173_v6  ;;  %v372_v37 = vadd.f32 %v371_v28, %v370_v31  ;;  %v385_v6 = vsel %vm82_vm1, %v271_v57, 0.0  ;;  %v204_v28 = vsel %vm82_vm1, %v78_v25, 0.0  ;;  %v79_v31 = vld [vmem:[%s786_s0 + $0x1f0] sm:$0xff] }
  0x5e   :  { %v282_v53 = vmul.f32 %v79_v31, %v79_v31 }
  0x5f   :  { %v177_v18 = vadd.f32 %v176_v8, %v175_v12  ;;  %v374_v43 = vadd.f32 %v373_v34, %v372_v37  ;;  %v387_v12 = vsel %vm82_vm1, %v272_v63, 0.0  ;;  %v206_v34 = vsel %vm82_vm1, %v79_v31, 0.0  ;;  %v80_v37 = vld [vmem:[%s786_s0 + $0x1f8] sm:$0xff] }
  0x60   :  { %v283_v57 = vmul.f32 %v80_v37, %v80_v37 }
  0x61   :  { %v179_v24 = vadd.f32 %v178_v14, %v177_v18  ;;  %v376_v49 = vadd.f32 %v375_v40, %v374_v43  ;;  %v389_v18 = vsel %vm82_vm1, %v273_v5, 0.0  ;;  %v208_v40 = vsel %vm82_vm1, %v80_v37, 0.0 }
  0x63   :  { %v181_v30 = vadd.f32 %v180_v20, %v179_v24  ;;  %v378_v55 = vadd.f32 %v377_v46, %v376_v49  ;;  %v391_v24 = vsel %vm82_vm1, %v274_v11, 0.0  ;;  %v399_v46 = vsel %vm82_vm1, %v278_v35, 0.0 }
  0x64   :  { %v281_v49 = vmul.f32 %v78_v25, %v78_v25 }
  0x65   :  { %v183_v36 = vadd.f32 %v182_v26, %v181_v30  ;;  %v380_v61 = vadd.f32 %v379_v52, %v378_v55  ;;  %v393_v30 = vsel %vm82_vm1, %v275_v17, 0.0 }
  0x67   :  { %v185_v42 = vadd.f32 %v184_v32, %v183_v36  ;;  %v382_v3 = vadd.f32 %v381_v58, %v380_v61  ;;  %v395_v36 = vsel %vm82_vm1, %v276_v23, 0.0  ;;  %v405_v58 = vsel %vm82_vm1, %v281_v49, 0.0 }
  0x68   :  { %v407_v61 = vsel %vm82_vm1, %v282_v53, 0.0 }
  0x69   :  { %v187_v48 = vadd.f32 %v186_v38, %v185_v42  ;;  %v384_v9 = vadd.f32 %v383_v0, %v382_v3  ;;  %v397_v42 = vsel %vm82_vm1, %v277_v29, 0.0  ;;  %v409_v0 = vsel %vm82_vm1, %v283_v57, 0.0  ;;  %v81_v3 = vld [vmem:[%s787_s1] sm:$0x1] }
  0x6b   :  { %v189_v54 = vadd.f32 %v188_v44, %v187_v48  ;;  %v386_v15 = vadd.f32 %v385_v6, %v384_v9 }
  0x6d   :  { %v191_v60 = vadd.f32 %v190_v50, %v189_v54  ;;  %v388_v21 = vadd.f32 %v387_v12, %v386_v15  ;;  %v401_v50 = vsel %vm82_vm1, %v279_v41, 0.0  ;;  %v403_v54 = vsel %vm82_vm1, %v280_v45, 0.0  ;;  %v219_v12 = vld [vmem:[%s788_s2] sm:$0x1] }
  0x6f   :  { %v193_v2 = vadd.f32 %v192_v56, %v191_v60  ;;  %v390_v27 = vadd.f32 %v389_v18, %v388_v21 }
  0x71   :  { %v195_v8 = vadd.f32 %v194_v62, %v193_v2  ;;  %v392_v33 = vadd.f32 %v391_v24, %v390_v27 }
  0x73   :  { %v197_v14 = vadd.f32 %v196_v4, %v195_v8  ;;  %v394_v39 = vadd.f32 %v393_v30, %v392_v33 }
  0x75   :  { %v199_v20 = vadd.f32 %v198_v10, %v197_v14  ;;  %v396_v44 = vadd.f32 %v395_v36, %v394_v39 }
  0x77   :  { %v201_v26 = vadd.f32 %v200_v16, %v199_v20  ;;  %v398_v48 = vadd.f32 %v397_v42, %v396_v44 }
  0x79   :  { %v203_v32 = vadd.f32 %v202_v22, %v201_v26  ;;  %v400_v52 = vadd.f32 %v399_v46, %v398_v48 }
  0x7b   :  { %v205_v38 = vadd.f32 %v204_v28, %v203_v32  ;;  %v402_v56 = vadd.f32 %v401_v50, %v400_v52 }
  0x7d   :  { %v207_v43 = vadd.f32 %v206_v34, %v205_v38  ;;  %v404_v60 = vadd.f32 %v403_v54, %v402_v56 }
  0x7f   :  { %v209_v47 = vadd.f32 %v208_v40, %v207_v43  ;;  %v406_v63 = vadd.f32 %v405_v58, %v404_v60 }
  0x81   :  { %v210_v51 = vrot.slane %v209_v47, 4  ;;  %v408_v2 = vadd.f32 %v407_v61, %v406_v63 }
  0x83   :  { %v211_v55 = vadd.f32 %v210_v51, %v209_v47  ;;  %v410_v5 = vadd.f32 %v409_v0, %v408_v2 }
  0x85   :  { %v212_v59 = vrot.slane %v211_v55, 2  ;;  %v411_v7 = vrot.slane %v410_v5, 4 }
  0x87   :  { %v213_v62 = vadd.f32 %v212_v59, %v211_v55  ;;  %v412_v8 = vadd.f32 %v411_v7, %v410_v5 }
  0x89   :  { %v214_v1 = vrot.slane %v213_v62, 1  ;;  %v413_v9 = vrot.slane %v412_v8, 2 }
  0x8b   :  { %v215_v4 = vadd.f32 %v214_v1, %v213_v62  ;;  %v414_v10 = vadd.f32 %v413_v9, %v412_v8 }
  0x8d   :  { %v216_v6 = vadd.f32 %v215_v4, %v81_v3  ;;  %v415_v11 = vrot.slane %v414_v10, 1 }
  0x8f   :  { %218 = vst.msk [vmem:[%s787_s1] sm:$0x1] %vm14_vm0, %v216_v6  ;;  %v416_v13 = vadd.f32 %v415_v11, %v414_v10 }
  0x91   :  { %v417_v14 = vadd.f32 %v416_v13, %v219_v12 }
  0x93   :  { %418 = vst.msk [vmem:[%s788_s2] sm:$0x1] %vm14_vm0, %v417_v14 }

// kernel: bottleneck_forward.5
= control target key start
LH: loop header
LB: loop body
LE: loop exit
PB: predicated region body
PF: predicated region fallthrough
CT: control target
= control target key end

     0   :  { %vm359_vm3 = vcmask 130048   ;;  %vm1027_vm4 = vcmask 27648   ;;  %vm626_vm5 = vcmask 31744   ;;  %vm31_vm6 = vcmask 24576   ;;  %s2354_s5 = inlined_call_operand.vmem [shape: bf16[16,4], index: 5, kind: input, shape index: {}]   ;;  %s2355_s1 = inlined_call_operand.vmem [shape: f32[1,16], index: 1, kind: input, shape index: {}]   ;;  %s2356_s2 = inlined_call_operand.vmem [shape: f32[1,16], index: 2, kind: input, shape index: {}]   ;;  %s2357_s3 = inlined_call_operand.vmem [shape: f32[1,16], index: 3, kind: input, shape index: {}]   ;;  %s2358_s0 = inlined_call_operand.vmem [shape: f32[512,16], index: 0, kind: input, shape index: {}]   ;;  %s2359_s4 = inlined_call_operand.vmem [shape: f32[1,16], index: 4, kind: input, shape index: {}]   ;;  %s2360_s6 = inlined_call_operand.vmem [shape: bf16[512,4], index: 6, kind: output, shape index: {0}]   ;;  %s2361_s7 = inlined_call_operand.vmem [shape: f32[1,4], index: 7, kind: output, shape index: {1}]   ;;  %s2362_s8 = inlined_call_operand.vmem [shape: f32[1,4], index: 8, kind: output, shape index: {2}]  }
   0x1   :  { %v1140_v0 = vld [vmem:[%s2354_s5] sm:$0xff]  ;;  %v35_v19 = vld [vmem:[%s2358_s0 + $0x8] sm:$0xff]  ;;  %v36_v37 = vld [vmem:[%s2358_s0 + $0x10] sm:$0xff] }
   0x2   :  { %v98_v1 = vld [vmem:[%s2355_s1] sm:$0x1]  ;;  %463 = vmatpush.bf16.msra.mxu0 %v1140_v0  ;;  %1141 = vmatpush.bf16.msra.mxu1 %v1140_v0  ;;  %v51_v24 = vld [vmem:[%s2358_s0 + $0x88] sm:$0xff]  ;;  %v37_v38 = vld [vmem:[%s2358_s0 + $0x18] sm:$0xff] }
   0x3   :  { %v100_v2 = vld [vmem:[%s2356_s2] sm:$0x1]  ;;  %v99_v3 = vmul.f32 0.001953125, %v98_v1  ;;  %1142 = vmatpush.bf16.msra.mxu2 %v1140_v0  ;;  %1143 = vmatpush.bf16.msra.mxu3 %v1140_v0  ;;  %v52_v43 = vld [vmem:[%s2358_s0 + $0x90] sm:$0xff]  ;;  %v53_v44 = vld [vmem:[%s2358_s0 + $0x98] sm:$0xff] }
   0x4   :  { %v101_v4 = vmul.f32 0.001953125, %v100_v2  ;;  %v105_v14 = vld [vmem:[%s2357_s3] sm:$0x1]  ;;  %v67_v58 = vld [vmem:[%s2358_s0 + $0x108] sm:$0xff] }
   0x5   :  { %v102_v5 = vmul.f32 %v99_v3, %v99_v3  ;;  %v34_v18 = vld [vmem:[%s2358_s0] sm:$0xff]  ;;  %v39_v1 = vld [vmem:[%s2358_s0 + $0x28] sm:$0xff] }
   0x6   :  { %v118_v20 = vld [vmem:[%s2359_s4] sm:$0x1] }
   0x7   :  { %v103_v6 = vsub.f32 %v101_v4, %v102_v5  ;;  %v50_v23 = vld [vmem:[%s2358_s0 + $0x80] sm:$0xff] }
   0x8   :  { %v66_v57 = vld [vmem:[%s2358_s0 + $0x100] sm:$0xff] }
   0x9   :  { %v104_v7 = vmax.f32 %v103_v6, 0.0  ;;  %v38_v0 = vld [vmem:[%s2358_s0 + $0x20] sm:$0xff]  ;;  %v55_v6 = vld [vmem:[%s2358_s0 + $0xa8] sm:$0xff] }
   0xa   :  { %v54_v5 = vld [vmem:[%s2358_s0 + $0xa0] sm:$0xff] }
   0xb   :  { %v106_v8 = vadd.f32 1e-05, %v104_v7 }
   0xd   :  { %1145 = vrsqrt.f32 %v106_v8  ;;  %vm113_vm0 = vweird.f32 %v106_v8 }
  0x13   :  { %v1146_v9 = vpop.eup %1145 }
  0x14   :  { %v108_v10 = vmul.f32 %v1146_v9, %v106_v8  ;;  %vm114_vm1 = vweird.f32 %v1146_v9 }
  0x15   :  { %vm115_vm2 = vmor %vm113_vm0, %vm114_vm1 }
  0x16   :  { %v109_v11 = vmul.f32 %v1146_v9, %v108_v10 }
  0x18   :  { %v110_v12 = vmul.f32 0.5, %v109_v11 }
  0x1a   :  { %v111_v13 = vsub.f32 1.5, %v110_v12 }
  0x1c   :  { %v112_v15 = vmul.f32 %v1146_v9, %v111_v13 }
  0x1e   :  { %v116_v16 = vsel %vm115_vm2, %v1146_v9, %v112_v15 }
  0x1f   :  { %v117_v17 = vmul.f32 %v116_v16, %v105_v14 }
  0x21   :  { %v119_v21 = vmul.f32 %v117_v17, %v99_v3  ;;  %v1214_v22 = vperm.slane %v117_v17, 0 }
  0x23   :  { %v120_v25 = vsub.f32 %v118_v20, %v119_v21  ;;  %v124_v26 = vmul.f32 %v1214_v22, %v34_v18  ;;  %v125_v27 = vmul.f32 %v1214_v22, %v35_v19  ;;  %v140_v28 = vmul.f32 %v1214_v22, %v50_v23  ;;  %v68_v20 = vld [vmem:[%s2358_s0 + $0x110] sm:$0xff]  ;;  %v69_v21 = vld [vmem:[%s2358_s0 + $0x118] sm:$0xff] }
  0x24   :  { %v141_v29 = vmul.f32 %v1214_v22, %v51_v24  ;;  %v126_v45 = vmul.f32 %v1214_v22, %v36_v37  ;;  %v127_v46 = vmul.f32 %v1214_v22, %v37_v38  ;;  %v142_v47 = vmul.f32 %v1214_v22, %v52_v43 }
  0x25   :  { %v1226_v30 = vperm.slane %v120_v25, 0  ;;  %v143_v48 = vmul.f32 %v1214_v22, %v53_v44  ;;  %v156_v59 = vmul.f32 %v1214_v22, %v66_v57  ;;  %v157_v60 = vmul.f32 %v1214_v22, %v67_v58 }
  0x26   :  { %v128_v7 = vmul.f32 %v1214_v22, %v38_v0  ;;  %v129_v8 = vmul.f32 %v1214_v22, %v39_v1  ;;  %v144_v10 = vmul.f32 %v1214_v22, %v54_v5  ;;  %v145_v11 = vmul.f32 %v1214_v22, %v55_v6  ;;  %v58_v5 = vld [vmem:[%s2358_s0 + $0xc0] sm:$0xff]  ;;  %v59_v6 = vld [vmem:[%s2358_s0 + $0xc8] sm:$0xff] }
  0x27   :  { %v191_v31 = vadd.f32 %v1226_v30, %v124_v26  ;;  %v192_v32 = vadd.f32 %v1226_v30, %v125_v27  ;;  %v207_v33 = vadd.f32 %v1226_v30, %v140_v28  ;;  %v208_v34 = vadd.f32 %v1226_v30, %v141_v29  ;;  %v40_v28 = vld [vmem:[%s2358_s0 + $0x30] sm:$0xff]  ;;  %v41_v29 = vld [vmem:[%s2358_s0 + $0x38] sm:$0xff] }
  0x28   :  { %v193_v49 = vadd.f32 %v1226_v30, %v126_v45  ;;  %v194_v50 = vadd.f32 %v1226_v30, %v127_v46  ;;  %v209_v51 = vadd.f32 %v1226_v30, %v142_v47  ;;  %v210_v52 = vadd.f32 %v1226_v30, %v143_v48 }
  0x29   :  { %v255_v35 = vmax.f32 %v191_v31, 0.0  ;;  %v256_v36 = vmax.f32 %v192_v32, 0.0  ;;  %v271_v39 = vmax.f32 %v207_v33, 0.0  ;;  %v272_v40 = vmax.f32 %v208_v34, 0.0  ;;  %v56_v34 = vld [vmem:[%s2358_s0 + $0xb0] sm:$0xff] }
  0x2a   :  { %v257_v53 = vmax.f32 %v193_v49, 0.0  ;;  %v258_v54 = vmax.f32 %v194_v50, 0.0  ;;  %v273_v55 = vmax.f32 %v209_v51, 0.0  ;;  %v274_v56 = vmax.f32 %v210_v52, 0.0  ;;  %v70_v49 = vld [vmem:[%s2358_s0 + $0x120] sm:$0xff]  ;;  %v71_v50 = vld [vmem:[%s2358_s0 + $0x128] sm:$0xff] }
  0x2b   :  { %v319_v41 = vpack.c.bf16 %v256_v36, %v255_v35  ;;  %v327_v42 = vpack.c.bf16 %v272_v40, %v271_v39  ;;  %v223_v62 = vadd.f32 %v1226_v30, %v156_v59  ;;  %v224_v63 = vadd.f32 %v1226_v30, %v157_v60  ;;  %v57_v35 = vld [vmem:[%s2358_s0 + $0xb8] sm:$0xff]  ;;  %v82_v51 = vld [vmem:[%s2358_s0 + $0x180] sm:$0xff] }
  0x2c   :  { %v320_v61 = vpack.c.bf16 %v258_v54, %v257_v53  ;;  %v328_v2 = vpack.c.bf16 %v274_v56, %v273_v55  ;;  %v195_v12 = vadd.f32 %v1226_v30, %v128_v7  ;;  %v196_v13 = vadd.f32 %v1226_v30, %v129_v8  ;;  %v83_v54 = vld [vmem:[%s2358_s0 + $0x188] sm:$0xff] }
  0x2d   :  { %1108 = vmatmul.msk.bf16.vlgmr.msra.gmra.mxu0 %vm359_vm3, %v319_v41  ;;  %1116 = vmatmul.msk.bf16.vlgmr.msra.gmra.mxu1 %vm359_vm3, %v327_v42  ;;  %v287_v3 = vmax.f32 %v223_v62, 0.0  ;;  %v288_v4 = vmax.f32 %v224_v63, 0.0  ;;  %v211_v14 = vadd.f32 %v1226_v30, %v144_v10  ;;  %v212_v15 = vadd.f32 %v1226_v30, %v145_v11  ;;  %v43_v62 = vld [vmem:[%s2358_s0 + $0x48] sm:$0xff] }
  0x2e   :  { %v259_v16 = vmax.f32 %v195_v12, 0.0  ;;  %v260_v17 = vmax.f32 %v196_v13, 0.0  ;;  %v158_v23 = vmul.f32 %v1214_v22, %v68_v20  ;;  %v159_v24 = vmul.f32 %v1214_v22, %v69_v21  ;;  %v72_v21 = vld [vmem:[%s2358_s0 + $0x130] sm:$0xff] }
  0x2f   :  { %v335_v9 = vpack.c.bf16 %v288_v4, %v287_v3  ;;  %v275_v18 = vmax.f32 %v211_v14, 0.0  ;;  %v276_v19 = vmax.f32 %v212_v15, 0.0  ;;  %v130_v36 = vmul.f32 %v1214_v22, %v40_v28 }
  0x30   :  { %v321_v25 = vpack.c.bf16 %v260_v17, %v259_v16  ;;  %v225_v26 = vadd.f32 %v1226_v30, %v158_v23  ;;  %v226_v27 = vadd.f32 %v1226_v30, %v159_v24  ;;  %v131_v37 = vmul.f32 %v1214_v22, %v41_v29  ;;  %v73_v23 = vld [vmem:[%s2358_s0 + $0x138] sm:$0xff]  ;;  %v84_v24 = vld [vmem:[%s2358_s0 + $0x190] sm:$0xff] }
  0x31   :  { %1124 = vmatmul.msk.bf16.vlgmr.msra.gmra.mxu2 %vm359_vm3, %v335_v9  ;;  %v329_v31 = vpack.c.bf16 %v276_v19, %v275_v18  ;;  %v146_v39 = vmul.f32 %v1214_v22, %v56_v34  ;;  %v147_v40 = vmul.f32 %v1214_v22, %v57_v35  ;;  %v197_v41 = vadd.f32 %v1226_v30, %v130_v36  ;;  %v44_v35 = vld [vmem:[%s2358_s0 + $0x50] sm:$0xff]  ;;  %v45_v36 = vld [vmem:[%s2358_s0 + $0x58] sm:$0xff] }
  0x32   :  { %v289_v32 = vmax.f32 %v225_v26, 0.0  ;;  %v290_v33 = vmax.f32 %v226_v27, 0.0  ;;  %v198_v42 = vadd.f32 %v1226_v30, %v131_v37  ;;  %v160_v52 = vmul.f32 %v1214_v22, %v70_v49  ;;  %v85_v27 = vld [vmem:[%s2358_s0 + $0x198] sm:$0xff] }
  0x33   :  { %v213_v43 = vadd.f32 %v1226_v30, %v146_v39  ;;  %v214_v44 = vadd.f32 %v1226_v30, %v147_v40  ;;  %v261_v45 = vmax.f32 %v197_v41, 0.0  ;;  %v161_v53 = vmul.f32 %v1214_v22, %v71_v50 }
  0x34   :  { %v336_v38 = vpack.c.bf16 %v290_v33, %v289_v32  ;;  %v262_v46 = vmax.f32 %v198_v42, 0.0  ;;  %v172_v55 = vmul.f32 %v1214_v22, %v82_v51  ;;  %v173_v56 = vmul.f32 %v1214_v22, %v83_v54 }
  0x35   :  { %v277_v47 = vmax.f32 %v213_v43, 0.0  ;;  %v278_v48 = vmax.f32 %v214_v44, 0.0  ;;  %v227_v58 = vadd.f32 %v1226_v30, %v160_v52  ;;  %v228_v59 = vadd.f32 %v1226_v30, %v161_v53  ;;  %v60_v43 = vld [vmem:[%s2358_s0 + $0xd0] sm:$0xff]  ;;  %v61_v44 = vld [vmem:[%s2358_s0 + $0xd8] sm:$0xff] }
  0x36   :  { %v322_v57 = vpack.c.bf16 %v262_v46, %v261_v45  ;;  %v239_v60 = vadd.f32 %v1226_v30, %v172_v55  ;;  %v240_v0 = vadd.f32 %v1226_v30, %v173_v56  ;;  %v133_v8 = vmul.f32 %v1214_v22, %v43_v62 }
  0x37   :  { %v330_v63 = vpack.c.bf16 %v278_v48, %v277_v47  ;;  %v291_v1 = vmax.f32 %v227_v58, 0.0  ;;  %v148_v11 = vmul.f32 %v1214_v22, %v58_v5  ;;  %v149_v12 = vmul.f32 %v1214_v22, %v59_v6 }
  0x38   :  { %v303_v3 = vmax.f32 %v239_v60, 0.0  ;;  %v304_v4 = vmax.f32 %v240_v0, 0.0  ;;  %v200_v14 = vadd.f32 %v1226_v30, %v133_v8  ;;  %v163_v26 = vmul.f32 %v1214_v22, %v73_v23  ;;  %v75_v60 = vld [vmem:[%s2358_s0 + $0x148] sm:$0xff] }
  0x39   :  { %v215_v15 = vadd.f32 %v1226_v30, %v148_v11  ;;  %v216_v16 = vadd.f32 %v1226_v30, %v149_v12  ;;  %v174_v28 = vmul.f32 %v1214_v22, %v84_v24  ;;  %v175_v29 = vmul.f32 %v1214_v22, %v85_v27  ;;  %v87_v0 = vld [vmem:[%s2358_s0 + $0x1a8] sm:$0xff] }
  0x3a   :  { %v343_v10 = vpack.c.bf16 %v304_v4, %v303_v3  ;;  %v264_v18 = vmax.f32 %v200_v14, 0.0  ;;  %v230_v33 = vadd.f32 %v1226_v30, %v163_v26  ;;  %v134_v45 = vmul.f32 %v1214_v22, %v44_v35  ;;  %v47_v8 = vld [vmem:[%s2358_s0 + $0x68] sm:$0xff]  ;;  %v88_v35 = vld [vmem:[%s2358_s0 + $0x1b0] sm:$0xff] }
  0x3b   :  { %v279_v19 = vmax.f32 %v215_v15, 0.0  ;;  %v280_v20 = vmax.f32 %v216_v16, 0.0  ;;  %v241_v34 = vadd.f32 %v1226_v30, %v174_v28  ;;  %v135_v46 = vmul.f32 %v1214_v22, %v45_v36  ;;  %v62_v15 = vld [vmem:[%s2358_s0 + $0xe0] sm:$0xff]  ;;  %v63_v16 = vld [vmem:[%s2358_s0 + $0xe8] sm:$0xff] }
  0x3c   :  { %1132 = vmatmul.msk.bf16.vlgmr.msra.gmra.mxu3 %vm359_vm3, %v343_v10  ;;  %v294_v40 = vmax.f32 %v230_v33, 0.0  ;;  %v150_v49 = vmul.f32 %v1214_v22, %v60_v43  ;;  %v151_v50 = vmul.f32 %v1214_v22, %v61_v44  ;;  %v201_v51 = vadd.f32 %v1226_v30, %v134_v45  ;;  %v76_v33 = vld [vmem:[%s2358_s0 + $0x150] sm:$0xff] }
  0x3d   :  { %1109 = vmatmul.msk.bf16.gmra.mxu0 %vm359_vm3, %v320_v61  ;;  %1117 = vmatmul.msk.bf16.gmra.mxu1 %vm359_vm3, %v328_v2  ;;  %v42_v61 = vld [vmem:[%s2358_s0 + $0x40] sm:$0xff]  ;;  %v292_v2 = vmax.f32 %v228_v59, 0.0  ;;  %v331_v37 = vpack.c.bf16 %v280_v20, %v279_v19  ;;  %v305_v41 = vmax.f32 %v241_v34, 0.0  ;;  %v202_v52 = vadd.f32 %v1226_v30, %v135_v46  ;;  %v77_v34 = vld [vmem:[%s2358_s0 + $0x158] sm:$0xff]  ;;  %v48_v45 = vld [vmem:[%s2358_s0 + $0x70] sm:$0xff] }
  0x3e   :  { %v132_v7 = vmul.f32 %v1214_v22, %v42_v61  ;;  %v217_v53 = vadd.f32 %v1226_v30, %v150_v49  ;;  %v218_v54 = vadd.f32 %v1226_v30, %v151_v50  ;;  %v265_v55 = vmax.f32 %v201_v51, 0.0  ;;  %v74_v59 = vld [vmem:[%s2358_s0 + $0x140] sm:$0xff]  ;;  %v49_v46 = vld [vmem:[%s2358_s0 + $0x78] sm:$0xff] }
  0x3f   :  { %v337_v9 = vpack.c.bf16 %v292_v2, %v291_v1  ;;  %v266_v56 = vmax.f32 %v202_v52, 0.0  ;;  %v86_v61 = vld [vmem:[%s2358_s0 + $0x1a0] sm:$0xff]  ;;  %v164_v62 = vmul.f32 %v1214_v22, %v74_v59  ;;  %v177_v2 = vmul.f32 %v1214_v22, %v87_v0 }
  0x40   :  { %v199_v13 = vadd.f32 %v1226_v30, %v132_v7  ;;  %v282_v58 = vmax.f32 %v218_v54, 0.0  ;;  %v176_v1 = vmul.f32 %v1214_v22, %v86_v61  ;;  %v46_v7 = vld [vmem:[%s2358_s0 + $0x60] sm:$0xff]  ;;  %v153_v23 = vmul.f32 %v1214_v22, %v63_v16  ;;  %v65_v54 = vld [vmem:[%s2358_s0 + $0xf8] sm:$0xff] }
  0x41   :  { %1125 = vmatmul.msk.bf16.gmra.mxu2 %vm359_vm3, %v336_v38  ;;  %v242_v38 = vadd.f32 %v1226_v30, %v175_v29  ;;  %v324_v3 = vpack.c.bf16 %v266_v56, %v265_v55  ;;  %v231_v4 = vadd.f32 %v1226_v30, %v164_v62  ;;  %v244_v10 = vadd.f32 %v1226_v30, %v177_v2 }
  0x42   :  { %v263_v17 = vmax.f32 %v199_v13, 0.0  ;;  %v243_v6 = vadd.f32 %v1226_v30, %v176_v1  ;;  %v220_v27 = vadd.f32 %v1226_v30, %v153_v23  ;;  %v166_v36 = vmul.f32 %v1214_v22, %v76_v33 }
  0x43   :  { %v306_v42 = vmax.f32 %v242_v38, 0.0  ;;  %v295_v11 = vmax.f32 %v231_v4, 0.0  ;;  %v308_v14 = vmax.f32 %v244_v10, 0.0  ;;  %v89_v38 = vld [vmem:[%s2358_s0 + $0x1b8] sm:$0xff]  ;;  %v138_v55 = vmul.f32 %v1214_v22, %v48_v45  ;;  %v91_v10 = vld [vmem:[%s2358_s0 + $0x1c8] sm:$0xff] }
  0x44   :  { %v307_v13 = vmax.f32 %v243_v6, 0.0  ;;  %v139_v56 = vmul.f32 %v1214_v22, %v49_v46  ;;  %v79_v6 = vld [vmem:[%s2358_s0 + $0x168] sm:$0xff] }
  0x45   :  { %v344_v48 = vpack.c.bf16 %v306_v42, %v305_v41  ;;  %v233_v42 = vadd.f32 %v1226_v30, %v166_v36  ;;  %v205_v61 = vadd.f32 %v1226_v30, %v138_v55 }
  0x46   :  { %v345_v20 = vpack.c.bf16 %v308_v14, %v307_v13  ;;  %v206_v62 = vadd.f32 %v1226_v30, %v139_v56 }
  0x47   :  { %v297_v49 = vmax.f32 %v233_v42, 0.0  ;;  %v269_v1 = vmax.f32 %v205_v61, 0.0  ;;  %v94_v61 = vld [vmem:[%s2358_s0 + $0x1e0] sm:$0xff] }
  0x48   :  { %v270_v2 = vmax.f32 %v206_v62, 0.0  ;;  %v95_v62 = vld [vmem:[%s2358_s0 + $0x1e8] sm:$0xff] }
  0x4a   :  { %v326_v13 = vpack.c.bf16 %v270_v2, %v269_v1 }
  0x4c   :  { %1133 = vmatmul.msk.bf16.gmra.mxu3 %vm359_vm3, %v344_v48 }
  0x4d   :  { %1110 = vmatmul.msk.bf16.gmra.mxu0 %vm359_vm3, %v321_v25  ;;  %1118 = vmatmul.msk.bf16.gmra.mxu1 %vm359_vm3, %v329_v31  ;;  %v162_v25 = vmul.f32 %v1214_v22, %v72_v21  ;;  %v323_v31 = vpack.c.bf16 %v264_v18, %v263_v17  ;;  %v136_v17 = vmul.f32 %v1214_v22, %v46_v7  ;;  %v90_v7 = vld [vmem:[%s2358_s0 + $0x1c0] sm:$0xff] }
  0x4e   :  { %v137_v18 = vmul.f32 %v1214_v22, %v47_v8  ;;  %v152_v21 = vmul.f32 %v1214_v22, %v62_v15 }
  0x4f   :  { %v229_v32 = vadd.f32 %v1226_v30, %v162_v25  ;;  %v203_v24 = vadd.f32 %v1226_v30, %v136_v17 }
  0x50   :  { %v204_v25 = vadd.f32 %v1226_v30, %v137_v18  ;;  %v219_v26 = vadd.f32 %v1226_v30, %v152_v21 }
  0x51   :  { %1126 = vmatmul.msk.bf16.gmra.mxu2 %vm359_vm3, %v337_v9  ;;  %v293_v39 = vmax.f32 %v229_v32, 0.0  ;;  %v267_v28 = vmax.f32 %v203_v24, 0.0  ;;  %v284_v32 = vmax.f32 %v220_v27, 0.0  ;;  %v81_v27 = vld [vmem:[%s2358_s0 + $0x178] sm:$0xff] }
  0x52   :  { %v268_v29 = vmax.f32 %v204_v25, 0.0 }
  0x53   :  { %v338_v47 = vpack.c.bf16 %v294_v40, %v293_v39  ;;  %v178_v39 = vmul.f32 %v1214_v22, %v88_v35  ;;  %v179_v40 = vmul.f32 %v1214_v22, %v89_v38 }
  0x54   :  { %v325_v41 = vpack.c.bf16 %v268_v29, %v267_v28  ;;  %v92_v28 = vld [vmem:[%s2358_s0 + $0x1d0] sm:$0xff] }
  0x55   :  { %v245_v44 = vadd.f32 %v1226_v30, %v178_v39  ;;  %v246_v48 = vadd.f32 %v1226_v30, %v179_v40  ;;  %v182_v33 = vmul.f32 %v1214_v22, %v92_v28 }
  0x57   :  { %v309_v51 = vmax.f32 %v245_v44, 0.0  ;;  %v310_v52 = vmax.f32 %v246_v48, 0.0 }
  0x5c   :  { %1134 = vmatmul.msk.bf16.gmra.mxu3 %vm359_vm3, %v345_v20 }
  0x5d   :  { %1111 = vmatmul.msk.bf16.gmra.mxu0 %vm359_vm3, %v322_v57  ;;  %1119 = vmatmul.msk.bf16.gmra.mxu1 %vm359_vm3, %v330_v63  ;;  %v281_v57 = vmax.f32 %v217_v53, 0.0  ;;  %v165_v63 = vmul.f32 %v1214_v22, %v75_v60  ;;  %v64_v53 = vld [vmem:[%s2358_s0 + $0xf0] sm:$0xff]  ;;  %v155_v60 = vmul.f32 %v1214_v22, %v65_v54 }
  0x5e   :  { %v154_v59 = vmul.f32 %v1214_v22, %v64_v53 }
  0x5f   :  { %v232_v5 = vadd.f32 %v1226_v30, %v165_v63  ;;  %v332_v9 = vpack.c.bf16 %v282_v58, %v281_v57  ;;  %v346_v58 = vpack.c.bf16 %v310_v52, %v309_v51  ;;  %v222_v0 = vadd.f32 %v1226_v30, %v155_v60 }
  0x60   :  { %v221_v63 = vadd.f32 %v1226_v30, %v154_v59 }
  0x61   :  { %1127 = vmatmul.msk.bf16.gmra.mxu2 %vm359_vm3, %v338_v47  ;;  %v296_v12 = vmax.f32 %v232_v5, 0.0  ;;  %v286_v4 = vmax.f32 %v222_v0, 0.0  ;;  %v78_v5 = vld [vmem:[%s2358_s0 + $0x160] sm:$0xff]  ;;  %v185_v0 = vmul.f32 %v1214_v22, %v95_v62 }
  0x62   :  { %v168_v8 = vmul.f32 %v1214_v22, %v78_v5 }
  0x63   :  { %v339_v19 = vpack.c.bf16 %v296_v12, %v295_v11  ;;  %v180_v11 = vmul.f32 %v1214_v22, %v90_v7  ;;  %v181_v12 = vmul.f32 %v1214_v22, %v91_v10  ;;  %v252_v2 = vadd.f32 %v1226_v30, %v185_v0 }
  0x64   :  { %v235_v14 = vadd.f32 %v1226_v30, %v168_v8 }
  0x65   :  { %v247_v16 = vadd.f32 %v1226_v30, %v180_v11  ;;  %v248_v18 = vadd.f32 %v1226_v30, %v181_v12  ;;  %v316_v12 = vmax.f32 %v252_v2, 0.0 }
  0x67   :  { %v311_v21 = vmax.f32 %v247_v16, 0.0  ;;  %v312_v23 = vmax.f32 %v248_v18, 0.0 }
  0x69   :  { %v347_v25 = vpack.c.bf16 %v312_v23, %v311_v21 }
  0x6c   :  { %1135 = vmatmul.msk.bf16.gmra.mxu3 %vm359_vm3, %v346_v58 }
  0x6d   :  { %1112 = vmatmul.msk.bf16.gmra.mxu0 %vm359_vm3, %v323_v31  ;;  %1120 = vmatmul.msk.bf16.gmra.mxu1 %vm359_vm3, %v331_v37  ;;  %v283_v31 = vmax.f32 %v219_v26, 0.0  ;;  %v167_v37 = vmul.f32 %v1214_v22, %v77_v34  ;;  %v80_v26 = vld [vmem:[%s2358_s0 + $0x170] sm:$0xff] }
  0x6e   :  { %v170_v29 = vmul.f32 %v1214_v22, %v80_v26  ;;  %v96_v26 = vld [vmem:[%s2358_s0 + $0x1f0] sm:$0xff] }
  0x6f   :  { %v234_v43 = vadd.f32 %v1226_v30, %v167_v37  ;;  %v333_v47 = vpack.c.bf16 %v284_v32, %v283_v31  ;;  %v171_v31 = vmul.f32 %v1214_v22, %v81_v27  ;;  %v93_v32 = vld [vmem:[%s2358_s0 + $0x1d8] sm:$0xff]  ;;  %v249_v37 = vadd.f32 %v1226_v30, %v182_v33 }
  0x70   :  { %v183_v34 = vmul.f32 %v1214_v22, %v93_v32  ;;  %v237_v35 = vadd.f32 %v1226_v30, %v170_v29  ;;  %v97_v27 = vld [vmem:[%s2358_s0 + $0x1f8] sm:$0xff]  ;;  %v186_v29 = vmul.f32 %v1214_v22, %v96_v26 }
  0x71   :  { %1128 = vmatmul.msk.bf16.gmra.mxu2 %vm359_vm3, %v339_v19  ;;  %v298_v50 = vmax.f32 %v234_v43, 0.0  ;;  %v299_v19 = vmax.f32 %v235_v14, 0.0  ;;  %v238_v36 = vadd.f32 %v1226_v30, %v171_v31  ;;  %v313_v45 = vmax.f32 %v249_v37, 0.0 }
  0x72   :  { %v250_v39 = vadd.f32 %v1226_v30, %v183_v34  ;;  %v301_v42 = vmax.f32 %v237_v35, 0.0  ;;  %v187_v31 = vmul.f32 %v1214_v22, %v97_v27  ;;  %v253_v32 = vadd.f32 %v1226_v30, %v186_v29 }
  0x73   :  { %v340_v57 = vpack.c.bf16 %v298_v50, %v297_v49  ;;  %v302_v44 = vmax.f32 %v238_v36, 0.0 }
  0x74   :  { %v314_v46 = vmax.f32 %v250_v39, 0.0  ;;  %v254_v35 = vadd.f32 %v1226_v30, %v187_v31 }
  0x76   :  { %v348_v48 = vpack.c.bf16 %v314_v46, %v313_v45  ;;  %v318_v45 = vmax.f32 %v254_v35, 0.0 }
  0x7c   :  { %1136 = vmatmul.msk.bf16.gmra.mxu3 %vm359_vm3, %v347_v25 }
  0x7d   :  { %1113 = vmatmul.msk.bf16.gmra.mxu0 %vm359_vm3, %v324_v3  ;;  %1121 = vmatmul.msk.bf16.gmra.mxu1 %vm359_vm3, %v332_v9  ;;  %v285_v3 = vmax.f32 %v221_v63, 0.0  ;;  %v169_v9 = vmul.f32 %v1214_v22, %v79_v6  ;;  %v184_v63 = vmul.f32 %v1214_v22, %v94_v61 }
  0x7f   :  { %v236_v15 = vadd.f32 %v1226_v30, %v169_v9  ;;  %v334_v17 = vpack.c.bf16 %v286_v4, %v285_v3  ;;  %v251_v1 = vadd.f32 %v1226_v30, %v184_v63 }
  0x81   :  { %1129 = vmatmul.msk.bf16.gmra.mxu2 %vm359_vm3, %v340_v57  ;;  %v300_v20 = vmax.f32 %v236_v15, 0.0  ;;  %v315_v8 = vmax.f32 %v251_v1, 0.0 }
  0x83   :  { %v341_v24 = vpack.c.bf16 %v300_v20, %v299_v19  ;;  %v349_v14 = vpack.c.bf16 %v316_v12, %v315_v8 }
  0x8c   :  { %1137 = vmatmul.msk.bf16.gmra.mxu3 %vm359_vm3, %v348_v48 }
  0x8d   :  { %1114 = vmatmul.msk.bf16.gmra.mxu0 %vm359_vm3, %v325_v41  ;;  %1122 = vmatmul.msk.bf16.gmra.mxu1 %vm359_vm3, %v333_v47  ;;  %v342_v47 = vpack.c.bf16 %v302_v44, %v301_v42 }
  0x91   :  { %1130 = vmatmul.msk.bf16.gmra.mxu2 %vm359_vm3, %v341_v24 }
  0x9c   :  { %1138 = vmatmul.msk.bf16.gmra.mxu3 %vm359_vm3, %v349_v14 }
  0x9d   :  { %1115 = vmatmul.msk.bf16.gmra.mxu0 %vm359_vm3, %v326_v13  ;;  %1123 = vmatmul.msk.bf16.gmra.mxu1 %vm359_vm3, %v334_v17 }
  0xa1   :  { %1131 = vmatmul.msk.bf16.gmra.mxu2 %vm359_vm3, %v342_v47 }
  0xaa   :  { %v465_v38 = vpop.f32.mrf.mxu0  ;;  %v1540_v41 = vpop.f32.mrf.mxu1 }
  0xab   :  { %v963_v40 = vpack.c.bf16 %v465_v38, %v465_v38  ;;  %v979_v43 = vpack.c.bf16 %v1540_v41, %v1540_v41  ;;  %v764_v49 = vmul.f32 %v465_v38, %v465_v38  ;;  %v627_v51 = vsel %vm626_vm5, %v465_v38, 0.0 }
  0xad   :  { %1028 = vst.msk [vmem:[%s2360_s6] sm:$0xf] %vm1027_vm4, %v963_v40  ;;  %v828_v58 = vsel %vm626_vm5, %v764_v49, 0.0 }
  0xae   :  { %1044 = vst.msk [vmem:[%s2360_s6 + $0x40] sm:$0xf] %vm1027_vm4, %v979_v43  ;;  %v317_v43 = vmax.f32 %v253_v32, 0.0 }
  0xb0   :  { %v350_v46 = vpack.c.bf16 %v318_v45, %v317_v43 }
  0xb2   :  { %v467_v50 = vpop.f32.mrf.mxu0  ;;  %v1556_v55 = vpop.f32.mrf.mxu1  ;;  %1139 = vmatmul.msk.bf16.gmra.mxu3 %vm359_vm3, %v350_v46 }
  0xb3   :  { %v628_v52 = vsel %vm626_vm5, %v467_v50, 0.0  ;;  %v765_v53 = vmul.f32 %v467_v50, %v467_v50  ;;  %v964_v54 = vpack.c.bf16 %v467_v50, %v467_v50  ;;  %v980_v57 = vpack.c.bf16 %v1556_v55, %v1556_v55 }
  0xb4   :  { %v629_v56 = vadd.f32 %v628_v52, %v627_v51  ;;  %v1595_v16 = vpop.f32.mrf.mxu2 }
  0xb5   :  { %v829_v59 = vsel %vm626_vm5, %v765_v53, 0.0  ;;  %1029 = vst.msk [vmem:[%s2360_s6 + $0x4] sm:$0xf] %vm1027_vm4, %v964_v54  ;;  %v995_v28 = vpack.c.bf16 %v1595_v16, %v1595_v16 }
  0xb6   :  { %v830_v60 = vadd.f32 %v829_v59, %v828_v58  ;;  %1045 = vst.msk [vmem:[%s2360_s6 + $0x44] sm:$0xf] %vm1027_vm4, %v980_v57 }
  0xb7   :  { %1060 = vst.msk [vmem:[%s2360_s6 + $0x80] sm:$0xf] %vm1027_vm4, %v995_v28 }
  0xba   :  { %v470_v3 = vpop.f32.mrf.mxu0  ;;  %v1581_v7 = vpop.f32.mrf.mxu1 }
  0xbb   :  { %v630_v4 = vsel %vm626_vm5, %v470_v3, 0.0  ;;  %v766_v5 = vmul.f32 %v470_v3, %v470_v3  ;;  %v965_v6 = vpack.c.bf16 %v470_v3, %v470_v3  ;;  %v981_v10 = vpack.c.bf16 %v1581_v7, %v1581_v7 }
  0xbc   :  { %v631_v9 = vadd.f32 %v630_v4, %v629_v56  ;;  %v1626_v34 = vpop.f32.mrf.mxu2 }
  0xbd   :  { %v831_v11 = vsel %vm626_vm5, %v766_v5, 0.0  ;;  %1030 = vst.msk [vmem:[%s2360_s6 + $0x8] sm:$0xf] %vm1027_vm4, %v965_v6  ;;  %v996_v30 = vpack.c.bf16 %v1626_v34, %v1626_v34 }
  0xbe   :  { %v832_v13 = vadd.f32 %v831_v11, %v830_v60  ;;  %1046 = vst.msk [vmem:[%s2360_s6 + $0x48] sm:$0xf] %vm1027_vm4, %v981_v10 }
  0xbf   :  { %1061 = vst.msk [vmem:[%s2360_s6 + $0x84] sm:$0xf] %vm1027_vm4, %v996_v30  ;;  %v1710_v0 = vpop.f32.mrf.mxu3 }
  0xc0   :  { %v1011_v3 = vpack.c.bf16 %v1710_v0, %v1710_v0 }
  0xc2   :  { %v472_v15 = vpop.f32.mrf.mxu0  ;;  %v1598_v20 = vpop.f32.mrf.mxu1  ;;  %1076 = vst.msk [vmem:[%s2360_s6 + $0xc0] sm:$0xf] %vm1027_vm4, %v1011_v3 }
  0xc3   :  { %v632_v17 = vsel %vm626_vm5, %v472_v15, 0.0  ;;  %v767_v18 = vmul.f32 %v472_v15, %v472_v15  ;;  %v966_v19 = vpack.c.bf16 %v472_v15, %v472_v15  ;;  %v982_v23 = vpack.c.bf16 %v1598_v20, %v1598_v20 }
  0xc4   :  { %v633_v21 = vadd.f32 %v632_v17, %v631_v9  ;;  %v1656_v48 = vpop.f32.mrf.mxu2 }
  0xc5   :  { %v833_v24 = vsel %vm626_vm5, %v767_v18, 0.0  ;;  %1031 = vst.msk [vmem:[%s2360_s6 + $0xc] sm:$0xf] %vm1027_vm4, %v966_v19  ;;  %v997_v52 = vpack.c.bf16 %v1656_v48, %v1656_v48 }
  0xc6   :  { %v834_v25 = vadd.f32 %v833_v24, %v832_v13  ;;  %1047 = vst.msk [vmem:[%s2360_s6 + $0x4c] sm:$0xf] %vm1027_vm4, %v982_v23 }
  0xc7   :  { %1062 = vst.msk [vmem:[%s2360_s6 + $0x88] sm:$0xf] %vm1027_vm4, %v997_v52  ;;  %v1742_v9 = vpop.f32.mrf.mxu3 }
  0xc8   :  { %v1012_v12 = vpack.c.bf16 %v1742_v9, %v1742_v9 }
  0xca   :  { %v475_v33 = vpop.f32.mrf.mxu0  ;;  %v1630_v39 = vpop.f32.mrf.mxu1  ;;  %1077 = vst.msk [vmem:[%s2360_s6 + $0xc4] sm:$0xf] %vm1027_vm4, %v1012_v12 }
  0xcb   :  { %v634_v36 = vsel %vm626_vm5, %v475_v33, 0.0  ;;  %v768_v37 = vmul.f32 %v475_v33, %v475_v33  ;;  %v967_v38 = vpack.c.bf16 %v475_v33, %v475_v33  ;;  %v983_v22 = vpack.c.bf16 %v1630_v39, %v1630_v39 }
  0xcc   :  { %v1632_v40 = vadd.f32 %v634_v36, %v633_v21  ;;  %v1680_v54 = vpop.f32.mrf.mxu2 }
  0xcd   :  { %v835_v42 = vsel %vm626_vm5, %v768_v37, 0.0  ;;  %1032 = vst.msk [vmem:[%s2360_s6 + $0x10] sm:$0xf] %vm1027_vm4, %v967_v38  ;;  %v998_v59 = vpack.c.bf16 %v1680_v54, %v1680_v54 }
  0xce   :  { %v1643_v44 = vadd.f32 %v835_v42, %v834_v25  ;;  %1048 = vst.msk [vmem:[%s2360_s6 + $0x50] sm:$0xf] %vm1027_vm4, %v983_v22 }
  0xcf   :  { %1063 = vst.msk [vmem:[%s2360_s6 + $0x8c] sm:$0xf] %vm1027_vm4, %v998_v59  ;;  %v1774_v18 = vpop.f32.mrf.mxu3 }
  0xd0   :  { %v1013_v23 = vpack.c.bf16 %v1774_v18, %v1774_v18 }
  0xd2   :  { %v1653_v47 = vpop.f32.mrf.mxu0  ;;  %v1660_v50 = vpop.f32.mrf.mxu1  ;;  %1078 = vst.msk [vmem:[%s2360_s6 + $0xc8] sm:$0xf] %vm1027_vm4, %v1013_v23 }
  0xd3   :  { %v968_v49 = vpack.c.bf16 %v1653_v47, %v1653_v47  ;;  %v984_v51 = vpack.c.bf16 %v1660_v50, %v1660_v50  ;;  %v769_v43 = vmul.f32 %v1653_v47, %v1653_v47  ;;  %v636_v52 = vsel %vm626_vm5, %v1653_v47, 0.0 }
  0xd4   :  { %v1704_v61 = vpop.f32.mrf.mxu2  ;;  %v637_v3 = vadd.f32 %v636_v52, %v1632_v40 }
  0xd5   :  { %1033 = vst.msk [vmem:[%s2360_s6 + $0x14] sm:$0xf] %vm1027_vm4, %v968_v49  ;;  %v999_v2 = vpack.c.bf16 %v1704_v61, %v1704_v61  ;;  %v837_v47 = vsel %vm626_vm5, %v769_v43, 0.0 }
  0xd6   :  { %1049 = vst.msk [vmem:[%s2360_s6 + $0x54] sm:$0xf] %vm1027_vm4, %v984_v51  ;;  %v838_v40 = vadd.f32 %v837_v47, %v1643_v44 }
  0xd7   :  { %1064 = vst.msk [vmem:[%s2360_s6 + $0x90] sm:$0xf] %vm1027_vm4, %v999_v2  ;;  %v1806_v28 = vpop.f32.mrf.mxu3 }
  0xd8   :  { %v1014_v32 = vpack.c.bf16 %v1806_v28, %v1806_v28 }
  0xda   :  { %v1678_v53 = vpop.f32.mrf.mxu0  ;;  %v1684_v57 = vpop.f32.mrf.mxu1  ;;  %1079 = vst.msk [vmem:[%s2360_s6 + $0xcc] sm:$0xf] %vm1027_vm4, %v1014_v32 }
  0xdb   :  { %v969_v56 = vpack.c.bf16 %v1678_v53, %v1678_v53  ;;  %v985_v58 = vpack.c.bf16 %v1684_v57, %v1684_v57 }
  0xdc   :  { %v1736_v5 = vpop.f32.mrf.mxu2 }
  0xdd   :  { %1034 = vst.msk [vmem:[%s2360_s6 + $0x18] sm:$0xf] %vm1027_vm4, %v969_v56  ;;  %v1000_v11 = vpack.c.bf16 %v1736_v5, %v1736_v5  ;;  %v770_v56 = vmul.f32 %v1678_v53, %v1678_v53 }
  0xde   :  { %1050 = vst.msk [vmem:[%s2360_s6 + $0x58] sm:$0xf] %vm1027_vm4, %v985_v58 }
  0xdf   :  { %1065 = vst.msk [vmem:[%s2360_s6 + $0x94] sm:$0xf] %vm1027_vm4, %v1000_v11  ;;  %v1834_v38 = vpop.f32.mrf.mxu3 }
  0xe0   :  { %v1015_v59 = vpack.c.bf16 %v1834_v38, %v1834_v38 }
  0xe2   :  { %v1702_v60 = vpop.f32.mrf.mxu0  ;;  %v1708_v63 = vpop.f32.mrf.mxu1  ;;  %1080 = vst.msk [vmem:[%s2360_s6 + $0xd0] sm:$0xf] %vm1027_vm4, %v1015_v59 }
  0xe3   :  { %v970_v62 = vpack.c.bf16 %v1702_v60, %v1702_v60  ;;  %v986_v1 = vpack.c.bf16 %v1708_v63, %v1708_v63 }
  0xe4   :  { %v1768_v14 = vpop.f32.mrf.mxu2 }
  0xe5   :  { %1035 = vst.msk [vmem:[%s2360_s6 + $0x1c] sm:$0xf] %vm1027_vm4, %v970_v62  ;;  %v1001_v21 = vpack.c.bf16 %v1768_v14, %v1768_v14  ;;  %v638_v62 = vsel %vm626_vm5, %v1678_v53, 0.0 }
  0xe6   :  { %1051 = vst.msk [vmem:[%s2360_s6 + $0x5c] sm:$0xf] %vm1027_vm4, %v986_v1  ;;  %v771_v1 = vmul.f32 %v1702_v60, %v1702_v60  ;;  %v639_v12 = vadd.f32 %v638_v62, %v637_v3 }
  0xe7   :  { %1066 = vst.msk [vmem:[%s2360_s6 + $0x98] sm:$0xf] %vm1027_vm4, %v1001_v21  ;;  %v1852_v49 = vpop.f32.mrf.mxu3 }
  0xe8   :  { %v1016_v53 = vpack.c.bf16 %v1852_v49, %v1852_v49 }
  0xea   :  { %v1730_v4 = vpop.f32.mrf.mxu0  ;;  %v1740_v8 = vpop.f32.mrf.mxu1  ;;  %1081 = vst.msk [vmem:[%s2360_s6 + $0xd4] sm:$0xf] %vm1027_vm4, %v1016_v53 }
  0xeb   :  { %v971_v6 = vpack.c.bf16 %v1730_v4, %v1730_v4  ;;  %v987_v10 = vpack.c.bf16 %v1740_v8, %v1740_v8  ;;  %v772_v11 = vmul.f32 %v1730_v4, %v1730_v4  ;;  %v642_v21 = vsel %vm626_vm5, %v1730_v4, 0.0 }
  0xec   :  { %v1800_v25 = vpop.f32.mrf.mxu2 }
  0xed   :  { %1036 = vst.msk [vmem:[%s2360_s6 + $0x20] sm:$0xf] %vm1027_vm4, %v971_v6  ;;  %v1002_v31 = vpack.c.bf16 %v1800_v25, %v1800_v25  ;;  %v839_v6 = vsel %vm626_vm5, %v770_v56, 0.0 }
  0xee   :  { %1052 = vst.msk [vmem:[%s2360_s6 + $0x60] sm:$0xf] %vm1027_vm4, %v987_v10  ;;  %v640_v10 = vsel %vm626_vm5, %v1702_v60, 0.0  ;;  %v841_v60 = vsel %vm626_vm5, %v771_v1, 0.0 }
  0xef   :  { %1067 = vst.msk [vmem:[%s2360_s6 + $0x9c] sm:$0xf] %vm1027_vm4, %v1002_v31  ;;  %v1913_v44 = vpop.f32.mrf.mxu3  ;;  %v840_v31 = vadd.f32 %v839_v6, %v838_v40  ;;  %v641_v32 = vadd.f32 %v640_v10, %v639_v12 }
  0xf2   :  { %v1766_v13 = vpop.f32.mrf.mxu0  ;;  %v1772_v17 = vpop.f32.mrf.mxu1 }
  0xf3   :  { %v972_v15 = vpack.c.bf16 %v1766_v13, %v1766_v13  ;;  %v988_v19 = vpack.c.bf16 %v1772_v17, %v1772_v17  ;;  %v773_v23 = vmul.f32 %v1766_v13, %v1766_v13  ;;  %v644_v43 = vsel %vm626_vm5, %v1766_v13, 0.0 }
  0xf4   :  { %v1830_v35 = vpop.f32.mrf.mxu2 }
  0xf5   :  { %1037 = vst.msk [vmem:[%s2360_s6 + $0x24] sm:$0xf] %vm1027_vm4, %v972_v15  ;;  %v1003_v58 = vpack.c.bf16 %v1830_v35, %v1830_v35  ;;  %v845_v52 = vsel %vm626_vm5, %v773_v23, 0.0 }
  0xf6   :  { %1053 = vst.msk [vmem:[%s2360_s6 + $0x64] sm:$0xf] %vm1027_vm4, %v988_v19 }
  0xf7   :  { %1068 = vst.msk [vmem:[%s2360_s6 + $0xa0] sm:$0xf] %vm1027_vm4, %v1003_v58 }
  0xfa   :  { %v1794_v24 = vpop.f32.mrf.mxu0  ;;  %v1804_v27 = vpop.f32.mrf.mxu1 }
  0xfb   :  { %v973_v26 = vpack.c.bf16 %v1794_v24, %v1794_v24  ;;  %v989_v29 = vpack.c.bf16 %v1804_v27, %v1804_v27  ;;  %v774_v4 = vmul.f32 %v1794_v24, %v1794_v24  ;;  %v646_v13 = vsel %vm626_vm5, %v1794_v24, 0.0 }
  0xfc   :  { %v1846_v30 = vpop.f32.mrf.mxu2 }
  0xfd   :  { %1038 = vst.msk [vmem:[%s2360_s6 + $0x28] sm:$0xf] %vm1027_vm4, %v973_v26  ;;  %v1004_v2 = vpack.c.bf16 %v1846_v30, %v1846_v30  ;;  %v847_v47 = vsel %vm626_vm5, %v774_v4, 0.0 }
  0xfe   :  { %1054 = vst.msk [vmem:[%s2360_s6 + $0x68] sm:$0xf] %vm1027_vm4, %v989_v29 }
  0xff   :  { %1069 = vst.msk [vmem:[%s2360_s6 + $0xa4] sm:$0xf] %vm1027_vm4, %v1004_v2 }
 0x102   :  { %v492_v33 = vpop.f32.mrf.mxu0  ;;  %v1832_v37 = vpop.f32.mrf.mxu1 }
 0x103   :  { %v974_v36 = vpack.c.bf16 %v492_v33, %v492_v33  ;;  %v990_v22 = vpack.c.bf16 %v1832_v37, %v1832_v37  ;;  %v775_v56 = vmul.f32 %v492_v33, %v492_v33  ;;  %v648_v62 = vsel %vm626_vm5, %v492_v33, 0.0 }
 0x104   :  { %v1904_v19 = vpop.f32.mrf.mxu2 }
 0x105   :  { %1039 = vst.msk [vmem:[%s2360_s6 + $0x2c] sm:$0xf] %vm1027_vm4, %v974_v36  ;;  %v849_v10 = vsel %vm626_vm5, %v775_v56, 0.0 }
 0x106   :  { %1055 = vst.msk [vmem:[%s2360_s6 + $0x6c] sm:$0xf] %vm1027_vm4, %v990_v22  ;;  %v843_v22 = vsel %vm626_vm5, %v772_v11, 0.0 }
 0x10a   :  { %v495_v42 = vpop.f32.mrf.mxu0  ;;  %v1850_v46 = vpop.f32.mrf.mxu1 }
 0x10b   :  { %v975_v45 = vpack.c.bf16 %v495_v42, %v495_v42  ;;  %v991_v51 = vpack.c.bf16 %v1850_v46, %v1850_v46  ;;  %v776_v1 = vmul.f32 %v495_v42, %v495_v42  ;;  %v650_v11 = vsel %vm626_vm5, %v495_v42, 0.0 }
 0x10c   :  { %v1935_v6 = vpop.f32.mrf.mxu2  ;;  %v1005_v42 = vpack.c.bf16 %v1904_v19, %v1904_v19 }
 0x10d   :  { %1040 = vst.msk [vmem:[%s2360_s6 + $0x30] sm:$0xf] %vm1027_vm4, %v975_v45  ;;  %v842_v45 = vadd.f32 %v841_v60, %v840_v31  ;;  %v1941_v60 = vpop.f32.mrf.mxu3 }
 0x10e   :  { %1056 = vst.msk [vmem:[%s2360_s6 + $0x70] sm:$0xf] %vm1027_vm4, %v991_v51  ;;  %v643_v51 = vadd.f32 %v642_v21, %v641_v32 }
 0x10f   :  { %v844_v58 = vadd.f32 %v843_v22, %v842_v45  ;;  %1070 = vst.msk [vmem:[%s2360_s6 + $0xa8] sm:$0xf] %vm1027_vm4, %v1005_v42  ;;  %v1006_v45 = vpack.c.bf16 %v1935_v6, %v1935_v6 }
 0x110   :  { %v645_v59 = vadd.f32 %v644_v43, %v643_v51  ;;  %v1017_v43 = vpack.c.bf16 %v1913_v44, %v1913_v44 }
 0x111   :  { %v846_v2 = vadd.f32 %v845_v52, %v844_v58  ;;  %1071 = vst.msk [vmem:[%s2360_s6 + $0xac] sm:$0xf] %vm1027_vm4, %v1006_v45  ;;  %v783_v45 = vmul.f32 %v1598_v20, %v1598_v20 }
 0x112   :  { %v497_v15 = vpop.f32.mrf.mxu0  ;;  %v1911_v29 = vpop.f32.mrf.mxu1  ;;  %v647_v3 = vadd.f32 %v646_v13, %v645_v59  ;;  %1082 = vst.msk [vmem:[%s2360_s6 + $0xd8] sm:$0xf] %vm1027_vm4, %v1017_v43  ;;  %v1018_v13 = vpack.c.bf16 %v1941_v60, %v1941_v60 }
 0x113   :  { %v976_v26 = vpack.c.bf16 %v497_v15, %v497_v15  ;;  %v992_v36 = vpack.c.bf16 %v1911_v29, %v1911_v29  ;;  %v777_v40 = vmul.f32 %v497_v15, %v497_v15  ;;  %v848_v21 = vadd.f32 %v847_v47, %v846_v2 }
 0x114   :  { %v649_v23 = vadd.f32 %v648_v62, %v647_v3  ;;  %v652_v31 = vsel %vm626_vm5, %v497_v15, 0.0  ;;  %1083 = vst.msk [vmem:[%s2360_s6 + $0xdc] sm:$0xf] %vm1027_vm4, %v1018_v13  ;;  %v1982_v62 = vpop.f32.mrf.mxu2 }
 0x115   :  { %1041 = vst.msk [vmem:[%s2360_s6 + $0x34] sm:$0xf] %vm1027_vm4, %v976_v26  ;;  %v851_v26 = vsel %vm626_vm5, %v776_v1, 0.0  ;;  %v853_v15 = vsel %vm626_vm5, %v777_v40, 0.0  ;;  %v780_v1 = vmul.f32 %v1540_v41, %v1540_v41 }
 0x116   :  { %1057 = vst.msk [vmem:[%s2360_s6 + $0x74] sm:$0xf] %vm1027_vm4, %v992_v36  ;;  %v850_v36 = vadd.f32 %v849_v10, %v848_v21  ;;  %v651_v22 = vadd.f32 %v650_v11, %v649_v23  ;;  %v1989_v11 = vpop.f32.mrf.mxu3  ;;  %v658_v23 = vsel %vm626_vm5, %v1540_v41, 0.0  ;;  %v660_v41 = vsel %vm626_vm5, %v1556_v55, 0.0 }
 0x117   :  { %v859_v42 = vsel %vm626_vm5, %v780_v1, 0.0 }
 0x118   :  { %v852_v51 = vadd.f32 %v851_v26, %v850_v36  ;;  %v653_v52 = vadd.f32 %v652_v31, %v651_v22  ;;  %v782_v36 = vmul.f32 %v1581_v7, %v1581_v7 }
 0x11a   :  { %v500_v53 = vpop.f32.mrf.mxu0  ;;  %v1939_v24 = vpop.f32.mrf.mxu1  ;;  %v854_v58 = vadd.f32 %v853_v15, %v852_v51 }
 0x11b   :  { %v977_v12 = vpack.c.bf16 %v500_v53, %v500_v53  ;;  %v993_v33 = vpack.c.bf16 %v1939_v24, %v1939_v24  ;;  %v778_v32 = vmul.f32 %v500_v53, %v500_v53  ;;  %v654_v4 = vsel %vm626_vm5, %v500_v53, 0.0 }
 0x11c   :  { %v655_v59 = vadd.f32 %v654_v4, %v653_v52  ;;  %v662_v4 = vsel %vm626_vm5, %v1581_v7, 0.0  ;;  %v2016_v13 = vpop.f32.mrf.mxu2 }
 0x11d   :  { %1042 = vst.msk [vmem:[%s2360_s6 + $0x38] sm:$0xf] %vm1027_vm4, %v977_v12  ;;  %v855_v56 = vsel %vm626_vm5, %v778_v32, 0.0 }
 0x11e   :  { %1058 = vst.msk [vmem:[%s2360_s6 + $0x78] sm:$0xf] %vm1027_vm4, %v993_v33  ;;  %v856_v40 = vadd.f32 %v855_v56, %v854_v58  ;;  %v781_v33 = vmul.f32 %v1556_v55, %v1556_v55  ;;  %v863_v56 = vsel %vm626_vm5, %v782_v36, 0.0  ;;  %v664_v55 = vsel %vm626_vm5, %v1598_v20, 0.0 }
 0x11f   :  { %v784_v58 = vmul.f32 %v1630_v39, %v1630_v39  ;;  %v785_v20 = vmul.f32 %v1660_v50, %v1660_v50 }
 0x120   :  { %v861_v15 = vsel %vm626_vm5, %v781_v33, 0.0  ;;  %v786_v33 = vmul.f32 %v1684_v57, %v1684_v57 }
 0x122   :  { %v502_v47 = vpop.f32.mrf.mxu0  ;;  %v1987_v10 = vpop.f32.mrf.mxu1 }
 0x123   :  { %v656_v2 = vsel %vm626_vm5, %v502_v47, 0.0  ;;  %v779_v3 = vmul.f32 %v502_v47, %v502_v47  ;;  %v978_v53 = vpack.c.bf16 %v502_v47, %v502_v47  ;;  %v994_v21 = vpack.c.bf16 %v1987_v10, %v1987_v10  ;;  %v2025_v47 = vpop.f32.mrf.mxu3 }
 0x124   :  { %v657_v12 = vadd.f32 %v656_v2, %v655_v59  ;;  %v1007_v59 = vpack.c.bf16 %v1982_v62, %v1982_v62  ;;  %v1019_v2 = vpack.c.bf16 %v1989_v11, %v1989_v11 }
 0x125   :  { %v857_v26 = vsel %vm626_vm5, %v779_v3, 0.0  ;;  %1043 = vst.msk [vmem:[%s2360_s6 + $0x3c] sm:$0xf] %vm1027_vm4, %v978_v53  ;;  %v865_v3 = vsel %vm626_vm5, %v783_v45, 0.0  ;;  %v666_v53 = vsel %vm626_vm5, %v1630_v39, 0.0  ;;  %v867_v39 = vsel %vm626_vm5, %v784_v58, 0.0  ;;  %v2069_v45 = vpop.f32.mrf.mxu2 }
 0x126   :  { %v659_v31 = vadd.f32 %v658_v23, %v657_v12  ;;  %v858_v32 = vadd.f32 %v857_v26, %v856_v40  ;;  %1059 = vst.msk [vmem:[%s2360_s6 + $0x7c] sm:$0xf] %vm1027_vm4, %v994_v21  ;;  %v1008_v40 = vpack.c.bf16 %v2016_v13, %v2016_v13  ;;  %v668_v23 = vsel %vm626_vm5, %v1660_v50, 0.0 }
 0x127   :  { %1072 = vst.msk [vmem:[%s2360_s6 + $0xb0] sm:$0xf] %vm1027_vm4, %v1007_v59  ;;  %v1020_v26 = vpack.c.bf16 %v2025_v47, %v2025_v47  ;;  %v787_v50 = vmul.f32 %v1708_v63, %v1708_v63  ;;  %v789_v58 = vmul.f32 %v1772_v17, %v1772_v17 }
 0x128   :  { %v661_v22 = vadd.f32 %v660_v41, %v659_v31  ;;  %v860_v43 = vadd.f32 %v859_v42, %v858_v32  ;;  %1084 = vst.msk [vmem:[%s2360_s6 + $0xe0] sm:$0xf] %vm1027_vm4, %v1019_v2  ;;  %v869_v42 = vsel %vm626_vm5, %v785_v20, 0.0  ;;  %v670_v41 = vsel %vm626_vm5, %v1684_v57, 0.0 }
 0x129   :  { %1073 = vst.msk [vmem:[%s2360_s6 + $0xb4] sm:$0xf] %vm1027_vm4, %v1008_v40  ;;  %v790_v2 = vmul.f32 %v1804_v27, %v1804_v27  ;;  %v877_v20 = vsel %vm626_vm5, %v789_v58, 0.0  ;;  %v791_v40 = vmul.f32 %v1832_v37, %v1832_v37  ;;  %v686_v58 = vsel %vm626_vm5, %v1939_v24, 0.0 }
 0x12a   :  { %v663_v51 = vadd.f32 %v662_v4, %v661_v22  ;;  %v862_v52 = vadd.f32 %v861_v15, %v860_v43  ;;  %1085 = vst.msk [vmem:[%s2360_s6 + $0xe4] sm:$0xf] %vm1027_vm4, %v1020_v26  ;;  %v871_v43 = vsel %vm626_vm5, %v786_v33, 0.0  ;;  %v672_v15 = vsel %vm626_vm5, %v1708_v63, 0.0 }
 0x12b   :  { %v788_v4 = vmul.f32 %v1740_v8, %v1740_v8  ;;  %v1009_v33 = vpack.c.bf16 %v2069_v45, %v2069_v45 }
 0x12c   :  { %v665_v7 = vadd.f32 %v664_v55, %v663_v51  ;;  %v864_v1 = vadd.f32 %v863_v56, %v862_v52  ;;  %v2071_v52 = vpop.f32.mrf.mxu3  ;;  %v873_v56 = vsel %vm626_vm5, %v787_v50, 0.0  ;;  %v674_v55 = vsel %vm626_vm5, %v1740_v8, 0.0 }
 0x12d   :  { %v875_v63 = vsel %vm626_vm5, %v788_v4, 0.0  ;;  %v678_v8 = vsel %vm626_vm5, %v1804_v27, 0.0  ;;  %v2095_v26 = vpop.f32.mrf.mxu2  ;;  %v793_v50 = vmul.f32 %v1911_v29, %v1911_v29  ;;  %1074 = vst.msk [vmem:[%s2360_s6 + $0xb8] sm:$0xf] %vm1027_vm4, %v1009_v33  ;;  %v794_v4 = vmul.f32 %v1939_v24, %v1939_v24 }
 0x12e   :  { %v667_v12 = vadd.f32 %v666_v53, %v665_v7  ;;  %v866_v21 = vadd.f32 %v865_v3, %v864_v1  ;;  %v676_v1 = vsel %vm626_vm5, %v1772_v17, 0.0  ;;  %v680_v17 = vsel %vm626_vm5, %v1832_v37, 0.0 }
 0x12f   :  { %v682_v37 = vsel %vm626_vm5, %v1850_v46, 0.0 }
 0x130   :  { %v669_v31 = vadd.f32 %v668_v23, %v667_v12  ;;  %v868_v32 = vadd.f32 %v867_v39, %v866_v21  ;;  %v879_v39 = vsel %vm626_vm5, %v790_v2, 0.0  ;;  %v792_v23 = vmul.f32 %v1850_v46, %v1850_v46 }
 0x131   :  { %v688_v2 = vsel %vm626_vm5, %v1987_v10, 0.0 }
 0x132   :  { %v870_v36 = vadd.f32 %v869_v42, %v868_v32  ;;  %v671_v22 = vadd.f32 %v670_v41, %v669_v31  ;;  %v1021_v32 = vpack.c.bf16 %v2071_v52, %v2071_v52  ;;  %v881_v41 = vsel %vm626_vm5, %v791_v40, 0.0 }
 0x133   :  { %v883_v46 = vsel %vm626_vm5, %v792_v23, 0.0 }
 0x134   :  { %v673_v57 = vadd.f32 %v672_v15, %v671_v22  ;;  %v872_v51 = vadd.f32 %v871_v43, %v870_v36  ;;  %v2099_v42 = vpop.f32.mrf.mxu3  ;;  %v1010_v36 = vpack.c.bf16 %v2095_v26, %v2095_v26  ;;  %1086 = vst.msk [vmem:[%s2360_s6 + $0xe8] sm:$0xf] %vm1027_vm4, %v1021_v32  ;;  %v684_v15 = vsel %vm626_vm5, %v1911_v29, 0.0 }
 0x135   :  { %v795_v29 = vmul.f32 %v1987_v10, %v1987_v10  ;;  %v798_v10 = vmul.f32 %v1656_v48, %v1656_v48 }
 0x136   :  { %v675_v59 = vadd.f32 %v674_v55, %v673_v57  ;;  %v874_v7 = vadd.f32 %v873_v56, %v872_v51  ;;  %1075 = vst.msk [vmem:[%s2360_s6 + $0xbc] sm:$0xf] %vm1027_vm4, %v1010_v36  ;;  %v1022_v57 = vpack.c.bf16 %v2099_v42, %v2099_v42  ;;  %v885_v55 = vsel %vm626_vm5, %v793_v50, 0.0 }
 0x137   :  { %v889_v40 = vsel %vm626_vm5, %v795_v29, 0.0  ;;  %v800_v50 = vmul.f32 %v1704_v61, %v1704_v61 }
 0x138   :  { %v677_v3 = vadd.f32 %v676_v1, %v675_v59  ;;  %v876_v53 = vadd.f32 %v875_v63, %v874_v7  ;;  %1087 = vst.msk [vmem:[%s2360_s6 + $0xec] sm:$0xf] %vm1027_vm4, %v1022_v57  ;;  %v796_v63 = vmul.f32 %v1595_v16, %v1595_v16  ;;  %v887_v1 = vsel %vm626_vm5, %v794_v4, 0.0 }
 0x139   :  { %v801_v4 = vmul.f32 %v1736_v5, %v1736_v5 }
 0x13a   :  { %v679_v12 = vadd.f32 %v678_v8, %v677_v3  ;;  %v878_v21 = vadd.f32 %v877_v20, %v876_v53  ;;  %v690_v20 = vsel %vm626_vm5, %v1595_v16, 0.0  ;;  %v797_v8 = vmul.f32 %v1626_v34, %v1626_v34 }
 0x13b   :  { %v694_v16 = vsel %vm626_vm5, %v1656_v48, 0.0 }
 0x13c   :  { %v681_v31 = vadd.f32 %v680_v17, %v679_v12  ;;  %v880_v27 = vadd.f32 %v879_v39, %v878_v21  ;;  %v2141_v53 = vpop.f32.mrf.mxu3  ;;  %v891_v39 = vsel %vm626_vm5, %v796_v63, 0.0  ;;  %v692_v17 = vsel %vm626_vm5, %v1626_v34, 0.0 }
 0x13d   :  { %v696_v34 = vsel %vm626_vm5, %v1680_v54, 0.0  ;;  %v1023_v36 = vpack.c.bf16 %v2141_v53, %v2141_v53  ;;  %v803_v63 = vmul.f32 %v1800_v25, %v1800_v25 }
 0x13e   :  { %v683_v22 = vadd.f32 %v682_v37, %v681_v31  ;;  %v882_v43 = vadd.f32 %v881_v41, %v880_v27  ;;  %v893_v31 = vsel %vm626_vm5, %v797_v8, 0.0  ;;  %v799_v27 = vmul.f32 %v1680_v54, %v1680_v54 }
 0x13f   :  { %v895_v37 = vsel %vm626_vm5, %v798_v10, 0.0  ;;  %1088 = vst.msk [vmem:[%s2360_s6 + $0xf0] sm:$0xf] %vm1027_vm4, %v1023_v36 }
 0x140   :  { %v884_v51 = vadd.f32 %v883_v46, %v882_v43  ;;  %v685_v56 = vadd.f32 %v684_v15, %v683_v22  ;;  %v897_v48 = vsel %vm626_vm5, %v799_v27, 0.0  ;;  %v698_v15 = vsel %vm626_vm5, %v1704_v61, 0.0 }
 0x141   :  { %v802_v61 = vmul.f32 %v1768_v14, %v1768_v14  ;;  %v807_v27 = vmul.f32 %v1935_v6, %v1935_v6 }
 0x142   :  { %v886_v59 = vadd.f32 %v885_v55, %v884_v51  ;;  %v687_v7 = vadd.f32 %v686_v58, %v685_v56  ;;  %v899_v56 = vsel %vm626_vm5, %v800_v50, 0.0  ;;  %v700_v55 = vsel %vm626_vm5, %v1736_v5, 0.0 }
 0x144   :  { %v888_v3 = vadd.f32 %v887_v1, %v886_v59  ;;  %v689_v24 = vadd.f32 %v688_v2, %v687_v7  ;;  %v2165_v46 = vpop.f32.mrf.mxu3  ;;  %v901_v59 = vsel %vm626_vm5, %v801_v4, 0.0  ;;  %v702_v7 = vsel %vm626_vm5, %v1768_v14, 0.0 }
 0x145   :  { %v1024_v54 = vpack.c.bf16 %v2165_v46, %v2165_v46  ;;  %v903_v2 = vsel %vm626_vm5, %v802_v61, 0.0  ;;  %v706_v14 = vsel %vm626_vm5, %v1830_v35, 0.0 }
 0x146   :  { %v691_v12 = vadd.f32 %v690_v20, %v689_v24  ;;  %v890_v21 = vadd.f32 %v889_v40, %v888_v3  ;;  %v704_v3 = vsel %vm626_vm5, %v1800_v25, 0.0  ;;  %v804_v24 = vmul.f32 %v1830_v35, %v1830_v35 }
 0x147   :  { %1089 = vst.msk [vmem:[%s2360_s6 + $0xf4] sm:$0xf] %vm1027_vm4, %v1024_v54  ;;  %v905_v40 = vsel %vm626_vm5, %v803_v63, 0.0  ;;  %v708_v25 = vsel %vm626_vm5, %v1846_v30, 0.0  ;;  %v710_v35 = vsel %vm626_vm5, %v1904_v19, 0.0 }
 0x148   :  { %v693_v23 = vadd.f32 %v692_v17, %v691_v12  ;;  %v892_v33 = vadd.f32 %v891_v39, %v890_v21  ;;  %v805_v12 = vmul.f32 %v1846_v30, %v1846_v30  ;;  %v907_v10 = vsel %vm626_vm5, %v804_v24, 0.0 }
 0x149   :  { %v712_v30 = vsel %vm626_vm5, %v1935_v6, 0.0 }
 0x14a   :  { %v695_v32 = vadd.f32 %v694_v16, %v693_v23  ;;  %v894_v41 = vadd.f32 %v893_v31, %v892_v33  ;;  %v806_v23 = vmul.f32 %v1904_v19, %v1904_v19  ;;  %v909_v16 = vsel %vm626_vm5, %v805_v12, 0.0 }
 0x14b   :  { %v913_v19 = vsel %vm626_vm5, %v807_v27, 0.0 }
 0x14c   :  { %v697_v22 = vadd.f32 %v696_v34, %v695_v32  ;;  %v896_v43 = vadd.f32 %v895_v37, %v894_v41  ;;  %v2202_v21 = vpop.f32.mrf.mxu3  ;;  %v911_v37 = vsel %vm626_vm5, %v806_v23, 0.0  ;;  %v808_v34 = vmul.f32 %v1982_v62, %v1982_v62 }
 0x14d   :  { %v1025_v50 = vpack.c.bf16 %v2202_v21, %v2202_v21 }
 0x14e   :  { %v699_v57 = vadd.f32 %v698_v15, %v697_v22  ;;  %v898_v51 = vadd.f32 %v897_v48, %v896_v43  ;;  %v714_v43 = vsel %vm626_vm5, %v1982_v62, 0.0  ;;  %v809_v48 = vmul.f32 %v2016_v13, %v2016_v13 }
 0x14f   :  { %1090 = vst.msk [vmem:[%s2360_s6 + $0xf8] sm:$0xf] %vm1027_vm4, %v1025_v50  ;;  %v915_v54 = vsel %vm626_vm5, %v808_v34, 0.0  ;;  %v810_v62 = vmul.f32 %v2069_v45, %v2069_v45  ;;  %v818_v50 = vmul.f32 %v1913_v44, %v1913_v44 }
 0x150   :  { %v701_v58 = vadd.f32 %v700_v55, %v699_v57  ;;  %v900_v29 = vadd.f32 %v899_v56, %v898_v51  ;;  %v716_v57 = vsel %vm626_vm5, %v2016_v13, 0.0  ;;  %v917_v61 = vsel %vm626_vm5, %v809_v48, 0.0 }
 0x151   :  { %v919_v63 = vsel %vm626_vm5, %v810_v62, 0.0 }
 0x152   :  { %v902_v1 = vadd.f32 %v901_v59, %v900_v29  ;;  %v703_v5 = vadd.f32 %v702_v7, %v701_v58  ;;  %v718_v58 = vsel %vm626_vm5, %v2069_v45, 0.0  ;;  %v811_v29 = vmul.f32 %v2095_v26, %v2095_v26 }
 0x153   :  { %v812_v7 = vmul.f32 %v1710_v0, %v1710_v0 }
 0x154   :  { %v705_v20 = vadd.f32 %v704_v3, %v703_v5  ;;  %v904_v8 = vadd.f32 %v903_v2, %v902_v1  ;;  %v2230_v6 = vpop.f32.mrf.mxu3  ;;  %v720_v1 = vsel %vm626_vm5, %v2095_v26, 0.0  ;;  %v722_v2 = vsel %vm626_vm5, %v1710_v0, 0.0 }
 0x155   :  { %v1026_v51 = vpack.c.bf16 %v2230_v6, %v2230_v6  ;;  %v813_v3 = vmul.f32 %v1742_v9, %v1742_v9  ;;  %v921_v24 = vsel %vm626_vm5, %v811_v29, 0.0  ;;  %v923_v0 = vsel %vm626_vm5, %v812_v7, 0.0 }
 0x156   :  { %v707_v39 = vadd.f32 %v706_v14, %v705_v20  ;;  %v906_v17 = vadd.f32 %v905_v40, %v904_v8  ;;  %v1147_v20 = vmov 0.0   ;;  %v724_v26 = vsel %vm626_vm5, %v1742_v9, 0.0 }
 0x157   :  { %1091 = vst.msk [vmem:[%s2360_s6 + $0xfc] sm:$0xf] %vm1027_vm4, %v1026_v51  ;;  %v814_v14 = vmul.f32 %v1774_v18, %v1774_v18  ;;  %v728_v9 = vsel %vm626_vm5, %v1806_v28, 0.0  ;;  %v822_v29 = vmul.f32 %v2071_v52, %v2071_v52 }
 0x158   :  { %v709_v33 = vadd.f32 %v708_v25, %v707_v39  ;;  %v908_v31 = vadd.f32 %v907_v10, %v906_v17  ;;  %32 = vst.msk [vmem:[%s2361_s7] sm:$0x1] %vm31_vm6, %v1147_v20  ;;  %v925_v17 = vsel %vm626_vm5, %v813_v3, 0.0  ;;  %v726_v10 = vsel %vm626_vm5, %v1774_v18, 0.0 }
 0x159   :  { %33 = vst.msk [vmem:[%s2362_s8] sm:$0x1] %vm31_vm6, %v1147_v20  ;;  %v815_v25 = vmul.f32 %v1806_v28, %v1806_v28  ;;  %v730_v18 = vsel %vm626_vm5, %v1834_v38, 0.0  ;;  %v732_v28 = vsel %vm626_vm5, %v1852_v49, 0.0 }
 0x15a   :  { %v711_v32 = vadd.f32 %v710_v35, %v709_v33  ;;  %v910_v41 = vadd.f32 %v909_v16, %v908_v31  ;;  %v927_v31 = vsel %vm626_vm5, %v814_v14, 0.0  ;;  %v816_v16 = vmul.f32 %v1834_v38, %v1834_v38 }
 0x15b   :  { %v734_v38 = vsel %vm626_vm5, %v1913_v44, 0.0  ;;  %v738_v44 = vsel %vm626_vm5, %v1989_v11, 0.0  ;;  %v826_v14 = vmul.f32 %v2202_v21, %v2202_v21 }
 0x15c   :  { %v713_v36 = vadd.f32 %v712_v30, %v711_v32  ;;  %v912_v22 = vadd.f32 %v911_v37, %v910_v41  ;;  %v929_v32 = vsel %vm626_vm5, %v815_v25, 0.0  ;;  %v817_v41 = vmul.f32 %v1852_v49, %v1852_v49 }
 0x15d   :  { %v931_v34 = vsel %vm626_vm5, %v816_v16, 0.0  ;;  %v736_v49 = vsel %vm626_vm5, %v1941_v60, 0.0 }
 0x15e   :  { %v914_v15 = vadd.f32 %v913_v19, %v912_v22  ;;  %v715_v4 = vadd.f32 %v714_v43, %v713_v36  ;;  %v933_v19 = vsel %vm626_vm5, %v817_v41, 0.0  ;;  %v819_v43 = vmul.f32 %v1941_v60, %v1941_v60 }
 0x15f   :  { %v740_v60 = vsel %vm626_vm5, %v2025_v47, 0.0 }
 0x160   :  { %v916_v56 = vadd.f32 %v915_v54, %v914_v15  ;;  %v717_v55 = vadd.f32 %v716_v57, %v715_v4  ;;  %v935_v4 = vsel %vm626_vm5, %v818_v50, 0.0  ;;  %v820_v54 = vmul.f32 %v1989_v11, %v1989_v11  ;;  %v625_v50 = vld [vmem:[%s2361_s7] sm:$0x1] }
 0x161   :  { %v937_v51 = vsel %vm626_vm5, %v819_v43, 0.0  ;;  %v742_v11 = vsel %vm626_vm5, %v2071_v52, 0.0  ;;  %v746_v52 = vsel %vm626_vm5, %v2141_v53, 0.0 }
 0x162   :  { %v918_v13 = vadd.f32 %v917_v61, %v916_v56  ;;  %v719_v59 = vadd.f32 %v718_v58, %v717_v55  ;;  %v821_v56 = vmul.f32 %v2025_v47, %v2025_v47  ;;  %v939_v58 = vsel %vm626_vm5, %v820_v54, 0.0 }
 0x163   :  { %v744_v47 = vsel %vm626_vm5, %v2099_v42, 0.0 }
 0x164   :  { %v920_v5 = vadd.f32 %v919_v63, %v918_v13  ;;  %v721_v45 = vadd.f32 %v720_v1, %v719_v59  ;;  %v941_v7 = vsel %vm626_vm5, %v821_v56, 0.0  ;;  %v823_v63 = vmul.f32 %v2099_v42, %v2099_v42 }
 0x165   :  { %v748_v42 = vsel %vm626_vm5, %v2165_v46, 0.0 }
 0x166   :  { %v723_v8 = vadd.f32 %v722_v2, %v721_v45  ;;  %v922_v40 = vadd.f32 %v921_v24, %v920_v5  ;;  %v943_v45 = vsel %vm626_vm5, %v822_v29, 0.0  ;;  %v824_v2 = vmul.f32 %v2141_v53, %v2141_v53 }
 0x167   :  { %v945_v20 = vsel %vm626_vm5, %v823_v63, 0.0  ;;  %v750_v53 = vsel %vm626_vm5, %v2202_v21, 0.0 }
 0x168   :  { %v725_v12 = vadd.f32 %v724_v26, %v723_v8  ;;  %v924_v39 = vadd.f32 %v923_v0, %v922_v40  ;;  %v825_v8 = vmul.f32 %v2165_v46, %v2165_v46  ;;  %v947_v26 = vsel %vm626_vm5, %v824_v2, 0.0 }
 0x169   :  { %v752_v46 = vsel %vm626_vm5, %v2230_v6, 0.0 }
 0x16a   :  { %v727_v23 = vadd.f32 %v726_v10, %v725_v12  ;;  %v926_v33 = vadd.f32 %v925_v17, %v924_v39  ;;  %v949_v17 = vsel %vm626_vm5, %v825_v8, 0.0  ;;  %v827_v10 = vmul.f32 %v2230_v6, %v2230_v6 }
 0x16c   :  { %v729_v35 = vadd.f32 %v728_v9, %v727_v23  ;;  %v928_v27 = vadd.f32 %v927_v31, %v926_v33  ;;  %v951_v33 = vsel %vm626_vm5, %v826_v14, 0.0  ;;  %v953_v16 = vsel %vm626_vm5, %v827_v10, 0.0 }
 0x16e   :  { %v731_v37 = vadd.f32 %v730_v18, %v729_v35  ;;  %v930_v30 = vadd.f32 %v929_v32, %v928_v27 }
 0x170   :  { %v733_v36 = vadd.f32 %v732_v28, %v731_v37  ;;  %v932_v22 = vadd.f32 %v931_v34, %v930_v30 }
 0x172   :  { %v934_v48 = vadd.f32 %v933_v19, %v932_v22  ;;  %v735_v15 = vadd.f32 %v734_v38, %v733_v36  ;;  %v763_v22 = vld [vmem:[%s2362_s8] sm:$0x1] }
 0x174   :  { %v737_v57 = vadd.f32 %v736_v49, %v735_v15  ;;  %v936_v62 = vadd.f32 %v935_v4, %v934_v48 }
 0x176   :  { %v739_v55 = vadd.f32 %v738_v44, %v737_v57  ;;  %v938_v61 = vadd.f32 %v937_v51, %v936_v62 }
 0x178   :  { %v741_v13 = vadd.f32 %v740_v60, %v739_v55  ;;  %v940_v59 = vadd.f32 %v939_v58, %v938_v61 }
 0x17a   :  { %v743_v1 = vadd.f32 %v742_v11, %v741_v13  ;;  %v942_v5 = vadd.f32 %v941_v7, %v940_v59 }
 0x17c   :  { %v745_v3 = vadd.f32 %v744_v47, %v743_v1  ;;  %v944_v24 = vadd.f32 %v943_v45, %v942_v5 }
 0x17e   :  { %v946_v40 = vadd.f32 %v945_v20, %v944_v24  ;;  %v747_v0 = vadd.f32 %v746_v52, %v745_v3 }
 0x180   :  { %v948_v12 = vadd.f32 %v947_v26, %v946_v40  ;;  %v749_v39 = vadd.f32 %v748_v42, %v747_v0 }
 0x182   :  { %v950_v25 = vadd.f32 %v949_v17, %v948_v12  ;;  %v751_v23 = vadd.f32 %v750_v53, %v749_v39 }
 0x184   :  { %v952_v31 = vadd.f32 %v951_v33, %v950_v25  ;;  %v753_v9 = vadd.f32 %v752_v46, %v751_v23 }
 0x186   :  { %v754_v35 = vrot.slane %v753_v9, 4  ;;  %v954_v27 = vadd.f32 %v953_v16, %v952_v31 }
 0x188   :  { %v755_v32 = vadd.f32 %v754_v35, %v753_v9  ;;  %v955_v18 = vrot.slane %v954_v27, 4 }
 0x18a   :  { %v756_v41 = vrot.slane %v755_v32, 2  ;;  %v956_v21 = vadd.f32 %v955_v18, %v954_v27 }
 0x18c   :  { %v757_v37 = vadd.f32 %v756_v41, %v755_v32  ;;  %v957_v30 = vrot.slane %v956_v21, 2 }
 0x18e   :  { %v758_v34 = vrot.slane %v757_v37, 1  ;;  %v958_v28 = vadd.f32 %v957_v30, %v956_v21 }
 0x190   :  { %v759_v36 = vadd.f32 %v758_v34, %v757_v37  ;;  %v959_v6 = vrot.slane %v958_v28, 1 }
 0x192   :  { %v760_v19 = vadd.f32 %v759_v36, %v625_v50  ;;  %v960_v38 = vadd.f32 %v959_v6, %v958_v28 }
 0x194   :  { %762 = vst.msk [vmem:[%s2361_s7] sm:$0x1] %vm31_vm6, %v760_v19  ;;  %v961_v43 = vadd.f32 %v960_v38, %v763_v22 }
 0x196   :  { %962 = vst.msk [vmem:[%s2362_s8] sm:$0x1] %vm31_vm6, %v961_v43 }

// kernel: bottleneck_forward.7
= control target key start
LH: loop header
LB: loop body
LE: loop exit
PB: predicated region body
PF: predicated region fallthrough
CT: control target
= control target key end

     0   :  { %vm513_vm0 = vcmask 1041408   ;;  %vm416_vm4 = vcmask 31744   ;;  %vm814_vm5 = vcmask 130048   ;;  %s1917_s6 = inlined_call_operand.vmem [shape: bf16[4,16], index: 6, kind: input, shape index: {}]   ;;  %s1918_s2 = inlined_call_operand.vmem [shape: f32[1,4], index: 2, kind: input, shape index: {}]   ;;  %s1919_s3 = inlined_call_operand.vmem [shape: f32[1,4], index: 3, kind: input, shape index: {}]   ;;  %s1920_s0 = inlined_call_operand.vmem [shape: bf16[512,4], index: 0, kind: input, shape index: {}]   ;;  %s1921_s4 = inlined_call_operand.vmem [shape: f32[1,4], index: 4, kind: input, shape index: {}]   ;;  %s1922_s5 = inlined_call_operand.vmem [shape: f32[1,4], index: 5, kind: input, shape index: {}]   ;;  %s1923_s7 = inlined_call_operand.vmem [shape: f32[1,16], index: 7, kind: input, shape index: {}]   ;;  %s1924_s1 = inlined_call_operand.vmem [shape: f32[512,16], index: 1, kind: input, shape index: {}]   ;;  %s1925_s8 = inlined_call_operand.vmem [shape: f32[512,16], index: 8, kind: output, shape index: {}]  }
   0x1   :  { %v411_v0 = vld [vmem:[%s1917_s6] sm:$0x3]  ;;  %v1043_v26 = vld [vmem:[%s1920_s0 + $0x8] sm:$0xff]  }
   0x2   :  { %v158_v1 = vld [vmem:[%s1918_s2] sm:$0x1]  ;;  %v515_v2 = vsel %vm513_vm0, %v411_v0, 0  ;;  %v921_v35 = vunpack.c.l.bf16 %v1043_v26  ;;  %v922_v36 = vunpack.c.h.bf16 %v1043_v26  ;;  %v1051_v37 = vld [vmem:[%s1920_s0 + $0x48] sm:$0xff]  }
   0x3   :  { %v159_v3 = vmul.f32 0.001953125, %v158_v1  ;;  %v160_v4 = vld [vmem:[%s1919_s3] sm:$0x1]  ;;  %524 = vmatpush.bf16.msra.mxu0 %v515_v2  ;;  %1074 = vmatpush.bf16.msra.mxu1 %v515_v2  ;;  %v1059_v42 = vld [vmem:[%s1920_s0 + $0x88] sm:$0xff]   ;;  %v953_v50 = vunpack.c.l.bf16 %v1051_v37  ;;  %v954_v51 = vunpack.c.h.bf16 %v1051_v37 }
   0x4   :  { %v161_v5 = vmul.f32 0.001953125, %v160_v4  ;;  %1075 = vmatpush.bf16.msra.mxu2 %v515_v2  ;;  %1076 = vmatpush.bf16.msra.mxu3 %v515_v2  ;;  %v916_v15 = vld [vmem:[%s1920_s0] sm:$0xff]   ;;  %v1067_v43 = vld [vmem:[%s1920_s0 + $0xc8] sm:$0xff]   ;;  %v985_v52 = vunpack.c.l.bf16 %v1059_v42  ;;  %v986_v53 = vunpack.c.h.bf16 %v1059_v42 }
   0x5   :  { %v162_v6 = vmul.f32 %v159_v3, %v159_v3  ;;  %v165_v16 = vld [vmem:[%s1921_s4] sm:$0x1]  ;;  %v917_v22 = vunpack.c.l.bf16 %v916_v15  ;;  %v918_v23 = vunpack.c.h.bf16 %v916_v15  ;;  %v1017_v54 = vunpack.c.l.bf16 %v1067_v43 }
   0x6   :  { %v1050_v18 = vld [vmem:[%s1920_s0 + $0x40] sm:$0xff]   ;;  %v1018_v55 = vunpack.c.h.bf16 %v1067_v43 }
   0x7   :  { %v163_v7 = vsub.f32 %v161_v5, %v162_v6  ;;  %v1058_v19 = vld [vmem:[%s1920_s0 + $0x80] sm:$0xff]   ;;  %v949_v25 = vunpack.c.l.bf16 %v1050_v18  ;;  %v950_v28 = vunpack.c.h.bf16 %v1050_v18 }
   0x8   :  { %v1066_v20 = vld [vmem:[%s1920_s0 + $0xc0] sm:$0xff]   ;;  %v981_v29 = vunpack.c.l.bf16 %v1058_v19  ;;  %v982_v30 = vunpack.c.h.bf16 %v1058_v19 }
   0x9   :  { %v164_v8 = vmax.f32 %v163_v7, 0.0  ;;  %v178_v27 = vld [vmem:[%s1922_s5] sm:$0x1]  ;;  %v1013_v31 = vunpack.c.l.bf16 %v1066_v20  ;;  %v1014_v34 = vunpack.c.h.bf16 %v1066_v20 }
   0xb   :  { %v166_v9 = vadd.f32 1e-05, %v164_v8 }
   0xd   :  { %1078 = vrsqrt.f32 %v166_v9  ;;  %vm173_vm1 = vweird.f32 %v166_v9 }
  0x13   :  { %v1079_v10 = vpop.eup %1078 }
  0x14   :  { %v168_v11 = vmul.f32 %v1079_v10, %v166_v9  ;;  %vm174_vm2 = vweird.f32 %v1079_v10 }
  0x15   :  { %vm175_vm3 = vmor %vm173_vm1, %vm174_vm2 }
  0x16   :  { %v169_v12 = vmul.f32 %v1079_v10, %v168_v11 }
  0x18   :  { %v170_v13 = vmul.f32 0.5, %v169_v12 }
  0x1a   :  { %v171_v14 = vsub.f32 1.5, %v170_v13 }
  0x1c   :  { %v172_v17 = vmul.f32 %v1079_v10, %v171_v14 }
  0x1e   :  { %v176_v21 = vsel %vm175_vm3, %v1079_v10, %v172_v17 }
  0x1f   :  { %v177_v24 = vmul.f32 %v176_v21, %v165_v16 }
  0x21   :  { %v179_v32 = vmul.f32 %v177_v24, %v159_v3  ;;  %v1155_v33 = vperm.slane %v177_v24, 0 }
  0x23   :  { %v180_v38 = vsub.f32 %v178_v27, %v179_v32  ;;  %v184_v39 = vmul.f32 %v917_v22, %v1155_v33  ;;  %v185_v40 = vmul.f32 %v918_v23, %v1155_v33  ;;  %v200_v41 = vmul.f32 %v949_v25, %v1155_v33  ;;  %v1044_v32 = vld [vmem:[%s1920_s0 + $0x10] sm:$0xff]  }
  0x24   :  { %v201_v44 = vmul.f32 %v950_v28, %v1155_v33  ;;  %v216_v45 = vmul.f32 %v981_v29, %v1155_v33  ;;  %v217_v46 = vmul.f32 %v982_v30, %v1155_v33  ;;  %v232_v47 = vmul.f32 %v1013_v31, %v1155_v33 }
  0x25   :  { %v1173_v48 = vperm.slane %v180_v38, 0  ;;  %v233_v49 = vmul.f32 %v1014_v34, %v1155_v33  ;;  %v186_v12 = vmul.f32 %v921_v35, %v1155_v33  ;;  %v187_v13 = vmul.f32 %v922_v36, %v1155_v33  ;;  %v1052_v34 = vld [vmem:[%s1920_s0 + $0x50] sm:$0xff]  }
  0x26   :  { %v202_v14 = vmul.f32 %v953_v50, %v1155_v33  ;;  %v203_v15 = vmul.f32 %v954_v51, %v1155_v33  ;;  %v218_v16 = vmul.f32 %v985_v52, %v1155_v33  ;;  %v219_v17 = vmul.f32 %v986_v53, %v1155_v33 }
  0x27   :  { %v251_v56 = vadd.f32 %v1173_v48, %v184_v39  ;;  %v252_v57 = vadd.f32 %v1173_v48, %v185_v40  ;;  %v267_v58 = vadd.f32 %v1173_v48, %v200_v41  ;;  %v268_v59 = vadd.f32 %v1173_v48, %v201_v44  ;;  %v1060_v39 = vld [vmem:[%s1920_s0 + $0x90] sm:$0xff]  }
  0x28   :  { %v283_v60 = vadd.f32 %v1173_v48, %v216_v45  ;;  %v284_v61 = vadd.f32 %v1173_v48, %v217_v46  ;;  %v299_v62 = vadd.f32 %v1173_v48, %v232_v47  ;;  %v300_v63 = vadd.f32 %v1173_v48, %v233_v49  ;;  %v1068_v40 = vld [vmem:[%s1920_s0 + $0xd0] sm:$0xff]  }
  0x29   :  { %v315_v0 = vmax.f32 %v251_v56, 0.0  ;;  %v316_v1 = vmax.f32 %v252_v57, 0.0  ;;  %v331_v2 = vmax.f32 %v267_v58, 0.0  ;;  %v332_v3 = vmax.f32 %v268_v59, 0.0 }
  0x2a   :  { %v347_v4 = vmax.f32 %v283_v60, 0.0  ;;  %v348_v5 = vmax.f32 %v284_v61, 0.0  ;;  %v363_v6 = vmax.f32 %v299_v62, 0.0  ;;  %v364_v7 = vmax.f32 %v300_v63, 0.0 }
  0x2b   :  { %v379_v8 = vpack.c.bf16 %v316_v1, %v315_v0  ;;  %v387_v9 = vpack.c.bf16 %v332_v3, %v331_v2  ;;  %v234_v18 = vmul.f32 %v1017_v54, %v1155_v33  ;;  %v235_v19 = vmul.f32 %v1018_v55, %v1155_v33 }
  0x2c   :  { %v395_v10 = vpack.c.bf16 %v348_v5, %v347_v4  ;;  %v403_v11 = vpack.c.bf16 %v364_v7, %v363_v6  ;;  %v253_v20 = vadd.f32 %v1173_v48, %v186_v12  ;;  %v254_v21 = vadd.f32 %v1173_v48, %v187_v13  ;;  %v1045_v12 = vld [vmem:[%s1920_s0 + $0x18] sm:$0xff]  }
  0x2d   :  { %883 = vmatmul.msk.bf16.vlgmr.msra.gmra.mxu0 %vm416_vm4, %v379_v8  ;;  %891 = vmatmul.msk.bf16.vlgmr.msra.gmra.mxu1 %vm416_vm4, %v387_v9  ;;  %v269_v22 = vadd.f32 %v1173_v48, %v202_v14  ;;  %v270_v23 = vadd.f32 %v1173_v48, %v203_v15  ;;  %v285_v24 = vadd.f32 %v1173_v48, %v218_v16  ;;  %v925_v41 = vunpack.c.l.bf16 %v1044_v32  ;;  %v1053_v15 = vld [vmem:[%s1920_s0 + $0x58] sm:$0xff]  }
  0x2e   :  { %899 = vmatmul.msk.bf16.vlgmr.msra.gmra.mxu2 %vm416_vm4, %v395_v10  ;;  %907 = vmatmul.msk.bf16.vlgmr.msra.gmra.mxu3 %vm416_vm4, %v403_v11  ;;  %v286_v25 = vadd.f32 %v1173_v48, %v219_v17  ;;  %v301_v26 = vadd.f32 %v1173_v48, %v234_v18  ;;  %v302_v27 = vadd.f32 %v1173_v48, %v235_v19  ;;  %v317_v28 = vmax.f32 %v253_v20, 0.0  ;;  %v1061_v16 = vld [vmem:[%s1920_s0 + $0x98] sm:$0xff]  }
  0x2f   :  { %v318_v29 = vmax.f32 %v254_v21, 0.0  ;;  %v333_v30 = vmax.f32 %v269_v22, 0.0  ;;  %v334_v31 = vmax.f32 %v270_v23, 0.0  ;;  %v349_v35 = vmax.f32 %v285_v24, 0.0  ;;  %v1069_v17 = vld [vmem:[%s1920_s0 + $0xd8] sm:$0xff]  }
  0x30   :  { %v350_v36 = vmax.f32 %v286_v25, 0.0  ;;  %v365_v37 = vmax.f32 %v301_v26, 0.0  ;;  %v366_v38 = vmax.f32 %v302_v27, 0.0  ;;  %v926_v42 = vunpack.c.h.bf16 %v1044_v32 }
  0x31   :  { %v957_v43 = vunpack.c.l.bf16 %v1052_v34  ;;  %v958_v44 = vunpack.c.h.bf16 %v1052_v34  ;;  %v380_v45 = vpack.c.bf16 %v318_v29, %v317_v28  ;;  %v388_v46 = vpack.c.bf16 %v334_v31, %v333_v30 }
  0x32   :  { %v989_v47 = vunpack.c.l.bf16 %v1060_v39  ;;  %v990_v49 = vunpack.c.h.bf16 %v1060_v39  ;;  %v396_v50 = vpack.c.bf16 %v350_v36, %v349_v35  ;;  %v404_v51 = vpack.c.bf16 %v366_v38, %v365_v37 }
  0x33   :  { %v1021_v52 = vunpack.c.l.bf16 %v1068_v40  ;;  %v1022_v53 = vunpack.c.h.bf16 %v1068_v40  ;;  %v188_v54 = vmul.f32 %v925_v41, %v1155_v33  ;;  %v189_v55 = vmul.f32 %v926_v42, %v1155_v33 }
  0x34   :  { %v204_v56 = vmul.f32 %v957_v43, %v1155_v33  ;;  %v205_v57 = vmul.f32 %v958_v44, %v1155_v33  ;;  %v220_v58 = vmul.f32 %v989_v47, %v1155_v33  ;;  %v221_v59 = vmul.f32 %v990_v49, %v1155_v33 }
  0x35   :  { %v236_v60 = vmul.f32 %v1021_v52, %v1155_v33  ;;  %v237_v61 = vmul.f32 %v1022_v53, %v1155_v33  ;;  %v255_v62 = vadd.f32 %v1173_v48, %v188_v54  ;;  %v256_v63 = vadd.f32 %v1173_v48, %v189_v55  ;;  %v1046_v52 = vld [vmem:[%s1920_s0 + $0x20] sm:$0xff]  }
  0x36   :  { %v271_v0 = vadd.f32 %v1173_v48, %v204_v56  ;;  %v272_v1 = vadd.f32 %v1173_v48, %v205_v57  ;;  %v287_v2 = vadd.f32 %v1173_v48, %v220_v58  ;;  %v288_v3 = vadd.f32 %v1173_v48, %v221_v59  ;;  %v1054_v53 = vld [vmem:[%s1920_s0 + $0x60] sm:$0xff]  }
  0x37   :  { %v303_v4 = vadd.f32 %v1173_v48, %v236_v60  ;;  %v304_v5 = vadd.f32 %v1173_v48, %v237_v61  ;;  %v319_v6 = vmax.f32 %v255_v62, 0.0  ;;  %v320_v7 = vmax.f32 %v256_v63, 0.0  ;;  %v1062_v58 = vld [vmem:[%s1920_s0 + $0xa0] sm:$0xff]  }
  0x38   :  { %v335_v8 = vmax.f32 %v271_v0, 0.0  ;;  %v336_v9 = vmax.f32 %v272_v1, 0.0  ;;  %v351_v10 = vmax.f32 %v287_v2, 0.0  ;;  %v352_v11 = vmax.f32 %v288_v3, 0.0  ;;  %v1070_v59 = vld [vmem:[%s1920_s0 + $0xe0] sm:$0xff]  }
  0x39   :  { %v367_v13 = vmax.f32 %v303_v4, 0.0  ;;  %v368_v14 = vmax.f32 %v304_v5, 0.0  ;;  %v381_v18 = vpack.c.bf16 %v320_v7, %v319_v6  ;;  %v929_v20 = vunpack.c.l.bf16 %v1045_v12 }
  0x3a   :  { %v389_v19 = vpack.c.bf16 %v336_v9, %v335_v8  ;;  %v930_v21 = vunpack.c.h.bf16 %v1045_v12  ;;  %v397_v22 = vpack.c.bf16 %v352_v11, %v351_v10  ;;  %v961_v23 = vunpack.c.l.bf16 %v1053_v15 }
  0x3b   :  { %v962_v24 = vunpack.c.h.bf16 %v1053_v15  ;;  %v993_v25 = vunpack.c.l.bf16 %v1061_v16  ;;  %v405_v26 = vpack.c.bf16 %v368_v14, %v367_v13  ;;  %v994_v27 = vunpack.c.h.bf16 %v1061_v16 }
  0x3c   :  { %v1025_v28 = vunpack.c.l.bf16 %v1069_v17  ;;  %v1026_v29 = vunpack.c.h.bf16 %v1069_v17  ;;  %v190_v30 = vmul.f32 %v929_v20, %v1155_v33  ;;  %v191_v31 = vmul.f32 %v930_v21, %v1155_v33 }
  0x3d   :  { %884 = vmatmul.msk.bf16.gmra.mxu0 %vm416_vm4, %v380_v45  ;;  %892 = vmatmul.msk.bf16.gmra.mxu1 %vm416_vm4, %v388_v46  ;;  %v206_v32 = vmul.f32 %v961_v23, %v1155_v33  ;;  %v207_v34 = vmul.f32 %v962_v24, %v1155_v33  ;;  %v222_v35 = vmul.f32 %v993_v25, %v1155_v33  ;;  %v933_v60 = vunpack.c.l.bf16 %v1046_v52 }
  0x3e   :  { %900 = vmatmul.msk.bf16.gmra.mxu2 %vm416_vm4, %v396_v50  ;;  %908 = vmatmul.msk.bf16.gmra.mxu3 %vm416_vm4, %v404_v51  ;;  %v223_v36 = vmul.f32 %v994_v27, %v1155_v33  ;;  %v238_v37 = vmul.f32 %v1025_v28, %v1155_v33  ;;  %v239_v38 = vmul.f32 %v1026_v29, %v1155_v33  ;;  %v934_v61 = vunpack.c.h.bf16 %v1046_v52 }
  0x3f   :  { %v257_v39 = vadd.f32 %v1173_v48, %v190_v30  ;;  %v258_v40 = vadd.f32 %v1173_v48, %v191_v31  ;;  %v273_v41 = vadd.f32 %v1173_v48, %v206_v32  ;;  %v274_v42 = vadd.f32 %v1173_v48, %v207_v34  ;;  %v1047_v30 = vld [vmem:[%s1920_s0 + $0x28] sm:$0xff]  }
  0x40   :  { %v289_v43 = vadd.f32 %v1173_v48, %v222_v35  ;;  %v290_v44 = vadd.f32 %v1173_v48, %v223_v36  ;;  %v305_v45 = vadd.f32 %v1173_v48, %v238_v37  ;;  %v306_v46 = vadd.f32 %v1173_v48, %v239_v38  ;;  %v1055_v34 = vld [vmem:[%s1920_s0 + $0x68] sm:$0xff]  }
  0x41   :  { %v321_v47 = vmax.f32 %v257_v39, 0.0  ;;  %v322_v49 = vmax.f32 %v258_v40, 0.0  ;;  %v337_v50 = vmax.f32 %v273_v41, 0.0  ;;  %v338_v51 = vmax.f32 %v274_v42, 0.0  ;;  %v1063_v35 = vld [vmem:[%s1920_s0 + $0xa8] sm:$0xff]  }
  0x42   :  { %v353_v54 = vmax.f32 %v289_v43, 0.0  ;;  %v354_v55 = vmax.f32 %v290_v44, 0.0  ;;  %v369_v56 = vmax.f32 %v305_v45, 0.0  ;;  %v370_v57 = vmax.f32 %v306_v46, 0.0  ;;  %v1071_v36 = vld [vmem:[%s1920_s0 + $0xe8] sm:$0xff]  }
  0x43   :  { %v965_v62 = vunpack.c.l.bf16 %v1054_v53  ;;  %v966_v63 = vunpack.c.h.bf16 %v1054_v53  ;;  %v382_v0 = vpack.c.bf16 %v322_v49, %v321_v47  ;;  %v390_v1 = vpack.c.bf16 %v338_v51, %v337_v50 }
  0x44   :  { %v997_v2 = vunpack.c.l.bf16 %v1062_v58  ;;  %v998_v3 = vunpack.c.h.bf16 %v1062_v58  ;;  %v398_v4 = vpack.c.bf16 %v354_v55, %v353_v54  ;;  %v406_v5 = vpack.c.bf16 %v370_v57, %v369_v56 }
  0x45   :  { %v1029_v6 = vunpack.c.l.bf16 %v1070_v59  ;;  %v1030_v7 = vunpack.c.h.bf16 %v1070_v59  ;;  %v192_v8 = vmul.f32 %v933_v60, %v1155_v33  ;;  %v193_v9 = vmul.f32 %v934_v61, %v1155_v33 }
  0x46   :  { %v208_v10 = vmul.f32 %v965_v62, %v1155_v33  ;;  %v209_v11 = vmul.f32 %v966_v63, %v1155_v33  ;;  %v224_v12 = vmul.f32 %v997_v2, %v1155_v33  ;;  %v225_v13 = vmul.f32 %v998_v3, %v1155_v33 }
  0x47   :  { %v240_v14 = vmul.f32 %v1029_v6, %v1155_v33  ;;  %v241_v15 = vmul.f32 %v1030_v7, %v1155_v33  ;;  %v259_v16 = vadd.f32 %v1173_v48, %v192_v8  ;;  %v260_v17 = vadd.f32 %v1173_v48, %v193_v9  ;;  %v1048_v6 = vld [vmem:[%s1920_s0 + $0x30] sm:$0xff]  }
  0x48   :  { %v291_v20 = vadd.f32 %v1173_v48, %v224_v12  ;;  %v292_v21 = vadd.f32 %v1173_v48, %v225_v13  ;;  %v937_v39 = vunpack.c.l.bf16 %v1047_v30  ;;  %v938_v40 = vunpack.c.h.bf16 %v1047_v30  ;;  %v1056_v7 = vld [vmem:[%s1920_s0 + $0x70] sm:$0xff]  }
  0x49   :  { %v308_v23 = vadd.f32 %v1173_v48, %v241_v15  ;;  %v323_v24 = vmax.f32 %v259_v16, 0.0  ;;  %v324_v25 = vmax.f32 %v260_v17, 0.0  ;;  %v969_v42 = vunpack.c.l.bf16 %v1055_v34  ;;  %v1064_v12 = vld [vmem:[%s1920_s0 + $0xb0] sm:$0xff]  }
  0x4a   :  { %v355_v28 = vmax.f32 %v291_v20, 0.0  ;;  %v356_v29 = vmax.f32 %v292_v21, 0.0  ;;  %v970_v43 = vunpack.c.h.bf16 %v1055_v34  ;;  %v1001_v44 = vunpack.c.l.bf16 %v1063_v35  ;;  %v1072_v13 = vld [vmem:[%s1920_s0 + $0xf0] sm:$0xff]  }
  0x4b   :  { %v372_v32 = vmax.f32 %v308_v23, 0.0  ;;  %v383_v37 = vpack.c.bf16 %v324_v25, %v323_v24  ;;  %v1002_v46 = vunpack.c.h.bf16 %v1063_v35  ;;  %v1033_v47 = vunpack.c.l.bf16 %v1071_v36 }
  0x4c   :  { %v399_v41 = vpack.c.bf16 %v356_v29, %v355_v28  ;;  %v1034_v49 = vunpack.c.h.bf16 %v1071_v36  ;;  %v194_v50 = vmul.f32 %v937_v39, %v1155_v33  ;;  %v195_v51 = vmul.f32 %v938_v40, %v1155_v33 }
  0x4d   :  { %885 = vmatmul.msk.bf16.gmra.mxu0 %vm416_vm4, %v381_v18  ;;  %893 = vmatmul.msk.bf16.gmra.mxu1 %vm416_vm4, %v389_v19  ;;  %v275_v18 = vadd.f32 %v1173_v48, %v208_v10  ;;  %v276_v19 = vadd.f32 %v1173_v48, %v209_v11  ;;  %v210_v52 = vmul.f32 %v969_v42, %v1155_v33  ;;  %v942_v15 = vunpack.c.h.bf16 %v1048_v6 }
  0x4e   :  { %901 = vmatmul.msk.bf16.gmra.mxu2 %vm416_vm4, %v397_v22  ;;  %909 = vmatmul.msk.bf16.gmra.mxu3 %vm416_vm4, %v405_v26  ;;  %v307_v22 = vadd.f32 %v1173_v48, %v240_v14  ;;  %v211_v53 = vmul.f32 %v970_v43, %v1155_v33  ;;  %v226_v54 = vmul.f32 %v1001_v44, %v1155_v33  ;;  %v941_v14 = vunpack.c.l.bf16 %v1048_v6 }
  0x4f   :  { %v339_v26 = vmax.f32 %v275_v18, 0.0  ;;  %v340_v27 = vmax.f32 %v276_v19, 0.0  ;;  %v227_v55 = vmul.f32 %v1002_v46, %v1155_v33  ;;  %v242_v56 = vmul.f32 %v1033_v47, %v1155_v33 }
  0x50   :  { %v371_v31 = vmax.f32 %v307_v22, 0.0  ;;  %v243_v57 = vmul.f32 %v1034_v49, %v1155_v33  ;;  %v261_v58 = vadd.f32 %v1173_v48, %v194_v50  ;;  %v262_v59 = vadd.f32 %v1173_v48, %v195_v51  ;;  %v1049_v50 = vld [vmem:[%s1920_s0 + $0x38] sm:$0xff]  }
  0x51   :  { %v391_v38 = vpack.c.bf16 %v340_v27, %v339_v26  ;;  %v277_v60 = vadd.f32 %v1173_v48, %v210_v52  ;;  %v278_v61 = vadd.f32 %v1173_v48, %v211_v53  ;;  %v293_v62 = vadd.f32 %v1173_v48, %v226_v54  ;;  %v1057_v53 = vld [vmem:[%s1920_s0 + $0x78] sm:$0xff]  }
  0x52   :  { %v407_v45 = vpack.c.bf16 %v372_v32, %v371_v31  ;;  %v294_v63 = vadd.f32 %v1173_v48, %v227_v55  ;;  %v325_v2 = vmax.f32 %v261_v58, 0.0  ;;  %v326_v3 = vmax.f32 %v262_v59, 0.0  ;;  %v1065_v54 = vld [vmem:[%s1920_s0 + $0xb8] sm:$0xff]  }
  0x53   :  { %v357_v8 = vmax.f32 %v293_v62, 0.0  ;;  %v973_v16 = vunpack.c.l.bf16 %v1056_v7  ;;  %v974_v17 = vunpack.c.h.bf16 %v1056_v7  ;;  %v1005_v20 = vunpack.c.l.bf16 %v1064_v12  ;;  %v1073_v55 = vld [vmem:[%s1920_s0 + $0xf8] sm:$0xff]  }
  0x54   :  { %v358_v9 = vmax.f32 %v294_v63, 0.0  ;;  %v384_v18 = vpack.c.bf16 %v326_v3, %v325_v2  ;;  %v1006_v21 = vunpack.c.h.bf16 %v1064_v12  ;;  %v1037_v24 = vunpack.c.l.bf16 %v1072_v13 }
  0x55   :  { %v1038_v25 = vunpack.c.h.bf16 %v1072_v13  ;;  %v196_v26 = vmul.f32 %v941_v14, %v1155_v33  ;;  %v197_v27 = vmul.f32 %v942_v15, %v1155_v33  ;;  %v212_v28 = vmul.f32 %v973_v16, %v1155_v33 }
  0x56   :  { %v400_v22 = vpack.c.bf16 %v358_v9, %v357_v8  ;;  %v213_v29 = vmul.f32 %v974_v17, %v1155_v33  ;;  %v228_v30 = vmul.f32 %v1005_v20, %v1155_v33  ;;  %v229_v31 = vmul.f32 %v1006_v21, %v1155_v33 }
  0x57   :  { %v244_v32 = vmul.f32 %v1037_v24, %v1155_v33  ;;  %v245_v34 = vmul.f32 %v1038_v25, %v1155_v33  ;;  %v263_v35 = vadd.f32 %v1173_v48, %v196_v26  ;;  %v264_v36 = vadd.f32 %v1173_v48, %v197_v27 }
  0x58   :  { %v295_v39 = vadd.f32 %v1173_v48, %v228_v30  ;;  %v296_v40 = vadd.f32 %v1173_v48, %v229_v31  ;;  %v945_v58 = vunpack.c.l.bf16 %v1049_v50  ;;  %v946_v59 = vunpack.c.h.bf16 %v1049_v50  ;;  %v703_v50 = vld [vmem:[%s1924_s1 + $0x88] sm:$0xff] }
  0x59   :  { %v312_v42 = vadd.f32 %v1173_v48, %v245_v34  ;;  %v327_v43 = vmax.f32 %v263_v35, 0.0  ;;  %v328_v44 = vmax.f32 %v264_v36, 0.0  ;;  %v978_v62 = vunpack.c.h.bf16 %v1057_v53  ;;  %v702_v35 = vld [vmem:[%s1924_s1 + $0x80] sm:$0xff] }
  0x5a   :  { %v359_v47 = vmax.f32 %v295_v39, 0.0  ;;  %v360_v49 = vmax.f32 %v296_v40, 0.0  ;;  %v1009_v63 = vunpack.c.l.bf16 %v1065_v54  ;;  %v1041_v2 = vunpack.c.l.bf16 %v1073_v55 }
  0x5b   :  { %v376_v52 = vmax.f32 %v312_v42, 0.0  ;;  %v1042_v3 = vunpack.c.h.bf16 %v1073_v55  ;;  %v215_v7 = vmul.f32 %v978_v62, %v1155_v33 }
  0x5c   :  { %v230_v8 = vmul.f32 %v1009_v63, %v1155_v33 }
  0x5d   :  { %886 = vmatmul.msk.bf16.gmra.mxu0 %vm416_vm4, %v382_v0  ;;  %894 = vmatmul.msk.bf16.gmra.mxu1 %vm416_vm4, %v390_v1  ;;  %v309_v0 = vadd.f32 %v1173_v48, %v242_v56  ;;  %v310_v1 = vadd.f32 %v1173_v48, %v243_v57  ;;  %v385_v56 = vpack.c.bf16 %v328_v44, %v327_v43  ;;  %v734_v43 = vld [vmem:[%s1924_s1 + $0x180] sm:$0xff] }
  0x5e   :  { %902 = vmatmul.msk.bf16.gmra.mxu2 %vm416_vm4, %v398_v4  ;;  %910 = vmatmul.msk.bf16.gmra.mxu3 %vm416_vm4, %v406_v5  ;;  %v341_v4 = vmax.f32 %v277_v60, 0.0  ;;  %v342_v5 = vmax.f32 %v278_v61, 0.0  ;;  %v401_v60 = vpack.c.bf16 %v360_v49, %v359_v47  ;;  %v977_v61 = vunpack.c.l.bf16 %v1057_v53  ;;  %v687_v47 = vld [vmem:[%s1924_s1 + $0x8] sm:$0xff] }
  0x5f   :  { %v373_v10 = vmax.f32 %v309_v0, 0.0  ;;  %v374_v11 = vmax.f32 %v310_v1, 0.0  ;;  %v1010_v1 = vunpack.c.h.bf16 %v1065_v54  ;;  %v282_v15 = vadd.f32 %v1173_v48, %v215_v7 }
  0x60   :  { %v392_v19 = vpack.c.bf16 %v342_v5, %v341_v4  ;;  %v198_v4 = vmul.f32 %v945_v58, %v1155_v33  ;;  %v199_v5 = vmul.f32 %v946_v59, %v1155_v33  ;;  %v214_v6 = vmul.f32 %v977_v61, %v1155_v33  ;;  %v719_v58 = vld [vmem:[%s1924_s1 + $0x108] sm:$0xff] }
  0x61   :  { %v408_v23 = vpack.c.bf16 %v374_v11, %v373_v10  ;;  %v231_v9 = vmul.f32 %v1010_v1, %v1155_v33  ;;  %v246_v10 = vmul.f32 %v1041_v2, %v1155_v33  ;;  %v247_v11 = vmul.f32 %v1042_v3, %v1155_v33  ;;  %v704_v2 = vld [vmem:[%s1924_s1 + $0x90] sm:$0xff] }
  0x62   :  { %v265_v12 = vadd.f32 %v1173_v48, %v198_v4  ;;  %v266_v13 = vadd.f32 %v1173_v48, %v199_v5  ;;  %v281_v14 = vadd.f32 %v1173_v48, %v214_v6  ;;  %v297_v16 = vadd.f32 %v1173_v48, %v230_v8 }
  0x63   :  { %v298_v17 = vadd.f32 %v1173_v48, %v231_v9  ;;  %v346_v33 = vmax.f32 %v282_v15, 0.0 }
  0x64   :  { %v329_v20 = vmax.f32 %v265_v12, 0.0  ;;  %v330_v21 = vmax.f32 %v266_v13, 0.0  ;;  %v736_v12 = vld [vmem:[%s1924_s1 + $0x190] sm:$0xff] }
  0x65   :  { %v362_v24 = vmax.f32 %v298_v17, 0.0 }
  0x66   :  { %v386_v27 = vpack.c.bf16 %v330_v21, %v329_v20 }
  0x6d   :  { %887 = vmatmul.msk.bf16.gmra.mxu0 %vm416_vm4, %v383_v37  ;;  %895 = vmatmul.msk.bf16.gmra.mxu1 %vm416_vm4, %v391_v38  ;;  %v279_v37 = vadd.f32 %v1173_v48, %v212_v28  ;;  %v280_v38 = vadd.f32 %v1173_v48, %v213_v29 }
  0x6e   :  { %903 = vmatmul.msk.bf16.gmra.mxu2 %vm416_vm4, %v399_v41  ;;  %911 = vmatmul.msk.bf16.gmra.mxu3 %vm416_vm4, %v407_v45  ;;  %v311_v41 = vadd.f32 %v1173_v48, %v244_v32  ;;  %v686_v32 = vld [vmem:[%s1924_s1] sm:$0xff] }
  0x6f   :  { %v343_v45 = vmax.f32 %v279_v37, 0.0  ;;  %v344_v46 = vmax.f32 %v280_v38, 0.0 }
  0x70   :  { %v375_v51 = vmax.f32 %v311_v41, 0.0  ;;  %v718_v41 = vld [vmem:[%s1924_s1 + $0x100] sm:$0xff] }
  0x71   :  { %v393_v57 = vpack.c.bf16 %v344_v46, %v343_v45 }
  0x72   :  { %v409_v0 = vpack.c.bf16 %v376_v52, %v375_v51 }
  0x7d   :  { %888 = vmatmul.msk.bf16.gmra.mxu0 %vm416_vm4, %v384_v18  ;;  %896 = vmatmul.msk.bf16.gmra.mxu1 %vm416_vm4, %v392_v19  ;;  %v313_v18 = vadd.f32 %v1173_v48, %v246_v10  ;;  %v314_v19 = vadd.f32 %v1173_v48, %v247_v11  ;;  %v1403_v48 = vld [vmem:[%s1923_s7] ss:$0 sm:$0xff]  ;;  %v720_v10 = vld [vmem:[%s1924_s1 + $0x110] sm:$0xff] }
  0x7e   :  { %904 = vmatmul.msk.bf16.gmra.mxu2 %vm416_vm4, %v400_v22  ;;  %912 = vmatmul.msk.bf16.gmra.mxu3 %vm416_vm4, %v408_v23  ;;  %v345_v22 = vmax.f32 %v281_v14, 0.0  ;;  %v361_v23 = vmax.f32 %v297_v16, 0.0  ;;  %v689_v16 = vld [vmem:[%s1924_s1 + $0x18] sm:$0xff] }
  0x7f   :  { %v377_v25 = vmax.f32 %v313_v18, 0.0  ;;  %v378_v26 = vmax.f32 %v314_v19, 0.0  ;;  %v705_v18 = vld [vmem:[%s1924_s1 + $0x98] sm:$0xff] }
  0x80   :  { %v394_v28 = vpack.c.bf16 %v346_v33, %v345_v22  ;;  %v402_v29 = vpack.c.bf16 %v362_v24, %v361_v23 }
  0x81   :  { %v410_v30 = vpack.c.bf16 %v378_v26, %v377_v25  ;;  %v721_v25 = vld [vmem:[%s1924_s1 + $0x118] sm:$0xff] }
  0x8d   :  { %889 = vmatmul.msk.bf16.gmra.mxu0 %vm416_vm4, %v385_v56  ;;  %897 = vmatmul.msk.bf16.gmra.mxu1 %vm416_vm4, %v393_v57 }
  0x8e   :  { %905 = vmatmul.msk.bf16.gmra.mxu2 %vm416_vm4, %v401_v60  ;;  %913 = vmatmul.msk.bf16.gmra.mxu3 %vm416_vm4, %v409_v0  ;;  %v735_v60 = vld [vmem:[%s1924_s1 + $0x188] sm:$0xff]  ;;  %v688_v0 = vld [vmem:[%s1924_s1 + $0x10] sm:$0xff] }
  0x9d   :  { %890 = vmatmul.msk.bf16.gmra.mxu0 %vm416_vm4, %v386_v27  ;;  %898 = vmatmul.msk.bf16.gmra.mxu1 %vm416_vm4, %v394_v28  ;;  %v737_v27 = vld [vmem:[%s1924_s1 + $0x198] sm:$0xff] }
  0x9e   :  { %906 = vmatmul.msk.bf16.gmra.mxu2 %vm416_vm4, %v402_v29  ;;  %914 = vmatmul.msk.bf16.gmra.mxu3 %vm416_vm4, %v410_v30 }
  0xaa   :  { %v526_v31 = vpop.f32.mrf.mxu0  ;;  %v566_v34 = vpop.f32.mrf.mxu1 }
  0xab   :  { %v527_v36 = vadd.f32 %v1403_v48, %v526_v31  ;;  %v567_v37 = vadd.f32 %v1403_v48, %v566_v34  ;;  %v690_v31 = vld [vmem:[%s1924_s1 + $0x20] sm:$0xff] }
  0xac   :  { %v706_v34 = vld [vmem:[%s1924_s1 + $0xa0] sm:$0xff] }
  0xad   :  { %v750_v38 = vadd.f32 %v686_v32, %v527_v36  ;;  %v766_v39 = vadd.f32 %v702_v35, %v567_v37 }
  0xaf   :  { %815 = vst.msk [vmem:[%s1925_s8] sm:$0xff] %vm814_vm5, %v750_v38 }
  0xb0   :  { %831 = vst.msk [vmem:[%s1925_s8 + $0x80] sm:$0xff] %vm814_vm5, %v766_v39 }
  0xb1   :  { %v606_v40 = vpop.f32.mrf.mxu2  ;;  %v646_v42 = vpop.f32.mrf.mxu3 }
  0xb2   :  { %v607_v44 = vadd.f32 %v1403_v48, %v606_v40  ;;  %v647_v45 = vadd.f32 %v1403_v48, %v646_v42  ;;  %v528_v46 = vpop.f32.mrf.mxu0  ;;  %v568_v49 = vpop.f32.mrf.mxu1  ;;  %v722_v42 = vld [vmem:[%s1924_s1 + $0x120] sm:$0xff] }
  0xb3   :  { %v529_v51 = vadd.f32 %v1403_v48, %v528_v46  ;;  %v569_v52 = vadd.f32 %v1403_v48, %v568_v49  ;;  %v691_v49 = vld [vmem:[%s1924_s1 + $0x28] sm:$0xff] }
  0xb4   :  { %v782_v53 = vadd.f32 %v718_v41, %v607_v44  ;;  %v798_v54 = vadd.f32 %v734_v43, %v647_v45  ;;  %v738_v44 = vld [vmem:[%s1924_s1 + $0x1a0] sm:$0xff] }
  0xb5   :  { %v751_v55 = vadd.f32 %v687_v47, %v529_v51  ;;  %v767_v56 = vadd.f32 %v703_v50, %v569_v52  ;;  %v707_v51 = vld [vmem:[%s1924_s1 + $0xa8] sm:$0xff] }
  0xb6   :  { %847 = vst.msk [vmem:[%s1925_s8 + $0x100] sm:$0xff] %vm814_vm5, %v782_v53 }
  0xb7   :  { %863 = vst.msk [vmem:[%s1925_s8 + $0x180] sm:$0xff] %vm814_vm5, %v798_v54 }
  0xb8   :  { %816 = vst.msk [vmem:[%s1925_s8 + $0x8] sm:$0xff] %vm814_vm5, %v751_v55 }
  0xb9   :  { %832 = vst.msk [vmem:[%s1925_s8 + $0x88] sm:$0xff] %vm814_vm5, %v767_v56  ;;  %v608_v57 = vpop.f32.mrf.mxu2  ;;  %v648_v59 = vpop.f32.mrf.mxu3 }
  0xba   :  { %v609_v61 = vadd.f32 %v1403_v48, %v608_v57  ;;  %v649_v62 = vadd.f32 %v1403_v48, %v648_v59  ;;  %v531_v63 = vpop.f32.mrf.mxu0  ;;  %v571_v1 = vpop.f32.mrf.mxu1  ;;  %v723_v59 = vld [vmem:[%s1924_s1 + $0x128] sm:$0xff] }
  0xbb   :  { %v532_v3 = vadd.f32 %v1403_v48, %v531_v63  ;;  %v572_v4 = vadd.f32 %v1403_v48, %v571_v1  ;;  %v692_v1 = vld [vmem:[%s1924_s1 + $0x30] sm:$0xff] }
  0xbc   :  { %v783_v5 = vadd.f32 %v719_v58, %v609_v61  ;;  %v799_v6 = vadd.f32 %v735_v60, %v649_v62  ;;  %v739_v61 = vld [vmem:[%s1924_s1 + $0x1a8] sm:$0xff] }
  0xbd   :  { %v752_v7 = vadd.f32 %v688_v0, %v532_v3  ;;  %v768_v8 = vadd.f32 %v704_v2, %v572_v4  ;;  %v708_v3 = vld [vmem:[%s1924_s1 + $0xb0] sm:$0xff] }
  0xbe   :  { %848 = vst.msk [vmem:[%s1925_s8 + $0x108] sm:$0xff] %vm814_vm5, %v783_v5 }
  0xbf   :  { %864 = vst.msk [vmem:[%s1925_s8 + $0x188] sm:$0xff] %vm814_vm5, %v799_v6 }
  0xc0   :  { %817 = vst.msk [vmem:[%s1925_s8 + $0x10] sm:$0xff] %vm814_vm5, %v752_v7 }
  0xc1   :  { %833 = vst.msk [vmem:[%s1925_s8 + $0x90] sm:$0xff] %vm814_vm5, %v768_v8  ;;  %v611_v9 = vpop.f32.mrf.mxu2  ;;  %v651_v11 = vpop.f32.mrf.mxu3 }
  0xc2   :  { %v612_v13 = vadd.f32 %v1403_v48, %v611_v9  ;;  %v652_v14 = vadd.f32 %v1403_v48, %v651_v11  ;;  %v533_v15 = vpop.f32.mrf.mxu0  ;;  %v573_v17 = vpop.f32.mrf.mxu1  ;;  %v724_v11 = vld [vmem:[%s1924_s1 + $0x130] sm:$0xff] }
  0xc3   :  { %v534_v19 = vadd.f32 %v1403_v48, %v533_v15  ;;  %v574_v20 = vadd.f32 %v1403_v48, %v573_v17  ;;  %v693_v17 = vld [vmem:[%s1924_s1 + $0x38] sm:$0xff] }
  0xc4   :  { %v784_v21 = vadd.f32 %v720_v10, %v612_v13  ;;  %v800_v22 = vadd.f32 %v736_v12, %v652_v14  ;;  %v740_v13 = vld [vmem:[%s1924_s1 + $0x1b0] sm:$0xff] }
  0xc5   :  { %v753_v33 = vadd.f32 %v689_v16, %v534_v19  ;;  %v769_v23 = vadd.f32 %v705_v18, %v574_v20  ;;  %v709_v19 = vld [vmem:[%s1924_s1 + $0xb8] sm:$0xff] }
  0xc6   :  { %849 = vst.msk [vmem:[%s1925_s8 + $0x110] sm:$0xff] %vm814_vm5, %v784_v21 }
  0xc7   :  { %865 = vst.msk [vmem:[%s1925_s8 + $0x190] sm:$0xff] %vm814_vm5, %v800_v22 }
  0xc8   :  { %818 = vst.msk [vmem:[%s1925_s8 + $0x18] sm:$0xff] %vm814_vm5, %v753_v33 }
  0xc9   :  { %834 = vst.msk [vmem:[%s1925_s8 + $0x98] sm:$0xff] %vm814_vm5, %v769_v23  ;;  %v613_v24 = vpop.f32.mrf.mxu2  ;;  %v653_v26 = vpop.f32.mrf.mxu3 }
  0xca   :  { %v614_v28 = vadd.f32 %v1403_v48, %v613_v24  ;;  %v654_v29 = vadd.f32 %v1403_v48, %v653_v26  ;;  %v536_v30 = vpop.f32.mrf.mxu0  ;;  %v576_v32 = vpop.f32.mrf.mxu1  ;;  %v725_v26 = vld [vmem:[%s1924_s1 + $0x138] sm:$0xff] }
  0xcb   :  { %v537_v35 = vadd.f32 %v1403_v48, %v536_v30  ;;  %v577_v36 = vadd.f32 %v1403_v48, %v576_v32  ;;  %v694_v32 = vld [vmem:[%s1924_s1 + $0x40] sm:$0xff] }
  0xcc   :  { %v785_v37 = vadd.f32 %v721_v25, %v614_v28  ;;  %v801_v38 = vadd.f32 %v737_v27, %v654_v29  ;;  %v741_v28 = vld [vmem:[%s1924_s1 + $0x1b8] sm:$0xff] }
  0xcd   :  { %v754_v39 = vadd.f32 %v690_v31, %v537_v35  ;;  %v770_v40 = vadd.f32 %v706_v34, %v577_v36  ;;  %v710_v35 = vld [vmem:[%s1924_s1 + $0xc0] sm:$0xff] }
  0xce   :  { %850 = vst.msk [vmem:[%s1925_s8 + $0x118] sm:$0xff] %vm814_vm5, %v785_v37 }
  0xcf   :  { %866 = vst.msk [vmem:[%s1925_s8 + $0x198] sm:$0xff] %vm814_vm5, %v801_v38 }
  0xd0   :  { %819 = vst.msk [vmem:[%s1925_s8 + $0x20] sm:$0xff] %vm814_vm5, %v754_v39 }
  0xd1   :  { %835 = vst.msk [vmem:[%s1925_s8 + $0xa0] sm:$0xff] %vm814_vm5, %v770_v40  ;;  %v616_v41 = vpop.f32.mrf.mxu2  ;;  %v656_v43 = vpop.f32.mrf.mxu3 }
  0xd2   :  { %v617_v45 = vadd.f32 %v1403_v48, %v616_v41  ;;  %v657_v46 = vadd.f32 %v1403_v48, %v656_v43  ;;  %v538_v47 = vpop.f32.mrf.mxu0  ;;  %v578_v50 = vpop.f32.mrf.mxu1  ;;  %v726_v43 = vld [vmem:[%s1924_s1 + $0x140] sm:$0xff] }
  0xd3   :  { %v539_v52 = vadd.f32 %v1403_v48, %v538_v47  ;;  %v579_v53 = vadd.f32 %v1403_v48, %v578_v50  ;;  %v695_v50 = vld [vmem:[%s1924_s1 + $0x48] sm:$0xff] }
  0xd4   :  { %v786_v54 = vadd.f32 %v722_v42, %v617_v45  ;;  %v802_v55 = vadd.f32 %v738_v44, %v657_v46  ;;  %v742_v45 = vld [vmem:[%s1924_s1 + $0x1c0] sm:$0xff] }
  0xd5   :  { %v755_v56 = vadd.f32 %v691_v49, %v539_v52  ;;  %v771_v57 = vadd.f32 %v707_v51, %v579_v53  ;;  %v711_v52 = vld [vmem:[%s1924_s1 + $0xc8] sm:$0xff] }
  0xd6   :  { %851 = vst.msk [vmem:[%s1925_s8 + $0x120] sm:$0xff] %vm814_vm5, %v786_v54 }
  0xd7   :  { %867 = vst.msk [vmem:[%s1925_s8 + $0x1a0] sm:$0xff] %vm814_vm5, %v802_v55 }
  0xd8   :  { %820 = vst.msk [vmem:[%s1925_s8 + $0x28] sm:$0xff] %vm814_vm5, %v755_v56 }
  0xd9   :  { %836 = vst.msk [vmem:[%s1925_s8 + $0xa8] sm:$0xff] %vm814_vm5, %v771_v57  ;;  %v618_v58 = vpop.f32.mrf.mxu2  ;;  %v658_v60 = vpop.f32.mrf.mxu3 }
  0xda   :  { %v619_v62 = vadd.f32 %v1403_v48, %v618_v58  ;;  %v659_v63 = vadd.f32 %v1403_v48, %v658_v60  ;;  %v541_v0 = vpop.f32.mrf.mxu0  ;;  %v581_v2 = vpop.f32.mrf.mxu1  ;;  %v727_v60 = vld [vmem:[%s1924_s1 + $0x148] sm:$0xff] }
  0xdb   :  { %v542_v4 = vadd.f32 %v1403_v48, %v541_v0  ;;  %v582_v5 = vadd.f32 %v1403_v48, %v581_v2  ;;  %v696_v2 = vld [vmem:[%s1924_s1 + $0x50] sm:$0xff] }
  0xdc   :  { %v787_v6 = vadd.f32 %v723_v59, %v619_v62  ;;  %v803_v7 = vadd.f32 %v739_v61, %v659_v63  ;;  %v743_v62 = vld [vmem:[%s1924_s1 + $0x1c8] sm:$0xff] }
  0xdd   :  { %v756_v8 = vadd.f32 %v692_v1, %v542_v4  ;;  %v772_v9 = vadd.f32 %v708_v3, %v582_v5  ;;  %v712_v4 = vld [vmem:[%s1924_s1 + $0xd0] sm:$0xff] }
  0xde   :  { %852 = vst.msk [vmem:[%s1925_s8 + $0x128] sm:$0xff] %vm814_vm5, %v787_v6 }
  0xdf   :  { %868 = vst.msk [vmem:[%s1925_s8 + $0x1a8] sm:$0xff] %vm814_vm5, %v803_v7 }
  0xe0   :  { %821 = vst.msk [vmem:[%s1925_s8 + $0x30] sm:$0xff] %vm814_vm5, %v756_v8 }
  0xe1   :  { %837 = vst.msk [vmem:[%s1925_s8 + $0xb0] sm:$0xff] %vm814_vm5, %v772_v9  ;;  %v621_v10 = vpop.f32.mrf.mxu2  ;;  %v661_v12 = vpop.f32.mrf.mxu3 }
  0xe2   :  { %v622_v14 = vadd.f32 %v1403_v48, %v621_v10  ;;  %v662_v15 = vadd.f32 %v1403_v48, %v661_v12  ;;  %v543_v16 = vpop.f32.mrf.mxu0  ;;  %v583_v18 = vpop.f32.mrf.mxu1  ;;  %v728_v12 = vld [vmem:[%s1924_s1 + $0x150] sm:$0xff] }
  0xe3   :  { %v544_v20 = vadd.f32 %v1403_v48, %v543_v16  ;;  %v584_v21 = vadd.f32 %v1403_v48, %v583_v18  ;;  %v697_v18 = vld [vmem:[%s1924_s1 + $0x58] sm:$0xff] }
  0xe4   :  { %v788_v22 = vadd.f32 %v724_v11, %v622_v14  ;;  %v804_v33 = vadd.f32 %v740_v13, %v662_v15  ;;  %v744_v14 = vld [vmem:[%s1924_s1 + $0x1d0] sm:$0xff] }
  0xe5   :  { %v757_v23 = vadd.f32 %v693_v17, %v544_v20  ;;  %v773_v24 = vadd.f32 %v709_v19, %v584_v21  ;;  %v713_v20 = vld [vmem:[%s1924_s1 + $0xd8] sm:$0xff] }
  0xe6   :  { %853 = vst.msk [vmem:[%s1925_s8 + $0x130] sm:$0xff] %vm814_vm5, %v788_v22 }
  0xe7   :  { %869 = vst.msk [vmem:[%s1925_s8 + $0x1b0] sm:$0xff] %vm814_vm5, %v804_v33 }
  0xe8   :  { %822 = vst.msk [vmem:[%s1925_s8 + $0x38] sm:$0xff] %vm814_vm5, %v757_v23 }
  0xe9   :  { %838 = vst.msk [vmem:[%s1925_s8 + $0xb8] sm:$0xff] %vm814_vm5, %v773_v24  ;;  %v623_v25 = vpop.f32.mrf.mxu2  ;;  %v663_v27 = vpop.f32.mrf.mxu3 }
  0xea   :  { %v624_v29 = vadd.f32 %v1403_v48, %v623_v25  ;;  %v664_v30 = vadd.f32 %v1403_v48, %v663_v27  ;;  %v546_v31 = vpop.f32.mrf.mxu0  ;;  %v586_v34 = vpop.f32.mrf.mxu1  ;;  %v729_v27 = vld [vmem:[%s1924_s1 + $0x158] sm:$0xff] }
  0xeb   :  { %v547_v36 = vadd.f32 %v1403_v48, %v546_v31  ;;  %v587_v37 = vadd.f32 %v1403_v48, %v586_v34  ;;  %v698_v34 = vld [vmem:[%s1924_s1 + $0x60] sm:$0xff] }
  0xec   :  { %v789_v38 = vadd.f32 %v725_v26, %v624_v29  ;;  %v805_v39 = vadd.f32 %v741_v28, %v664_v30  ;;  %v745_v29 = vld [vmem:[%s1924_s1 + $0x1d8] sm:$0xff] }
  0xed   :  { %v758_v40 = vadd.f32 %v694_v32, %v547_v36  ;;  %v774_v41 = vadd.f32 %v710_v35, %v587_v37  ;;  %v714_v36 = vld [vmem:[%s1924_s1 + $0xe0] sm:$0xff] }
  0xee   :  { %854 = vst.msk [vmem:[%s1925_s8 + $0x138] sm:$0xff] %vm814_vm5, %v789_v38 }
  0xef   :  { %870 = vst.msk [vmem:[%s1925_s8 + $0x1b8] sm:$0xff] %vm814_vm5, %v805_v39 }
  0xf0   :  { %823 = vst.msk [vmem:[%s1925_s8 + $0x40] sm:$0xff] %vm814_vm5, %v758_v40 }
  0xf1   :  { %839 = vst.msk [vmem:[%s1925_s8 + $0xc0] sm:$0xff] %vm814_vm5, %v774_v41  ;;  %v626_v42 = vpop.f32.mrf.mxu2  ;;  %v666_v44 = vpop.f32.mrf.mxu3 }
  0xf2   :  { %v627_v46 = vadd.f32 %v1403_v48, %v626_v42  ;;  %v667_v47 = vadd.f32 %v1403_v48, %v666_v44  ;;  %v548_v49 = vpop.f32.mrf.mxu0  ;;  %v588_v51 = vpop.f32.mrf.mxu1  ;;  %v730_v44 = vld [vmem:[%s1924_s1 + $0x160] sm:$0xff] }
  0xf3   :  { %v549_v53 = vadd.f32 %v1403_v48, %v548_v49  ;;  %v589_v54 = vadd.f32 %v1403_v48, %v588_v51  ;;  %v699_v51 = vld [vmem:[%s1924_s1 + $0x68] sm:$0xff] }
  0xf4   :  { %v790_v55 = vadd.f32 %v726_v43, %v627_v46  ;;  %v806_v56 = vadd.f32 %v742_v45, %v667_v47  ;;  %v746_v46 = vld [vmem:[%s1924_s1 + $0x1e0] sm:$0xff] }
  0xf5   :  { %v759_v57 = vadd.f32 %v695_v50, %v549_v53  ;;  %v775_v58 = vadd.f32 %v711_v52, %v589_v54  ;;  %v715_v53 = vld [vmem:[%s1924_s1 + $0xe8] sm:$0xff] }
  0xf6   :  { %855 = vst.msk [vmem:[%s1925_s8 + $0x140] sm:$0xff] %vm814_vm5, %v790_v55 }
  0xf7   :  { %871 = vst.msk [vmem:[%s1925_s8 + $0x1c0] sm:$0xff] %vm814_vm5, %v806_v56 }
  0xf8   :  { %824 = vst.msk [vmem:[%s1925_s8 + $0x48] sm:$0xff] %vm814_vm5, %v759_v57 }
  0xf9   :  { %840 = vst.msk [vmem:[%s1925_s8 + $0xc8] sm:$0xff] %vm814_vm5, %v775_v58  ;;  %v628_v59 = vpop.f32.mrf.mxu2  ;;  %v668_v61 = vpop.f32.mrf.mxu3 }
  0xfa   :  { %v629_v63 = vadd.f32 %v1403_v48, %v628_v59  ;;  %v669_v0 = vadd.f32 %v1403_v48, %v668_v61  ;;  %v551_v1 = vpop.f32.mrf.mxu0  ;;  %v591_v3 = vpop.f32.mrf.mxu1  ;;  %v731_v61 = vld [vmem:[%s1924_s1 + $0x168] sm:$0xff] }
  0xfb   :  { %v552_v5 = vadd.f32 %v1403_v48, %v551_v1  ;;  %v592_v6 = vadd.f32 %v1403_v48, %v591_v3  ;;  %v700_v3 = vld [vmem:[%s1924_s1 + $0x70] sm:$0xff] }
  0xfc   :  { %v791_v7 = vadd.f32 %v727_v60, %v629_v63  ;;  %v807_v8 = vadd.f32 %v743_v62, %v669_v0  ;;  %v747_v63 = vld [vmem:[%s1924_s1 + $0x1e8] sm:$0xff] }
  0xfd   :  { %v760_v9 = vadd.f32 %v696_v2, %v552_v5  ;;  %v776_v10 = vadd.f32 %v712_v4, %v592_v6  ;;  %v716_v5 = vld [vmem:[%s1924_s1 + $0xf0] sm:$0xff] }
  0xfe   :  { %856 = vst.msk [vmem:[%s1925_s8 + $0x148] sm:$0xff] %vm814_vm5, %v791_v7 }
  0xff   :  { %872 = vst.msk [vmem:[%s1925_s8 + $0x1c8] sm:$0xff] %vm814_vm5, %v807_v8 }
 0x100   :  { %825 = vst.msk [vmem:[%s1925_s8 + $0x50] sm:$0xff] %vm814_vm5, %v760_v9 }
 0x101   :  { %841 = vst.msk [vmem:[%s1925_s8 + $0xd0] sm:$0xff] %vm814_vm5, %v776_v10  ;;  %v631_v11 = vpop.f32.mrf.mxu2  ;;  %v671_v13 = vpop.f32.mrf.mxu3 }
 0x102   :  { %v632_v15 = vadd.f32 %v1403_v48, %v631_v11  ;;  %v672_v16 = vadd.f32 %v1403_v48, %v671_v13  ;;  %v553_v17 = vpop.f32.mrf.mxu0  ;;  %v593_v19 = vpop.f32.mrf.mxu1  ;;  %v732_v13 = vld [vmem:[%s1924_s1 + $0x170] sm:$0xff] }
 0x103   :  { %v554_v21 = vadd.f32 %v1403_v48, %v553_v17  ;;  %v594_v22 = vadd.f32 %v1403_v48, %v593_v19  ;;  %v701_v19 = vld [vmem:[%s1924_s1 + $0x78] sm:$0xff] }
 0x104   :  { %v792_v33 = vadd.f32 %v728_v12, %v632_v15  ;;  %v808_v23 = vadd.f32 %v744_v14, %v672_v16  ;;  %v748_v15 = vld [vmem:[%s1924_s1 + $0x1f0] sm:$0xff] }
 0x105   :  { %v761_v24 = vadd.f32 %v697_v18, %v554_v21  ;;  %v777_v25 = vadd.f32 %v713_v20, %v594_v22  ;;  %v717_v21 = vld [vmem:[%s1924_s1 + $0xf8] sm:$0xff] }
 0x106   :  { %857 = vst.msk [vmem:[%s1925_s8 + $0x150] sm:$0xff] %vm814_vm5, %v792_v33 }
 0x107   :  { %873 = vst.msk [vmem:[%s1925_s8 + $0x1d0] sm:$0xff] %vm814_vm5, %v808_v23 }
 0x108   :  { %826 = vst.msk [vmem:[%s1925_s8 + $0x58] sm:$0xff] %vm814_vm5, %v761_v24 }
 0x109   :  { %842 = vst.msk [vmem:[%s1925_s8 + $0xd8] sm:$0xff] %vm814_vm5, %v777_v25  ;;  %v633_v26 = vpop.f32.mrf.mxu2  ;;  %v673_v28 = vpop.f32.mrf.mxu3 }
 0x10a   :  { %v634_v30 = vadd.f32 %v1403_v48, %v633_v26  ;;  %v674_v31 = vadd.f32 %v1403_v48, %v673_v28  ;;  %v556_v32 = vpop.f32.mrf.mxu0  ;;  %v596_v35 = vpop.f32.mrf.mxu1  ;;  %v733_v28 = vld [vmem:[%s1924_s1 + $0x178] sm:$0xff] }
 0x10b   :  { %v557_v37 = vadd.f32 %v1403_v48, %v556_v32  ;;  %v597_v38 = vadd.f32 %v1403_v48, %v596_v35 }
 0x10c   :  { %v793_v39 = vadd.f32 %v729_v27, %v634_v30  ;;  %v809_v40 = vadd.f32 %v745_v29, %v674_v31  ;;  %v749_v30 = vld [vmem:[%s1924_s1 + $0x1f8] sm:$0xff] }
 0x10d   :  { %v762_v41 = vadd.f32 %v698_v34, %v557_v37  ;;  %v778_v42 = vadd.f32 %v714_v36, %v597_v38 }
 0x10e   :  { %858 = vst.msk [vmem:[%s1925_s8 + $0x158] sm:$0xff] %vm814_vm5, %v793_v39 }
 0x10f   :  { %874 = vst.msk [vmem:[%s1925_s8 + $0x1d8] sm:$0xff] %vm814_vm5, %v809_v40 }
 0x110   :  { %827 = vst.msk [vmem:[%s1925_s8 + $0x60] sm:$0xff] %vm814_vm5, %v762_v41 }
 0x111   :  { %843 = vst.msk [vmem:[%s1925_s8 + $0xe0] sm:$0xff] %vm814_vm5, %v778_v42  ;;  %v636_v43 = vpop.f32.mrf.mxu2  ;;  %v676_v45 = vpop.f32.mrf.mxu3 }
 0x112   :  { %v637_v47 = vadd.f32 %v1403_v48, %v636_v43  ;;  %v677_v49 = vadd.f32 %v1403_v48, %v676_v45  ;;  %v558_v50 = vpop.f32.mrf.mxu0  ;;  %v598_v52 = vpop.f32.mrf.mxu1 }
 0x113   :  { %v559_v54 = vadd.f32 %v1403_v48, %v558_v50  ;;  %v599_v55 = vadd.f32 %v1403_v48, %v598_v52 }
 0x114   :  { %v794_v56 = vadd.f32 %v730_v44, %v637_v47  ;;  %v810_v57 = vadd.f32 %v746_v46, %v677_v49 }
 0x115   :  { %v763_v58 = vadd.f32 %v699_v51, %v559_v54  ;;  %v779_v59 = vadd.f32 %v715_v53, %v599_v55 }
 0x116   :  { %859 = vst.msk [vmem:[%s1925_s8 + $0x160] sm:$0xff] %vm814_vm5, %v794_v56 }
 0x117   :  { %875 = vst.msk [vmem:[%s1925_s8 + $0x1e0] sm:$0xff] %vm814_vm5, %v810_v57 }
 0x118   :  { %828 = vst.msk [vmem:[%s1925_s8 + $0x68] sm:$0xff] %vm814_vm5, %v763_v58 }
 0x119   :  { %844 = vst.msk [vmem:[%s1925_s8 + $0xe8] sm:$0xff] %vm814_vm5, %v779_v59  ;;  %v638_v60 = vpop.f32.mrf.mxu2  ;;  %v678_v62 = vpop.f32.mrf.mxu3 }
 0x11a   :  { %v639_v0 = vadd.f32 %v1403_v48, %v638_v60  ;;  %v679_v1 = vadd.f32 %v1403_v48, %v678_v62  ;;  %v561_v2 = vpop.f32.mrf.mxu0  ;;  %v601_v4 = vpop.f32.mrf.mxu1 }
 0x11b   :  { %v562_v6 = vadd.f32 %v1403_v48, %v561_v2  ;;  %v602_v7 = vadd.f32 %v1403_v48, %v601_v4 }
 0x11c   :  { %v795_v8 = vadd.f32 %v731_v61, %v639_v0  ;;  %v811_v9 = vadd.f32 %v747_v63, %v679_v1 }
 0x11d   :  { %v764_v10 = vadd.f32 %v700_v3, %v562_v6  ;;  %v780_v11 = vadd.f32 %v716_v5, %v602_v7 }
 0x11e   :  { %860 = vst.msk [vmem:[%s1925_s8 + $0x168] sm:$0xff] %vm814_vm5, %v795_v8 }
 0x11f   :  { %876 = vst.msk [vmem:[%s1925_s8 + $0x1e8] sm:$0xff] %vm814_vm5, %v811_v9 }
 0x120   :  { %829 = vst.msk [vmem:[%s1925_s8 + $0x70] sm:$0xff] %vm814_vm5, %v764_v10 }
 0x121   :  { %845 = vst.msk [vmem:[%s1925_s8 + $0xf0] sm:$0xff] %vm814_vm5, %v780_v11  ;;  %v641_v12 = vpop.f32.mrf.mxu2  ;;  %v681_v14 = vpop.f32.mrf.mxu3 }
 0x122   :  { %v642_v16 = vadd.f32 %v1403_v48, %v641_v12  ;;  %v682_v17 = vadd.f32 %v1403_v48, %v681_v14  ;;  %v563_v18 = vpop.f32.mrf.mxu0  ;;  %v603_v20 = vpop.f32.mrf.mxu1 }
 0x123   :  { %v564_v22 = vadd.f32 %v1403_v48, %v563_v18  ;;  %v604_v33 = vadd.f32 %v1403_v48, %v603_v20 }
 0x124   :  { %v796_v23 = vadd.f32 %v732_v13, %v642_v16  ;;  %v812_v24 = vadd.f32 %v748_v15, %v682_v17 }
 0x125   :  { %v765_v25 = vadd.f32 %v701_v19, %v564_v22  ;;  %v781_v26 = vadd.f32 %v717_v21, %v604_v33 }
 0x126   :  { %861 = vst.msk [vmem:[%s1925_s8 + $0x170] sm:$0xff] %vm814_vm5, %v796_v23 }
 0x127   :  { %877 = vst.msk [vmem:[%s1925_s8 + $0x1f0] sm:$0xff] %vm814_vm5, %v812_v24 }
 0x128   :  { %830 = vst.msk [vmem:[%s1925_s8 + $0x78] sm:$0xff] %vm814_vm5, %v765_v25 }
 0x129   :  { %846 = vst.msk [vmem:[%s1925_s8 + $0xf8] sm:$0xff] %vm814_vm5, %v781_v26  ;;  %v643_v27 = vpop.f32.mrf.mxu2  ;;  %v683_v29 = vpop.f32.mrf.mxu3 }
 0x12a   :  { %v644_v31 = vadd.f32 %v1403_v48, %v643_v27  ;;  %v684_v32 = vadd.f32 %v1403_v48, %v683_v29 }
 0x12c   :  { %v797_v34 = vadd.f32 %v733_v28, %v644_v31  ;;  %v813_v35 = vadd.f32 %v749_v30, %v684_v32 }
 0x12e   :  { %862 = vst.msk [vmem:[%s1925_s8 + $0x178] sm:$0xff] %vm814_vm5, %v797_v34 }
 0x12f   :  { %878 = vst.msk [vmem:[%s1925_s8 + $0x1f8] sm:$0xff] %vm814_vm5, %v813_v35 }

// kernel: bottleneck_forward.6
= control target key start
LH: loop header
LB: loop body
LE: loop exit
PB: predicated region body
PF: predicated region fallthrough
CT: control target
= control target key end

     0   :  { %s5102_s27 = smov 0   ;;  %s7007_s0 = inlined_call_operand.vmem [shape: bf16[512,4], index: 0, kind: input, shape index: {}]   ;;  %s7008_s1 = inlined_call_operand.vmem [shape: f32[1,4], index: 1, kind: input, shape index: {}]   ;;  %s7009_s2 = inlined_call_operand.vmem [shape: f32[1,4], index: 2, kind: input, shape index: {}]   ;;  %s7010_s3 = inlined_call_operand.vmem [shape: f32[1,4], index: 3, kind: input, shape index: {}]   ;;  %s7011_s4 = inlined_call_operand.vmem [shape: f32[1,4], index: 4, kind: input, shape index: {}]   ;;  %s7012_s5 = inlined_call_operand.vmem [shape: bf16[36,4], index: 5, kind: input, shape index: {}]   ;;  %s7013_s6 = inlined_call_operand.vmem [shape: bf16[512,4], index: 6, kind: output, shape index: {0}]   ;;  %s7014_s7 = inlined_call_operand.vmem [shape: f32[1,4], index: 7, kind: output, shape index: {1}]   ;;  %s7015_s8 = inlined_call_operand.vmem [shape: f32[1,4], index: 8, kind: output, shape index: {2}]  }
   0x1 LB: > { %s4765_s28 = sadd.s32 4294967295, %s5045_s27   ;;  %p4769_p0 = scmp.ge.s32.totalorder %s5045_s27, 1  ;;  %s5045_s27 = sphi %s5102_s27, %s19_s27  }
   0x2   : > { %p258_p1 = scmp.lt.s32.totalorder %s5045_s27, 3 }
   0x4   : > { %p259_p2 = pnand %p4769_p0, %p258_p1 }
   0x5   : > { %s4770_s29 = sshll.u32 (!%p259_p2), %s4765_s28, 5  ;;  %p4774_p4 = scmp.ne.s32.totalorder (!%p259_p2), %s4765_s28, 0 }
   0x6   : > { %262 = sbr.rel (%p259_p2) target bundleno = 1141 (0x475), region = 44  ;;  %p293_p3 = scmp.lt.s32.totalorder (!%p259_p2), %s4770_s29, 63 }
   0xb   : > { %s7027_s29 = smov (!%p293_p3, %s4770_s29), 63  ;;  %308 = sbr.rel (%p4774_p4) target bundleno = 73 (0x49), region = 48 }
   0xc   : > { %s4771_s30 = sshll.u32 %s7027_s29, 2 }
   0xd   : > { %s5113_s11 = scalar_lea.vmem %s7007_s0, %s4771_s30  ;;  %s5118_s14 = scalar_lea.vmem %s7013_s6, %s4771_s30 }
  0x10   : > { %vm309_vm0 = vcmask 24576   ;;  %vm312_vm1 = vcmask 27648   ;;  %v5047_v0 = vmov 0.0   ;;  %v5048_v1 = vmov 0  }
  0x11   : > { %310 = vst.msk [vmem:[%s7014_s7] sm:$0x1] %vm309_vm0, %v5047_v0 }
  0x12   : > { %311 = vst.msk [vmem:[%s7015_s8] sm:$0x1] %vm309_vm0, %v5047_v0 }
  0x13   : > { %313 = vst.msk [vmem:[#allocation2] sm:$0xf] %vm312_vm1, %v5048_v1 }
  0x14   : > { %314 = vst.msk [vmem:[#allocation2 + $0x4] sm:$0xf] %vm312_vm1, %v5048_v1 }
  0x15   : > { %315 = vst.msk [vmem:[#allocation2 + $0x8] sm:$0x1] %vm309_vm0, %v5048_v1 }
  0x16   : > { %316 = vst.msk [vmem:[#allocation2 + $0xc] sm:$0xf] %vm312_vm1, %v5048_v1 }
  0x17   : > { %317 = vst.msk [vmem:[#allocation2 + $0x10] sm:$0xf] %vm312_vm1, %v5048_v1 }
  0x18   : > { %318 = vst.msk [vmem:[#allocation2 + $0x14] sm:$0x1] %vm309_vm0, %v5048_v1 }
  0x19   : > { %319 = vst.msk [vmem:[#allocation2 + $0x18] sm:$0xf] %vm312_vm1, %v5048_v1 }
  0x1a   : > { %320 = vst.msk [vmem:[#allocation2 + $0x1c] sm:$0xf] %vm312_vm1, %v5048_v1 }
  0x1b   : > { %321 = vst.msk [vmem:[#allocation2 + $0x20] sm:$0x1] %vm309_vm0, %v5048_v1 }
  0x1c   : > { %322 = vst.msk [vmem:[#allocation2 + $0x24] sm:$0xf] %vm312_vm1, %v5048_v1 }
  0x1d   : > { %323 = vst.msk [vmem:[#allocation2 + $0x28] sm:$0xf] %vm312_vm1, %v5048_v1 }
  0x1e   : > { %324 = vst.msk [vmem:[#allocation2 + $0x2c] sm:$0x1] %vm309_vm0, %v5048_v1 }
  0x1f   : > { %325 = vst.msk [vmem:[#allocation2 + $0x30] sm:$0xf] %vm312_vm1, %v5048_v1 }
  0x20   : > { %326 = vst.msk [vmem:[#allocation2 + $0x34] sm:$0xf] %vm312_vm1, %v5048_v1 }
  0x21   : > { %327 = vst.msk [vmem:[#allocation2 + $0x38] sm:$0x1] %vm309_vm0, %v5048_v1 }
  0x22   : > { %328 = vst.msk [vmem:[#allocation2 + $0x3c] sm:$0xf] %vm312_vm1, %v5048_v1 }
  0x23   : > { %329 = vst.msk [vmem:[#allocation2 + $0x40] sm:$0xf] %vm312_vm1, %v5048_v1 }
  0x24   : > { %330 = vst.msk [vmem:[#allocation2 + $0x44] sm:$0x1] %vm309_vm0, %v5048_v1 }
  0x25   : > { %331 = vst.msk [vmem:[#allocation2 + $0x48] sm:$0xf] %vm312_vm1, %v5048_v1 }
  0x26   : > { %332 = vst.msk [vmem:[#allocation2 + $0x4c] sm:$0xf] %vm312_vm1, %v5048_v1 }
  0x27   : > { %333 = vst.msk [vmem:[#allocation2 + $0x50] sm:$0x1] %vm309_vm0, %v5048_v1 }
  0x28   : > { %334 = vst.msk [vmem:[#allocation2 + $0x54] sm:$0xf] %vm312_vm1, %v5048_v1 }
  0x29   : > { %335 = vst.msk [vmem:[#allocation2 + $0x58] sm:$0xf] %vm312_vm1, %v5048_v1 }
  0x2a   : > { %336 = vst.msk [vmem:[#allocation2 + $0x5c] sm:$0x1] %vm309_vm0, %v5048_v1 }
  0x2b   : > { %337 = vst.msk [vmem:[#allocation2 + $0x60] sm:$0xf] %vm312_vm1, %v5048_v1 }
  0x2c   : > { %338 = vst.msk [vmem:[#allocation2 + $0x64] sm:$0xf] %vm312_vm1, %v5048_v1 }
  0x2d   : > { %339 = vst.msk [vmem:[#allocation2 + $0x68] sm:$0x1] %vm309_vm0, %v5048_v1 }
  0x2e   : > { %340 = vst.msk [vmem:[#allocation2 + $0x6c] sm:$0xf] %vm312_vm1, %v5048_v1 }
  0x2f   : > { %341 = vst.msk [vmem:[#allocation2 + $0x70] sm:$0xf] %vm312_vm1, %v5048_v1 }
  0x30   : > { %342 = vst.msk [vmem:[#allocation2 + $0x74] sm:$0x1] %vm309_vm0, %v5048_v1 }
  0x31   : > { %343 = vst.msk [vmem:[#allocation2 + $0x78] sm:$0xf] %vm312_vm1, %v5048_v1 }
  0x32   : > { %344 = vst.msk [vmem:[#allocation2 + $0x7c] sm:$0xf] %vm312_vm1, %v5048_v1 }
  0x33   : > { %345 = vst.msk [vmem:[#allocation2 + $0x80] sm:$0x1] %vm309_vm0, %v5048_v1 }
  0x34   : > { %346 = vst.msk [vmem:[#allocation2 + $0x84] sm:$0xf] %vm312_vm1, %v5048_v1 }
  0x35   : > { %347 = vst.msk [vmem:[#allocation2 + $0x88] sm:$0xf] %vm312_vm1, %v5048_v1 }
  0x36   : > { %348 = vst.msk [vmem:[#allocation2 + $0x8c] sm:$0x1] %vm309_vm0, %v5048_v1 }
  0x37   : > { %349 = vst.msk [vmem:[#allocation2 + $0x90] sm:$0xf] %vm312_vm1, %v5048_v1 }
  0x38   : > { %350 = vst.msk [vmem:[#allocation2 + $0x94] sm:$0xf] %vm312_vm1, %v5048_v1 }
  0x39   : > { %351 = vst.msk [vmem:[#allocation2 + $0x98] sm:$0x1] %vm309_vm0, %v5048_v1 }
  0x3a   : > { %352 = vst.msk [vmem:[#allocation2 + $0x9c] sm:$0xf] %vm312_vm1, %v5048_v1 }
  0x3b   : > { %353 = vst.msk [vmem:[#allocation2 + $0xa0] sm:$0xf] %vm312_vm1, %v5048_v1 }
  0x3c   : > { %354 = vst.msk [vmem:[#allocation2 + $0xa4] sm:$0x1] %vm309_vm0, %v5048_v1 }
  0x3d   : > { %355 = vst.msk [vmem:[#allocation2 + $0xa8] sm:$0xf] %vm312_vm1, %v5048_v1 }
  0x3e   : > { %356 = vst.msk [vmem:[#allocation2 + $0xac] sm:$0xf] %vm312_vm1, %v5048_v1 }
  0x3f   : > { %357 = vst.msk [vmem:[#allocation2 + $0xb0] sm:$0x1] %vm309_vm0, %v5048_v1 }
  0x40   : > { %358 = vst.msk [vmem:[#allocation2 + $0xb4] sm:$0xf] %vm312_vm1, %v5048_v1 }
  0x41   : > { %359 = vst.msk [vmem:[#allocation2 + $0xb8] sm:$0xf] %vm312_vm1, %v5048_v1 }
  0x42   : > { %360 = vst.msk [vmem:[#allocation2 + $0xbc] sm:$0x1] %vm309_vm0, %v5048_v1 }
  0x43   : > { %361 = vst.msk [vmem:[#allocation2 + $0xc0] sm:$0xf] %vm312_vm1, %v5048_v1 }
  0x44   : > { %362 = vst.msk [vmem:[#allocation2 + $0xc4] sm:$0xf] %vm312_vm1, %v5048_v1 }
  0x45   : > { %363 = vst.msk [vmem:[#allocation2 + $0xc8] sm:$0x1] %vm309_vm0, %v5048_v1 }
  0x46   : > { %364 = vst.msk [vmem:[#allocation2 + $0xcc] sm:$0xf] %vm312_vm1, %v5048_v1 }
  0x47   : > { %365 = vst.msk [vmem:[#allocation2 + $0xd0] sm:$0xf] %vm312_vm1, %v5048_v1 }
  0x48   : > { %366 = vst.msk [vmem:[#allocation2 + $0xd4] sm:$0x1] %vm309_vm0, %v5048_v1 }
  0x49 PF: > { %v1094_v2 = vld [vmem:[#allocation2] sm:$0xf]  ;;  %v1095_v3 = vld [vmem:[#allocation2 + $0x4] sm:$0xf]  ;;  %vm1142_vm2 = vsmask.f32 3328 }
  0x4a   : > { %v1146_v4 = vshrl.u32 %v1094_v2, 16  ;;  %v1149_v5 = vshll.u32 %v1094_v2, 16  ;;  %v1155_v6 = vshll.u32 %v1095_v3, 16  ;;  %v1159_v7 = vshrl.u32 %v1095_v3, 16  ;;  %v431_v10 = vld [vmem:[%s7008_s1] sm:$0x1] }
  0x4b   : > { %vm1143_vm3 = vsmask.f32 7440  ;;  %v1096_v12 = vld [vmem:[#allocation2 + $0x8] sm:$0x1]  ;;  %v432_v13 = vmul.f32 0.001953125, %v431_v10  ;;  %s5049_s23 = smov 4  }
  0x4c   : > { %v1148_v8 = vrot.slane %v1146_v4, 4  ;;  %v1151_v9 = vrot.slane %v1149_v5, 5  ;;  %v1161_v11 = vrot.slane %v1159_v7, 4  ;;  %v433_v14 = vld [vmem:[%s7009_s2] sm:$0x1]  ;;  %v1157_v16 = vrot.slane %v1155_v6, 5  ;;  %vm5188_vm4 = vmor %vm1142_vm2, %vm1143_vm3 }
  0x4d   : > { %v434_v17 = vmul.f32 0.001953125, %v433_v14  ;;  %v435_v19 = vmul.f32 %v432_v13, %v432_v13  ;;  %v1165_v22 = vshll.u32 %v1096_v12, 16  ;;  %v4932_v35 = vld [vmem:[%s5113_s11] sm:$0xff]   ;;  %v4996_v38 = vld [vmem:[%s5113_s11 + $0x10] sm:$0xff]   ;;  %v4997_v39 = vld [vmem:[%s5113_s11 + $0x18] sm:$0xff]   ;;  %vm912_vm10 = vcmask 27648  }
  0x4e   : > { %v1152_v15 = vor.u32 %v1151_v9, %v1148_v8  ;;  %v1162_v21 = vor.u32 %v1161_v11, %v1157_v16  ;;  %v438_v36 = vld [vmem:[%s7010_s3] sm:$0x1]  ;;  %v4999_v40 = vld [vmem:[%s5113_s11 + $0x28] sm:$0xff]   ;;  %v4933_v43 = vunpack.c.l.bf16 %v4932_v35  ;;  %v4934_v44 = vunpack.c.h.bf16 %v4932_v35  ;;  %v5228_v5 = vld [vmem:[%s5113_s11 + $0x30] sm:$0xff]   ;;  %s5050_s29 = smov 8   ;;  %s5051_s30 = smov 12  }
  0x4f   : > { %v436_v23 = vsub.f32 %v434_v17, %v435_v19  ;;  %v1167_v27 = vrot.slane %v1165_v22, 5  ;;  %v4995_v42 = vld [vmem:[%s5113_s11 + $0x8] sm:$0xff]   ;;  %v4941_v46 = vunpack.c.l.bf16 %v4996_v38  ;;  %v451_v47 = vld [vmem:[%s7011_s4] sm:$0x1]  ;;  %v4942_v48 = vunpack.c.h.bf16 %v4996_v38  ;;  %s5052_s9 = smov 16   ;;  %s5053_s10 = smov 20  }
  0x50   : > { %v1153_v20 = vrot.slane %v1152_v15, 4  ;;  %v1163_v26 = vrot.slane %v1162_v21, 4  ;;  %v4945_v49 = vunpack.c.l.bf16 %v4997_v39  ;;  %v4946_v50 = vunpack.c.h.bf16 %v4997_v39  ;;  %v5219_v1 = vld [vmem:[%s5113_s11 + $0x20] sm:$0xff]   ;;  %s5055_s12 = smov 28   ;;  %s5056_s13 = smov 32  }
  0x51   : > { %v437_v25 = vmax.f32 %v436_v23, 0.0  ;;  %v4953_v51 = vunpack.c.l.bf16 %v4999_v40  ;;  %v4954_v54 = vunpack.c.h.bf16 %v4999_v40  ;;  %v4937_v55 = vunpack.c.l.bf16 %v4995_v42 }
  0x52   : > { %v1158_v24 = vsel %vm5188_vm4, %v1153_v20, %v1157_v16  ;;  %v1168_v29 = vsel %vm5188_vm4, %v1163_v26, %v1167_v27  ;;  %v4938_v56 = vunpack.c.h.bf16 %v4995_v42  ;;  %vm588_vm8 = vsmask.f32 256 }
  0x53   : > { %1529 = vrot.lane.b32.xlu0 %v1158_v24, %s5049_s23  ;;  %v439_v28 = vadd.f32 1e-05, %v437_v25  ;;  %vm589_vm9 = vsmask.f32 4368  ;;  %vm913_vm11 = vsmask.f32 7938  ;;  %v4949_v7 = vunpack.c.l.bf16 %v5219_v1 }
  0x54   : > { %vm920_vm12 = vcmask 24576   ;;  %v4957_v8 = vunpack.c.l.bf16 %v5228_v5  ;;  %v4958_v9 = vunpack.c.h.bf16 %v5228_v5  ;;  %vm5250_vm13 = vmor %vm588_vm8, %vm589_vm9  ;;  %vm1754_vm0 = vcmask 1042432  }
  0x55   : > { %5037 = vrsqrt.f32 %v439_v28  ;;  %vm446_vm5 = vweird.f32 %v439_v28  ;;  %vm5256_vm14 = vmand %vm912_vm10, %vm913_vm11  ;;  %vm1755_vm1 = vcmask 1046532   ;;  %vm1625_vm3 = vcmask 60448  }
  0x56   : > { %vm5263_vm15 = vmand %vm920_vm12, %vm588_vm8  ;;  %vm3056_vm8 = vcmask 191648   ;;  %vm4362_vm9 = vcmask 1041408   ;;  %vm3250_vm11 = vcmask 224448  }
  0x57   : > { %vm5676_vm2 = vmor %vm1754_vm0, %vm1755_vm1 }
  0x5b   : > { %1531 = vrot.lane.b32.xlu0 %v1168_v29, %s5049_s23  ;;  %v5038_v30 = vpop.eup %5037 }
  0x5c   : > { %v441_v31 = vmul.f32 %v5038_v30, %v439_v28  ;;  %vm447_vm6 = vweird.f32 %v5038_v30 }
  0x5d   : > { %vm448_vm7 = vmor %vm446_vm5, %vm447_vm6  ;;  %vm1965_vm5 = vcmask 93248   ;;  %vm2158_vm6 = vcmask 126048  }
  0x5e   : > { %v442_v32 = vmul.f32 %v5038_v30, %v441_v31 }
  0x60   : > { %v443_v33 = vmul.f32 0.5, %v442_v32 }
  0x62   : > { %v444_v34 = vsub.f32 1.5, %v443_v33 }
  0x64   : > { %v445_v37 = vmul.f32 %v5038_v30, %v444_v34 }
  0x66   : > { %v449_v41 = vsel %vm448_vm7, %v5038_v30, %v445_v37  ;;  %vm2719_vm7 = vcmask 158848  }
  0x67   : > { %v450_v45 = vmul.f32 %v449_v41, %v438_v36 }
  0x69   : > { %v452_v52 = vmul.f32 %v450_v45, %v432_v13  ;;  %v5209_v53 = vperm.slane %v450_v45, 0 }
  0x6b   : > { %v453_v57 = vsub.f32 %v451_v47, %v452_v52  ;;  %v457_v58 = vmul.f32 %v4933_v43, %v5209_v53  ;;  %v458_v59 = vmul.f32 %v4934_v44, %v5209_v53  ;;  %v461_v60 = vmul.f32 %v4941_v46, %v5209_v53  ;;  %v915_v47 = vld [vmem:[#allocation2 + $0xc] sm:$0xf] }
  0x6c   : > { %v462_v61 = vmul.f32 %v4942_v48, %v5209_v53  ;;  %v463_v62 = vmul.f32 %v4945_v49, %v5209_v53  ;;  %v464_v63 = vmul.f32 %v4946_v50, %v5209_v53  ;;  %v467_v0 = vmul.f32 %v4953_v51, %v5209_v53 }
  0x6d   : > { %v5221_v2 = vperm.slane %v453_v57, 0  ;;  %v468_v3 = vmul.f32 %v4954_v54, %v5209_v53  ;;  %v5225_v4 = vmul.f32 %v4937_v55, %v5209_v53  ;;  %v5231_v6 = vmul.f32 %v4938_v56, %v5209_v53  ;;  %v922_v54 = vld [vmem:[#allocation2 + $0x14] sm:$0x1] }
  0x6f   : > { %v492_v10 = vadd.f32 %v5221_v2, %v457_v58  ;;  %v493_v11 = vadd.f32 %v5221_v2, %v458_v59  ;;  %v496_v12 = vadd.f32 %v5221_v2, %v461_v60  ;;  %v497_v13 = vadd.f32 %v5221_v2, %v462_v61  ;;  %v932_v60 = vld [vmem:[#allocation2 + $0x24] sm:$0xf] }
  0x70   : > { %v498_v14 = vadd.f32 %v5221_v2, %v463_v62  ;;  %v499_v15 = vadd.f32 %v5221_v2, %v464_v63  ;;  %v502_v16 = vadd.f32 %v5221_v2, %v467_v0  ;;  %v503_v17 = vadd.f32 %v5221_v2, %v468_v3 }
  0x71   : > { %v524_v19 = vmax.f32 %v492_v10, 0.0  ;;  %v525_v20 = vmax.f32 %v493_v11, 0.0  ;;  %v528_v21 = vmax.f32 %v496_v12, 0.0  ;;  %v529_v22 = vmax.f32 %v497_v13, 0.0 }
  0x72   : > { %v530_v23 = vmax.f32 %v498_v14, 0.0  ;;  %v531_v24 = vmax.f32 %v499_v15, 0.0  ;;  %v534_v25 = vmax.f32 %v502_v16, 0.0  ;;  %v535_v26 = vmax.f32 %v503_v17, 0.0  ;;  %v936_v14 = vld [vmem:[#allocation2 + $0x2c] sm:$0x1] }
  0x73   : > { %v556_v27 = vpack.c.bf16 %v524_v19, %v524_v19  ;;  %v557_v28 = vpack.c.bf16 %v525_v20, %v525_v20  ;;  %v560_v29 = vpack.c.bf16 %v528_v21, %v528_v21  ;;  %v561_v30 = vpack.c.bf16 %v529_v22, %v529_v22  ;;  %v943_v19 = vld [vmem:[#allocation2 + $0x38] sm:$0x1] }
  0x74   : > { %v5244_v31 = vpack.c.bf16 %v530_v23, %v530_v23  ;;  %v563_v32 = vpack.c.bf16 %v531_v24, %v531_v24  ;;  %v566_v33 = vpack.c.bf16 %v534_v25, %v534_v25  ;;  %v5246_v34 = vpack.c.bf16 %v535_v26, %v535_v26 }
  0x75   : > { %v592_v35 = vshrl.u32 %v556_v27, 16  ;;  %v595_v36 = vshll.u32 %v556_v27, 16  ;;  %v600_v37 = vshrl.u32 %v557_v28, 16  ;;  %v603_v38 = vshll.u32 %v557_v28, 16  ;;  %v953_v28 = vld [vmem:[#allocation2 + $0x48] sm:$0xf] }
  0x76   : > { %v626_v40 = vshrl.u32 %v560_v29, 16  ;;  %v629_v41 = vshll.u32 %v560_v29, 16  ;;  %v634_v42 = vshrl.u32 %v561_v30, 16  ;;  %v637_v43 = vshll.u32 %v561_v30, 16 }
  0x77   : > { %v594_v44 = vrot.slane %v592_v35, 7  ;;  %v602_v45 = vrot.slane %v600_v37, 7  ;;  %v643_v48 = vshrl.u32 %v5244_v31, 16  ;;  %v651_v49 = vshrl.u32 %v563_v32, 16 }
  0x78   : > { %v628_v50 = vrot.slane %v626_v40, 7  ;;  %v636_v51 = vrot.slane %v634_v42, 7  ;;  %v654_v55 = vshll.u32 %v563_v32, 16  ;;  %v677_v56 = vshrl.u32 %v566_v33, 16 }
  0x79   : > { %v597_v57 = vor.u32 %v595_v36, %v594_v44  ;;  %v598_v58 = vrot.slane %v594_v44, 4  ;;  %v605_v59 = vor.u32 %v603_v38, %v602_v45  ;;  %v607_v61 = vrot.slane %v602_v45, 4 }
  0x7a   : > { %v631_v62 = vor.u32 %v629_v41, %v628_v50  ;;  %v632_v63 = vrot.slane %v628_v50, 4  ;;  %v639_v0 = vor.u32 %v637_v43, %v636_v51  ;;  %v5267_v3 = vrot.slane %v643_v48, 7 }
  0x7b   : > { %v606_v10 = vsel %vm5250_vm13, %v598_v58, %v605_v59  ;;  %v916_v11 = vsel %vm5256_vm14, %v597_v57, %v915_v47  ;;  %v923_v12 = vsel %vm5263_vm15, %v607_v61, %v922_v54  ;;  %v653_v13 = vrot.slane %v651_v49, 7 }
  0x7c   : > { %917 = vst [vmem:[#allocation2 + $0xc] sm:$0xf] %v916_v11  ;;  %v640_v15 = vsel %vm5250_vm13, %v632_v63, %v639_v0  ;;  %v933_v16 = vsel %vm5256_vm14, %v631_v62, %v932_v60  ;;  %v649_v17 = vrot.slane %v5267_v3, 4  ;;  %v641_v20 = vrot.slane %v636_v51, 4 }
  0x7d   : > { %919 = vst.msk [vmem:[#allocation2 + $0x10] sm:$0xf] %vm912_vm10, %v606_v10  ;;  %v656_v21 = vor.u32 %v654_v55, %v653_v13  ;;  %v658_v22 = vrot.slane %v653_v13, 4  ;;  %v679_v23 = vrot.slane %v677_v56, 7  ;;  %v680_v24 = vshll.u32 %v566_v33, 16 }
  0x7e   : > { %934 = vst [vmem:[#allocation2 + $0x24] sm:$0xf] %v933_v16  ;;  %v937_v25 = vsel %vm5263_vm15, %v641_v20, %v936_v14  ;;  %v685_v26 = vshrl.u32 %v5246_v34, 16  ;;  %v688_v27 = vshll.u32 %v5246_v34, 16  ;;  %v494_v29 = vadd.f32 %v5221_v2, %v5225_v4  ;;  %v5298_v4 = vld [vmem:[%s5113_s11 + $0x40] sm:$0xff]  }
  0x7f   : > { %935 = vst.msk [vmem:[#allocation2 + $0x28] sm:$0xf] %vm912_vm10, %v640_v15  ;;  %v657_v30 = vsel %vm5250_vm13, %v649_v17, %v656_v21  ;;  %v944_v32 = vsel %vm5263_vm15, %v658_v22, %v943_v19  ;;  %v682_v33 = vor.u32 %v680_v24, %v679_v23  ;;  %v683_v35 = vrot.slane %v679_v23, 4 }
  0x80   : > { %924 = vst [vmem:[#allocation2 + $0x14] sm:$0x1] %v923_v12  ;;  %v5292_v36 = vrot.slane %v685_v26, 7  ;;  %v495_v34 = vadd.f32 %v5221_v2, %v5231_v6  ;;  %v526_v37 = vmax.f32 %v494_v29, 0.0  ;;  %v4950_v38 = vunpack.c.h.bf16 %v5219_v1 }
  0x81   : > { %942 = vst.msk [vmem:[#allocation2 + $0x34] sm:$0xf] %vm912_vm10, %v657_v30  ;;  %v954_v40 = vsel %vm5256_vm14, %v682_v33, %v953_v28  ;;  %v465_v41 = vmul.f32 %v4949_v7, %v5209_v53  ;;  %v469_v42 = vmul.f32 %v4957_v8, %v5209_v53  ;;  %v470_v6 = vmul.f32 %v4958_v9, %v5209_v53 }
  0x82   : > { %945 = vst [vmem:[#allocation2 + $0x38] sm:$0x1] %v944_v32  ;;  %v690_v43 = vor.u32 %v688_v27, %v5292_v36  ;;  %v527_v44 = vmax.f32 %v495_v34, 0.0  ;;  %v5313_v45 = vpack.c.bf16 %v526_v37, %v526_v37  ;;  %v466_v47 = vmul.f32 %v4950_v38, %v5209_v53 }
  0x83   : > { %v1097_v48 = vld [vmem:[#allocation2 + $0xc] sm:$0xf]  ;;  %938 = vst [vmem:[#allocation2 + $0x2c] sm:$0x1] %v937_v25  ;;  %v5317_v1 = vadd.f32 %v5221_v2, %v465_v41  ;;  %v5320_v7 = vadd.f32 %v5221_v2, %v469_v42  ;;  %v5323_v8 = vadd.f32 %v5221_v2, %v470_v6  ;;  %v4965_v5 = vunpack.c.l.bf16 %v5298_v4 }
  0x84   : > { %v1098_v9 = vld [vmem:[#allocation2 + $0x10] sm:$0xf]  ;;  %v1170_v49 = vshrl.u32 %v1097_v48, 16  ;;  %v1173_v50 = vshll.u32 %v1097_v48, 16  ;;  %v691_v51 = vsel %vm5250_vm13, %v683_v35, %v690_v43  ;;  %955 = vst [vmem:[#allocation2 + $0x48] sm:$0xf] %v954_v40  ;;  %v5328_v54 = vpack.c.bf16 %v527_v44, %v527_v44 }
  0x85   : > { %v1179_v55 = vshll.u32 %v1098_v9, 16  ;;  %v1183_v56 = vshrl.u32 %v1098_v9, 16  ;;  %v1103_v57 = vld [vmem:[#allocation2 + $0x24] sm:$0xf]  ;;  %956 = vst.msk [vmem:[#allocation2 + $0x4c] sm:$0xf] %vm912_vm10, %v691_v51  ;;  %v5332_v58 = vadd.f32 %v5221_v2, %v466_v47  ;;  %v4966_v59 = vunpack.c.h.bf16 %v5298_v4 }
  0x86   : > { %v1172_v60 = vrot.slane %v1170_v49, 4  ;;  %v1175_v61 = vrot.slane %v1173_v50, 5  ;;  %v1104_v62 = vld [vmem:[#allocation2 + $0x28] sm:$0xf]  ;;  %v1218_v63 = vshrl.u32 %v1103_v57, 16  ;;  %v1221_v0 = vshll.u32 %v1103_v57, 16 }
  0x87   : > { %v1181_v10 = vrot.slane %v1179_v55, 5  ;;  %v1185_v11 = vrot.slane %v1183_v56, 4  ;;  %v1227_v12 = vshll.u32 %v1104_v62, 16  ;;  %v1231_v13 = vshrl.u32 %v1104_v62, 16  ;;  %v1099_v14 = vld [vmem:[#allocation2 + $0x14] sm:$0x1] }
  0x88   : > { %v1176_v15 = vor.u32 %v1175_v61, %v1172_v60  ;;  %v1220_v16 = vrot.slane %v1218_v63, 4  ;;  %v1223_v17 = vrot.slane %v1221_v0, 5  ;;  %v1189_v19 = vshll.u32 %v1099_v14, 16  ;;  %v1107_v20 = vld [vmem:[#allocation2 + $0x34] sm:$0xf] }
  0x89   : > { %v1229_v21 = vrot.slane %v1227_v12, 5  ;;  %v1186_v22 = vor.u32 %v1185_v11, %v1181_v10  ;;  %v1108_v23 = vld [vmem:[#allocation2 + $0x38] sm:$0x1]  ;;  %v1251_v24 = vshll.u32 %v1107_v20, 16  ;;  %v1255_v25 = vshrl.u32 %v1107_v20, 16 }
  0x8a   : > { %v1177_v26 = vrot.slane %v1176_v15, 4  ;;  %v1224_v27 = vor.u32 %v1223_v17, %v1220_v16  ;;  %v1191_v28 = vrot.slane %v1189_v19, 5  ;;  %v1261_v29 = vshll.u32 %v1108_v23, 16  ;;  %v1105_v30 = vld [vmem:[#allocation2 + $0x2c] sm:$0x1] }
  0x8b   : > { %v1187_v32 = vrot.slane %v1186_v22, 4  ;;  %v5335_v33 = vrot.slane %v1251_v24, 5  ;;  %v1257_v35 = vrot.slane %v1255_v25, 4  ;;  %v1233_v34 = vrot.slane %v1231_v13, 4  ;;  %v1112_v37 = vld [vmem:[#allocation2 + $0x48] sm:$0xf] }
  0x8c   : > { %v1182_v38 = vsel %vm5188_vm4, %v1177_v26, %v1181_v10  ;;  %v1225_v40 = vrot.slane %v1224_v27, 4  ;;  %v1263_v41 = vrot.slane %v1261_v29, 5  ;;  %v1237_v42 = vshll.u32 %v1105_v30, 16  ;;  %v5339_v6 = vld [vmem:[#allocation2 + $0x4c] sm:$0xf] }
  0x8d   : > { %1533 = vrot.lane.b32.xlu1 %v1182_v38, %s5049_s23  ;;  %v1192_v43 = vsel %vm5188_vm4, %v1187_v32, %v1191_v28  ;;  %v1258_v44 = vor.u32 %v1257_v35, %v5335_v33  ;;  %v1234_v47 = vor.u32 %v1233_v34, %v1229_v21  ;;  %v1290_v48 = vshrl.u32 %v1112_v37, 16  ;;  %v929_v29 = vld [vmem:[#allocation2 + $0x20] sm:$0x1]  ;;  %v957_v30 = vld [vmem:[#allocation2 + $0x50] sm:$0x1] }
  0x8e   : > { %v1230_v9 = vsel %vm5188_vm4, %v1225_v40, %v1229_v21  ;;  %v5347_v49 = vrot.slane %v1237_v42, 5  ;;  %v1293_v50 = vshll.u32 %v1112_v37, 16  ;;  %v1299_v51 = vshll.u32 %v5339_v6, 16 }
  0x8f   : > { %1541 = vrot.lane.b32.xlu0 %v1230_v9, %s5049_s23  ;;  %v1259_v55 = vrot.slane %v1258_v44, 4  ;;  %v5351_v56 = vrot.slane %v1234_v47, 4  ;;  %v1292_v57 = vrot.slane %v1290_v48, 4  ;;  %v1303_v60 = vshrl.u32 %v5339_v6, 16 }
  0x90   : > { %v1295_v61 = vrot.slane %v1293_v50, 5  ;;  %v5354_v62 = vrot.slane %v1299_v51, 5  ;;  %v609_v63 = vshrl.u32 %v5313_v45, 16  ;;  %v612_v0 = vshll.u32 %v5313_v45, 16  ;;  %v925_v45 = vld [vmem:[#allocation2 + $0x18] sm:$0xf] }
  0x91   : > { %v1264_v10 = vsel %vm5188_vm4, %v1259_v55, %v1263_v41  ;;  %v1240_v11 = vsel %vm5188_vm4, %v5351_v56, %v5347_v49  ;;  %v617_v12 = vshrl.u32 %v5328_v54, 16  ;;  %v620_v13 = vshll.u32 %v5328_v54, 16 }
  0x92   : > { %v1296_v14 = vor.u32 %v1295_v61, %v1292_v57  ;;  %v611_v15 = vrot.slane %v609_v63, 7  ;;  %v532_v16 = vmax.f32 %v5317_v1, 0.0  ;;  %v533_v17 = vmax.f32 %v5332_v58, 0.0  ;;  %v964_v57 = vld [vmem:[#allocation2 + $0x5c] sm:$0x1] }
  0x93   : > { %v619_v19 = vrot.slane %v617_v12, 7  ;;  %v536_v20 = vmax.f32 %v5320_v7, 0.0  ;;  %v537_v21 = vmax.f32 %v5323_v8, 0.0  ;;  %v692_v22 = vrot.slane %v5292_v36, 4 }
  0x94   : > { %v1297_v23 = vrot.slane %v1296_v14, 4  ;;  %v614_v24 = vor.u32 %v612_v0, %v611_v15  ;;  %v615_v25 = vrot.slane %v611_v15, 4  ;;  %v564_v26 = vpack.c.bf16 %v532_v16, %v532_v16 }
  0x95   : > { %1535 = vrot.lane.b32.xlu1 %v1192_v43, %s5049_s23  ;;  %v622_v54 = vor.u32 %v620_v13, %v619_v19  ;;  %v565_v27 = vpack.c.bf16 %v533_v17, %v533_v17  ;;  %v5372_v28 = vpack.c.bf16 %v536_v20, %v536_v20  ;;  %v569_v1 = vpack.c.bf16 %v537_v21, %v537_v21  ;;  %v946_v43 = vld [vmem:[#allocation2 + $0x3c] sm:$0xf] }
  0x96   : > { %v1302_v58 = vsel %vm5188_vm4, %v1297_v23, %v5354_v62  ;;  %v926_v7 = vsel %vm5256_vm14, %v614_v24, %v925_v45  ;;  %v660_v8 = vshrl.u32 %v564_v26, 16  ;;  %v663_v36 = vshll.u32 %v564_v26, 16 }
  0x97   : > { %1547 = vrot.lane.b32.xlu0 %v1264_v10, %s5049_s23  ;;  %v623_v32 = vsel %vm5250_vm13, %v615_v25, %v622_v54  ;;  %927 = vst [vmem:[#allocation2 + $0x18] sm:$0xf] %v926_v7  ;;  %v668_v35 = vshrl.u32 %v565_v27, 16  ;;  %v671_v34 = vshll.u32 %v565_v27, 16  ;;  %v694_v37 = vshrl.u32 %v5372_v28, 16 }
  0x98   : > { %928 = vst.msk [vmem:[#allocation2 + $0x1c] sm:$0xf] %vm912_vm10, %v623_v32  ;;  %v662_v38 = vrot.slane %v660_v8, 7  ;;  %v702_v40 = vshrl.u32 %v569_v1, 16  ;;  %v705_v41 = vshll.u32 %v569_v1, 16  ;;  %v624_v42 = vrot.slane %v619_v19, 4 }
  0x99   : > { %v5384_v6 = vrot.slane %v668_v35, 7  ;;  %v5386_v44 = vrot.slane %v694_v37, 7  ;;  %v958_v47 = vsel %vm5263_vm15, %v692_v22, %v957_v30  ;;  %v1305_v48 = vrot.slane %v1303_v60, 4  ;;  %v5001_v60 = vld [vmem:[%s5113_s11 + $0x38] sm:$0xff]  }
  0x9a   : > { %v665_v9 = vor.u32 %v663_v36, %v662_v38  ;;  %v666_v49 = vrot.slane %v662_v38, 4  ;;  %v704_v50 = vrot.slane %v702_v40, 7  ;;  %v930_v51 = vsel %vm5263_vm15, %v624_v42, %v929_v29  ;;  %959 = vst [vmem:[#allocation2 + $0x50] sm:$0x1] %v958_v47 }
  0x9b   : > { %v673_v55 = vor.u32 %v671_v34, %v5384_v6  ;;  %v700_v56 = vrot.slane %v5386_v44, 4  ;;  %931 = vst [vmem:[#allocation2 + $0x20] sm:$0x1] %v930_v51  ;;  %v1306_v61 = vor.u32 %v1305_v48, %v5354_v62  ;;  %v473_v63 = vmul.f32 %v4965_v5, %v5209_v53 }
  0x9c   : > { %v947_v0 = vsel %vm5256_vm14, %v665_v9, %v946_v43  ;;  %v707_v10 = vor.u32 %v705_v41, %v704_v50  ;;  %v709_v12 = vrot.slane %v704_v50, 4  ;;  %v474_v13 = vmul.f32 %v4966_v59, %v5209_v53 }
  0x9d   : > { %1543 = vrot.lane.b32.xlu1 %v1240_v11, %s5049_s23  ;;  %v674_v14 = vsel %vm5250_vm13, %v666_v49, %v673_v55  ;;  %948 = vst [vmem:[#allocation2 + $0x3c] sm:$0xf] %v947_v0  ;;  %v5407_v62 = vrot.slane %v1306_v61, 4  ;;  %v508_v5 = vadd.f32 %v5221_v2, %v473_v63  ;;  %v646_v15 = vshll.u32 %v5244_v31, 16  ;;  %v939_v11 = vld [vmem:[#allocation2 + $0x30] sm:$0xf] }
  0x9e   : > { %v1100_v16 = vld [vmem:[#allocation2 + $0x18] sm:$0xf]  ;;  %949 = vst.msk [vmem:[#allocation2 + $0x40] sm:$0xf] %vm912_vm10, %v674_v14  ;;  %v708_v17 = vsel %vm5250_vm13, %v700_v56, %v707_v10  ;;  %v965_v4 = vsel %vm5263_vm15, %v709_v12, %v964_v57  ;;  %v509_v59 = vadd.f32 %v5221_v2, %v474_v13  ;;  %v4961_v19 = vunpack.c.l.bf16 %v5001_v60 }
  0x9f   : > { %1553 = vrot.lane.b32.xlu0 %v1302_v58, %s5049_s23  ;;  %v1101_v45 = vld [vmem:[#allocation2 + $0x1c] sm:$0xf]  ;;  %v1194_v20 = vshrl.u32 %v1100_v16, 16  ;;  %v1197_v21 = vshll.u32 %v1100_v16, 16  ;;  %963 = vst.msk [vmem:[#allocation2 + $0x58] sm:$0xf] %vm912_vm10, %v708_v17  ;;  %v648_v31 = vor.u32 %v646_v15, %v5267_v3  ;;  %v4962_v22 = vunpack.c.h.bf16 %v5001_v60 }
  0xa0   : > { %v1203_v23 = vshll.u32 %v1101_v45, 16  ;;  %v1207_v24 = vshrl.u32 %v1101_v45, 16  ;;  %966 = vst [vmem:[#allocation2 + $0x5c] sm:$0x1] %v965_v4  ;;  %v540_v25 = vmax.f32 %v508_v5, 0.0  ;;  %v541_v26 = vmax.f32 %v509_v59, 0.0 }
  0xa1   : > { %v1196_v54 = vrot.slane %v1194_v20, 4  ;;  %v1199_v27 = vrot.slane %v1197_v21, 5  ;;  %v1114_v1 = vld [vmem:[#allocation2 + $0x50] sm:$0x1]  ;;  %v940_v7 = vsel %vm5256_vm14, %v648_v31, %v939_v11  ;;  %v471_v58 = vmul.f32 %v4961_v19, %v5209_v53  ;;  %v974_v11 = vld [vmem:[#allocation2 + $0x6c] sm:$0xf] }
  0xa2   : > { %v1205_v8 = vrot.slane %v1203_v23, 5  ;;  %v1209_v36 = vrot.slane %v1207_v24, 4  ;;  %v1102_v29 = vld [vmem:[#allocation2 + $0x20] sm:$0x1]  ;;  %v1309_v30 = vshll.u32 %v1114_v1, 16  ;;  %v572_v32 = vpack.c.bf16 %v540_v25, %v540_v25 }
  0xa3   : > { %v1200_v3 = vor.u32 %v1199_v27, %v1196_v54  ;;  %v1213_v35 = vshll.u32 %v1102_v29, 16  ;;  %v573_v34 = vpack.c.bf16 %v541_v26, %v541_v26  ;;  %941 = vst [vmem:[#allocation2 + $0x30] sm:$0xf] %v940_v7  ;;  %v472_v37 = vmul.f32 %v4962_v22, %v5209_v53  ;;  %v5003_v7 = vld [vmem:[%s5113_s11 + $0x48] sm:$0xff]  }
  0xa4   : > { %v1109_v38 = vld [vmem:[#allocation2 + $0x3c] sm:$0xf]  ;;  %v1210_v40 = vor.u32 %v1209_v36, %v1205_v8  ;;  %v5424_v41 = vrot.slane %v1309_v30, 5  ;;  %v728_v42 = vshrl.u32 %v572_v32, 16  ;;  %v731_v43 = vshll.u32 %v572_v32, 16 }
  0xa5   : > { %v1201_v47 = vrot.slane %v1200_v3, 4  ;;  %v5426_v48 = vld [vmem:[#allocation2 + $0x40] sm:$0xf]  ;;  %v1266_v9 = vshrl.u32 %v1109_v38, 16  ;;  %v1269_v49 = vshll.u32 %v1109_v38, 16  ;;  %v1215_v50 = vrot.slane %v1213_v35, 5 }
  0xa6   : > { %v1275_v51 = vshll.u32 %v5426_v48, 16  ;;  %v1279_v55 = vshrl.u32 %v5426_v48, 16  ;;  %v1116_v56 = vld [vmem:[#allocation2 + $0x58] sm:$0xf]  ;;  %v1211_v57 = vrot.slane %v1210_v40, 4  ;;  %v1312_v61 = vsel %vm5188_vm4, %v5407_v62, %v5424_v41 }
  0xa7   : > { %v1206_v63 = vsel %vm5188_vm4, %v1201_v47, %v1205_v8  ;;  %v1268_v60 = vrot.slane %v1266_v9, 4  ;;  %v1271_v0 = vrot.slane %v1269_v49, 5  ;;  %v1117_v10 = vld [vmem:[#allocation2 + $0x5c] sm:$0x1]  ;;  %v1323_v12 = vshll.u32 %v1116_v56, 16 }
  0xa8   : > { %1537 = vrot.lane.b32.xlu2 %v1206_v63, %s5049_s23  ;;  %v5437_v13 = vrot.slane %v1275_v51, 5  ;;  %v1327_v14 = vshrl.u32 %v1116_v56, 16  ;;  %v1333_v5 = vshll.u32 %v1117_v10, 16  ;;  %v1216_v15 = vsel %vm5188_vm4, %v1211_v57, %v1215_v50  ;;  %v5005_v63 = vld [vmem:[%s5113_s11 + $0x58] sm:$0xff]  }
  0xa9   : > { %v1272_v16 = vor.u32 %v1271_v0, %v1268_v60  ;;  %v5441_v17 = vrot.slane %v1323_v12, 5  ;;  %v730_v4 = vrot.slane %v728_v42, 7  ;;  %v736_v59 = vshrl.u32 %v573_v34, 16  ;;  %v950_v42 = vld [vmem:[#allocation2 + $0x44] sm:$0x1] }
  0xaa   : > { %v1329_v19 = vrot.slane %v1327_v14, 4  ;;  %v1335_v45 = vrot.slane %v1333_v5, 5  ;;  %v739_v20 = vshll.u32 %v573_v34, 16  ;;  %v1106_v21 = vld [vmem:[#allocation2 + $0x30] sm:$0xf]  ;;  %v506_v31 = vadd.f32 %v5221_v2, %v471_v58 }
  0xab   : > { %v1273_v22 = vrot.slane %v1272_v16, 4  ;;  %v733_v23 = vor.u32 %v731_v43, %v730_v4  ;;  %v734_v24 = vrot.slane %v730_v4, 4  ;;  %v5444_v25 = vrot.slane %v736_v59, 7  ;;  %v967_v59 = vld [vmem:[#allocation2 + $0x60] sm:$0xf] }
  0xac   : > { %v1330_v26 = vor.u32 %v1329_v19, %v5441_v17  ;;  %v1242_v54 = vshrl.u32 %v1106_v21, 16  ;;  %v1245_v27 = vshll.u32 %v1106_v21, 16  ;;  %v507_v1 = vadd.f32 %v5221_v2, %v472_v37  ;;  %v978_v19 = vld [vmem:[#allocation2 + $0x74] sm:$0x1] }
  0xad   : > { %v1278_v8 = vsel %vm5188_vm4, %v1273_v22, %v5437_v13  ;;  %v741_v36 = vor.u32 %v739_v20, %v5444_v25  ;;  %v975_v58 = vsel %vm5256_vm14, %v733_v23, %v974_v11  ;;  %v538_v29 = vmax.f32 %v506_v31, 0.0 }
  0xae   : > { %1549 = vrot.lane.b32.xlu1 %v1278_v8, %s5049_s23  ;;  %v1331_v30 = vrot.slane %v1330_v26, 4  ;;  %976 = vst [vmem:[#allocation2 + $0x6c] sm:$0xf] %v975_v58  ;;  %v1244_v32 = vrot.slane %v1242_v54, 4  ;;  %v1247_v3 = vrot.slane %v1245_v27, 5  ;;  %v539_v35 = vmax.f32 %v507_v1, 0.0 }
  0xaf   : > { %v742_v34 = vsel %vm5250_vm13, %v734_v24, %v741_v36  ;;  %v570_v37 = vpack.c.bf16 %v538_v29, %v538_v29  ;;  %v4969_v38 = vunpack.c.l.bf16 %v5003_v7  ;;  %v4970_v40 = vunpack.c.h.bf16 %v5003_v7 }
  0xb0   : > { %v1336_v43 = vsel %vm5188_vm4, %v1331_v30, %v1335_v45  ;;  %1539 = vrot.lane.b32.xlu2 %v1216_v15, %s5049_s23  ;;  %977 = vst.msk [vmem:[#allocation2 + $0x70] sm:$0xf] %vm912_vm10, %v742_v34  ;;  %v1248_v47 = vor.u32 %v1247_v3, %v1244_v32  ;;  %v571_v9 = vpack.c.bf16 %v539_v35, %v539_v35  ;;  %v675_v49 = vrot.slane %v5384_v6, 4 }
  0xb1   : > { %1559 = vrot.lane.b32.xlu0 %v1336_v43, %s5049_s23  ;;  %v711_v50 = vshrl.u32 %v570_v37, 16  ;;  %v714_v51 = vshll.u32 %v570_v37, 16  ;;  %v475_v56 = vmul.f32 %v4969_v38, %v5209_v53  ;;  %v476_v57 = vmul.f32 %v4970_v40, %v5209_v53  ;;  %v985_v43 = vld [vmem:[#allocation2 + $0x80] sm:$0x1] }
  0xb2   : > { %v1249_v60 = vrot.slane %v1248_v47, 4  ;;  %v719_v0 = vshrl.u32 %v571_v9, 16  ;;  %v722_v10 = vshll.u32 %v571_v9, 16  ;;  %v951_v12 = vsel %vm5263_vm15, %v675_v49, %v950_v42 }
  0xb3   : > { %v713_v14 = vrot.slane %v711_v50, 7  ;;  %v510_v5 = vadd.f32 %v5221_v2, %v475_v56  ;;  %v511_v6 = vadd.f32 %v5221_v2, %v476_v57  ;;  %952 = vst [vmem:[#allocation2 + $0x44] sm:$0x1] %v951_v12  ;;  %v1281_v15 = vrot.slane %v1279_v55, 4 }
  0xb4   : > { %v1254_v16 = vsel %vm5188_vm4, %v1249_v60, %v5335_v33  ;;  %v5476_v4 = vrot.slane %v719_v0, 7  ;;  %v743_v11 = vrot.slane %v5444_v25, 4  ;;  %v4977_v45 = vunpack.c.l.bf16 %v5005_v63 }
  0xb5   : > { %v1121_v20 = vld [vmem:[#allocation2 + $0x6c] sm:$0xf]  ;;  %v716_v21 = vor.u32 %v714_v51, %v713_v14  ;;  %v717_v31 = vrot.slane %v713_v14, 4  ;;  %v542_v22 = vmax.f32 %v510_v5, 0.0  ;;  %v543_v23 = vmax.f32 %v511_v6, 0.0  ;;  %v5006_v5 = vld [vmem:[%s5113_s11 + $0x60] sm:$0xff]  }
  0xb6   : > { %1555 = vrot.lane.b32.xlu1 %v1312_v61, %s5049_s23  ;;  %v1362_v33 = vshrl.u32 %v1121_v20, 16  ;;  %v1365_v48 = vshll.u32 %v1121_v20, 16  ;;  %v724_v55 = vor.u32 %v722_v10, %v5476_v4  ;;  %v1282_v24 = vor.u32 %v1281_v15, %v5437_v13  ;;  %v960_v14 = vld [vmem:[#allocation2 + $0x54] sm:$0xf] }
  0xb7   : > { %v1122_v25 = vld [vmem:[#allocation2 + $0x70] sm:$0xf]  ;;  %v968_v26 = vsel %vm5256_vm14, %v716_v21, %v967_v59  ;;  %v5489_v54 = vpack.c.bf16 %v542_v22, %v542_v22  ;;  %v575_v27 = vpack.c.bf16 %v543_v23, %v543_v23  ;;  %v979_v1 = vsel %vm5263_vm15, %v743_v11, %v978_v19 }
  0xb8   : > { %v1364_v7 = vrot.slane %v1362_v33, 4  ;;  %v1367_v8 = vrot.slane %v1365_v48, 5  ;;  %v1371_v62 = vshll.u32 %v1122_v25, 16  ;;  %v1375_v41 = vshrl.u32 %v1122_v25, 16  ;;  %1545 = vrot.lane.b32.xlu2 %v1254_v16, %s5049_s23  ;;  %969 = vst [vmem:[#allocation2 + $0x60] sm:$0xf] %v968_v26 }
  0xb9   : > { %v725_v61 = vsel %vm5250_vm13, %v717_v31, %v724_v55  ;;  %v745_v13 = vshrl.u32 %v5489_v54, 16  ;;  %v753_v36 = vshrl.u32 %v575_v27, 16  ;;  %v756_v58 = vshll.u32 %v575_v27, 16  ;;  %980 = vst [vmem:[#allocation2 + $0x74] sm:$0x1] %v979_v1 }
  0xba   : > { %v1368_v29 = vor.u32 %v1367_v8, %v1364_v7  ;;  %v1373_v30 = vrot.slane %v1371_v62, 5  ;;  %970 = vst.msk [vmem:[#allocation2 + $0x64] sm:$0xf] %vm912_vm10, %v725_v61  ;;  %v1111_v32 = vld [vmem:[#allocation2 + $0x44] sm:$0x1]  ;;  %v1283_v3 = vrot.slane %v1282_v24, 4  ;;  %v4978_v35 = vunpack.c.h.bf16 %v5005_v63 }
  0xbb   : > { %v5498_v34 = vrot.slane %v745_v13, 7  ;;  %v755_v37 = vrot.slane %v753_v36, 7  ;;  %v1285_v38 = vshll.u32 %v1111_v32, 16  ;;  %v1377_v40 = vrot.slane %v1375_v41, 4  ;;  %v5004_v63 = vld [vmem:[%s5113_s11 + $0x50] sm:$0xff]  }
  0xbc   : > { %v1369_v42 = vrot.slane %v1368_v29, 4  ;;  %v479_v47 = vmul.f32 %v4977_v45, %v5209_v53  ;;  %v480_v9 = vmul.f32 %v4978_v35, %v5209_v53  ;;  %v697_v49 = vshll.u32 %v5372_v28, 16 }
  0xbd   : > { %v751_v50 = vrot.slane %v5498_v34, 4  ;;  %v758_v51 = vor.u32 %v756_v58, %v755_v37  ;;  %v760_v56 = vrot.slane %v755_v37, 4  ;;  %v1287_v57 = vrot.slane %v1285_v38, 5 }
  0xbe   : > { %v1374_v60 = vsel %vm5188_vm4, %v1369_v42, %v1373_v30  ;;  %v1378_v0 = vor.u32 %v1377_v40, %v1373_v30  ;;  %v514_v10 = vadd.f32 %v5221_v2, %v479_v47  ;;  %v515_v12 = vadd.f32 %v5221_v2, %v480_v9 }
  0xbf   : > { %1565 = vrot.lane.b32.xlu0 %v1374_v60, %s5049_s23  ;;  %v1118_v6 = vld [vmem:[#allocation2 + $0x60] sm:$0xf]  ;;  %v759_v28 = vsel %vm5250_vm13, %v751_v50, %v758_v51  ;;  %v986_v15 = vsel %vm5263_vm15, %v760_v56, %v985_v43  ;;  %v1288_v16 = vsel %vm5188_vm4, %v1283_v3, %v1287_v57  ;;  %v699_v59 = vor.u32 %v697_v49, %v5386_v44 }
  0xc0   : > { %v1338_v11 = vshrl.u32 %v1118_v6, 16  ;;  %v1341_v19 = vshll.u32 %v1118_v6, 16  ;;  %984 = vst.msk [vmem:[#allocation2 + $0x7c] sm:$0xf] %vm912_vm10, %v759_v28  ;;  %1551 = vrot.lane.b32.xlu2 %v1288_v16, %s5049_s23  ;;  %v1123_v45 = vld [vmem:[#allocation2 + $0x74] sm:$0x1]  ;;  %v4973_v20 = vunpack.c.l.bf16 %v5004_v63  ;;  %v4974_v21 = vunpack.c.h.bf16 %v5004_v63 }
  0xc1   : > { %v5520_v31 = vld [vmem:[#allocation2 + $0x64] sm:$0xf]  ;;  %987 = vst [vmem:[#allocation2 + $0x80] sm:$0x1] %v986_v15  ;;  %v5522_v22 = vrot.slane %v1378_v0, 4  ;;  %v1381_v23 = vshll.u32 %v1123_v45, 16  ;;  %v961_v33 = vsel %vm5256_vm14, %v699_v59, %v960_v14  ;;  %v4981_v48 = vunpack.c.l.bf16 %v5006_v5 }
  0xc2   : > { %v1340_v44 = vrot.slane %v1338_v11, 4  ;;  %v1343_v55 = vrot.slane %v1341_v19, 5  ;;  %v1347_v24 = vshll.u32 %v5520_v31, 16  ;;  %v1351_v25 = vshrl.u32 %v5520_v31, 16  ;;  %962 = vst [vmem:[#allocation2 + $0x54] sm:$0xf] %v961_v33 }
  0xc3   : > { %v5528_v26 = vrot.slane %v1381_v23, 5  ;;  %v546_v27 = vmax.f32 %v514_v10, 0.0  ;;  %v547_v1 = vmax.f32 %v515_v12, 0.0  ;;  %v477_v7 = vmul.f32 %v4973_v20, %v5209_v53  ;;  %v995_v14 = vld [vmem:[#allocation2 + $0x90] sm:$0xf] }
  0xc4   : > { %v1344_v8 = vor.u32 %v1343_v55, %v1340_v44  ;;  %v5531_v62 = vrot.slane %v1347_v24, 5  ;;  %v478_v41 = vmul.f32 %v4974_v21, %v5209_v53  ;;  %v4982_v61 = vunpack.c.h.bf16 %v5006_v5 }
  0xc5   : > { %v1384_v13 = vsel %vm5188_vm4, %v5522_v22, %v5528_v26  ;;  %v578_v36 = vpack.c.bf16 %v546_v27, %v546_v27  ;;  %v579_v58 = vpack.c.bf16 %v547_v1, %v547_v1  ;;  %v512_v29 = vadd.f32 %v5221_v2, %v477_v7 }
  0xc6   : > { %v1345_v30 = vrot.slane %v1344_v8, 4  ;;  %v513_v32 = vadd.f32 %v5221_v2, %v478_v41  ;;  %v481_v3 = vmul.f32 %v4981_v48, %v5209_v53  ;;  %v482_v35 = vmul.f32 %v4982_v61, %v5209_v53  ;;  %v971_v48 = vld [vmem:[#allocation2 + $0x68] sm:$0x1] }
  0xc7   : > { %v1125_v37 = vld [vmem:[#allocation2 + $0x7c] sm:$0xf]  ;;  %v779_v38 = vshrl.u32 %v578_v36, 16  ;;  %v782_v40 = vshll.u32 %v578_v36, 16  ;;  %v787_v42 = vshrl.u32 %v579_v58, 16  ;;  %v790_v43 = vshll.u32 %v579_v58, 16 }
  0xc8   : > { %v1350_v47 = vsel %vm5188_vm4, %v1345_v30, %v5531_v62  ;;  %v1126_v9 = vld [vmem:[#allocation2 + $0x80] sm:$0x1]  ;;  %v1395_v49 = vshll.u32 %v1125_v37, 16  ;;  %v1399_v50 = vshrl.u32 %v1125_v37, 16  ;;  %v544_v51 = vmax.f32 %v512_v29, 0.0 }
  0xc9   : > { %1561 = vrot.lane.b32.xlu1 %v1350_v47, %s5049_s23  ;;  %v1405_v56 = vshll.u32 %v1126_v9, 16  ;;  %v781_v57 = vrot.slane %v779_v38, 7  ;;  %v5546_v63 = vrot.slane %v787_v42, 7  ;;  %v1115_v60 = vld [vmem:[#allocation2 + $0x54] sm:$0xf]  ;;  %v545_v0 = vmax.f32 %v513_v32, 0.0 }
  0xca   : > { %v5548_v10 = vrot.slane %v1395_v49, 5  ;;  %v1401_v12 = vrot.slane %v1399_v50, 4  ;;  %v1314_v5 = vshrl.u32 %v1115_v60, 16  ;;  %v1317_v6 = vshll.u32 %v1115_v60, 16  ;;  %v988_v30 = vld [vmem:[#allocation2 + $0x84] sm:$0xf] }
  0xcb   : > { %v1407_v28 = vrot.slane %v1405_v56, 5  ;;  %v784_v15 = vor.u32 %v782_v40, %v781_v57  ;;  %v785_v16 = vrot.slane %v781_v57, 4  ;;  %v792_v59 = vor.u32 %v790_v43, %v5546_v63  ;;  %v999_v9 = vld [vmem:[#allocation2 + $0x98] sm:$0x1] }
  0xcc   : > { %v1402_v11 = vor.u32 %v1401_v12, %v5548_v10  ;;  %v1316_v19 = vrot.slane %v1314_v5, 4  ;;  %v1319_v45 = vrot.slane %v1317_v6, 5  ;;  %v576_v20 = vpack.c.bf16 %v544_v51, %v544_v51  ;;  %v5583_v51 = vld [vmem:[%s5113_s11 + $0x68] sm:$0xff]  }
  0xcd   : > { %v793_v21 = vsel %vm5250_vm13, %v785_v16, %v792_v59  ;;  %v996_v22 = vsel %vm5256_vm14, %v784_v15, %v995_v14  ;;  %v577_v23 = vpack.c.bf16 %v545_v0, %v545_v0  ;;  %v516_v33 = vadd.f32 %v5221_v2, %v481_v3 }
  0xce   : > { %v1403_v44 = vrot.slane %v1402_v11, 4  ;;  %997 = vst [vmem:[#allocation2 + $0x90] sm:$0xf] %v996_v22  ;;  %v1320_v55 = vor.u32 %v1319_v45, %v1316_v19  ;;  %v762_v24 = vshrl.u32 %v576_v20, 16  ;;  %v765_v26 = vshll.u32 %v576_v20, 16 }
  0xcf   : > { %998 = vst.msk [vmem:[#allocation2 + $0x94] sm:$0xf] %vm912_vm10, %v793_v21  ;;  %v770_v27 = vshrl.u32 %v577_v23, 16  ;;  %v773_v1 = vshll.u32 %v577_v23, 16  ;;  %v517_v7 = vadd.f32 %v5221_v2, %v482_v35  ;;  %v548_v8 = vmax.f32 %v516_v33, 0.0  ;;  %v5008_v35 = vld [vmem:[%s5113_s11 + $0x70] sm:$0xff]  }
  0xd0   : > { %v1408_v41 = vsel %vm5188_vm4, %v1403_v44, %v1407_v28  ;;  %v1321_v61 = vrot.slane %v1320_v55, 4  ;;  %v764_v36 = vrot.slane %v762_v24, 7  ;;  %v726_v58 = vrot.slane %v5476_v4, 4  ;;  %v1006_v20 = vld [vmem:[#allocation2 + $0xa4] sm:$0x1] }
  0xd1   : > { %1571 = vrot.lane.b32.xlu0 %v1408_v41, %s5049_s23  ;;  %1567 = vrot.lane.b32.xlu1 %v1384_v13, %s5049_s23  ;;  %v5564_v29 = vrot.slane %v770_v27, 7  ;;  %v549_v32 = vmax.f32 %v517_v7, 0.0  ;;  %v5566_v3 = vpack.c.bf16 %v548_v8, %v548_v8  ;;  %v1353_v47 = vrot.slane %v1351_v25, 4 }
  0xd2   : > { %v1326_v37 = vsel %vm5188_vm4, %v1321_v61, %v5441_v17  ;;  %v767_v38 = vor.u32 %v765_v26, %v764_v36  ;;  %v768_v40 = vrot.slane %v764_v36, 4  ;;  %v972_v4 = vsel %vm5263_vm15, %v726_v58, %v971_v48 }
  0xd3   : > { %1557 = vrot.lane.b32.xlu2 %v1326_v37, %s5049_s23  ;;  %v775_v13 = vor.u32 %v773_v1, %v5564_v29  ;;  %v581_v42 = vpack.c.bf16 %v549_v32, %v549_v32  ;;  %v796_v43 = vshrl.u32 %v5566_v3, 16  ;;  %973 = vst [vmem:[#allocation2 + $0x68] sm:$0x1] %v972_v4  ;;  %v794_v49 = vrot.slane %v5546_v63, 4 }
  0xd4   : > { %v989_v17 = vsel %vm5256_vm14, %v767_v38, %v988_v30  ;;  %v4989_v50 = vunpack.c.l.bf16 %v5008_v35  ;;  %v4990_v12 = vunpack.c.h.bf16 %v5008_v35  ;;  %v1354_v16 = vor.u32 %v1353_v47, %v5531_v62 }
  0xd5   : > { %v1130_v56 = vld [vmem:[#allocation2 + $0x90] sm:$0xf]  ;;  %v776_v57 = vsel %vm5250_vm13, %v768_v40, %v775_v13  ;;  %990 = vst [vmem:[#allocation2 + $0x84] sm:$0xf] %v989_v17  ;;  %v5587_v60 = vrot.slane %v796_v43, 7  ;;  %v804_v0 = vshrl.u32 %v581_v42, 16  ;;  %v1000_v63 = vsel %vm5263_vm15, %v794_v49, %v999_v9 }
  0xd6   : > { %v1131_v31 = vld [vmem:[#allocation2 + $0x94] sm:$0xf]  ;;  %v1434_v25 = vshrl.u32 %v1130_v56, 16  ;;  %v1437_v14 = vshll.u32 %v1130_v56, 16  ;;  %991 = vst.msk [vmem:[#allocation2 + $0x88] sm:$0xf] %vm912_vm10, %v776_v57  ;;  %v485_v5 = vmul.f32 %v4989_v50, %v5209_v53  ;;  %v486_v23 = vmul.f32 %v4990_v12, %v5209_v53 }
  0xd7   : > { %v1443_v6 = vshll.u32 %v1131_v31, 16  ;;  %v1447_v28 = vshrl.u32 %v1131_v31, 16  ;;  %v806_v15 = vrot.slane %v804_v0, 7  ;;  %1001 = vst [vmem:[#allocation2 + $0x98] sm:$0x1] %v1000_v63  ;;  %v802_v19 = vrot.slane %v5587_v60, 4 }
  0xd8   : > { %v1436_v59 = vrot.slane %v1434_v25, 4  ;;  %v1439_v11 = vrot.slane %v1437_v14, 5  ;;  %v807_v45 = vshll.u32 %v581_v42, 16  ;;  %v4985_v33 = vunpack.c.l.bf16 %v5583_v51  ;;  %v981_v42 = vld [vmem:[#allocation2 + $0x78] sm:$0xf] }
  0xd9   : > { %v1445_v21 = vrot.slane %v1443_v6, 5  ;;  %v811_v22 = vrot.slane %v806_v15, 4  ;;  %v520_v24 = vadd.f32 %v5221_v2, %v485_v5  ;;  %v748_v62 = vshll.u32 %v5489_v54, 16 }
  0xda   : > { %v1440_v48 = vor.u32 %v1439_v11, %v1436_v59  ;;  %v809_v44 = vor.u32 %v807_v45, %v806_v15  ;;  %v1120_v55 = vld [vmem:[#allocation2 + $0x68] sm:$0x1]  ;;  %v1355_v27 = vrot.slane %v1354_v16, 4  ;;  %v1449_v7 = vrot.slane %v1447_v28, 4 }
  0xdb   : > { %v1007_v26 = vsel %vm5263_vm15, %v811_v22, %v1006_v20  ;;  %v1357_v1 = vshll.u32 %v1120_v55, 16  ;;  %v521_v36 = vadd.f32 %v5221_v2, %v486_v23  ;;  %v552_v58 = vmax.f32 %v520_v24, 0.0  ;;  %v1016_v23 = vld [vmem:[#allocation2 + $0xb4] sm:$0xf] }
  0xdc   : > { %v1441_v8 = vrot.slane %v1440_v48, 4  ;;  %v1127_v41 = vld [vmem:[#allocation2 + $0x84] sm:$0xf]  ;;  %v810_v61 = vsel %vm5250_vm13, %v802_v19, %v809_v44  ;;  %1008 = vst [vmem:[#allocation2 + $0xa4] sm:$0x1] %v1007_v26  ;;  %v750_v54 = vor.u32 %v748_v62, %v5498_v34  ;;  %v4986_v37 = vunpack.c.h.bf16 %v5583_v51 }
  0xdd   : > { %v5604_v30 = vld [vmem:[#allocation2 + $0x88] sm:$0xf]  ;;  %v1410_v32 = vshrl.u32 %v1127_v41, 16  ;;  %v1413_v35 = vshll.u32 %v1127_v41, 16  ;;  %1005 = vst.msk [vmem:[#allocation2 + $0xa0] sm:$0xf] %vm912_vm10, %v810_v61  ;;  %v483_v43 = vmul.f32 %v4985_v33, %v5209_v53  ;;  %v1450_v17 = vor.u32 %v1449_v7, %v1445_v21 }
  0xde   : > { %v1446_v38 = vsel %vm5188_vm4, %v1441_v8, %v1445_v21  ;;  %v1419_v40 = vshll.u32 %v5604_v30, 16  ;;  %v1359_v4 = vrot.slane %v1357_v1, 5  ;;  %v1132_v13 = vld [vmem:[#allocation2 + $0x98] sm:$0x1]  ;;  %v553_v50 = vmax.f32 %v521_v36, 0.0 }
  0xdf   : > { %1577 = vrot.lane.b32.xlu0 %v1446_v38, %s5049_s23  ;;  %v1412_v47 = vrot.slane %v1410_v32, 4  ;;  %v1415_v9 = vrot.slane %v1413_v35, 5  ;;  %v1453_v49 = vshll.u32 %v1132_v13, 16  ;;  %v584_v51 = vpack.c.bf16 %v552_v58, %v552_v58 }
  0xe0   : > { %v1360_v34 = vsel %vm5188_vm4, %v1355_v27, %v1359_v4  ;;  %v5616_v57 = vrot.slane %v1419_v40, 5  ;;  %v982_v0 = vsel %vm5256_vm14, %v750_v54, %v981_v42  ;;  %v484_v12 = vmul.f32 %v4986_v37, %v5209_v53  ;;  %v992_v4 = vld [vmem:[#allocation2 + $0x8c] sm:$0x1] }
  0xe1   : > { %v1416_v56 = vor.u32 %v1415_v9, %v1412_v47  ;;  %1563 = vrot.lane.b32.xlu2 %v1360_v34, %s5049_s23  ;;  %v585_v31 = vpack.c.bf16 %v553_v50, %v553_v50  ;;  %v830_v25 = vshrl.u32 %v584_v51, 16  ;;  %v833_v14 = vshll.u32 %v584_v51, 16  ;;  %983 = vst [vmem:[#allocation2 + $0x78] sm:$0xf] %v982_v0  ;;  %v1009_v34 = vld [vmem:[#allocation2 + $0xa8] sm:$0xf] }
  0xe2   : > { %v518_v63 = vadd.f32 %v5221_v2, %v483_v43  ;;  %v1451_v28 = vrot.slane %v1450_v17, 4  ;;  %v519_v15 = vadd.f32 %v5221_v2, %v484_v12  ;;  %v1455_v48 = vrot.slane %v1453_v49, 5 }
  0xe3   : > { %v1417_v5 = vrot.slane %v1416_v56, 4  ;;  %v1135_v6 = vld [vmem:[#allocation2 + $0xa4] sm:$0x1]  ;;  %v832_v11 = vrot.slane %v830_v25, 7  ;;  %v838_v19 = vshrl.u32 %v585_v31, 16  ;;  %v841_v45 = vshll.u32 %v585_v31, 16 }
  0xe4   : > { %v1134_v16 = vld [vmem:[#allocation2 + $0xa0] sm:$0xf]  ;;  %v1477_v59 = vshll.u32 %v1135_v6, 16  ;;  %v550_v33 = vmax.f32 %v518_v63, 0.0  ;;  %v551_v27 = vmax.f32 %v519_v15, 0.0  ;;  %v1423_v7 = vshrl.u32 %v5604_v30, 16 }
  0xe5   : > { %v1422_v20 = vsel %vm5188_vm4, %v1417_v5, %v5616_v57  ;;  %v1467_v21 = vshll.u32 %v1134_v16, 16  ;;  %v1471_v22 = vshrl.u32 %v1134_v16, 16  ;;  %v835_v44 = vor.u32 %v833_v14, %v832_v11  ;;  %v1020_v14 = vld [vmem:[#allocation2 + $0xbc] sm:$0x1] }
  0xe6   : > { %1573 = vrot.lane.b32.xlu1 %v1422_v20, %s5049_s23  ;;  %v836_v55 = vrot.slane %v832_v11, 4  ;;  %v840_v24 = vrot.slane %v838_v19, 7  ;;  %v582_v1 = vpack.c.bf16 %v550_v33, %v550_v33  ;;  %v1479_v8 = vrot.slane %v1477_v59, 5  ;;  %v5650_v11 = vld [vmem:[#allocation2 + $0x4] sm:$0xf] }
  0xe7   : > { %v5628_v62 = vrot.slane %v1467_v21, 5  ;;  %v1473_v26 = vrot.slane %v1471_v22, 4  ;;  %v1017_v61 = vsel %vm5256_vm14, %v835_v44, %v1016_v23  ;;  %v583_v32 = vpack.c.bf16 %v551_v27, %v551_v27 }
  0xe8   : > { %v843_v41 = vor.u32 %v841_v45, %v840_v24  ;;  %1018 = vst [vmem:[#allocation2 + $0xb4] sm:$0xf] %v1017_v61  ;;  %v1124_v58 = vld [vmem:[#allocation2 + $0x78] sm:$0xf]  ;;  %v813_v35 = vshrl.u32 %v582_v1, 16  ;;  %v816_v54 = vshll.u32 %v582_v1, 16  ;;  %v1456_v37 = vsel %vm5188_vm4, %v1451_v28, %v1455_v48 }
  0xe9   : > { %v1474_v36 = vor.u32 %v1473_v26, %v5628_v62  ;;  %v1386_v40 = vshrl.u32 %v1124_v58, 16  ;;  %v1389_v30 = vshll.u32 %v1124_v58, 16  ;;  %v821_v43 = vshrl.u32 %v583_v32, 16  ;;  %v1002_v45 = vld [vmem:[#allocation2 + $0x9c] sm:$0xf] }
  0xea   : > { %v844_v38 = vsel %vm5250_vm13, %v836_v55, %v843_v41  ;;  %v815_v42 = vrot.slane %v813_v35, 7  ;;  %v824_v47 = vshll.u32 %v583_v32, 16  ;;  %v777_v49 = vrot.slane %v5564_v29, 4  ;;  %v1013_v1 = vld [vmem:[#allocation2 + $0xb0] sm:$0x1] }
  0xeb   : > { %v1475_v13 = vrot.slane %v1474_v36, 4  ;;  %1019 = vst.msk [vmem:[#allocation2 + $0xb8] sm:$0xf] %vm912_vm10, %v844_v38  ;;  %v1388_v9 = vrot.slane %v1386_v40, 4  ;;  %v1391_v17 = vrot.slane %v1389_v30, 5  ;;  %v823_v0 = vrot.slane %v821_v43, 7 }
  0xec   : > { %v818_v51 = vor.u32 %v816_v54, %v815_v42  ;;  %v819_v56 = vrot.slane %v815_v42, 4  ;;  %v993_v31 = vsel %vm5263_vm15, %v777_v49, %v992_v4  ;;  %v1425_v25 = vrot.slane %v1423_v7, 4  ;;  %v1660_v35 = vld [vmem:[#allocation2 + $0x8] sm:$0x1]  ;;  %v1530_v42 = vpop.permute.xlu0 %1529 }
  0xed   : > { %v1480_v50 = vsel %vm5188_vm4, %v1475_v13, %v1479_v8  ;;  %v1392_v12 = vor.u32 %v1391_v17, %v1388_v9  ;;  %v826_v63 = vor.u32 %v824_v47, %v823_v0  ;;  %994 = vst [vmem:[#allocation2 + $0x8c] sm:$0x1] %v993_v31  ;;  %v845_v5 = vrot.slane %v840_v24, 4 }
  0xee   : > { %1583 = vrot.lane.b32.xlu0 %v1480_v50, %s5049_s23  ;;  %1579 = vrot.lane.b32.xlu1 %v1456_v37, %s5049_s23  ;;  %v1010_v29 = vsel %vm5256_vm14, %v818_v51, %v1009_v34  ;;  %v1426_v22 = vor.u32 %v1425_v25, %v5616_v57  ;;  %v799_v23 = vshll.u32 %v5566_v3, 16  ;;  %v1759_v27 = vrot.slane %v5650_v11, 5  ;;  %v1030_v34 = vld [vmem:[#allocation2] sm:$0xf]  ;;  %v1678_v11 = vld [vmem:[#allocation2 + $0x50] sm:$0x1] }
  0xef   : > { %v1139_v6 = vld [vmem:[#allocation2 + $0xb4] sm:$0xf]  ;;  %v1393_v28 = vrot.slane %v1392_v12, 4  ;;  %1011 = vst [vmem:[#allocation2 + $0xa8] sm:$0xf] %v1010_v29  ;;  %v827_v59 = vsel %vm5250_vm13, %v819_v56, %v826_v63  ;;  %v1021_v19 = vsel %vm5263_vm15, %v845_v5, %v1020_v14  ;;  %v828_v3 = vrot.slane %v823_v0, 4 }
  0xf0   : > { %v1506_v15 = vshrl.u32 %v1139_v6, 16  ;;  %v1509_v16 = vshll.u32 %v1139_v6, 16  ;;  %1012 = vst.msk [vmem:[#allocation2 + $0xac] sm:$0xf] %vm912_vm10, %v827_v59  ;;  %v801_v55 = vor.u32 %v799_v23, %v5587_v60  ;;  %v1427_v8 = vrot.slane %v1426_v22, 4 }
  0xf1   : > { %v1398_v21 = vsel %vm5188_vm4, %v1393_v28, %v5548_v10  ;;  %1022 = vst [vmem:[#allocation2 + $0xbc] sm:$0x1] %v1021_v19  ;;  %v1014_v60 = vsel %vm5263_vm15, %v828_v3, %v1013_v1  ;;  %v1761_v43 = vrot.slane %v1759_v27, 4  ;;  %v1762_v47 = vrot.slane %v1660_v35, 5  ;;  %v1664_v6 = vld [vmem:[#allocation2 + $0x18] sm:$0xe] }
  0xf2   : > { %v1140_v20 = vld [vmem:[#allocation2 + $0xb8] sm:$0xf]  ;;  %v1508_v33 = vrot.slane %v1506_v15, 4  ;;  %v1511_v48 = vrot.slane %v1509_v16, 5  ;;  %1569 = vrot.lane.b32.xlu2 %v1398_v21, %s5049_s23  ;;  %v1003_v57 = vsel %vm5256_vm14, %v801_v55, %v1002_v45  ;;  %1015 = vst [vmem:[#allocation2 + $0xb0] sm:$0x1] %v1014_v60 }
  0xf3   : > { %v1515_v44 = vshll.u32 %v1140_v20, 16  ;;  %v1519_v10 = vshrl.u32 %v1140_v20, 16  ;;  %1004 = vst [vmem:[#allocation2 + $0x9c] sm:$0xf] %v1003_v57  ;;  %v1763_v14 = vsel %vm5676_vm2, %v1761_v43, %v1762_v47  ;;  %v5687_v28 = vld [vmem:[#allocation2 + $0x1c] sm:$0xf] }
  0xf4   : > { %v1512_v24 = vor.u32 %v1511_v48, %v1508_v33  ;;  %v1129_v7 = vld [vmem:[#allocation2 + $0x8c] sm:$0x1]  ;;  %1062 = vst.msk [vmem:[#allocation3] sm:$0xf] %vm912_vm10, %v1030_v34  ;;  %v1532_v21 = vpop.permute.xlu0 %1531  ;;  %v1031_v22 = vld [vmem:[#allocation2 + $0x4] sm:$0xf] }
  0xf5   : > { %v1517_v26 = vrot.slane %v1515_v44, 5  ;;  %v1429_v36 = vshll.u32 %v1129_v7, 16  ;;  %v1521_v13 = vrot.slane %v1519_v10, 4  ;;  %1626 = vst.msk [vmem:[#allocation3] sm:$0xf] %vm1625_vm3, %v1530_v42  ;;  %v4777_v33 = vrot.slane %v1664_v6, 9 }
  0xf6   : > { %v1513_v41 = vrot.slane %v1512_v24, 4  ;;  %v1136_v61 = vld [vmem:[#allocation2 + $0xa8] sm:$0xf]  ;;  %v1773_v48 = vrot.slane %v5687_v28, 5  ;;  %1063 = vst.msk [vmem:[#allocation3 + $0x4] sm:$0xf] %vm912_vm10, %v1031_v22 }
  0xf7   : > { %v1482_v58 = vshrl.u32 %v1136_v61, 16  ;;  %v1485_v32 = vshll.u32 %v1136_v61, 16  ;;  %v1137_v37 = vld [vmem:[#allocation2 + $0xac] sm:$0xf]  ;;  %v1431_v38 = vrot.slane %v1429_v36, 5  ;;  %v1522_v12 = vor.u32 %v1521_v13, %v1517_v26 }
  0xf8   : > { %v1518_v54 = vsel %vm5188_vm4, %v1513_v41, %v1517_v26  ;;  %v1491_v4 = vshll.u32 %v1137_v37, 16  ;;  %v1141_v17 = vld [vmem:[#allocation2 + $0xbc] sm:$0x1]  ;;  %v1495_v56 = vshrl.u32 %v1137_v37, 16  ;;  %v1034_v55 = vld [vmem:[#allocation2 + $0x18] sm:$0xf] }
  0xf9   : > { %1589 = vrot.lane.b32.xlu0 %v1518_v54, %s5049_s23  ;;  %v1484_v40 = vrot.slane %v1482_v58, 4  ;;  %v1487_v30 = vrot.slane %v1485_v32, 5  ;;  %v1432_v9 = vsel %vm5188_vm4, %v1427_v8, %v1431_v38  ;;  %v1525_v31 = vshll.u32 %v1141_v17, 16  ;;  %v1138_v20 = vld [vmem:[#allocation2 + $0xb0] sm:$0x1] }
  0xfa   : > { %v1493_v50 = vrot.slane %v1491_v4, 5  ;;  %1575 = vrot.lane.b32.xlu2 %v1432_v9, %s5049_s23  ;;  %v1133_v25 = vld [vmem:[#allocation2 + $0x9c] sm:$0xf]  ;;  %v1497_v59 = vrot.slane %v1495_v56, 4  ;;  %v1523_v19 = vrot.slane %v1522_v12, 4  ;;  %v1501_v10 = vshll.u32 %v1138_v20, 16 }
  0xfb   : > { %v1488_v49 = vor.u32 %v1487_v30, %v1484_v40  ;;  %v1458_v63 = vshrl.u32 %v1133_v25, 16  ;;  %v1461_v29 = vshll.u32 %v1133_v25, 16  ;;  %v1527_v45 = vrot.slane %v1525_v31, 5  ;;  %v5693_v24 = vld [vmem:[#allocation2 + $0x28] sm:$0xf] }
  0xfc   : > { %1627 = vst.msk [vmem:[#allocation3 + $0x4] sm:$0xf] %vm1625_vm3, %v1532_v21  ;;  %v1498_v1 = vor.u32 %v1497_v59, %v1493_v50  ;;  %v1774_v8 = vsel %vm5676_vm2, %v4777_v33, %v1773_v48  ;;  %v1661_v3 = vld [vmem:[#allocation2 + $0xc] sm:$0xe]  ;;  %v1662_v41 = vld [vmem:[#allocation2 + $0x10] sm:$0xf] }
  0xfd   : > { %v1489_v0 = vrot.slane %v1488_v49, 4  ;;  %v1460_v15 = vrot.slane %v1458_v63, 4  ;;  %v1463_v16 = vrot.slane %v1461_v29, 5  ;;  %1066 = vst.msk [vmem:[#allocation3 + $0x10] sm:$0xf] %vm912_vm10, %v1034_v55  ;;  %v1528_v7 = vsel %vm5188_vm4, %v1523_v19, %v1527_v45 }
  0xfe   : > { %v1780_v61 = vrot.slane %v5693_v24, 5  ;;  %v1669_v36 = vld [vmem:[#allocation2 + $0x2c] sm:$0x1]  ;;  %v1499_v58 = vrot.slane %v1498_v1, 4  ;;  %v1503_v32 = vrot.slane %v1501_v10, 5  ;;  %v4776_v35 = vrot.slane %v1661_v3, 9 }
  0xff   : > { %v1494_v5 = vsel %vm5188_vm4, %v1489_v0, %v1493_v50  ;;  %v1464_v44 = vor.u32 %v1463_v16, %v1460_v15  ;;  %v1766_v60 = vrot.slane %v1662_v41, 5  ;;  %v1534_v54 = vpop.permute.xlu1 %1533  ;;  %v1032_v37 = vld [vmem:[#allocation2 + $0xc] sm:$0xf]  ;;  %v1036_v40 = vld [vmem:[#allocation2 + $0x24] sm:$0xf]  ;;  %v1783_v30 = vrot.slane %v1669_v36, 5 }
 0x100   : > { %1585 = vrot.lane.b32.xlu1 %v1494_v5, %s5049_s23  ;;  %1064 = vst.msk [vmem:[#allocation3 + $0x8] sm:$0xf] %vm912_vm10, %v1032_v37  ;;  %v1035_v13 = vld [vmem:[#allocation2 + $0x1c] sm:$0xf]  ;;  %v1504_v42 = vsel %vm5188_vm4, %v1499_v58, %v1503_v32  ;;  %v1658_v47 = vld [vmem:[#allocation2] sm:$0xe] }
 0x101   : > { %1871 = vrot.lane.b32.xlu0 %v1763_v14, %s5050_s29  ;;  %v1465_v26 = vrot.slane %v1464_v44, 4  ;;  %v1542_v38 = vpop.permute.xlu0 %1541  ;;  %1628 = vst.msk [vmem:[#allocation3 + $0x8] sm:$0xf] %vm1625_vm3, %v1534_v54  ;;  %v1767_v43 = vsel %vm5676_vm2, %v4776_v35, %v1766_v60  ;;  %v1666_v17 = vld [vmem:[#allocation2 + $0x20] sm:$0x1]  ;;  %v4775_v50 = vrot.slane %v1658_v47, 9 }
 0x102   : > { %v1538_v23 = vpop.permute.xlu2 %1537  ;;  %1068 = vst.msk [vmem:[#allocation3 + $0x18] sm:$0xf] %vm912_vm10, %v1036_v40  ;;  %v1673_v34 = vld [vmem:[#allocation2 + $0x3c] sm:$0xe]  ;;  %v1674_v49 = vld [vmem:[#allocation2 + $0x40] sm:$0xf] }
 0x103   : > { %1630 = vst.msk [vmem:[#allocation3 + $0x10] sm:$0xf] %vm1625_vm3, %v1538_v23  ;;  %v1470_v57 = vsel %vm5188_vm4, %v1465_v26, %v5628_v62  ;;  %v1782_v62 = vrot.slane %v1780_v61, 4  ;;  %v1775_v56 = vrot.slane %v1773_v48, 4  ;;  %v1776_v0 = vrot.slane %v1666_v17, 5 }
 0x104   : > { %1581 = vrot.lane.b32.xlu2 %v1470_v57, %s5049_s23  ;;  %1632 = vst.msk [vmem:[#allocation3 + $0x18] sm:$0xf] %vm1625_vm3, %v1542_v38  ;;  %v1033_v12 = vld [vmem:[#allocation2 + $0x10] sm:$0xf]  ;;  %v1039_v25 = vld [vmem:[#allocation2 + $0x34] sm:$0xf]  ;;  %v1760_v28 = vsel %vm5676_vm2, %v4775_v50, %v1759_v27 }
 0x105   : > { %v1784_v9 = vsel %vm5676_vm2, %v1782_v62, %v1783_v30  ;;  %1067 = vst.msk [vmem:[#allocation3 + $0x14] sm:$0xf] %vm912_vm10, %v1035_v13  ;;  %v4780_v63 = vrot.slane %v1673_v34, 9  ;;  %v1794_v29 = vrot.slane %v1674_v49, 5  ;;  %v5727_v5 = vld [vmem:[#allocation2 + $0x4c] sm:$0xf]  ;;  %v1777_v16 = vsel %vm5676_vm2, %v1775_v56, %v1776_v0 }
 0x106   : > { %1065 = vst.msk [vmem:[#allocation3 + $0xc] sm:$0xf] %vm912_vm10, %v1033_v12  ;;  %v1038_v6 = vld [vmem:[#allocation2 + $0x30] sm:$0xf]  ;;  %v1663_v19 = vld [vmem:[#allocation2 + $0x14] sm:$0x1] }
 0x107   : > { %v1536_v31 = vpop.permute.xlu1 %1535  ;;  %1071 = vst.msk [vmem:[#allocation3 + $0x24] sm:$0xf] %vm912_vm10, %v1039_v25  ;;  %v1670_v59 = vld [vmem:[#allocation2 + $0x30] sm:$0xe]  ;;  %v1795_v45 = vsel %vm5676_vm2, %v4780_v63, %v1794_v29  ;;  %v1671_v20 = vld [vmem:[#allocation2 + $0x34] sm:$0xf] }
 0x108   : > { %1591 = vrot.lane.b32.xlu1 %v1528_v7, %s5049_s23  ;;  %1629 = vst.msk [vmem:[#allocation3 + $0xc] sm:$0xf] %vm1625_vm3, %v1536_v31  ;;  %v1801_v21 = vrot.slane %v5727_v5, 5  ;;  %v1768_v27 = vrot.slane %v1766_v60, 4  ;;  %v1769_v22 = vrot.slane %v1663_v19, 5  ;;  %v4779_v23 = vrot.slane %v1670_v59, 9 }
 0x109   : > { %1877 = vrot.lane.b32.xlu0 %v1774_v8, %s5050_s29  ;;  %v1548_v14 = vpop.permute.xlu0 %1547  ;;  %1070 = vst.msk [vmem:[#allocation3 + $0x20] sm:$0xf] %vm912_vm10, %v1038_v6  ;;  %v1787_v33 = vrot.slane %v1671_v20, 5  ;;  %v1037_v48 = vld [vmem:[#allocation2 + $0x28] sm:$0xf]  ;;  %v1804_v1 = vrot.slane %v1678_v11, 5 }
 0x10a   : > { %v1540_v4 = vpop.permute.xlu2 %1539  ;;  %1635 = vst.msk [vmem:[#allocation3 + $0x24] sm:$0xf] %vm1625_vm3, %v1548_v14  ;;  %v1042_v55 = vld [vmem:[#allocation2 + $0x48] sm:$0xf]  ;;  %v1803_v26 = vrot.slane %v1801_v21, 4  ;;  %v1770_v8 = vsel %vm5676_vm2, %v1768_v27, %v1769_v22  ;;  %v1796_v54 = vrot.slane %v1794_v29, 4 }
 0x10b   : > { %1631 = vst.msk [vmem:[#allocation3 + $0x14] sm:$0xf] %vm1625_vm3, %v1540_v4  ;;  %v1041_v7 = vld [vmem:[#allocation2 + $0x40] sm:$0xf]  ;;  %v1788_v57 = vsel %vm5676_vm2, %v4779_v23, %v1787_v33  ;;  %v1667_v3 = vld [vmem:[#allocation2 + $0x24] sm:$0xe] }
 0x10c   : > { %1587 = vrot.lane.b32.xlu2 %v1504_v42, %s5049_s23  ;;  %1069 = vst.msk [vmem:[#allocation3 + $0x1c] sm:$0xf] %vm912_vm10, %v1037_v48  ;;  %v1805_v41 = vsel %vm5676_vm2, %v1803_v26, %v1804_v1  ;;  %v1675_v36 = vld [vmem:[#allocation2 + $0x44] sm:$0x1]  ;;  %v1682_v32 = vld [vmem:[#allocation2 + $0x60] sm:$0xe] }
 0x10d   : > { %1074 = vst.msk [vmem:[#allocation3 + $0x30] sm:$0xf] %vm912_vm10, %v1042_v55  ;;  %v1683_v35 = vld [vmem:[#allocation2 + $0x64] sm:$0xf]  ;;  %v4778_v60 = vrot.slane %v1667_v3, 9  ;;  %v1797_v37 = vrot.slane %v1675_v36, 5 }
 0x10e   : > { %1073 = vst.msk [vmem:[#allocation3 + $0x2c] sm:$0xf] %vm912_vm10, %v1041_v7  ;;  %v1040_v38 = vld [vmem:[#allocation2 + $0x3c] sm:$0xf]  ;;  %v1045_v62 = vld [vmem:[#allocation2 + $0x58] sm:$0xf] }
 0x10f   : > { %v1544_v44 = vpop.permute.xlu1 %1543  ;;  %v4783_v30 = vrot.slane %v1682_v32, 9  ;;  %v1815_v4 = vrot.slane %v1683_v35, 5  ;;  %1072 = vst.msk [vmem:[#allocation3 + $0x28] sm:$0xf] %vm912_vm10, %v1040_v38  ;;  %v5764_v13 = vld [vmem:[#allocation2 + $0x70] sm:$0xf] }
 0x110   : > { %1873 = vrot.lane.b32.xlu1 %v1767_v43, %s5050_s29  ;;  %1633 = vst.msk [vmem:[#allocation3 + $0x1c] sm:$0xf] %vm1625_vm3, %v1544_v44  ;;  %v1044_v42 = vld [vmem:[#allocation2 + $0x54] sm:$0xf]  ;;  %v1781_v43 = vsel %vm5676_vm2, %v4778_v60, %v1780_v61  ;;  %v1672_v34 = vld [vmem:[#allocation2 + $0x38] sm:$0x1] }
 0x111   : > { %1883 = vrot.lane.b32.xlu0 %v1784_v9, %s5050_s29  ;;  %v1554_v10 = vpop.permute.xlu0 %1553  ;;  %1077 = vst.msk [vmem:[#allocation3 + $0x3c] sm:$0xf] %vm912_vm10, %v1045_v62  ;;  %v1798_v9 = vsel %vm5676_vm2, %v1796_v54, %v1797_v37  ;;  %v1679_v17 = vld [vmem:[#allocation2 + $0x54] sm:$0xe]  ;;  %v1816_v49 = vsel %vm5676_vm2, %v4783_v30, %v1815_v4  ;;  %v1680_v50 = vld [vmem:[#allocation2 + $0x58] sm:$0xf] }
 0x112   : > { %v1546_v15 = vpop.permute.xlu2 %1545  ;;  %1638 = vst.msk [vmem:[#allocation3 + $0x30] sm:$0xf] %vm1625_vm3, %v1554_v10  ;;  %v1822_v56 = vrot.slane %v5764_v13, 5  ;;  %v1687_v24 = vld [vmem:[#allocation2 + $0x74] sm:$0x1]  ;;  %v1789_v61 = vrot.slane %v1787_v33, 4 }
 0x113   : > { %1634 = vst.msk [vmem:[#allocation3 + $0x20] sm:$0xf] %vm1625_vm3, %v1546_v15  ;;  %v1790_v0 = vrot.slane %v1672_v34, 5  ;;  %v4782_v12 = vrot.slane %v1679_v17, 9  ;;  %v1808_v31 = vrot.slane %v1680_v50, 5  ;;  %v1825_v6 = vrot.slane %v1687_v24, 5 }
 0x114   : > { %1869 = vrot.lane.b32.xlu2 %v1760_v28, %s5050_s29  ;;  %1076 = vst.msk [vmem:[#allocation3 + $0x38] sm:$0xf] %vm912_vm10, %v1044_v42  ;;  %v1043_v25 = vld [vmem:[#allocation2 + $0x4c] sm:$0xf]  ;;  %v1824_v29 = vrot.slane %v1822_v56, 4  ;;  %v1817_v22 = vrot.slane %v1815_v4, 4 }
 0x115   : > { %v1048_v63 = vld [vmem:[#allocation2 + $0x6c] sm:$0xf]  ;;  %1075 = vst.msk [vmem:[#allocation3 + $0x34] sm:$0xf] %vm912_vm10, %v1043_v25  ;;  %v1047_v28 = vld [vmem:[#allocation2 + $0x64] sm:$0xf]  ;;  %v1791_v15 = vsel %vm5676_vm2, %v1789_v61, %v1790_v0  ;;  %v1809_v59 = vsel %vm5676_vm2, %v4782_v12, %v1808_v31 }
 0x116   : > { %1080 = vst.msk [vmem:[#allocation3 + $0x48] sm:$0xf] %vm912_vm10, %v1048_v63  ;;  %v1684_v19 = vld [vmem:[#allocation2 + $0x68] sm:$0x1]  ;;  %v1826_v20 = vsel %vm5676_vm2, %v1824_v29, %v1825_v6  ;;  %v1691_v11 = vld [vmem:[#allocation2 + $0x84] sm:$0xe] }
 0x117   : > { %1079 = vst.msk [vmem:[#allocation3 + $0x44] sm:$0xf] %vm912_vm10, %v1047_v28  ;;  %v1692_v27 = vld [vmem:[#allocation2 + $0x88] sm:$0xf]  ;;  %v1818_v23 = vrot.slane %v1684_v19, 5  ;;  %v4786_v26 = vrot.slane %v1691_v11, 9 }
 0x118   : > { %1879 = vrot.lane.b32.xlu1 %v1777_v16, %s5050_s29  ;;  %v1046_v44 = vld [vmem:[#allocation2 + $0x60] sm:$0xf]  ;;  %v1051_v55 = vld [vmem:[#allocation2 + $0x7c] sm:$0xf]  ;;  %v1836_v1 = vrot.slane %v1692_v27, 5  ;;  %v1810_v5 = vrot.slane %v1808_v31, 4 }
 0x119   : > { %1889 = vrot.lane.b32.xlu0 %v1795_v45, %s5050_s29  ;;  %v1676_v45 = vld [vmem:[#allocation2 + $0x48] sm:$0xe]  ;;  %1078 = vst.msk [vmem:[#allocation3 + $0x40] sm:$0xf] %vm912_vm10, %v1046_v44  ;;  %v1050_v10 = vld [vmem:[#allocation2 + $0x78] sm:$0xf] }
 0x11a   : > { %v1552_v58 = vpop.permute.xlu2 %1551  ;;  %v4781_v33 = vrot.slane %v1676_v45, 9  ;;  %v5800_v7 = vld [vmem:[#allocation2 + $0x94] sm:$0xf]  ;;  %1083 = vst.msk [vmem:[#allocation3 + $0x54] sm:$0xf] %vm912_vm10, %v1051_v55  ;;  %v1838_v61 = vrot.slane %v1836_v1, 4 }
 0x11b   : > { %1637 = vst.msk [vmem:[#allocation3 + $0x2c] sm:$0xf] %vm1625_vm3, %v1552_v58  ;;  %v1681_v3 = vld [vmem:[#allocation2 + $0x5c] sm:$0x1]  ;;  %v1688_v36 = vld [vmem:[#allocation2 + $0x78] sm:$0xe] }
 0x11c   : > { %1875 = vrot.lane.b32.xlu2 %v1770_v8, %s5050_s29  ;;  %v1802_v8 = vsel %vm5676_vm2, %v4781_v33, %v1801_v21  ;;  %1082 = vst.msk [vmem:[#allocation3 + $0x50] sm:$0xf] %vm912_vm10, %v1050_v10  ;;  %v1689_v58 = vld [vmem:[#allocation2 + $0x7c] sm:$0xf]  ;;  %v1843_v32 = vrot.slane %v5800_v7, 5  ;;  %v1811_v21 = vrot.slane %v1681_v3, 5 }
 0x11d   : > { %v1696_v35 = vld [vmem:[#allocation2 + $0x98] sm:$0x1]  ;;  %v4785_v60 = vrot.slane %v1688_v36, 9  ;;  %v1829_v54 = vrot.slane %v1689_v58, 5  ;;  %v1049_v37 = vld [vmem:[#allocation2 + $0x70] sm:$0xf] }
 0x11e   : > { %v1845_v38 = vrot.slane %v1843_v32, 4  ;;  %1081 = vst.msk [vmem:[#allocation3 + $0x4c] sm:$0xf] %vm912_vm10, %v1049_v37  ;;  %v1054_v4 = vld [vmem:[#allocation2 + $0x90] sm:$0xf] }
 0x11f   : > { %v1053_v42 = vld [vmem:[#allocation2 + $0x88] sm:$0xf]  ;;  %1086 = vst.msk [vmem:[#allocation3 + $0x60] sm:$0xf] %vm912_vm10, %v1054_v4  ;;  %v1693_v34 = vld [vmem:[#allocation2 + $0x8c] sm:$0x1] }
 0x120   : > { %1885 = vrot.lane.b32.xlu1 %v1788_v57, %s5050_s29  ;;  %v1550_v40 = vpop.permute.xlu1 %1549  ;;  %v1819_v57 = vsel %vm5676_vm2, %v1817_v22, %v1818_v23  ;;  %1085 = vst.msk [vmem:[#allocation3 + $0x5c] sm:$0xf] %vm912_vm10, %v1053_v42  ;;  %v1701_v50 = vld [vmem:[#allocation2 + $0xac] sm:$0xf]  ;;  %v1839_v0 = vrot.slane %v1693_v34, 5 }
 0x121   : > { %1895 = vrot.lane.b32.xlu0 %v1805_v41, %s5050_s29  ;;  %1636 = vst.msk [vmem:[#allocation3 + $0x28] sm:$0xf] %vm1625_vm3, %v1550_v40  ;;  %v1837_v41 = vsel %vm5676_vm2, %v4786_v26, %v1836_v1  ;;  %v1846_v40 = vrot.slane %v1696_v35, 5  ;;  %v1052_v12 = vld [vmem:[#allocation2 + $0x84] sm:$0xf]  ;;  %v1857_v25 = vrot.slane %v1701_v50, 5 }
 0x122   : > { %1084 = vst.msk [vmem:[#allocation3 + $0x58] sm:$0xf] %vm912_vm10, %v1052_v12  ;;  %v1057_v29 = vld [vmem:[#allocation2 + $0xa0] sm:$0xf]  ;;  %v5833_v6 = vld [vmem:[#allocation2 + $0xb8] sm:$0xf] }
 0x123   : > { %v1560_v47 = vpop.permute.xlu0 %1559  ;;  %v1847_v17 = vsel %vm5676_vm2, %v1845_v38, %v1846_v40  ;;  %v1056_v28 = vld [vmem:[#allocation2 + $0x9c] sm:$0xf]  ;;  %v1690_v19 = vld [vmem:[#allocation2 + $0x80] sm:$0x1]  ;;  %1089 = vst.msk [vmem:[#allocation3 + $0x6c] sm:$0xf] %vm912_vm10, %v1057_v29 }
 0x124   : > { %1641 = vst.msk [vmem:[#allocation3 + $0x3c] sm:$0xf] %vm1625_vm3, %v1560_v47  ;;  %1881 = vrot.lane.b32.xlu2 %v1781_v43, %s5050_s29  ;;  %v1812_v43 = vsel %vm5676_vm2, %v1810_v5, %v1811_v21  ;;  %v1830_v47 = vsel %vm5676_vm2, %v4785_v60, %v1829_v54  ;;  %v1864_v11 = vrot.slane %v5833_v6, 5  ;;  %v1705_v13 = vld [vmem:[#allocation2 + $0xbc] sm:$0x1]  ;;  %v1832_v27 = vrot.slane %v1690_v19, 5 }
 0x125   : > { %1088 = vst.msk [vmem:[#allocation3 + $0x68] sm:$0xf] %vm912_vm10, %v1056_v28  ;;  %v1055_v33 = vld [vmem:[#allocation2 + $0x94] sm:$0xf]  ;;  %v1867_v55 = vrot.slane %v1705_v13, 5  ;;  %v1859_v35 = vrot.slane %v1857_v25, 4 }
 0x126   : > { %v1866_v44 = vrot.slane %v1864_v11, 4  ;;  %1087 = vst.msk [vmem:[#allocation3 + $0x64] sm:$0xf] %vm912_vm10, %v1055_v33  ;;  %v1059_v10 = vld [vmem:[#allocation2 + $0xac] sm:$0xf] }
 0x127   : > { %1091 = vst.msk [vmem:[#allocation3 + $0x74] sm:$0xf] %vm912_vm10, %v1059_v10  ;;  %v1058_v21 = vld [vmem:[#allocation2 + $0xa8] sm:$0xf]  ;;  %v1699_v38 = vld [vmem:[#allocation2 + $0xa4] sm:$0x1] }
 0x128   : > { %1891 = vrot.lane.b32.xlu1 %v1798_v9, %s5050_s29  ;;  %v1556_v14 = vpop.permute.xlu1 %1555  ;;  %v1685_v9 = vld [vmem:[#allocation2 + $0x6c] sm:$0xe]  ;;  %v1868_v3 = vsel %vm5676_vm2, %v1866_v44, %v1867_v55  ;;  %1090 = vst.msk [vmem:[#allocation3 + $0x70] sm:$0xf] %vm912_vm10, %v1058_v21  ;;  %v2000_v40 = vld [vmem:[#allocation2 + $0x18] sm:$0xf] }
 0x129   : > { %1901 = vrot.lane.b32.xlu0 %v1816_v49, %s5050_s29  ;;  %1639 = vst.msk [vmem:[#allocation3 + $0x34] sm:$0xf] %vm1625_vm3, %v1556_v14  ;;  %v1700_v49 = vld [vmem:[#allocation2 + $0xa8] sm:$0xe]  ;;  %v4784_v24 = vrot.slane %v1685_v9, 9  ;;  %v1853_v4 = vrot.slane %v1699_v38, 5 }
 0x12a   : > { %v4789_v31 = vrot.slane %v1700_v49, 9  ;;  %v1061_v7 = vld [vmem:[#allocation2 + $0xb8] sm:$0xf]  ;;  %v1998_v42 = vld [vmem:[#allocation2 + $0xc] sm:$0xf] }
 0x12b   : > { %1093 = vst.msk [vmem:[#allocation3 + $0x7c] sm:$0xf] %vm912_vm10, %v1061_v7  ;;  %v2002_v28 = vld [vmem:[#allocation2 + $0x24] sm:$0xf]  ;;  %v2015_v33 = vld [vmem:[#allocation2 + $0x70] sm:$0xf] }
 0x12c   : > { %1887 = vrot.lane.b32.xlu2 %v1791_v15, %s5050_s29  ;;  %v1823_v15 = vsel %vm5676_vm2, %v4784_v24, %v1822_v56  ;;  %v1858_v45 = vsel %vm5676_vm2, %v4789_v31, %v1857_v25  ;;  %v1831_v56 = vrot.slane %v1829_v54, 4  ;;  %v2001_v24 = vld [vmem:[#allocation2 + $0x1c] sm:$0xf]  ;;  %v1999_v31 = vld [vmem:[#allocation2 + $0x10] sm:$0xf] }
 0x12d   : > { %v1558_v16 = vpop.permute.xlu2 %1557  ;;  %v2004_v25 = vld [vmem:[#allocation2 + $0x30] sm:$0xf]  ;;  %v2011_v38 = vld [vmem:[#allocation2 + $0x58] sm:$0xf] }
 0x12e   : > { %1640 = vst.msk [vmem:[#allocation3 + $0x38] sm:$0xf] %vm1625_vm3, %v1558_v16  ;;  %v1840_v16 = vsel %vm5676_vm2, %v1838_v61, %v1839_v0  ;;  %v1833_v26 = vsel %vm5676_vm2, %v1831_v56, %v1832_v27  ;;  %v2006_v61 = vld [vmem:[#allocation2 + $0x3c] sm:$0xf]  ;;  %v2005_v27 = vld [vmem:[#allocation2 + $0x34] sm:$0xf] }
 0x130   : > { %1897 = vrot.lane.b32.xlu1 %v1809_v59, %s5050_s29  ;;  %v1697_v59 = vld [vmem:[#allocation2 + $0x9c] sm:$0xe] }
 0x131   : > { %v1566_v48 = vpop.permute.xlu0 %1565  ;;  %1907 = vrot.lane.b32.xlu0 %v1826_v20, %s5050_s29  ;;  %v1698_v20 = vld [vmem:[#allocation2 + $0xa0] sm:$0xf]  ;;  %v4788_v22 = vrot.slane %v1697_v59, 9  ;;  %v5009_v59 = vld [vmem:[%s5113_s11 + $0x78] sm:$0xff]   ;;  %s5054_s11 = smov 24  }
 0x132   : > { %1644 = vst.msk [vmem:[#allocation3 + $0x48] sm:$0xf] %vm1625_vm3, %v1566_v48  ;;  %v1850_v23 = vrot.slane %v1698_v20, 5  ;;  %v1060_v48 = vld [vmem:[#allocation2 + $0xb4] sm:$0xf]  ;;  %v4993_v19 = vunpack.c.l.bf16 %v5009_v59 }
 0x133   : > { %1092 = vst.msk [vmem:[#allocation3 + $0x78] sm:$0xf] %vm912_vm10, %v1060_v48 }
 0x134   : > { %1893 = vrot.lane.b32.xlu2 %v1802_v8, %s5050_s29  ;;  %v1851_v8 = vsel %vm5676_vm2, %v4788_v22, %v1850_v23  ;;  %v487_v20 = vmul.f32 %v4993_v19, %v5209_v53  ;;  %v2010_v22 = vld [vmem:[#allocation2 + $0x54] sm:$0xf] }
 0x136   : > { %v522_v56 = vadd.f32 %v5221_v2, %v487_v20  ;;  %v2027_v20 = vld [vmem:[#allocation2 + $0xb8] sm:$0xf] }
 0x138   : > { %1903 = vrot.lane.b32.xlu1 %v1819_v57, %s5050_s29  ;;  %v1694_v57 = vld [vmem:[#allocation2 + $0x90] sm:$0xe] }
 0x139   : > { %1913 = vrot.lane.b32.xlu0 %v1837_v41, %s5050_s29  ;;  %v1702_v41 = vld [vmem:[#allocation2 + $0xb0] sm:$0x1]  ;;  %v4787_v36 = vrot.slane %v1694_v57, 9  ;;  %v2008_v57 = vld [vmem:[#allocation2 + $0x48] sm:$0xf] }
 0x13a   : > { %v1860_v5 = vrot.slane %v1702_v41, 5 }
 0x13b   : > { %v1564_v62 = vpop.permute.xlu2 %1563  ;;  %v1562_v30 = vpop.permute.xlu1 %1561  ;;  %v1844_v60 = vsel %vm5676_vm2, %v4787_v36, %v1843_v32  ;;  %v2018_v36 = vld [vmem:[#allocation2 + $0x84] sm:$0xf] }
 0x13c   : > { %1643 = vst.msk [vmem:[#allocation3 + $0x44] sm:$0xf] %vm1625_vm3, %v1564_v62  ;;  %1899 = vrot.lane.b32.xlu2 %v1812_v43, %s5050_s29  ;;  %v1861_v54 = vsel %vm5676_vm2, %v1859_v35, %v1860_v5  ;;  %v1703_v43 = vld [vmem:[#allocation2 + $0xb4] sm:$0xe]  ;;  %v4994_v5 = vunpack.c.h.bf16 %v5009_v59 }
 0x13d   : > { %1642 = vst.msk [vmem:[#allocation3 + $0x40] sm:$0xf] %vm1625_vm3, %v1562_v30  ;;  %v1852_v30 = vrot.slane %v1850_v23, 4  ;;  %v4790_v34 = vrot.slane %v1703_v43, 9  ;;  %v554_v23 = vmax.f32 %v522_v56, 0.0 }
 0x13f   : > { %v1854_v32 = vsel %vm5676_vm2, %v1852_v30, %v1853_v4  ;;  %v1865_v50 = vsel %vm5676_vm2, %v4790_v34, %v1864_v11  ;;  %v586_v48 = vpack.c.bf16 %v554_v23, %v554_v23  ;;  %v2196_v23 = vld [vmem:[#allocation2 + $0x20] sm:$0x1] }
 0x140   : > { %1909 = vrot.lane.b32.xlu1 %v1830_v47, %s5050_s29  ;;  %v2003_v47 = vld [vmem:[#allocation2 + $0x28] sm:$0xf] }
 0x141   : > { %1919 = vrot.lane.b32.xlu0 %v1847_v17, %s5050_s29  ;;  %v847_v55 = vshrl.u32 %v586_v48, 16 }
 0x143   : > { %v1572_v14 = vpop.permute.xlu0 %1571  ;;  %v1568_v63 = vpop.permute.xlu1 %1567  ;;  %v849_v10 = vrot.slane %v847_v55, 7 }
 0x144   : > { %1647 = vst.msk [vmem:[#allocation3 + $0x54] sm:$0xf] %vm1625_vm3, %v1572_v14  ;;  %1905 = vrot.lane.b32.xlu2 %v1823_v15, %s5050_s29  ;;  %v2009_v14 = vld [vmem:[#allocation2 + $0x4c] sm:$0xf]  ;;  %v2007_v15 = vld [vmem:[#allocation2 + $0x40] sm:$0xf] }
 0x145   : > { %1645 = vst.msk [vmem:[#allocation3 + $0x4c] sm:$0xf] %vm1625_vm3, %v1568_v63 }
 0x148   : > { %1915 = vrot.lane.b32.xlu1 %v1840_v16, %s5050_s29  ;;  %v2012_v16 = vld [vmem:[#allocation2 + $0x60] sm:$0xf] }
 0x149   : > { %1925 = vrot.lane.b32.xlu0 %v1858_v45, %s5050_s29 }
 0x14c   : > { %v1570_v1 = vpop.permute.xlu2 %1569  ;;  %1911 = vrot.lane.b32.xlu2 %v1833_v26, %s5050_s29 }
 0x14d   : > { %1646 = vst.msk [vmem:[#allocation3 + $0x50] sm:$0xf] %vm1625_vm3, %v1570_v1 }
 0x150   : > { %1921 = vrot.lane.b32.xlu1 %v1851_v8, %s5050_s29  ;;  %v850_v8 = vshll.u32 %v586_v48, 16 }
 0x151   : > { %v1578_v58 = vpop.permute.xlu0 %1577  ;;  %1931 = vrot.lane.b32.xlu0 %v1868_v3, %s5050_s29  ;;  %v2013_v3 = vld [vmem:[#allocation2 + $0x64] sm:$0xf] }
 0x152   : > { %1650 = vst.msk [vmem:[#allocation3 + $0x60] sm:$0xf] %vm1625_vm3, %v1578_v58  ;;  %v852_v41 = vor.u32 %v850_v8, %v849_v10  ;;  %v1023_v58 = vld [vmem:[#allocation2 + $0xc0] sm:$0xf] }
 0x154   : > { %v1576_v37 = vpop.permute.xlu2 %1575  ;;  %1917 = vrot.lane.b32.xlu2 %v1844_v60, %s5050_s29  ;;  %v1024_v35 = vsel %vm5256_vm14, %v852_v41, %v1023_v58  ;;  %vm4148_vm14 = vcmask 290048  }
 0x155   : > { %1649 = vst.msk [vmem:[#allocation3 + $0x5c] sm:$0xf] %vm1625_vm3, %v1576_v37 }
 0x156   : > { %1025 = vst [vmem:[#allocation2 + $0xc0] sm:$0xf] %v1024_v35 }
 0x158   : > { %v1574_v62 = vpop.permute.xlu1 %1573  ;;  %1927 = vrot.lane.b32.xlu1 %v1861_v54, %s5050_s29  ;;  %v488_v54 = vmul.f32 %v4994_v5, %v5209_v53  ;;  %v2193_v5 = vld [vmem:[#allocation2 + $0x14] sm:$0x1] }
 0x159   : > { %1648 = vst.msk [vmem:[#allocation3 + $0x58] sm:$0xf] %vm1625_vm3, %v1574_v62  ;;  %2066 = vrot.lane.b32.xlu0 %v2000_v40, %s5051_s30  ;;  %v2016_v40 = vld [vmem:[#allocation2 + $0x78] sm:$0xf]  ;;  %v2021_v62 = vld [vmem:[#allocation2 + $0x94] sm:$0xf] }
 0x15a   : > { %v523_v46 = vadd.f32 %v5221_v2, %v488_v54  ;;  %v2014_v2 = vld [vmem:[#allocation2 + $0x6c] sm:$0xf] }
 0x15c   : > { %1923 = vrot.lane.b32.xlu2 %v1854_v32, %s5050_s29  ;;  %v555_v30 = vmax.f32 %v523_v46, 0.0  ;;  %v2191_v32 = vld [vmem:[#allocation2 + $0xc] sm:$0xf] }
 0x15d   : > { %v2243_v34 = vshll.u32 %v2191_v32, 16 }
 0x15e   : > { %v1582_v49 = vpop.permute.xlu2 %1581  ;;  %v587_v4 = vpack.c.bf16 %v555_v30, %v555_v30 }
 0x15f   : > { %1652 = vst.msk [vmem:[#allocation3 + $0x68] sm:$0xf] %vm1625_vm3, %v1582_v49 }
 0x160   : > { %v1584_v9 = vpop.permute.xlu0 %1583  ;;  %v1580_v17 = vpop.permute.xlu1 %1579  ;;  %2062 = vrot.lane.b32.xlu1 %v1998_v42, %s5051_s30  ;;  %v855_v43 = vshrl.u32 %v587_v4, 16 }
 0x161   : > { %1653 = vst.msk [vmem:[#allocation3 + $0x6c] sm:$0xf] %vm1625_vm3, %v1584_v9  ;;  %2072 = vrot.lane.b32.xlu0 %v2003_v47, %s5051_s30  ;;  %v858_v47 = vshll.u32 %v587_v4, 16  ;;  %v2019_v9 = vld [vmem:[#allocation2 + $0x88] sm:$0xf]  ;;  %v2259_v4 = vshll.u32 %v2193_v5, 16 }
 0x162   : > { %1651 = vst.msk [vmem:[#allocation3 + $0x64] sm:$0xf] %vm1625_vm3, %v1580_v17  ;;  %v2240_v17 = vshrl.u32 %v2191_v32, 16  ;;  %v5934_v49 = vrot.slane %v855_v43, 7 }
 0x164   : > { %1929 = vrot.lane.b32.xlu2 %v1865_v50, %s5050_s29  ;;  %v2024_v50 = vld [vmem:[#allocation2 + $0xa8] sm:$0xf] }
 0x166   : > { %v1588_v0 = vpop.permute.xlu2 %1587 }
 0x167   : > { %1655 = vst.msk [vmem:[#allocation3 + $0x74] sm:$0xf] %vm1625_vm3, %v1588_v0 }
 0x168   : > { %2068 = vrot.lane.b32.xlu1 %v2001_v24, %s5051_s30  ;;  %v853_v24 = vrot.slane %v849_v10, 4  ;;  %v2283_v10 = vshll.u32 %v2196_v23, 16 }
 0x169   : > { %2078 = vrot.lane.b32.xlu0 %v2006_v61, %s5051_s30  ;;  %v860_v61 = vor.u32 %v858_v47, %v5934_v49 }
 0x16a   : > { %v2285_v35 = vrot.slane %v2283_v10, 5  ;;  %v2206_v10 = vld [vmem:[#allocation2 + $0x48] sm:$0xf] }
 0x16b   : > { %v1590_v12 = vpop.permute.xlu0 %1589 }
 0x16c   : > { %1656 = vst.msk [vmem:[#allocation3 + $0x78] sm:$0xf] %vm1625_vm3, %v1590_v12  ;;  %2064 = vrot.lane.b32.xlu2 %v1999_v31, %s5051_s30  ;;  %v2242_v12 = vrot.slane %v2240_v17, 4  ;;  %v2245_v31 = vrot.slane %v2243_v34, 5  ;;  %v2261_v34 = vrot.slane %v2259_v4, 5 }
 0x16e   : > { %v1870_v63 = vpop.permute.xlu2 %1869 }
 0x16f   : > { %1966 = vst.msk [vmem:[#allocation3] sm:$0xf] %vm1965_vm5, %v1870_v63  ;;  %v2195_v63 = vld [vmem:[#allocation2 + $0x1c] sm:$0xf] }
 0x170   : > { %2074 = vrot.lane.b32.xlu1 %v2004_v25, %s5051_s30  ;;  %v2273_v19 = vshll.u32 %v2195_v63, 16 }
 0x171   : > { %2084 = vrot.lane.b32.xlu0 %v2009_v14, %s5051_s30  ;;  %v2192_v14 = vld [vmem:[#allocation2 + $0x10] sm:$0xf] }
 0x172   : > { %v1586_v29 = vpop.permute.xlu1 %1585  ;;  %v2249_v59 = vshll.u32 %v2192_v14, 16  ;;  %v5949_v56 = vrot.slane %v2273_v19, 5  ;;  %v2253_v55 = vshrl.u32 %v2192_v14, 16 }
 0x173   : > { %1654 = vst.msk [vmem:[#allocation3 + $0x70] sm:$0xf] %vm1625_vm3, %v1586_v29  ;;  %v1872_v6 = vpop.permute.xlu0 %1871  ;;  %v861_v29 = vsel %vm5250_vm13, %v853_v24, %v860_v61  ;;  %vm3811_vm13 = vcmask 257248  }
 0x174   : > { %1967 = vst.msk [vmem:[#allocation3 + $0x4] sm:$0xf] %vm1965_vm5, %v1872_v6  ;;  %2070 = vrot.lane.b32.xlu2 %v2002_v28, %s5051_s30  ;;  %v2022_v28 = vld [vmem:[#allocation2 + $0x9c] sm:$0xf]  ;;  %v2255_v41 = vrot.slane %v2253_v55, 4 }
 0x175   : > { %1026 = vst.msk [vmem:[#allocation2 + $0xc4] sm:$0xf] %vm912_vm10, %v861_v29 }
 0x176   : > { %v1876_v45 = vpop.permute.xlu2 %1875 }
 0x177   : > { %1969 = vst.msk [vmem:[#allocation3 + $0xc] sm:$0xf] %vm1965_vm5, %v1876_v45  ;;  %v2277_v45 = vshrl.u32 %v2195_v63, 16 }
 0x178   : > { %2080 = vrot.lane.b32.xlu1 %v2007_v15, %s5051_s30  ;;  %v2017_v15 = vld [vmem:[#allocation2 + $0x7c] sm:$0xf] }
 0x179   : > { %2090 = vrot.lane.b32.xlu0 %v2012_v16, %s5051_s30  ;;  %v2246_v16 = vor.u32 %v2245_v31, %v2242_v12  ;;  %v5970_v12 = vld [vmem:[#allocation2 + $0x28] sm:$0xf] }
 0x17a   : > { %v1592_v11 = vpop.permute.xlu1 %1591  ;;  %v2301_v55 = vshrl.u32 %v5970_v12, 16 }
 0x17b   : > { %1657 = vst.msk [vmem:[#allocation3 + $0x7c] sm:$0xf] %vm1625_vm3, %v1592_v11  ;;  %v1878_v13 = vpop.permute.xlu0 %1877  ;;  %v2247_v11 = vrot.slane %v2246_v16, 4 }
 0x17c   : > { %1970 = vst.msk [vmem:[#allocation3 + $0x10] sm:$0xf] %vm1965_vm5, %v1878_v13  ;;  %2076 = vrot.lane.b32.xlu2 %v2005_v27, %s5051_s30  ;;  %v2251_v13 = vrot.slane %v2249_v59, 5  ;;  %v2279_v27 = vrot.slane %v2277_v45, 4  ;;  %v2026_v45 = vld [vmem:[#allocation2 + $0xb4] sm:$0xf] }
 0x17e   : > { %v1882_v44 = vpop.permute.xlu2 %1881  ;;  %v2256_v30 = vor.u32 %v2255_v41, %v2251_v13 }
 0x17f   : > { %1972 = vst.msk [vmem:[#allocation3 + $0x18] sm:$0xf] %vm1965_vm5, %v1882_v44  ;;  %v2020_v44 = vld [vmem:[#allocation2 + $0x90] sm:$0xf] }
 0x180   : > { %2086 = vrot.lane.b32.xlu1 %v2010_v22, %s5051_s30  ;;  %v2257_v17 = vrot.slane %v2256_v30, 4 }
 0x181   : > { %2096 = vrot.lane.b32.xlu0 %v2015_v33, %s5051_s30  ;;  %v2200_v33 = vld [vmem:[#allocation2 + $0x30] sm:$0xf] }
 0x182   : > { %v1874_v26 = vpop.permute.xlu1 %1873  ;;  %v2312_v8 = vshrl.u32 %v2200_v33, 16  ;;  %v2262_v19 = vsel %vm5188_vm4, %v2257_v17, %v2261_v34  ;;  %v2303_v17 = vrot.slane %v2301_v55, 4  ;;  %v2203_v34 = vld [vmem:[#allocation2 + $0x3c] sm:$0xf] }
 0x183   : > { %1968 = vst.msk [vmem:[#allocation3 + $0x8] sm:$0xf] %vm1965_vm5, %v1874_v26  ;;  %v1884_v1 = vpop.permute.xlu0 %1883  ;;  %v2025_v26 = vld [vmem:[#allocation2 + $0xac] sm:$0xf] }
 0x184   : > { %1973 = vst.msk [vmem:[#allocation3 + $0x1c] sm:$0xf] %vm1965_vm5, %v1884_v1  ;;  %2082 = vrot.lane.b32.xlu2 %v2008_v57, %s5051_s30  ;;  %v2280_v1 = vor.u32 %v2279_v27, %v5949_v56  ;;  %v2315_v57 = vshll.u32 %v2200_v33, 16 }
 0x186   : > { %v1888_v21 = vpop.permute.xlu2 %1887  ;;  %v2281_v58 = vrot.slane %v2280_v1, 4 }
 0x187   : > { %1975 = vst.msk [vmem:[#allocation3 + $0x24] sm:$0xf] %vm1965_vm5, %v1888_v21  ;;  %v2314_v21 = vrot.slane %v2312_v8, 4 }
 0x188   : > { %2092 = vrot.lane.b32.xlu1 %v2013_v3, %s5051_s30  ;;  %v2252_v3 = vsel %vm5188_vm4, %v2247_v11, %v2251_v13  ;;  %v2297_v11 = vshll.u32 %v5970_v12, 16 }
 0x189   : > { %2102 = vrot.lane.b32.xlu0 %v2018_v36, %s5051_s30 }
 0x18a   : > { %v1880_v60 = vpop.permute.xlu1 %1879 }
 0x18b   : > { %1971 = vst.msk [vmem:[#allocation3 + $0x14] sm:$0xf] %vm1965_vm5, %v1880_v60  ;;  %v1890_v37 = vpop.permute.xlu0 %1889  ;;  %v2317_v60 = vrot.slane %v2315_v57, 5 }
 0x18c   : > { %1976 = vst.msk [vmem:[#allocation3 + $0x28] sm:$0xf] %vm1965_vm5, %v1890_v37  ;;  %2088 = vrot.lane.b32.xlu2 %v2011_v38, %s5051_s30  ;;  %v2201_v37 = vld [vmem:[#allocation2 + $0x34] sm:$0xf]  ;;  %v2197_v38 = vld [vmem:[#allocation2 + $0x24] sm:$0xf] }
 0x18d   : > { %v2321_v32 = vshll.u32 %v2201_v37, 16  ;;  %v2291_v43 = vshll.u32 %v2197_v38, 16 }
 0x18e   : > { %v1894_v7 = vpop.permute.xlu2 %1893 }
 0x18f   : > { %1978 = vst.msk [vmem:[#allocation3 + $0x30] sm:$0xf] %vm1965_vm5, %v1894_v7  ;;  %v2028_v7 = vld [vmem:[#allocation2 + $0xc0] sm:$0xf] }
 0x190   : > { %2098 = vrot.lane.b32.xlu1 %v2016_v40, %s5051_s30  ;;  %v2204_v40 = vld [vmem:[#allocation2 + $0x40] sm:$0xf] }
 0x191   : > { %2108 = vrot.lane.b32.xlu0 %v2021_v62, %s5051_s30  ;;  %v2023_v62 = vld [vmem:[#allocation2 + $0xa0] sm:$0xf]  ;;  %v2345_v47 = vshll.u32 %v2204_v40, 16 }
 0x192   : > { %v1886_v53 = vpop.permute.xlu1 %1885 }
 0x193   : > { %1974 = vst.msk [vmem:[#allocation3 + $0x20] sm:$0xf] %vm1965_vm5, %v1886_v53  ;;  %v1896_v42 = vpop.permute.xlu0 %1895  ;;  %v2318_v53 = vor.u32 %v2317_v60, %v2314_v21  ;;  %v5973_v63 = vrot.slane %v2345_v47, 5  ;;  %v5991_v60 = vld [vmem:[#allocation2 + $0x58] sm:$0xf] }
 0x194   : > { %1979 = vst.msk [vmem:[#allocation3 + $0x34] sm:$0xf] %vm1965_vm5, %v1896_v42  ;;  %2094 = vrot.lane.b32.xlu2 %v2014_v2, %s5051_s30  ;;  %v2288_v42 = vshrl.u32 %v2197_v38, 16  ;;  %v2286_v2 = vsel %vm5188_vm4, %v2281_v58, %v2285_v35  ;;  %v2213_v58 = vld [vmem:[#allocation2 + $0x64] sm:$0xf] }
 0x195   : > { %v2319_v61 = vrot.slane %v2318_v53, 4  ;;  %v2417_v4 = vshll.u32 %v2213_v58, 16 }
 0x196   : > { %v1900_v0 = vpop.permute.xlu2 %1899  ;;  %v2290_v31 = vrot.slane %v2288_v42, 4  ;;  %v2393_v42 = vshll.u32 %v5991_v60, 16 }
 0x197   : > { %1981 = vst.msk [vmem:[#allocation3 + $0x3c] sm:$0xf] %vm1965_vm5, %v1900_v0  ;;  %v5968_v0 = vrot.slane %v2321_v32, 5 }
 0x198   : > { %2104 = vrot.lane.b32.xlu1 %v2019_v9, %s5051_s30  ;;  %v2349_v9 = vshrl.u32 %v2204_v40, 16  ;;  %v2363_v40 = vshll.u32 %v2206_v10, 16 }
 0x199   : > { %2114 = vrot.lane.b32.xlu0 %v2024_v50, %s5051_s30  ;;  %v2194_v50 = vld [vmem:[#allocation2 + $0x18] sm:$0xf] }
 0x19a   : > { %v1892_v25 = vpop.permute.xlu1 %1891  ;;  %v2351_v29 = vrot.slane %v2349_v9, 4  ;;  %v2264_v16 = vshrl.u32 %v2194_v50, 16  ;;  %v2267_v59 = vshll.u32 %v2194_v50, 16  ;;  %v2365_v9 = vrot.slane %v2363_v40, 5 }
 0x19b   : > { %1977 = vst.msk [vmem:[#allocation3 + $0x2c] sm:$0xf] %vm1965_vm5, %v1892_v25  ;;  %v1902_v6 = vpop.permute.xlu0 %1901  ;;  %v2293_v25 = vrot.slane %v2291_v43, 5 }
 0x19c   : > { %1982 = vst.msk [vmem:[#allocation3 + $0x40] sm:$0xf] %vm1965_vm5, %v1902_v6  ;;  %2100 = vrot.lane.b32.xlu2 %v2017_v15, %s5051_s30  ;;  %v2209_v6 = vld [vmem:[#allocation2 + $0x54] sm:$0xf]  ;;  %v2205_v15 = vld [vmem:[#allocation2 + $0x44] sm:$0x1]  ;;  %v2352_v23 = vor.u32 %v2351_v29, %v5973_v63 }
 0x19d   : > { %v2384_v13 = vshrl.u32 %v2209_v6, 16  ;;  %v2387_v27 = vshll.u32 %v2209_v6, 16  ;;  %v2355_v33 = vshll.u32 %v2205_v15, 16  ;;  %v2199_v29 = vld [vmem:[#allocation2 + $0x2c] sm:$0x1]  ;;  %v2336_v15 = vshrl.u32 %v2203_v34, 16 }
 0x19e   : > { %v1906_v39 = vpop.permute.xlu2 %1905  ;;  %v2353_v5 = vrot.slane %v2352_v23, 4  ;;  %v2214_v6 = vld [vmem:[#allocation2 + $0x68] sm:$0x1] }
 0x19f   : > { %1984 = vst.msk [vmem:[#allocation3 + $0x48] sm:$0xf] %vm1965_vm5, %v1906_v39  ;;  %v2294_v39 = vor.u32 %v2293_v25, %v2290_v31  ;;  %v2386_v41 = vrot.slane %v2384_v13, 4  ;;  %v2357_v21 = vrot.slane %v2355_v33, 5  ;;  %v2397_v13 = vshrl.u32 %v5991_v60, 16 }
 0x1a0   : > { %2110 = vrot.lane.b32.xlu1 %v2022_v28, %s5051_s30  ;;  %v2427_v23 = vshll.u32 %v2214_v6, 16  ;;  %v2338_v55 = vrot.slane %v2336_v15, 4  ;;  %v2212_v15 = vld [vmem:[#allocation2 + $0x60] sm:$0xf] }
 0x1a1   : > { %2120 = vrot.lane.b32.xlu0 %v2027_v20, %s5051_s30  ;;  %v2325_v20 = vshrl.u32 %v2201_v37, 16  ;;  %v2295_v57 = vrot.slane %v2294_v39, 4  ;;  %v2358_v43 = vsel %vm5188_vm4, %v2353_v5, %v2357_v21  ;;  %v2211_v5 = vld [vmem:[#allocation2 + $0x5c] sm:$0x1] }
 0x1a2   : > { %v1898_v22 = vpop.permute.xlu1 %1897  ;;  %v6031_v21 = vld [vmem:[#allocation2 + $0x7c] sm:$0xf] }
 0x1a3   : > { %1980 = vst.msk [vmem:[#allocation3 + $0x38] sm:$0xf] %vm1965_vm5, %v1898_v22  ;;  %v1908_v48 = vpop.permute.xlu0 %1907  ;;  %v2324_v22 = vsel %vm5188_vm4, %v2319_v61, %v5968_v0  ;;  %v2327_v1 = vrot.slane %v2325_v20, 4  ;;  %v6004_v61 = vld [vmem:[#allocation2 + $0x4c] sm:$0xf] }
 0x1a4   : > { %1985 = vst.msk [vmem:[#allocation3 + $0x4c] sm:$0xf] %vm1965_vm5, %v1908_v48  ;;  %2106 = vrot.lane.b32.xlu2 %v2020_v44, %s5051_s30  ;;  %v2266_v48 = vrot.slane %v2264_v16, 4  ;;  %v2269_v44 = vrot.slane %v2267_v59, 5  ;;  %v2339_v16 = vshll.u32 %v2203_v34, 16  ;;  %v2369_v39 = vshll.u32 %v6004_v61, 16 }
 0x1a5   : > { %v2328_v30 = vor.u32 %v2327_v1, %v5968_v0  ;;  %v6006_v0 = vrot.slane %v2417_v4, 5  ;;  %v2218_v59 = vld [vmem:[#allocation2 + $0x78] sm:$0xf]  ;;  %v2373_v4 = vshrl.u32 %v6004_v61, 16 }
 0x1a6   : > { %v1912_v36 = vpop.permute.xlu2 %1911  ;;  %v2270_v38 = vor.u32 %v2269_v44, %v2266_v48  ;;  %v2456_v48 = vshrl.u32 %v2218_v59, 16  ;;  %v2459_v44 = vshll.u32 %v2218_v59, 16 }
 0x1a7   : > { %1987 = vst.msk [vmem:[#allocation3 + $0x54] sm:$0xf] %vm1965_vm5, %v1912_v36  ;;  %v2389_v36 = vrot.slane %v2387_v27, 5  ;;  %v2329_v50 = vrot.slane %v2328_v30, 4  ;;  %v2307_v27 = vshll.u32 %v2199_v29, 16  ;;  %v2375_v61 = vrot.slane %v2373_v4, 4 }
 0x1a8   : > { %2116 = vrot.lane.b32.xlu1 %v2025_v26, %s5051_s30  ;;  %v2202_v26 = vld [vmem:[#allocation2 + $0x38] sm:$0x1]  ;;  %v2458_v60 = vrot.slane %v2456_v48, 4  ;;  %v2408_v48 = vshrl.u32 %v2212_v15, 16  ;;  %v2224_v4 = vld [vmem:[#allocation2 + $0x90] sm:$0xf] }
 0x1a9   : > { %2623 = vrot.lane.b32.xlu0 %v2252_v3, %s5052_s9  ;;  %v5988_v3 = vrot.slane %v2297_v11, 5  ;;  %v2331_v37 = vshll.u32 %v2202_v26, 16  ;;  %v2390_v32 = vor.u32 %v2389_v36, %v2386_v41  ;;  %v2341_v26 = vrot.slane %v2339_v16, 5  ;;  %v2227_v16 = vld [vmem:[#allocation2 + $0x9c] sm:$0xf] }
 0x1aa   : > { %v1904_v54 = vpop.permute.xlu1 %1903  ;;  %v2429_v36 = vrot.slane %v2427_v23, 5 }
 0x1ab   : > { %1983 = vst.msk [vmem:[#allocation3 + $0x44] sm:$0xf] %vm1965_vm5, %v1904_v54  ;;  %v1914_v46 = vpop.permute.xlu0 %1913  ;;  %v2300_v53 = vsel %vm5188_vm4, %v2295_v57, %v5988_v3  ;;  %v2391_v25 = vrot.slane %v2390_v32, 4  ;;  %v2304_v11 = vor.u32 %v2303_v17, %v5988_v3  ;;  %v2215_v57 = vld [vmem:[#allocation2 + $0x6c] sm:$0xf]  ;;  %v2309_v3 = vrot.slane %v2307_v27, 5 }
 0x1ac   : > { %1988 = vst.msk [vmem:[#allocation3 + $0x58] sm:$0xf] %vm1965_vm5, %v1914_v46  ;;  %2112 = vrot.lane.b32.xlu2 %v2023_v62, %s5051_s30  ;;  %v2360_v46 = vshrl.u32 %v2206_v10, 16  ;;  %v2029_v62 = vld [vmem:[#allocation2 + $0xc4] sm:$0xf]  ;;  %v6027_v10 = vrot.slane %v2369_v39, 5 }
 0x1ad   : > { %v2435_v40 = vshll.u32 %v2215_v57, 16  ;;  %v2469_v27 = vshrl.u32 %v6031_v21, 16 }
 0x1ae   : > { %v1918_v24 = vpop.permute.xlu2 %1917  ;;  %v2362_v47 = vrot.slane %v2360_v46, 4  ;;  %v2432_v46 = vshrl.u32 %v2215_v57, 16  ;;  %v2376_v23 = vor.u32 %v2375_v61, %v6027_v10 }
 0x1af   : > { %1990 = vst.msk [vmem:[#allocation3 + $0x60] sm:$0xf] %vm1965_vm5, %v1918_v24  ;;  %v2333_v24 = vrot.slane %v2331_v37, 5 }
 0x1b0   : > { %2122 = vrot.lane.b32.xlu1 %v2028_v7, %s5051_s30  ;;  %v2421_v7 = vshrl.u32 %v2213_v58, 16  ;;  %v2366_v20 = vor.u32 %v2365_v9, %v2362_v47  ;;  %v2399_v58 = vrot.slane %v2397_v13, 4 }
 0x1b1   : > { %2629 = vrot.lane.b32.xlu0 %v2286_v2, %s5052_s9  ;;  %v2271_v2 = vrot.slane %v2270_v38, 4  ;;  %v2334_v33 = vsel %vm5188_vm4, %v2329_v50, %v2333_v24  ;;  %v2342_v38 = vor.u32 %v2341_v26, %v2338_v55  ;;  %v2434_v50 = vrot.slane %v2432_v46, 4 }
 0x1b2   : > { %v1910_v14 = vpop.permute.xlu1 %1909  ;;  %v2423_v12 = vrot.slane %v2421_v7, 4  ;;  %v2367_v1 = vrot.slane %v2366_v20, 4  ;;  %v2437_v24 = vrot.slane %v2435_v40, 5  ;;  %v6074_v40 = vld [vmem:[#allocation2 + $0xa0] sm:$0xf] }
 0x1b3   : > { %1986 = vst.msk [vmem:[#allocation3 + $0x50] sm:$0xf] %vm1965_vm5, %v1910_v14  ;;  %v1920_v28 = vpop.permute.xlu0 %1919  ;;  %v6009_v14 = vrot.slane %v2393_v42, 5  ;;  %v2403_v42 = vshll.u32 %v2211_v5, 16  ;;  %v2343_v17 = vrot.slane %v2342_v38, 4 }
 0x1b4   : > { %1991 = vst.msk [vmem:[#allocation3 + $0x64] sm:$0xf] %vm1965_vm5, %v1920_v28  ;;  %2118 = vrot.lane.b32.xlu2 %v2026_v45, %s5051_s30  ;;  %v2276_v45 = vsel %vm5188_vm4, %v2271_v2, %v5949_v56  ;;  %v2372_v7 = vsel %vm5188_vm4, %v2367_v1, %v6027_v10  ;;  %v2465_v2 = vshll.u32 %v6031_v21, 16  ;;  %v2438_v39 = vor.u32 %v2437_v24, %v2434_v50  ;;  %v2220_v5 = vld [vmem:[#allocation2 + $0x80] sm:$0x1] }
 0x1b5   : > { %v2396_v56 = vsel %vm5188_vm4, %v2391_v25, %v6009_v14  ;;  %v2400_v32 = vor.u32 %v2399_v58, %v6009_v14  ;;  %v6048_v25 = vld [vmem:[#allocation2 + $0x70] sm:$0xf]  ;;  %v2410_v21 = vrot.slane %v2408_v48, 4  ;;  %v2504_v50 = vshrl.u32 %v2224_v4, 16 }
 0x1b6   : > { %v1924_v8 = vpop.permute.xlu2 %1923  ;;  %v2208_v14 = vld [vmem:[#allocation2 + $0x50] sm:$0x1]  ;;  %v2467_v20 = vrot.slane %v2465_v2, 5  ;;  %v2445_v10 = vshrl.u32 %v6048_v25, 16  ;;  %v2507_v24 = vshll.u32 %v2224_v4, 16 }
 0x1b7   : > { %1993 = vst.msk [vmem:[#allocation3 + $0x6c] sm:$0xf] %vm1965_vm5, %v1924_v8  ;;  %v2305_v8 = vrot.slane %v2304_v11, 4  ;;  %v2223_v11 = vld [vmem:[#allocation2 + $0x8c] sm:$0x1] }
 0x1b8   : > { %2625 = vrot.lane.b32.xlu1 %v2262_v19, %s5052_s9  ;;  %v2499_v1 = vshll.u32 %v2223_v11, 16 }
 0x1b9   : > { %2635 = vrot.lane.b32.xlu0 %v2324_v22, %s5052_s9  ;;  %v2424_v22 = vor.u32 %v2423_v12, %v6006_v0  ;;  %v2401_v12 = vrot.slane %v2400_v32, 4 }
 0x1ba   : > { %v1916_v35 = vpop.permute.xlu1 %1915  ;;  %v2501_v46 = vrot.slane %v2499_v1, 5 }
 0x1bb   : > { %1989 = vst.msk [vmem:[#allocation3 + $0x5c] sm:$0xf] %vm1965_vm5, %v1916_v35  ;;  %v1926_v54 = vpop.permute.xlu0 %1925  ;;  %v2425_v41 = vrot.slane %v2424_v22, 4  ;;  %v2441_v22 = vshll.u32 %v6048_v25, 16 }
 0x1bc   : > { %1994 = vst.msk [vmem:[#allocation3 + $0x70] sm:$0xf] %vm1965_vm5, %v1926_v54  ;;  %2124 = vrot.lane.b32.xlu2 %v2029_v62, %s5051_s30  ;;  %v2461_v54 = vrot.slane %v2459_v44, 5  ;;  %v2222_v62 = vld [vmem:[#allocation2 + $0x88] sm:$0xf]  ;;  %v2411_v44 = vshll.u32 %v2212_v15, 16 }
 0x1bd   : > { %v2489_v47 = vshll.u32 %v2222_v62, 16  ;;  %v2493_v9 = vshrl.u32 %v2222_v62, 16  ;;  %v1027_v62 = vld [vmem:[#allocation2 + $0xc8] sm:$0x1]  ;;  %v2447_v15 = vrot.slane %v2445_v10, 4 }
 0x1be   : > { %v1930_v31 = vpop.permute.xlu2 %1929  ;;  %v2462_v34 = vor.u32 %v2461_v54, %v2458_v60  ;;  %v2413_v60 = vrot.slane %v2411_v44, 5 }
 0x1bf   : > { %1996 = vst.msk [vmem:[#allocation3 + $0x78] sm:$0xf] %vm1965_vm5, %v1930_v31  ;;  %v2405_v31 = vrot.slane %v2403_v42, 5  ;;  %v6051_v6 = vrot.slane %v2489_v47, 5 }
 0x1c0   : > { %2631 = vrot.lane.b32.xlu1 %v2300_v53, %s5052_s9  ;;  %v2310_v53 = vsel %vm5188_vm4, %v2305_v8, %v2309_v3  ;;  %v862_v8 = vrot.slane %v5934_v49, 4  ;;  %v2439_v3 = vrot.slane %v2438_v39, 4 }
 0x1c1   : > { %2641 = vrot.lane.b32.xlu0 %v2358_v43, %s5052_s9  ;;  %v2430_v43 = vsel %vm5188_vm4, %v2425_v41, %v2429_v36  ;;  %v2406_v55 = vsel %vm5188_vm4, %v2401_v12, %v2405_v31  ;;  %v6070_v41 = vrot.slane %v2441_v22, 5  ;;  %v2377_v36 = vrot.slane %v2376_v23, 4  ;;  %v2232_v22 = vld [vmem:[#allocation2 + $0xb0] sm:$0x1] }
 0x1c2   : > { %v1922_v28 = vpop.permute.xlu1 %1921  ;;  %v1028_v2 = vsel %vm5263_vm15, %v862_v8, %v1027_v62  ;;  %v2571_v10 = vshll.u32 %v2232_v22, 16  ;;  %v6131_v22 = vld [vmem:[#allocation2 + $0x10] sm:$0xf]  ;;  %vm4313_vm15 = vcmask 293888  }
 0x1c3   : > { %1992 = vst.msk [vmem:[#allocation3 + $0x68] sm:$0xf] %vm1965_vm5, %v1922_v28  ;;  %v1932_v19 = vpop.permute.xlu0 %1931  ;;  %v2495_v28 = vrot.slane %v2493_v9, 4  ;;  %v2444_v32 = vsel %vm5188_vm4, %v2439_v3, %v6070_v41  ;;  %v2414_v9 = vor.u32 %v2413_v60, %v2410_v21 }
 0x1c4   : > { %1997 = vst.msk [vmem:[#allocation3 + $0x7c] sm:$0xf] %vm1965_vm5, %v1932_v19  ;;  %2627 = vrot.lane.b32.xlu2 %v2276_v45, %s5052_s9  ;;  %v2348_v19 = vsel %vm5188_vm4, %v2343_v17, %v5973_v63  ;;  %v2463_v45 = vrot.slane %v2462_v34, 4  ;;  %v2531_v63 = vshll.u32 %v2227_v16, 16  ;;  %v2537_v34 = vshll.u32 %v6074_v40, 16 }
 0x1c5   : > { %v2496_v26 = vor.u32 %v2495_v28, %v6051_v6  ;;  %1029 = vst [vmem:[#allocation2 + $0xc8] sm:$0x1] %v1028_v2 }
 0x1c6   : > { %v2065_v35 = vpop.permute.xlu2 %2064  ;;  %v2468_v57 = vsel %vm5188_vm4, %v2463_v45, %v2467_v20  ;;  %v2533_v49 = vrot.slane %v2531_v63, 5  ;;  %v6091_v28 = vrot.slane %v2537_v34, 5  ;;  %v2509_v45 = vrot.slane %v2507_v24, 5 }
 0x1c7   : > { %2160 = vst.msk [vmem:[#allocation3 + $0x4] sm:$0xf] %vm2158_vm6, %v2065_v35  ;;  %v2471_v35 = vrot.slane %v2469_v27, 4  ;;  %v2497_v38 = vrot.slane %v2496_v26, 4  ;;  %v2225_v27 = vld [vmem:[#allocation2 + $0x94] sm:$0xf]  ;;  %v2448_v26 = vor.u32 %v2447_v15, %v6070_v41 }
 0x1c8   : > { %2637 = vrot.lane.b32.xlu1 %v2334_v33, %s5052_s9  ;;  %v2379_v33 = vshll.u32 %v2208_v14, 16  ;;  %v2415_v14 = vrot.slane %v2414_v9, 4 }
 0x1c9   : > { %2647 = vrot.lane.b32.xlu0 %v2396_v56, %s5052_s9  ;;  %v2528_v56 = vshrl.u32 %v2227_v16, 16  ;;  %v2472_v42 = vor.u32 %v2471_v35, %v2467_v20  ;;  %v2502_v31 = vsel %vm5188_vm4, %v2497_v38, %v2501_v46  ;;  %v2221_v16 = vld [vmem:[#allocation2 + $0x84] sm:$0xf]  ;;  %v2217_v20 = vld [vmem:[#allocation2 + $0x74] sm:$0x1]  ;;  %v2449_v21 = vrot.slane %v2448_v26, 4 }
 0x1ca   : > { %v1928_v37 = vpop.permute.xlu1 %1927  ;;  %v2381_v58 = vrot.slane %v2379_v33, 5  ;;  %v2480_v48 = vshrl.u32 %v2221_v16, 16  ;;  %v2483_v44 = vshll.u32 %v2221_v16, 16  ;;  %v2420_v63 = vsel %vm5188_vm4, %v2415_v14, %v6006_v0  ;;  %v2226_v16 = vld [vmem:[#allocation2 + $0x98] sm:$0x1] }
 0x1cb   : > { %1995 = vst.msk [vmem:[#allocation3 + $0x74] sm:$0xf] %vm1965_vm5, %v1928_v37  ;;  %v2067_v30 = vpop.permute.xlu0 %2066  ;;  %v2530_v54 = vrot.slane %v2528_v56, 4  ;;  %v2473_v52 = vrot.slane %v2472_v42, 4  ;;  %v2236_v56 = vld [vmem:[#allocation2 + $0xc0] sm:$0xf] }
 0x1cc   : > { %2161 = vst.msk [vmem:[#allocation3 + $0x8] sm:$0xf] %vm2158_vm6, %v2067_v30  ;;  %2633 = vrot.lane.b32.xlu2 %v2310_v53, %s5052_s9  ;;  %v2382_v47 = vsel %vm5188_vm4, %v2377_v36, %v2381_v58  ;;  %v2451_v1 = vshll.u32 %v2217_v20, 16  ;;  %v2600_v58 = vshrl.u32 %v2236_v56, 16  ;;  %v2603_v35 = vshll.u32 %v2236_v56, 16 }
 0x1cd   : > { %v2534_v17 = vor.u32 %v2533_v49, %v2530_v54  ;;  %v2485_v0 = vrot.slane %v2483_v44, 5  ;;  %v2573_v46 = vrot.slane %v2571_v10, 5  ;;  %v2237_v42 = vld [vmem:[#allocation2 + $0xc4] sm:$0xf] }
 0x1ce   : > { %v2071_v29 = vpop.permute.xlu2 %2070  ;;  %v2453_v41 = vrot.slane %v2451_v1, 5  ;;  %v2605_v4 = vrot.slane %v2603_v35, 5 }
 0x1cf   : > { %2163 = vst.msk [vmem:[#allocation3 + $0x10] sm:$0xf] %vm2158_vm6, %v2071_v29  ;;  %v2535_v29 = vrot.slane %v2534_v17, 4 }
 0x1d0   : > { %2643 = vrot.lane.b32.xlu1 %v2372_v7, %s5052_s9  ;;  %v2231_v7 = vld [vmem:[#allocation2 + $0xac] sm:$0xf]  ;;  %v2454_v2 = vsel %vm5188_vm4, %v2449_v21, %v2453_v41 }
 0x1d1   : > { %2653 = vrot.lane.b32.xlu0 %v2430_v43, %s5052_s9  ;;  %v2475_v43 = vshll.u32 %v2220_v5, 16  ;;  %v2561_v61 = vshll.u32 %v2231_v7, 16  ;;  %v2565_v12 = vshrl.u32 %v2231_v7, 16  ;;  %v2540_v36 = vsel %vm5188_vm4, %v2535_v29, %v6091_v28  ;;  %v2233_v7 = vld [vmem:[#allocation2 + $0xb4] sm:$0xf] }
 0x1d2   : > { %v2063_v59 = vpop.permute.xlu1 %2062  ;;  %v2482_v5 = vrot.slane %v2480_v48, 4  ;;  %v2576_v34 = vshrl.u32 %v2233_v7, 16 }
 0x1d3   : > { %2159 = vst.msk [vmem:[#allocation3] sm:$0xf] %vm2158_vm6, %v2063_v59  ;;  %v2073_v13 = vpop.permute.xlu0 %2072  ;;  %v2477_v25 = vrot.slane %v2475_v43, 5  ;;  %v6094_v39 = vrot.slane %v2561_v61, 5  ;;  %v2567_v11 = vrot.slane %v2565_v12, 4  ;;  %v2517_v43 = vshrl.u32 %v2225_v27, 16 }
 0x1d4   : > { %2164 = vst.msk [vmem:[#allocation3 + $0x14] sm:$0xf] %vm2158_vm6, %v2073_v13  ;;  %2639 = vrot.lane.b32.xlu2 %v2348_v19, %s5052_s9  ;;  %v2506_v19 = vrot.slane %v2504_v50, 4  ;;  %v2579_v50 = vshll.u32 %v2233_v7, 16  ;;  %v2609_v12 = vshll.u32 %v2237_v42, 16 }
 0x1d5   : > { %v2478_v33 = vsel %vm5188_vm4, %v2473_v52, %v2477_v25  ;;  %v2568_v3 = vor.u32 %v2567_v11, %v6094_v39  ;;  %v2519_v14 = vrot.slane %v2517_v43, 4  ;;  %v2234_v11 = vld [vmem:[#allocation2 + $0xb8] sm:$0xf]  ;;  %v2758_v7 = vld [vmem:[#allocation2 + $0x24] sm:$0xe] }
 0x1d6   : > { %v2077_v37 = vpop.permute.xlu2 %2076  ;;  %v2510_v8 = vor.u32 %v2509_v45, %v2506_v19  ;;  %v2581_v15 = vrot.slane %v2579_v50, 5  ;;  %v2611_v20 = vrot.slane %v2609_v12, 5  ;;  %v2585_v26 = vshll.u32 %v2234_v11, 16 }
 0x1d7   : > { %2166 = vst.msk [vmem:[#allocation3 + $0x1c] sm:$0xf] %vm2158_vm6, %v2077_v37  ;;  %v2569_v38 = vrot.slane %v2568_v3, 4 }
 0x1d8   : > { %2649 = vrot.lane.b32.xlu1 %v2406_v55, %s5052_s9  ;;  %v2541_v55 = vshrl.u32 %v6074_v40, 16  ;;  %v2511_v49 = vrot.slane %v2510_v8, 4  ;;  %v2229_v40 = vld [vmem:[#allocation2 + $0xa4] sm:$0x1]  ;;  %v2850_v8 = vrot.slane %v6131_v22, 5 }
 0x1d9   : > { %2659 = vrot.lane.b32.xlu0 %v2468_v57, %s5052_s9  ;;  %v2513_v57 = vshll.u32 %v2225_v27, 16  ;;  %v2547_v9 = vshll.u32 %v2229_v40, 16  ;;  %v2574_v24 = vsel %vm5188_vm4, %v2569_v38, %v2573_v46 }
 0x1da   : > { %v2069_v30 = vpop.permute.xlu1 %2068  ;;  %v2543_v60 = vrot.slane %v2541_v55, 4  ;;  %v2852_v41 = vrot.slane %v2850_v8, 4 }
 0x1db   : > { %2162 = vst.msk [vmem:[#allocation3 + $0xc] sm:$0xf] %vm2158_vm6, %v2069_v30  ;;  %v2079_v53 = vpop.permute.xlu0 %2078  ;;  %v2515_v37 = vrot.slane %v2513_v57, 5  ;;  %v2602_v30 = vrot.slane %v2600_v58, 4  ;;  %v2549_v25 = vrot.slane %v2547_v9, 5 }
 0x1dc   : > { %2167 = vst.msk [vmem:[#allocation3 + $0x20] sm:$0xf] %vm2158_vm6, %v2079_v53  ;;  %2645 = vrot.lane.b32.xlu2 %v2382_v47, %s5052_s9  ;;  %v2544_v47 = vor.u32 %v2543_v60, %v6091_v28  ;;  %v2578_v28 = vrot.slane %v2576_v34, 4  ;;  %v2235_v9 = vld [vmem:[#allocation2 + $0xbc] sm:$0x1]  ;;  %v4793_v34 = vrot.slane %v2758_v7, 9 }
 0x1dd   : > { %v2516_v17 = vsel %vm5188_vm4, %v2511_v49, %v2515_v37  ;;  %v2606_v61 = vor.u32 %v2605_v4, %v2602_v30 }
 0x1de   : > { %v2083_v59 = vpop.permute.xlu2 %2082  ;;  %v2545_v52 = vrot.slane %v2544_v47, 4  ;;  %v2582_v55 = vor.u32 %v2581_v15, %v2578_v28  ;;  %v2756_v28 = vld [vmem:[#allocation2 + $0x1c] sm:$0xf] }
 0x1df   : > { %2169 = vst.msk [vmem:[#allocation3 + $0x28] sm:$0xf] %vm2158_vm6, %v2083_v59  ;;  %v2230_v59 = vld [vmem:[#allocation2 + $0xa8] sm:$0xf]  ;;  %v2607_v45 = vrot.slane %v2606_v61, 4 }
 0x1e0   : > { %2655 = vrot.lane.b32.xlu1 %v2444_v32, %s5052_s9  ;;  %v2486_v32 = vor.u32 %v2485_v0, %v2482_v5  ;;  %v2552_v48 = vshrl.u32 %v2230_v59, 16  ;;  %v2555_v44 = vshll.u32 %v2230_v59, 16  ;;  %v2550_v56 = vsel %vm5188_vm4, %v2545_v52, %v2549_v25  ;;  %v6158_v61 = vld [vmem:[#allocation2 + $0x34] sm:$0xf] }
 0x1e1   : > { %2665 = vrot.lane.b32.xlu0 %v2502_v31, %s5052_s9  ;;  %v2612_v1 = vsel %vm5188_vm4, %v2607_v45, %v2611_v20  ;;  %v2583_v35 = vrot.slane %v2582_v55, 4  ;;  %v2587_v5 = vrot.slane %v2585_v26, 5  ;;  %v2595_v52 = vshll.u32 %v2235_v9, 16  ;;  %v2767_v55 = vld [vmem:[#allocation2 + $0x48] sm:$0xe] }
 0x1e2   : > { %v2075_v13 = vpop.permute.xlu1 %2074  ;;  %v2487_v31 = vrot.slane %v2486_v32, 4  ;;  %v2554_v10 = vrot.slane %v2552_v48, 4  ;;  %v2871_v15 = vrot.slane %v6158_v61, 5  ;;  %v2768_v26 = vld [vmem:[#allocation2 + $0x4c] sm:$0xf] }
 0x1e3   : > { %2165 = vst.msk [vmem:[#allocation3 + $0x18] sm:$0xf] %vm2158_vm6, %v2075_v13  ;;  %v2085_v23 = vpop.permute.xlu0 %2084  ;;  %v2588_v40 = vsel %vm5188_vm4, %v2583_v35, %v2587_v5  ;;  %v2776_v9 = vld [vmem:[#allocation2 + $0x6c] sm:$0xe] }
 0x1e4   : > { %2170 = vst.msk [vmem:[#allocation3 + $0x2c] sm:$0xf] %vm2158_vm6, %v2085_v23  ;;  %2651 = vrot.lane.b32.xlu2 %v2420_v63, %s5052_s9  ;;  %v2492_v27 = vsel %vm5188_vm4, %v2487_v31, %v6051_v6  ;;  %v2520_v23 = vor.u32 %v2519_v14, %v2515_v37  ;;  %v2613_v63 = vshrl.u32 %v2237_v42, 16  ;;  %v2754_v6 = vld [vmem:[#allocation2 + $0x14] sm:$0x1]  ;;  %v2589_v37 = vshrl.u32 %v2234_v11, 16 }
 0x1e5   : > { %v2853_v60 = vrot.slane %v2754_v6, 5 }
 0x1e6   : > { %v2089_v54 = vpop.permute.xlu2 %2088  ;;  %v2521_v57 = vrot.slane %v2520_v23, 4  ;;  %v2615_v0 = vrot.slane %v2613_v63, 4  ;;  %v2591_v42 = vrot.slane %v2589_v37, 4  ;;  %v2760_v63 = vld [vmem:[#allocation2 + $0x2c] sm:$0x1] }
 0x1e7   : > { %2172 = vst.msk [vmem:[#allocation3 + $0x34] sm:$0xf] %vm2158_vm6, %v2089_v54  ;;  %v2238_v54 = vld [vmem:[#allocation2 + $0xc8] sm:$0x1]  ;;  %v2854_v4 = vsel %vm5676_vm2, %v2852_v41, %v2853_v60  ;;  %v2757_v41 = vld [vmem:[#allocation2 + $0x20] sm:$0x1] }
 0x1e8   : > { %2661 = vrot.lane.b32.xlu1 %v2478_v33, %s5052_s9  ;;  %v2523_v33 = vshll.u32 %v2226_v16, 16  ;;  %v2619_v30 = vshll.u32 %v2238_v54, 16  ;;  %v2592_v31 = vor.u32 %v2591_v42, %v2587_v5  ;;  %v2763_v16 = vld [vmem:[#allocation2 + $0x38] sm:$0x1]  ;;  %v2764_v54 = vld [vmem:[#allocation2 + $0x3c] sm:$0xe] }
 0x1e9   : > { %2671 = vrot.lane.b32.xlu0 %v2540_v36, %s5052_s9  ;;  %v2557_v36 = vrot.slane %v2555_v44, 5  ;;  %v2752_v44 = vld [vmem:[#allocation2 + $0xc] sm:$0xe]  ;;  %v6188_v5 = vld [vmem:[#allocation2 + $0x58] sm:$0xf] }
 0x1ea   : > { %v2081_v62 = vpop.permute.xlu1 %2080  ;;  %v2525_v3 = vrot.slane %v2523_v33, 5  ;;  %v2621_v47 = vrot.slane %v2619_v30, 5  ;;  %v2593_v59 = vrot.slane %v2592_v31, 4  ;;  %v2892_v37 = vrot.slane %v6188_v5, 5 }
 0x1eb   : > { %2168 = vst.msk [vmem:[#allocation3 + $0x24] sm:$0xf] %vm2158_vm6, %v2081_v62  ;;  %v2091_v53 = vpop.permute.xlu0 %2090  ;;  %v2558_v46 = vor.u32 %v2557_v36, %v2554_v10  ;;  %v2616_v62 = vor.u32 %v2615_v0, %v2611_v20  ;;  %v2857_v20 = vrot.slane %v2756_v28, 5  ;;  %v4796_v36 = vrot.slane %v2767_v55, 9 }
 0x1ec   : > { %2173 = vst.msk [vmem:[#allocation3 + $0x38] sm:$0xf] %vm2158_vm6, %v2091_v53  ;;  %2657 = vrot.lane.b32.xlu2 %v2454_v2, %s5052_s9  ;;  %v2526_v38 = vsel %vm5188_vm4, %v2521_v57, %v2525_v3  ;;  %v2759_v53 = vld [vmem:[#allocation2 + $0x28] sm:$0xf]  ;;  %v2867_v3 = vrot.slane %v2760_v63, 5 }
 0x1ed   : > { %v2559_v32 = vrot.slane %v2558_v46, 4  ;;  %v2617_v2 = vrot.slane %v2616_v62, 4  ;;  %v2864_v50 = vrot.slane %v2759_v53, 5  ;;  %v2859_v22 = vrot.slane %v2857_v20, 4 }
 0x1ee   : > { %v2095_v29 = vpop.permute.xlu2 %2094  ;;  %v2860_v46 = vrot.slane %v2757_v41, 5 }
 0x1ef   : > { %2175 = vst.msk [vmem:[#allocation3 + $0x40] sm:$0xf] %vm2158_vm6, %v2095_v29  ;;  %v2564_v12 = vsel %vm5188_vm4, %v2559_v32, %v6094_v39  ;;  %v2622_v25 = vsel %vm5188_vm4, %v2617_v2, %v2621_v47  ;;  %v2865_v14 = vsel %vm5676_vm2, %v4793_v34, %v2864_v50  ;;  %v2755_v29 = vld [vmem:[#allocation2 + $0x18] sm:$0xe]  ;;  %v2866_v57 = vrot.slane %v2864_v50, 4 }
 0x1f0   : > { %2667 = vrot.lane.b32.xlu1 %v2516_v17, %s5052_s9  ;;  %v4792_v45 = vrot.slane %v2755_v29, 9  ;;  %v2861_v32 = vsel %vm5676_vm2, %v2859_v22, %v2860_v46  ;;  %v2769_v47 = vld [vmem:[#allocation2 + $0x50] sm:$0x1]  ;;  %v6219_v29 = vld [vmem:[#allocation2 + $0x7c] sm:$0xf] }
 0x1f1   : > { %2677 = vrot.lane.b32.xlu0 %v2574_v24, %s5052_s9  ;;  %v2775_v22 = vld [vmem:[#allocation2 + $0x68] sm:$0x1] }
 0x1f2   : > { %v2087_v19 = vpop.permute.xlu1 %2086  ;;  %v2858_v48 = vsel %vm5676_vm2, %v4792_v45, %v2857_v20  ;;  %v2774_v45 = vld [vmem:[#allocation2 + $0x64] sm:$0xf]  ;;  %v2913_v20 = vrot.slane %v6219_v29, 5 }
 0x1f3   : > { %2171 = vst.msk [vmem:[#allocation3 + $0x30] sm:$0xf] %vm2158_vm6, %v2087_v19  ;;  %v2097_v13 = vpop.permute.xlu0 %2096  ;;  %v2597_v19 = vrot.slane %v2595_v52, 5  ;;  %v4799_v52 = vrot.slane %v2776_v9, 9 }
 0x1f4   : > { %2176 = vst.msk [vmem:[#allocation3 + $0x44] sm:$0xf] %vm2158_vm6, %v2097_v13  ;;  %2663 = vrot.lane.b32.xlu2 %v2492_v27, %s5052_s9  ;;  %v2873_v13 = vrot.slane %v2871_v15, 4  ;;  %v2874_v27 = vrot.slane %v2763_v16, 5 }
 0x1f5   : > { %v2598_v33 = vsel %vm5188_vm4, %v2593_v59, %v2597_v19  ;;  %v2766_v59 = vld [vmem:[#allocation2 + $0x44] sm:$0x1] }
 0x1f6   : > { %v2101_v58 = vpop.permute.xlu2 %2100 }
 0x1f7   : > { %2178 = vst.msk [vmem:[#allocation3 + $0x4c] sm:$0xf] %vm2158_vm6, %v2101_v58  ;;  %v2885_v58 = vrot.slane %v2768_v26, 5  ;;  %v2770_v26 = vld [vmem:[#allocation2 + $0x54] sm:$0xe] }
 0x1f8   : > { %2673 = vrot.lane.b32.xlu1 %v2550_v56, %s5052_s9  ;;  %v2875_v56 = vsel %vm5676_vm2, %v2873_v13, %v2874_v27  ;;  %v2881_v13 = vrot.slane %v2766_v59, 5 }
 0x1f9   : > { %2683 = vrot.lane.b32.xlu0 %v2612_v1, %s5052_s9  ;;  %v4791_v1 = vrot.slane %v2752_v44, 9  ;;  %v2886_v60 = vsel %vm5676_vm2, %v4796_v36, %v2885_v58 }
 0x1fa   : > { %v2093_v21 = vpop.permute.xlu1 %2092 }
 0x1fb   : > { %2174 = vst.msk [vmem:[#allocation3 + $0x3c] sm:$0xf] %vm2158_vm6, %v2093_v21  ;;  %v2103_v49 = vpop.permute.xlu0 %2102  ;;  %v2851_v0 = vsel %vm5676_vm2, %v4791_v1, %v2850_v8  ;;  %v2868_v21 = vsel %vm5676_vm2, %v2866_v57, %v2867_v3  ;;  %v2785_v57 = vld [vmem:[#allocation2 + $0x90] sm:$0xe]  ;;  %v2786_v3 = vld [vmem:[#allocation2 + $0x94] sm:$0xf] }
 0x1fc   : > { %2179 = vst.msk [vmem:[#allocation3 + $0x50] sm:$0xf] %vm2158_vm6, %v2103_v49  ;;  %2669 = vrot.lane.b32.xlu2 %v2526_v38, %s5052_s9  ;;  %v2765_v49 = vld [vmem:[#allocation2 + $0x40] sm:$0xf]  ;;  %v2772_v38 = vld [vmem:[#allocation2 + $0x5c] sm:$0x1] }
 0x1fd   : > { %v2878_v62 = vrot.slane %v2765_v49, 5  ;;  %v2895_v7 = vrot.slane %v2772_v38, 5  ;;  %v2927_v41 = vrot.slane %v2786_v3, 5 }
 0x1fe   : > { %v2107_v43 = vpop.permute.xlu2 %2106 }
 0x1ff   : > { %2181 = vst.msk [vmem:[#allocation3 + $0x58] sm:$0xf] %vm2158_vm6, %v2107_v43  ;;  %v2761_v43 = vld [vmem:[#allocation2 + $0x30] sm:$0xe]  ;;  %v2880_v61 = vrot.slane %v2878_v62, 4 }
 0x200   : > { %2679 = vrot.lane.b32.xlu1 %v2588_v40, %s5052_s9  ;;  %v4795_v40 = vrot.slane %v2764_v54, 9  ;;  %v4794_v34 = vrot.slane %v2761_v43, 9  ;;  %v6250_v54 = vld [vmem:[#allocation2 + $0xa0] sm:$0xf] }
 0x201   : > { %2962 = vrot.lane.b32.xlu0 %v2854_v4, %s5053_s10  ;;  %v2894_v4 = vrot.slane %v2892_v37, 4  ;;  %v2882_v63 = vsel %vm5676_vm2, %v2880_v61, %v2881_v13  ;;  %v3090_v13 = vld [vmem:[#allocation2 + $0x18] sm:$0xf] }
 0x202   : > { %v2099_v17 = vpop.permute.xlu1 %2098  ;;  %v2879_v42 = vsel %vm5676_vm2, %v4795_v40, %v2878_v62  ;;  %v2872_v28 = vsel %vm5676_vm2, %v4794_v34, %v2871_v15  ;;  %v2783_v40 = vld [vmem:[#allocation2 + $0x88] sm:$0xf]  ;;  %v2934_v62 = vrot.slane %v6250_v54, 5  ;;  %v2779_v34 = vld [vmem:[#allocation2 + $0x78] sm:$0xe] }
 0x203   : > { %2177 = vst.msk [vmem:[#allocation3 + $0x48] sm:$0xf] %vm2158_vm6, %v2099_v17  ;;  %v2109_v24 = vpop.permute.xlu0 %2108  ;;  %v2896_v2 = vsel %vm5676_vm2, %v2894_v4, %v2895_v7  ;;  %v2777_v17 = vld [vmem:[#allocation2 + $0x70] sm:$0xf]  ;;  %v2902_v4 = vrot.slane %v2775_v22, 5 }
 0x204   : > { %2182 = vst.msk [vmem:[#allocation3 + $0x5c] sm:$0xf] %vm2158_vm6, %v2109_v24  ;;  %2675 = vrot.lane.b32.xlu2 %v2564_v12, %s5052_s9  ;;  %v2887_v24 = vrot.slane %v2885_v58, 4  ;;  %v2888_v12 = vrot.slane %v2769_v47, 5  ;;  %v3284_v47 = vld [vmem:[#allocation2 + $0x1c] sm:$0xf] }
 0x206   : > { %v2113_v39 = vpop.permute.xlu2 %2112  ;;  %v2889_v16 = vsel %vm5676_vm2, %v2887_v24, %v2888_v12  ;;  %v2787_v24 = vld [vmem:[#allocation2 + $0x98] sm:$0x1]  ;;  %v3341_v12 = vshll.u32 %v3284_v47, 16 }
 0x207   : > { %2184 = vst.msk [vmem:[#allocation3 + $0x64] sm:$0xf] %vm2158_vm6, %v2113_v39  ;;  %v2773_v39 = vld [vmem:[#allocation2 + $0x60] sm:$0xe] }
 0x208   : > { %2685 = vrot.lane.b32.xlu1 %v2622_v25, %s5052_s9  ;;  %v2906_v25 = vrot.slane %v2777_v17, 5  ;;  %v4798_v27 = vrot.slane %v2773_v39, 9  ;;  %v6280_v59 = vrot.slane %v3341_v12, 5 }
 0x209   : > { %2968 = vrot.lane.b32.xlu0 %v2865_v14, %s5053_s10 }
 0x20a   : > { %v2105_v11 = vpop.permute.xlu1 %2104  ;;  %v2907_v19 = vsel %vm5676_vm2, %v4799_v52, %v2906_v25  ;;  %v2908_v58 = vrot.slane %v2906_v25, 4  ;;  %v4800_v52 = vrot.slane %v2779_v34, 9 }
 0x20b   : > { %2180 = vst.msk [vmem:[#allocation3 + $0x54] sm:$0xf] %vm2158_vm6, %v2105_v11  ;;  %v2115_v23 = vpop.permute.xlu0 %2114  ;;  %v2781_v11 = vld [vmem:[#allocation2 + $0x80] sm:$0x1] }
 0x20c   : > { %2185 = vst.msk [vmem:[#allocation3 + $0x68] sm:$0xf] %vm2158_vm6, %v2115_v23  ;;  %2681 = vrot.lane.b32.xlu2 %v2598_v33, %s5052_s9  ;;  %v2899_v23 = vrot.slane %v2774_v45, 5  ;;  %v2916_v44 = vrot.slane %v2781_v11, 5  ;;  %v3285_v45 = vld [vmem:[#allocation2 + $0x20] sm:$0x1]  ;;  %v2914_v11 = vsel %vm5676_vm2, %v4800_v52, %v2913_v20 }
 0x20e   : > { %v2119_v6 = vpop.permute.xlu2 %2118  ;;  %v2900_v55 = vsel %vm5676_vm2, %v4798_v27, %v2899_v23  ;;  %v2901_v5 = vrot.slane %v2899_v23, 4  ;;  %v2791_v27 = vld [vmem:[#allocation2 + $0xa8] sm:$0xe]  ;;  %v2792_v23 = vld [vmem:[#allocation2 + $0xac] sm:$0xf] }
 0x20f   : > { %2187 = vst.msk [vmem:[#allocation3 + $0x70] sm:$0xf] %vm2158_vm6, %v2119_v6  ;;  %v2778_v6 = vld [vmem:[#allocation2 + $0x74] sm:$0x1] }
 0x210   : > { %2964 = vrot.lane.b32.xlu1 %v2858_v48, %s5053_s10  ;;  %v2915_v48 = vrot.slane %v2913_v20, 4  ;;  %v2903_v9 = vsel %vm5676_vm2, %v2901_v5, %v2902_v4  ;;  %v4804_v20 = vrot.slane %v2791_v27, 9  ;;  %v3845_v5 = vld [vmem:[#allocation2 + $0x1c] sm:$0xf]  ;;  %v3287_v27 = vld [vmem:[#allocation2 + $0x28] sm:$0xf] }
 0x211   : > { %2974 = vrot.lane.b32.xlu0 %v2875_v56, %s5053_s10 }
 0x212   : > { %v2111_v10 = vpop.permute.xlu1 %2110  ;;  %v2917_v1 = vsel %vm5676_vm2, %v2915_v48, %v2916_v44  ;;  %v3351_v48 = vshll.u32 %v3285_v45, 16 }
 0x213   : > { %2183 = vst.msk [vmem:[#allocation3 + $0x60] sm:$0xf] %vm2158_vm6, %v2111_v10  ;;  %v2121_v35 = vpop.permute.xlu0 %2120  ;;  %v4797_v10 = vrot.slane %v2770_v26, 9 }
 0x214   : > { %2188 = vst.msk [vmem:[#allocation3 + $0x74] sm:$0xf] %vm2158_vm6, %v2121_v35  ;;  %2960 = vrot.lane.b32.xlu2 %v2851_v0, %s5053_s10  ;;  %v2909_v35 = vrot.slane %v2778_v6, 5 }
 0x215   : > { %v2893_v49 = vsel %vm5676_vm2, %v4797_v10, %v2892_v37  ;;  %v2788_v10 = vld [vmem:[#allocation2 + $0x9c] sm:$0xe] }
 0x216   : > { %v2125_v8 = vpop.permute.xlu2 %2124  ;;  %v2910_v38 = vsel %vm5676_vm2, %v2908_v58, %v2909_v35  ;;  %v4803_v58 = vrot.slane %v2788_v10, 9 }
 0x217   : > { %2190 = vst.msk [vmem:[#allocation3 + $0x7c] sm:$0xf] %vm2158_vm6, %v2125_v8  ;;  %v2782_v8 = vld [vmem:[#allocation2 + $0x84] sm:$0xe] }
 0x218   : > { %2970 = vrot.lane.b32.xlu1 %v2868_v21, %s5053_s10  ;;  %v4802_v21 = vrot.slane %v2785_v57, 9  ;;  %v4801_v7 = vrot.slane %v2782_v8, 9  ;;  %v3092_v8 = vld [vmem:[#allocation2 + $0x24] sm:$0xf] }
 0x219   : > { %2980 = vrot.lane.b32.xlu0 %v2886_v60, %s5053_s10 }
 0x21a   : > { %v2117_v30 = vpop.permute.xlu1 %2116  ;;  %v2928_v46 = vsel %vm5676_vm2, %v4802_v21, %v2927_v41 }
 0x21b   : > { %2186 = vst.msk [vmem:[#allocation3 + $0x6c] sm:$0xf] %vm2158_vm6, %v2117_v30  ;;  %v2624_v53 = vpop.permute.xlu0 %2623  ;;  %v2790_v30 = vld [vmem:[#allocation2 + $0xa4] sm:$0x1] }
 0x21c   : > { %2720 = vst.msk [vmem:[#allocation3] sm:$0xf] %vm2719_vm7, %v2624_v53  ;;  %2966 = vrot.lane.b32.xlu2 %v2861_v32, %s5053_s10  ;;  %v2920_v53 = vrot.slane %v2783_v40, 5  ;;  %v2937_v43 = vrot.slane %v2790_v30, 5  ;;  %v2793_v40 = vld [vmem:[#allocation2 + $0xb0] sm:$0x1] }
 0x21d   : > { %v3844_v30 = vld [vmem:[#allocation2 + $0x18] sm:$0xe] }
 0x21e   : > { %v2628_v50 = vpop.permute.xlu2 %2627  ;;  %v2921_v17 = vsel %vm5676_vm2, %v4801_v7, %v2920_v53  ;;  %v2922_v44 = vrot.slane %v2920_v53, 4  ;;  %v2944_v53 = vrot.slane %v2793_v40, 5 }
 0x21f   : > { %2722 = vst.msk [vmem:[#allocation3 + $0x8] sm:$0xf] %vm2719_vm7, %v2628_v50 }
 0x220   : > { %2976 = vrot.lane.b32.xlu1 %v2879_v42, %s5053_s10  ;;  %v2936_v42 = vrot.slane %v2934_v62, 4 }
 0x221   : > { %2986 = vrot.lane.b32.xlu0 %v2896_v2, %s5053_s10 }
 0x222   : > { %v2123_v31 = vpop.permute.xlu1 %2122  ;;  %v2938_v50 = vsel %vm5676_vm2, %v2936_v42, %v2937_v43  ;;  %v4807_v42 = vrot.slane %v3844_v30, 9  ;;  %v3942_v43 = vrot.slane %v3845_v5, 5 }
 0x223   : > { %2189 = vst.msk [vmem:[#allocation3 + $0x78] sm:$0xf] %vm2158_vm6, %v2123_v31  ;;  %v2630_v14 = vpop.permute.xlu0 %2629  ;;  %v3345_v31 = vshrl.u32 %v3284_v47, 16 }
 0x224   : > { %2723 = vst.msk [vmem:[#allocation3 + $0xc] sm:$0xf] %vm2719_vm7, %v2630_v14  ;;  %2972 = vrot.lane.b32.xlu2 %v2872_v28, %s5053_s10  ;;  %v2929_v14 = vrot.slane %v2927_v41, 4  ;;  %v2930_v28 = vrot.slane %v2787_v24, 5 }
 0x226   : > { %v2634_v15 = vpop.permute.xlu2 %2633  ;;  %v2931_v61 = vsel %vm5676_vm2, %v2929_v14, %v2930_v28  ;;  %v3099_v14 = vld [vmem:[#allocation2 + $0x4c] sm:$0xf] }
 0x227   : > { %2725 = vst.msk [vmem:[#allocation3 + $0x14] sm:$0xf] %vm2719_vm7, %v2634_v15  ;;  %v2784_v15 = vld [vmem:[#allocation2 + $0x8c] sm:$0x1] }
 0x228   : > { %2982 = vrot.lane.b32.xlu1 %v2889_v16, %s5053_s10 }
 0x229   : > { %2992 = vrot.lane.b32.xlu0 %v2907_v19, %s5053_s10  ;;  %v3347_v19 = vrot.slane %v3345_v31, 4  ;;  %v3943_v31 = vsel %vm5676_vm2, %v4807_v42, %v3942_v43 }
 0x22a   : > { %v2626_v33 = vpop.permute.xlu1 %2625 }
 0x22b   : > { %2721 = vst.msk [vmem:[#allocation3 + $0x4] sm:$0xf] %vm2719_vm7, %v2626_v33  ;;  %v2636_v56 = vpop.permute.xlu0 %2635  ;;  %v3348_v33 = vor.u32 %v3347_v19, %v6280_v59 }
 0x22c   : > { %2726 = vst.msk [vmem:[#allocation3 + $0x18] sm:$0xf] %vm2719_vm7, %v2636_v56  ;;  %2978 = vrot.lane.b32.xlu2 %v2882_v63, %s5053_s10  ;;  %v2923_v56 = vrot.slane %v2784_v15, 5  ;;  %v2941_v63 = vrot.slane %v2792_v23, 5 }
 0x22d   : > { %v3349_v26 = vrot.slane %v3348_v33, 4  ;;  %v6328_v33 = vld [vmem:[#allocation2 + $0x28] sm:$0xf] }
 0x22e   : > { %v2640_v36 = vpop.permute.xlu2 %2639  ;;  %v2924_v57 = vsel %vm5676_vm2, %v2922_v44, %v2923_v56  ;;  %v2942_v3 = vsel %vm5676_vm2, %v4804_v20, %v2941_v63  ;;  %v2943_v7 = vrot.slane %v2941_v63, 4  ;;  %v3093_v44 = vld [vmem:[#allocation2 + $0x28] sm:$0xf]  ;;  %v3365_v20 = vshll.u32 %v3287_v27, 16  ;;  %v3846_v63 = vld [vmem:[#allocation2 + $0x20] sm:$0x1] }
 0x22f   : > { %2728 = vst.msk [vmem:[#allocation3 + $0x20] sm:$0xf] %vm2719_vm7, %v2640_v36 }
 0x230   : > { %2988 = vrot.lane.b32.xlu1 %v2900_v55, %s5053_s10  ;;  %v2945_v24 = vsel %vm5676_vm2, %v2943_v7, %v2944_v53  ;;  %v3367_v10 = vrot.slane %v3365_v20, 5 }
 0x231   : > { %2998 = vrot.lane.b32.xlu0 %v2917_v1, %s5053_s10  ;;  %v3353_v1 = vrot.slane %v3351_v48, 5 }
 0x232   : > { %v2632_v0 = vpop.permute.xlu1 %2631 }
 0x233   : > { %2724 = vst.msk [vmem:[#allocation3 + $0x10] sm:$0xf] %vm2719_vm7, %v2632_v0  ;;  %v2642_v60 = vpop.permute.xlu0 %2641  ;;  %v3354_v36 = vsel %vm5188_vm4, %v3349_v26, %v3353_v1  ;;  %v3283_v0 = vld [vmem:[#allocation2 + $0x18] sm:$0xf]  ;;  %v3949_v26 = vrot.slane %v6328_v33, 5 }
 0x234   : > { %2729 = vst.msk [vmem:[#allocation3 + $0x24] sm:$0xf] %vm2719_vm7, %v2642_v60  ;;  %2984 = vrot.lane.b32.xlu2 %v2893_v49, %s5053_s10  ;;  %v3295_v60 = vld [vmem:[#allocation2 + $0x48] sm:$0xf]  ;;  %v2935_v49 = vsel %vm5676_vm2, %v4803_v58, %v2934_v62  ;;  %v3335_v22 = vshll.u32 %v3283_v0, 16 }
 0x235   : > { %v3428_v4 = vshrl.u32 %v3295_v60, 16  ;;  %v3849_v1 = vld [vmem:[#allocation2 + $0x2c] sm:$0x1] }
 0x236   : > { %v2646_v37 = vpop.permute.xlu2 %2645  ;;  %v3337_v54 = vrot.slane %v3335_v22, 5 }
 0x237   : > { %2731 = vst.msk [vmem:[#allocation3 + $0x2c] sm:$0xf] %vm2719_vm7, %v2646_v37  ;;  %v3431_v37 = vshll.u32 %v3295_v60, 16  ;;  %v3430_v47 = vrot.slane %v3428_v4, 4  ;;  %v3308_v60 = vld [vmem:[#allocation2 + $0x7c] sm:$0xf] }
 0x238   : > { %2994 = vrot.lane.b32.xlu1 %v2910_v38, %s5053_s10  ;;  %v3332_v38 = vshrl.u32 %v3283_v0, 16  ;;  %v3952_v0 = vrot.slane %v3849_v1, 5  ;;  %v3533_v30 = vshll.u32 %v3308_v60, 16  ;;  %v3537_v5 = vshrl.u32 %v3308_v60, 16 }
 0x239   : > { %3004 = vrot.lane.b32.xlu0 %v2928_v46, %s5053_s10  ;;  %v3091_v46 = vld [vmem:[#allocation2 + $0x1c] sm:$0xf] }
 0x23a   : > { %v2638_v32 = vpop.permute.xlu1 %2637  ;;  %v3539_v42 = vrot.slane %v3537_v5, 4 }
 0x23b   : > { %2727 = vst.msk [vmem:[#allocation3 + $0x1c] sm:$0xf] %vm2719_vm7, %v2638_v32  ;;  %v2648_v2 = vpop.permute.xlu0 %2647  ;;  %v3334_v32 = vrot.slane %v3332_v38, 4 }
 0x23c   : > { %2732 = vst.msk [vmem:[#allocation3 + $0x30] sm:$0xf] %vm2719_vm7, %v2648_v2  ;;  %2990 = vrot.lane.b32.xlu2 %v2903_v9, %s5053_s10  ;;  %v3433_v9 = vrot.slane %v3431_v37, 5 }
 0x23d   : > { %v3338_v12 = vor.u32 %v3337_v54, %v3334_v32  ;;  %v3288_v32 = vld [vmem:[#allocation2 + $0x2c] sm:$0x1] }
 0x23e   : > { %v2652_v25 = vpop.permute.xlu2 %2651  ;;  %v3434_v28 = vor.u32 %v3433_v9, %v3430_v47  ;;  %v3098_v47 = vld [vmem:[#allocation2 + $0x48] sm:$0xf] }
 0x23f   : > { %2734 = vst.msk [vmem:[#allocation3 + $0x38] sm:$0xf] %vm2719_vm7, %v2652_v25  ;;  %v3339_v19 = vrot.slane %v3338_v12, 4  ;;  %v3857_v12 = vld [vmem:[#allocation2 + $0x4c] sm:$0xf] }
 0x240   : > { %3000 = vrot.lane.b32.xlu1 %v2921_v17, %s5053_s10  ;;  %v3286_v17 = vld [vmem:[#allocation2 + $0x24] sm:$0xf] }
 0x241   : > { %3010 = vrot.lane.b32.xlu0 %v2938_v50, %s5053_s10  ;;  %v3296_v50 = vld [vmem:[#allocation2 + $0x4c] sm:$0xf]  ;;  %v3356_v52 = vshrl.u32 %v3286_v17, 16  ;;  %v3359_v25 = vshll.u32 %v3286_v17, 16  ;;  %v3344_v48 = vsel %vm5188_vm4, %v3339_v19, %v6280_v59  ;;  %v3375_v17 = vshll.u32 %v3288_v32, 16 }
 0x242   : > { %v2644_v16 = vpop.permute.xlu1 %2643  ;;  %v3441_v56 = vshrl.u32 %v3296_v50, 16  ;;  %v3970_v19 = vrot.slane %v3857_v12, 5  ;;  %v3101_v32 = vld [vmem:[#allocation2 + $0x58] sm:$0xf] }
 0x243   : > { %2730 = vst.msk [vmem:[#allocation3 + $0x28] sm:$0xf] %vm2719_vm7, %v2644_v16  ;;  %v2654_v39 = vpop.permute.xlu0 %2653  ;;  %v3437_v16 = vshll.u32 %v3296_v50, 16  ;;  %v3358_v45 = vrot.slane %v3356_v52, 4  ;;  %v3106_v50 = vld [vmem:[#allocation2 + $0x78] sm:$0xf] }
 0x244   : > { %2735 = vst.msk [vmem:[#allocation3 + $0x3c] sm:$0xf] %vm2719_vm7, %v2654_v39  ;;  %2996 = vrot.lane.b32.xlu2 %v2914_v11, %s5053_s10  ;;  %v3361_v11 = vrot.slane %v3359_v25, 5 }
 0x245   : > { %v3439_v15 = vrot.slane %v3437_v16, 5 }
 0x246   : > { %v2658_v29 = vpop.permute.xlu2 %2657 }
 0x247   : > { %2737 = vst.msk [vmem:[#allocation3 + $0x44] sm:$0xf] %vm2719_vm7, %v2658_v29  ;;  %v3362_v29 = vor.u32 %v3361_v11, %v3358_v45 }
 0x248   : > { %3006 = vrot.lane.b32.xlu1 %v2931_v61, %s5053_s10 }
 0x249   : > { %3154 = vrot.lane.b32.xlu0 %v3090_v13, %s5054_s11  ;;  %v3435_v13 = vrot.slane %v3434_v28, 4 }
 0x24a   : > { %v2650_v55 = vpop.permute.xlu1 %2649 }
 0x24b   : > { %2733 = vst.msk [vmem:[#allocation3 + $0x34] sm:$0xf] %vm2719_vm7, %v2650_v55  ;;  %v2660_v6 = vpop.permute.xlu0 %2659  ;;  %v3440_v55 = vsel %vm5188_vm4, %v3435_v13, %v3439_v15 }
 0x24c   : > { %2738 = vst.msk [vmem:[#allocation3 + $0x48] sm:$0xf] %vm2719_vm7, %v2660_v6  ;;  %3002 = vrot.lane.b32.xlu2 %v2924_v57, %s5053_s10  ;;  %v3944_v6 = vrot.slane %v3942_v43, 4  ;;  %v3945_v57 = vrot.slane %v3846_v63, 5  ;;  %v3298_v63 = vld [vmem:[#allocation2 + $0x54] sm:$0xf] }
 0x24e   : > { %v2664_v35 = vpop.permute.xlu2 %2663  ;;  %v3946_v38 = vsel %vm5676_vm2, %v3944_v6, %v3945_v57  ;;  %v3107_v57 = vld [vmem:[#allocation2 + $0x7c] sm:$0xf] }
 0x24f   : > { %2740 = vst.msk [vmem:[#allocation3 + $0x50] sm:$0xf] %vm2719_vm7, %v2664_v35  ;;  %v3951_v35 = vrot.slane %v3949_v26, 4 }
 0x250   : > { %3012 = vrot.lane.b32.xlu1 %v2942_v3, %s5053_s10  ;;  %v3363_v3 = vrot.slane %v3362_v29, 4 }
 0x251   : > { %3717 = vrot.lane.b32.xlu0 %v3354_v36, %s5055_s12  ;;  %v3443_v36 = vrot.slane %v3441_v56, 4  ;;  %v3953_v40 = vsel %vm5676_vm2, %v3951_v35, %v3952_v0  ;;  %v3307_v56 = vld [vmem:[#allocation2 + $0x78] sm:$0xf]  ;;  %v3455_v35 = vshll.u32 %v3298_v63, 16  ;;  %v3972_v0 = vrot.slane %v3970_v19, 4 }
 0x252   : > { %v2656_v21 = vpop.permute.xlu1 %2655  ;;  %v3368_v22 = vsel %vm5188_vm4, %v3363_v3, %v3367_v10  ;;  %v3524_v1 = vshrl.u32 %v3307_v56, 16  ;;  %v3527_v6 = vshll.u32 %v3307_v56, 16  ;;  %v3858_v3 = vld [vmem:[#allocation2 + $0x50] sm:$0x1] }
 0x253   : > { %2736 = vst.msk [vmem:[#allocation3 + $0x40] sm:$0xf] %vm2719_vm7, %v2656_v21  ;;  %v2666_v41 = vpop.permute.xlu0 %2665  ;;  %v3297_v21 = vld [vmem:[#allocation2 + $0x50] sm:$0x1] }
 0x254   : > { %2741 = vst.msk [vmem:[#allocation3 + $0x54] sm:$0xf] %vm2719_vm7, %v2666_v41  ;;  %3008 = vrot.lane.b32.xlu2 %v2935_v49, %s5053_s10  ;;  %v3369_v49 = vshrl.u32 %v3287_v27, 16  ;;  %v3847_v27 = vld [vmem:[#allocation2 + $0x24] sm:$0xe]  ;;  %v3529_v33 = vrot.slane %v3527_v6, 5 }
 0x256   : > { %v2670_v62 = vpop.permute.xlu2 %2669  ;;  %v3371_v4 = vrot.slane %v3369_v49, 4 }
 0x257   : > { %2743 = vst.msk [vmem:[#allocation3 + $0x5c] sm:$0xf] %vm2719_vm7, %v2670_v62  ;;  %v6355_v62 = vrot.slane %v3533_v30, 5  ;;  %v3299_v30 = vld [vmem:[#allocation2 + $0x58] sm:$0xf] }
 0x258   : > { %3156 = vrot.lane.b32.xlu1 %v3091_v46, %s5054_s11  ;;  %v3444_v46 = vor.u32 %v3443_v36, %v3439_v15  ;;  %v3372_v9 = vor.u32 %v3371_v4, %v3367_v10  ;;  %v3868_v10 = vld [vmem:[#allocation2 + $0x78] sm:$0xe]  ;;  %v3869_v36 = vld [vmem:[#allocation2 + $0x7c] sm:$0xf] }
 0x259   : > { %3158 = vrot.lane.b32.xlu0 %v3092_v8, %s5054_s11  ;;  %v3447_v8 = vshll.u32 %v3297_v21, 16  ;;  %v3973_v21 = vrot.slane %v3858_v3, 5  ;;  %v4815_v60 = vrot.slane %v3868_v10, 9  ;;  %v3998_v49 = vrot.slane %v3869_v36, 5 }
 0x25a   : > { %v2662_v2 = vpop.permute.xlu1 %2661  ;;  %v3445_v7 = vrot.slane %v3444_v46, 4  ;;  %v3373_v25 = vrot.slane %v3372_v9, 4  ;;  %v3457_v46 = vrot.slane %v3455_v35, 5  ;;  %v3291_v35 = vld [vmem:[#allocation2 + $0x38] sm:$0x1] }
 0x25b   : > { %2739 = vst.msk [vmem:[#allocation3 + $0x4c] sm:$0xf] %vm2719_vm7, %v2662_v2  ;;  %v2672_v34 = vpop.permute.xlu0 %2671  ;;  %v3449_v53 = vrot.slane %v3447_v8, 5  ;;  %v3309_v2 = vld [vmem:[#allocation2 + $0x80] sm:$0x1]  ;;  %v3974_v5 = vsel %vm5676_vm2, %v3972_v0, %v3973_v21 }
 0x25c   : > { %2744 = vst.msk [vmem:[#allocation3 + $0x60] sm:$0xf] %vm2719_vm7, %v2672_v34  ;;  %3014 = vrot.lane.b32.xlu2 %v2945_v24, %s5053_s10  ;;  %v3856_v24 = vld [vmem:[#allocation2 + $0x48] sm:$0xe]  ;;  %v3543_v52 = vshll.u32 %v3309_v2, 16 }
 0x25d   : > { %v3450_v34 = vsel %vm5188_vm4, %v3445_v7, %v3449_v53  ;;  %v4811_v16 = vrot.slane %v3856_v24, 9  ;;  %v3289_v8 = vld [vmem:[#allocation2 + $0x30] sm:$0xf]  ;;  %v3290_v24 = vld [vmem:[#allocation2 + $0x34] sm:$0xf] }
 0x25e   : > { %v2676_v39 = vpop.permute.xlu2 %2675  ;;  %v3545_v11 = vrot.slane %v3543_v52, 5  ;;  %v3380_v7 = vshrl.u32 %v3289_v8, 16  ;;  %v3383_v53 = vshll.u32 %v3289_v8, 16 }
 0x25f   : > { %2746 = vst.msk [vmem:[#allocation3 + $0x68] sm:$0xf] %vm2719_vm7, %v2676_v39  ;;  %v3971_v15 = vsel %vm5676_vm2, %v4811_v16, %v3970_v19  ;;  %v3389_v16 = vshll.u32 %v3290_v24, 16  ;;  %v3870_v19 = vld [vmem:[#allocation2 + $0x80] sm:$0x1] }
 0x260   : > { %4052 = vrot.lane.b32.xlu1 %v3943_v31, %s5056_s13  ;;  %v3540_v31 = vor.u32 %v3539_v42, %v6355_v62  ;;  %v3461_v42 = vshll.u32 %v3299_v30, 16  ;;  %v3385_v9 = vrot.slane %v3383_v53, 5 }
 0x261   : > { %3172 = vrot.lane.b32.xlu0 %v3099_v14, %s5054_s11  ;;  %v3377_v14 = vrot.slane %v3375_v17, 5 }
 0x262   : > { %v2668_v61 = vpop.permute.xlu1 %2667  ;;  %v3541_v45 = vrot.slane %v3540_v31, 4  ;;  %v6399_v31 = vld [vmem:[#allocation2 + $0x34] sm:$0xf] }
 0x263   : > { %2742 = vst.msk [vmem:[#allocation3 + $0x58] sm:$0xf] %vm2719_vm7, %v2668_v61  ;;  %v2678_v23 = vpop.permute.xlu0 %2677  ;;  %v3378_v13 = vsel %vm5188_vm4, %v3373_v25, %v3377_v14  ;;  %v3095_v25 = vld [vmem:[#allocation2 + $0x34] sm:$0xf]  ;;  %v3465_v14 = vshrl.u32 %v3299_v30, 16 }
 0x264   : > { %2747 = vst.msk [vmem:[#allocation3 + $0x6c] sm:$0xf] %vm2719_vm7, %v2678_v23  ;;  %3715 = vrot.lane.b32.xlu2 %v3344_v48, %s5055_s12  ;;  %v3546_v23 = vsel %vm5188_vm4, %v3541_v45, %v3545_v11  ;;  %v4808_v48 = vrot.slane %v3847_v27, 9  ;;  %v3956_v45 = vrot.slane %v6399_v31, 5  ;;  %v3852_v11 = vld [vmem:[#allocation2 + $0x38] sm:$0x1] }
 0x265   : > { %v3391_v27 = vrot.slane %v3389_v16, 5  ;;  %v3959_v56 = vrot.slane %v3852_v11, 5  ;;  %v4929_v31 = vld [vmem:[%s7012_s5] sm:$0xff] }
 0x266   : > { %v2682_v59 = vpop.permute.xlu2 %2681 }
 0x267   : > { %2749 = vst.msk [vmem:[#allocation3 + $0x74] sm:$0xf] %vm2719_vm7, %v2682_v59  ;;  %v3094_v59 = vld [vmem:[#allocation2 + $0x30] sm:$0xf] }
 0x268   : > { %3160 = vrot.lane.b32.xlu1 %v3093_v44, %s5054_s11 }
 0x269   : > { %3731 = vrot.lane.b32.xlu0 %v3440_v55, %s5055_s12  ;;  %v3950_v55 = vsel %vm5676_vm2, %v4808_v48, %v3949_v26 }
 0x26a   : > { %v2674_v58 = vpop.permute.xlu1 %2673 }
 0x26b   : > { %2745 = vst.msk [vmem:[#allocation3 + $0x64] sm:$0xf] %vm2719_vm7, %v2674_v58  ;;  %v2684_v41 = vpop.permute.xlu0 %2683  ;;  %v3452_v58 = vshrl.u32 %v3298_v63, 16  ;;  %v3393_v63 = vshrl.u32 %v3290_v24, 16 }
 0x26c   : > { %2750 = vst.msk [vmem:[#allocation3 + $0x78] sm:$0xf] %vm2719_vm7, %v2684_v41  ;;  %4054 = vrot.lane.b32.xlu2 %v3946_v38, %s5056_s13  ;;  %v3526_v41 = vrot.slane %v3524_v1, 4 }
 0x26d   : > { %v3395_v3 = vrot.slane %v3393_v63, 4 }
 0x26e   : > { %v2961_v37 = vpop.permute.xlu2 %2960  ;;  %v3530_v4 = vor.u32 %v3529_v33, %v3526_v41  ;;  %v3319_v41 = vld [vmem:[#allocation2 + $0xa8] sm:$0xf]  ;;  %v3100_v33 = vld [vmem:[#allocation2 + $0x54] sm:$0xf] }
 0x26f   : > { %3057 = vst.msk [vmem:[#allocation3] sm:$0xf] %vm3056_vm8, %v2961_v37  ;;  %v3999_v37 = vsel %vm5676_vm2, %v4815_v60, %v3998_v49  ;;  %v3399_v60 = vshll.u32 %v3291_v35, 16  ;;  %v3620_v8 = vshrl.u32 %v3319_v41, 16 }
 0x270   : > { %3719 = vrot.lane.b32.xlu1 %v3368_v22, %s5055_s12  ;;  %v3454_v22 = vrot.slane %v3452_v58, 4 }
 0x271   : > { %4058 = vrot.lane.b32.xlu0 %v3953_v40, %s5056_s13 }
 0x272   : > { %v2680_v54 = vpop.permute.xlu1 %2679 }
 0x273   : > { %2748 = vst.msk [vmem:[#allocation3 + $0x70] sm:$0xf] %vm2719_vm7, %v2680_v54  ;;  %v2963_v43 = vpop.permute.xlu0 %2962  ;;  %v3458_v54 = vor.u32 %v3457_v46, %v3454_v22  ;;  %v3859_v22 = vld [vmem:[#allocation2 + $0x54] sm:$0xe]  ;;  %v6430_v46 = vld [vmem:[#allocation2 + $0x58] sm:$0xf] }
 0x274   : > { %3058 = vst.msk [vmem:[#allocation3 + $0x4] sm:$0xf] %vm3056_vm8, %v2963_v43  ;;  %3170 = vrot.lane.b32.xlu2 %v3098_v47, %s5054_s11  ;;  %v3531_v43 = vrot.slane %v3530_v4, 4  ;;  %v3382_v47 = vrot.slane %v3380_v7, 4  ;;  %v3977_v7 = vrot.slane %v6430_v46, 5 }
 0x276   : > { %v2967_v28 = vpop.permute.xlu2 %2966  ;;  %v3536_v52 = vsel %vm5188_vm4, %v3531_v43, %v6355_v62 }
 0x277   : > { %3060 = vst.msk [vmem:[#allocation3 + $0xc] sm:$0xf] %vm3056_vm8, %v2967_v28  ;;  %v3386_v28 = vor.u32 %v3385_v9, %v3382_v47  ;;  %v4217_v47 = vld [vmem:[%s7012_s5 + $0x10] sm:$0x3] }
 0x278   : > { %3733 = vrot.lane.b32.xlu1 %v3450_v34, %s5055_s12  ;;  %v3459_v34 = vrot.slane %v3458_v54, 4 }
 0x279   : > { %3186 = vrot.lane.b32.xlu0 %v3106_v50, %s5054_s11  ;;  %v3463_v50 = vrot.slane %v3461_v42, 5  ;;  %v3310_v42 = vld [vmem:[#allocation2 + $0x84] sm:$0xf] }
 0x27a   : > { %v2686_v39 = vpop.permute.xlu1 %2685  ;;  %v3548_v24 = vshrl.u32 %v3310_v42, 16 }
 0x27b   : > { %2751 = vst.msk [vmem:[#allocation3 + $0x7c] sm:$0xf] %vm2719_vm7, %v2686_v39  ;;  %v2969_v61 = vpop.permute.xlu0 %2968  ;;  %v3464_v39 = vsel %vm5188_vm4, %v3459_v34, %v3463_v50 }
 0x27c   : > { %3061 = vst.msk [vmem:[#allocation3 + $0x10] sm:$0xf] %vm3056_vm8, %v2969_v61  ;;  %3721 = vrot.lane.b32.xlu2 %v3378_v13, %s5055_s12  ;;  %v4000_v61 = vrot.slane %v3998_v49, 4  ;;  %v4001_v13 = vrot.slane %v3870_v19, 5  ;;  %v3550_v11 = vrot.slane %v3548_v24, 4 }
 0x27e   : > { %v2973_v44 = vpop.permute.xlu2 %2972 }
 0x27f   : > { %3063 = vst.msk [vmem:[#allocation3 + $0x18] sm:$0xf] %vm3056_vm8, %v2973_v44  ;;  %v3958_v44 = vrot.slane %v3956_v45, 4 }
 0x280   : > { %4068 = vrot.lane.b32.xlu1 %v3971_v15, %s5056_s13  ;;  %v3387_v15 = vrot.slane %v3386_v28, 4 }
 0x281   : > { %3749 = vrot.lane.b32.xlu0 %v3546_v23, %s5055_s12  ;;  %v3467_v23 = vrot.slane %v3465_v14, 4 }
 0x282   : > { %v2965_v29 = vpop.permute.xlu1 %2964  ;;  %v3392_v1 = vsel %vm5188_vm4, %v3387_v15, %v3391_v27 }
 0x283   : > { %3059 = vst.msk [vmem:[#allocation3 + $0x8] sm:$0xf] %vm3056_vm8, %v2965_v29  ;;  %v2975_v20 = vpop.permute.xlu0 %2974  ;;  %v3300_v29 = vld [vmem:[#allocation2 + $0x5c] sm:$0x1]  ;;  %v3468_v6 = vor.u32 %v3467_v23, %v3463_v50  ;;  %v3850_v50 = vld [vmem:[#allocation2 + $0x30] sm:$0xe] }
 0x284   : > { %3064 = vst.msk [vmem:[#allocation3 + $0x1c] sm:$0xf] %vm3056_vm8, %v2975_v20  ;;  %4056 = vrot.lane.b32.xlu2 %v3950_v55, %s5056_s13  ;;  %v4002_v55 = vsel %vm5676_vm2, %v4000_v61, %v4001_v13  ;;  %v4809_v16 = vrot.slane %v3850_v50, 9 }
 0x285   : > { %v3469_v36 = vrot.slane %v3468_v6, 4 }
 0x286   : > { %v2979_v26 = vpop.permute.xlu2 %2978 }
 0x287   : > { %3066 = vst.msk [vmem:[#allocation3 + $0x24] sm:$0xf] %vm3056_vm8, %v2979_v26  ;;  %v3396_v26 = vor.u32 %v3395_v3, %v3391_v27  ;;  %v3311_v27 = vld [vmem:[#allocation2 + $0x88] sm:$0xf] }
 0x288   : > { %3188 = vrot.lane.b32.xlu1 %v3107_v57, %s5054_s11  ;;  %v3471_v57 = vshll.u32 %v3300_v29, 16  ;;  %v3109_v29 = vld [vmem:[#allocation2 + $0x88] sm:$0xf] }
 0x289   : > { %3162 = vrot.lane.b32.xlu0 %v3094_v59, %s5054_s11  ;;  %v3960_v59 = vsel %vm5676_vm2, %v3958_v44, %v3959_v56  ;;  %v3397_v30 = vrot.slane %v3396_v26, 4  ;;  %v4930_v44 = vld [vmem:[%s7012_s5 + $0x8] sm:$0xff]  ;;  %v3957_v56 = vsel %vm5676_vm2, %v4809_v16, %v3956_v45  ;;  %v3979_v45 = vrot.slane %v3977_v7, 4 }
 0x28a   : > { %v2971_v38 = vpop.permute.xlu1 %2970  ;;  %v3473_v58 = vrot.slane %v3471_v57, 5 }
 0x28b   : > { %3062 = vst.msk [vmem:[#allocation3 + $0x14] sm:$0xf] %vm3056_vm8, %v2971_v38  ;;  %v2981_v40 = vpop.permute.xlu0 %2980  ;;  %v3108_v38 = vld [vmem:[#allocation2 + $0x84] sm:$0xf] }
 0x28c   : > { %3067 = vst.msk [vmem:[#allocation3 + $0x28] sm:$0xf] %vm3056_vm8, %v2981_v40  ;;  %4070 = vrot.lane.b32.xlu2 %v3974_v5, %s5056_s13  ;;  %v3474_v49 = vsel %vm5188_vm4, %v3469_v36, %v3473_v58  ;;  %v3623_v40 = vshll.u32 %v3319_v41, 16  ;;  %v3401_v5 = vrot.slane %v3399_v60, 5  ;;  %v3561_v60 = vshrl.u32 %v3311_v27, 16 }
 0x28e   : > { %v2985_v2 = vpop.permute.xlu2 %2984  ;;  %v3625_v54 = vrot.slane %v3623_v40, 5  ;;  %v3402_v9 = vsel %vm5188_vm4, %v3397_v30, %v3401_v5  ;;  %v3563_v40 = vrot.slane %v3561_v60, 4  ;;  %v3855_v60 = vld [vmem:[#allocation2 + $0x44] sm:$0x1] }
 0x28f   : > { %3069 = vst.msk [vmem:[#allocation3 + $0x30] sm:$0xf] %vm3056_vm8, %v2985_v2  ;;  %v3320_v2 = vld [vmem:[#allocation2 + $0xac] sm:$0xf] }
 0x290   : > { %4084 = vrot.lane.b32.xlu1 %v3999_v37, %s5056_s13  ;;  %v4812_v37 = vrot.slane %v3859_v22, 9  ;;  %v3629_v14 = vshll.u32 %v3320_v2, 16 }
 0x291   : > { %3176 = vrot.lane.b32.xlu0 %v3101_v32, %s5054_s11  ;;  %v3622_v32 = vrot.slane %v3620_v8, 4 }
 0x292   : > { %v2977_v17 = vpop.permute.xlu1 %2976  ;;  %v3978_v34 = vsel %vm5676_vm2, %v4812_v37, %v3977_v7  ;;  %v3631_v15 = vrot.slane %v3629_v14, 5  ;;  %v3312_v37 = vld [vmem:[#allocation2 + $0x8c] sm:$0x1] }
 0x293   : > { %3065 = vst.msk [vmem:[#allocation3 + $0x20] sm:$0xf] %vm3056_vm8, %v2977_v17  ;;  %v2987_v12 = vpop.permute.xlu0 %2986  ;;  %v4307_v17 = vunpack.c.l.b16 %v4217_v47  ;;  %v3096_v47 = vld [vmem:[#allocation2 + $0x3c] sm:$0xf] }
 0x294   : > { %3070 = vst.msk [vmem:[#allocation3 + $0x34] sm:$0xf] %vm3056_vm8, %v2987_v12  ;;  %3747 = vrot.lane.b32.xlu2 %v3536_v52, %s5055_s12  ;;  %v3551_v12 = vshll.u32 %v3310_v42, 16  ;;  %v3115_v52 = vld [vmem:[#allocation2 + $0xac] sm:$0xf] }
 0x295   : > { %v4310_v28 = vpack.c.b16 %v4307_v17, %v4307_v17  ;;  %v3881_v17 = vld [vmem:[#allocation2 + $0xac] sm:$0xf] }
 0x296   : > { %v2991_v62 = vpop.permute.xlu2 %2990  ;;  %v3553_v61 = vrot.slane %v3551_v12, 5  ;;  %v4026_v14 = vrot.slane %v3881_v17, 5 }
 0x297   : > { %3072 = vst.msk [vmem:[#allocation3 + $0x3c] sm:$0xf] %vm3056_vm8, %v2991_v62  ;;  %v4364_v19 = vsel %vm4362_vm9, %v4310_v28, 0 }
 0x298   : > { %3164 = vrot.lane.b32.xlu1 %v3095_v25, %s5054_s11  ;;  %v3626_v25 = vor.u32 %v3625_v54, %v3622_v32  ;;  %4371 = vmatpush.bf16.msra.mxu0 %v4364_v19  ;;  %v3554_v63 = vor.u32 %v3553_v61, %v3550_v11  ;;  %v3301_v32 = vld [vmem:[#allocation2 + $0x60] sm:$0xf]  ;;  %v3114_v54 = vld [vmem:[#allocation2 + $0xa8] sm:$0xf]  ;;  %v3302_v61 = vld [vmem:[#allocation2 + $0x64] sm:$0xf] }
 0x299   : > { %3735 = vrot.lane.b32.xlu0 %v3464_v39, %s5055_s12  ;;  %5010 = vmatpush.bf16.msra.mxu1 %v4364_v19  ;;  %v3479_v50 = vshll.u32 %v3301_v32, 16 }
 0x29a   : > { %v2983_v48 = vpop.permute.xlu1 %2982  ;;  %v3627_v62 = vrot.slane %v3626_v25, 4  ;;  %5011 = vmatpush.bf16.msra.mxu2 %v4364_v19  ;;  %5012 = vmatpush.bf16.msra.mxu3 %v4364_v19  ;;  %v3555_v36 = vrot.slane %v3554_v63, 4 }
 0x29b   : > { %3068 = vst.msk [vmem:[#allocation3 + $0x2c] sm:$0xf] %vm3056_vm8, %v2983_v48  ;;  %v2993_v20 = vpop.permute.xlu0 %2992  ;;  %v6451_v48 = vld [vmem:[#allocation2 + $0x88] sm:$0xf]  ;;  %v3481_v19 = vrot.slane %v3479_v50, 5 }
 0x29c   : > { %3073 = vst.msk [vmem:[#allocation3 + $0x40] sm:$0xf] %vm3056_vm8, %v2993_v20  ;;  %4086 = vrot.lane.b32.xlu2 %v4002_v55, %s5056_s13  ;;  %v3633_v20 = vshrl.u32 %v3320_v2, 16  ;;  %v3557_v55 = vshll.u32 %v3311_v27, 16  ;;  %4372 = vmatpush.bf16.msra.mxu0 %v4930_v44  ;;  %v3632_v6 = vsel %vm5188_vm4, %v3627_v62, %v3631_v15  ;;  %v4005_v57 = vrot.slane %v6451_v48, 5 }
 0x29d   : > { %5013 = vmatpush.bf16.msra.mxu1 %v4930_v44 }
 0x29e   : > { %v2997_v10 = vpop.permute.xlu2 %2996  ;;  %5014 = vmatpush.bf16.msra.mxu2 %v4930_v44  ;;  %5015 = vmatpush.bf16.msra.mxu3 %v4930_v44  ;;  %v3559_v58 = vrot.slane %v3557_v55, 5  ;;  %v3635_v35 = vrot.slane %v3633_v20, 4  ;;  %v3103_v44 = vld [vmem:[#allocation2 + $0x64] sm:$0xf] }
 0x29f   : > { %3075 = vst.msk [vmem:[#allocation3 + $0x48] sm:$0xf] %vm3056_vm8, %v2997_v10 }
 0x2a0   : > { %3723 = vrot.lane.b32.xlu1 %v3392_v1, %s5055_s12  ;;  %v3861_v1 = vld [vmem:[#allocation2 + $0x5c] sm:$0x1]  ;;  %4373 = vmatpush.bf16.msra.mxu0 %v4929_v31  ;;  %v3636_v22 = vor.u32 %v3635_v35, %v3631_v15  ;;  %v3564_v42 = vor.u32 %v3563_v40, %v3559_v58  ;;  %v3871_v15 = vld [vmem:[#allocation2 + $0x84] sm:$0xe]  ;;  %v3489_v35 = vshrl.u32 %v3302_v61, 16 }
 0x2a1   : > { %4062 = vrot.lane.b32.xlu0 %v3960_v59, %s5056_s13  ;;  %v3873_v59 = vld [vmem:[#allocation2 + $0x8c] sm:$0x1]  ;;  %v3980_v3 = vrot.slane %v3861_v1, 5  ;;  %5016 = vmatpush.bf16.msra.mxu1 %v4929_v31  ;;  %v4816_v20 = vrot.slane %v3871_v15, 9 }
 0x2a2   : > { %v2989_v0 = vpop.permute.xlu1 %2988  ;;  %v4008_v41 = vrot.slane %v3873_v59, 5  ;;  %5017 = vmatpush.bf16.msra.mxu2 %v4929_v31  ;;  %5018 = vmatpush.bf16.msra.mxu3 %v4929_v31  ;;  %v3637_v5 = vrot.slane %v3636_v22, 4  ;;  %v3565_v24 = vrot.slane %v3564_v42, 4 }
 0x2a3   : > { %3071 = vst.msk [vmem:[#allocation3 + $0x38] sm:$0xf] %vm3056_vm8, %v2989_v0  ;;  %v2999_v21 = vpop.permute.xlu0 %2998 }
 0x2a4   : > { %3076 = vst.msk [vmem:[#allocation3 + $0x4c] sm:$0xf] %vm3056_vm8, %v2999_v21  ;;  %3174 = vrot.lane.b32.xlu2 %v3100_v33, %s5054_s11  ;;  %v4007_v21 = vrot.slane %v4005_v57, 4  ;;  %v3321_v33 = vld [vmem:[#allocation2 + $0xb0] sm:$0x1] }
 0x2a5   : > { %v3639_v46 = vshll.u32 %v3321_v33, 16 }
 0x2a6   : > { %v3003_v4 = vpop.permute.xlu2 %3002  ;;  %v4009_v8 = vsel %vm5676_vm2, %v4007_v21, %v4008_v41  ;;  %v3882_v41 = vld [vmem:[#allocation2 + $0xb0] sm:$0x1] }
 0x2a7   : > { %3078 = vst.msk [vmem:[#allocation3 + $0x54] sm:$0xf] %vm3056_vm8, %v3003_v4  ;;  %v3641_v4 = vrot.slane %v3639_v46, 5  ;;  %v4029_v48 = vrot.slane %v3882_v41, 5  ;;  %v3491_v46 = vrot.slane %v3489_v35, 4 }
 0x2a8   : > { %3737 = vrot.lane.b32.xlu1 %v3474_v49, %s5055_s12  ;;  %v3981_v49 = vsel %vm5676_vm2, %v3979_v45, %v3980_v3  ;;  %v3293_v45 = vld [vmem:[#allocation2 + $0x40] sm:$0xf] }
 0x2a9   : > { %3190 = vrot.lane.b32.xlu0 %v3108_v38, %s5054_s11  ;;  %v3560_v38 = vsel %vm5188_vm4, %v3555_v36, %v3559_v58  ;;  %v3642_v2 = vsel %vm5188_vm4, %v3637_v5, %v3641_v4  ;;  %v4006_v36 = vsel %vm5676_vm2, %v4816_v20, %v4005_v57  ;;  %v3097_v58 = vld [vmem:[#allocation2 + $0x40] sm:$0xf]  ;;  %v3413_v21 = vshll.u32 %v3293_v45, 16  ;;  %v3303_v4 = vld [vmem:[#allocation2 + $0x68] sm:$0x1] }
 0x2aa   : > { %v2995_v53 = vpop.permute.xlu1 %2994  ;;  %v3966_v5 = vrot.slane %v3855_v60, 5  ;;  %v3495_v42 = vshll.u32 %v3303_v4, 16  ;;  %v3313_v20 = vld [vmem:[#allocation2 + $0x90] sm:$0xf]  ;;  %v3864_v4 = vld [vmem:[#allocation2 + $0x68] sm:$0x1] }
 0x2ab   : > { %3074 = vst.msk [vmem:[#allocation3 + $0x44] sm:$0xf] %vm3056_vm8, %v2995_v53  ;;  %v3005_v43 = vpop.permute.xlu0 %3004  ;;  %v3415_v22 = vrot.slane %v3413_v21, 5 }
 0x2ac   : > { %3079 = vst.msk [vmem:[#allocation3 + $0x58] sm:$0xf] %vm3056_vm8, %v3005_v43  ;;  %3725 = vrot.lane.b32.xlu2 %v3402_v9, %s5055_s12  ;;  %v3567_v43 = vshll.u32 %v3312_v37, 16  ;;  %v3880_v9 = vld [vmem:[#allocation2 + $0xa8] sm:$0xe]  ;;  %v3497_v17 = vrot.slane %v3495_v42, 5 }
 0x2ad   : > { %v4819_v25 = vrot.slane %v3880_v9, 9 }
 0x2ae   : > { %v3009_v39 = vpop.permute.xlu2 %3008  ;;  %v3569_v12 = vrot.slane %v3567_v43, 5 }
 0x2af   : > { %3081 = vst.msk [vmem:[#allocation3 + $0x60] sm:$0xf] %vm3056_vm8, %v3009_v39  ;;  %v3292_v39 = vld [vmem:[#allocation2 + $0x3c] sm:$0xf]  ;;  %v4027_v62 = vsel %vm5676_vm2, %v4819_v25, %v4026_v14 }
 0x2b0   : > { %4072 = vrot.lane.b32.xlu1 %v3978_v34, %s5056_s13  ;;  %v3476_v34 = vshrl.u32 %v3301_v32, 16  ;;  %v3404_v27 = vshrl.u32 %v3292_v39, 16 }
 0x2b1   : > { %3204 = vrot.lane.b32.xlu0 %v3115_v52, %s5054_s11 }
 0x2b2   : > { %v3001_v13 = vpop.permute.xlu1 %3000  ;;  %v3478_v16 = vrot.slane %v3476_v34, 4  ;;  %v3406_v55 = vrot.slane %v3404_v27, 4  ;;  %v3294_v34 = vld [vmem:[#allocation2 + $0x44] sm:$0x1] }
 0x2b3   : > { %3077 = vst.msk [vmem:[#allocation3 + $0x50] sm:$0xf] %vm3056_vm8, %v3001_v13  ;;  %v3011_v23 = vpop.permute.xlu0 %3010  ;;  %v3570_v13 = vsel %vm5188_vm4, %v3565_v24, %v3569_v12  ;;  %v3322_v12 = vld [vmem:[#allocation2 + $0xb4] sm:$0xf] }
 0x2b4   : > { %3082 = vst.msk [vmem:[#allocation3 + $0x64] sm:$0xf] %vm3056_vm8, %v3011_v23  ;;  %4060 = vrot.lane.b32.xlu2 %v3957_v56, %s5056_s13  ;;  %v3407_v23 = vshll.u32 %v3292_v39, 16  ;;  %v3482_v56 = vor.u32 %v3481_v19, %v3478_v16  ;;  %v3110_v16 = vld [vmem:[#allocation2 + $0x90] sm:$0xf] }
 0x2b5   : > { %v3862_v19 = vld [vmem:[#allocation2 + $0x60] sm:$0xe]  ;;  %v3863_v39 = vld [vmem:[#allocation2 + $0x64] sm:$0xf] }
 0x2b6   : > { %v3015_v10 = vpop.permute.xlu2 %3014  ;;  %v3409_v1 = vrot.slane %v3407_v23, 5  ;;  %v3483_v59 = vrot.slane %v3482_v56, 4  ;;  %v4813_v27 = vrot.slane %v3862_v19, 9  ;;  %v3984_v23 = vrot.slane %v3863_v39, 5 }
 0x2b7   : > { %3084 = vst.msk [vmem:[#allocation3 + $0x6c] sm:$0xf] %vm3056_vm8, %v3015_v10  ;;  %v6504_v10 = vld [vmem:[#allocation2 + $0x40] sm:$0xf] }
 0x2b8   : > { %3192 = vrot.lane.b32.xlu1 %v3109_v29, %s5054_s11  ;;  %v3485_v29 = vshll.u32 %v3302_v61, 16  ;;  %v3647_v61 = vshll.u32 %v3322_v12, 16 }
 0x2b9   : > { %3763 = vrot.lane.b32.xlu0 %v3632_v6, %s5055_s12 }
 0x2ba   : > { %v3007_v0 = vpop.permute.xlu1 %3006  ;;  %v3487_v31 = vrot.slane %v3485_v29, 5  ;;  %v3649_v29 = vrot.slane %v3647_v61, 5 }
 0x2bb   : > { %3080 = vst.msk [vmem:[#allocation3 + $0x5c] sm:$0xf] %vm3056_vm8, %v3007_v0  ;;  %v3155_v26 = vpop.permute.xlu0 %3154  ;;  %v3410_v0 = vor.u32 %v3409_v1, %v3406_v55  ;;  %v3323_v55 = vld [vmem:[#allocation2 + $0xb8] sm:$0xf] }
 0x2bc   : > { %3251 = vst.msk [vmem:[#allocation3] sm:$0xf] %vm3250_vm11, %v3155_v26  ;;  %4074 = vrot.lane.b32.xlu2 %v3981_v49, %s5056_s13  ;;  %v3488_v33 = vsel %vm5188_vm4, %v3483_v59, %v3487_v31  ;;  %v3963_v26 = vrot.slane %v6504_v10, 5  ;;  %v4028_v49 = vrot.slane %v4026_v14, 4  ;;  %v3423_v14 = vshll.u32 %v3294_v34, 16 }
 0x2bd   : > { %v3985_v59 = vsel %vm5676_vm2, %v4813_v27, %v3984_v23  ;;  %v3653_v35 = vshll.u32 %v3323_v55, 16  ;;  %v3987_v10 = vrot.slane %v3864_v4, 5  ;;  %v3324_v34 = vld [vmem:[#allocation2 + $0xbc] sm:$0x1] }
 0x2be   : > { %v3716_v30 = vpop.permute.xlu2 %3715 }
 0x2bf   : > { %3812 = vst.msk [vmem:[#allocation3] sm:$0xf] %vm3811_vm13, %v3716_v30  ;;  %v3965_v30 = vrot.slane %v3963_v26, 4 }
 0x2c0   : > { %3751 = vrot.lane.b32.xlu1 %v3560_v38, %s5055_s12  ;;  %v3411_v38 = vrot.slane %v3410_v0, 4 }
 0x2c1   : > { %4090 = vrot.lane.b32.xlu0 %v4009_v8, %s5056_s13  ;;  %v3967_v43 = vsel %vm5676_vm2, %v3965_v30, %v3966_v5 }
 0x2c2   : > { %v3013_v7 = vpop.permute.xlu1 %3012  ;;  %v3416_v32 = vsel %vm5188_vm4, %v3411_v38, %v3415_v22 }
 0x2c3   : > { %3083 = vst.msk [vmem:[#allocation3 + $0x68] sm:$0xf] %vm3056_vm8, %v3013_v7  ;;  %v3718_v53 = vpop.permute.xlu0 %3717  ;;  %v3417_v7 = vshrl.u32 %v3293_v45, 16  ;;  %v3572_v45 = vshrl.u32 %v3313_v20, 16 }
 0x2c4   : > { %3202 = vrot.lane.b32.xlu2 %v3114_v54, %s5054_s11  ;;  %v3492_v54 = vor.u32 %v3491_v46, %v3487_v31  ;;  %v3853_v31 = vld [vmem:[#allocation2 + $0x3c] sm:$0xe] }
 0x2c5   : > { %v4810_v0 = vrot.slane %v3853_v31, 9  ;;  %v3574_v41 = vrot.slane %v3572_v45, 4  ;;  %v3104_v31 = vld [vmem:[#allocation2 + $0x6c] sm:$0xf] }
 0x2c6   : > { %v4055_v52 = vpop.permute.xlu2 %4054  ;;  %v3493_v9 = vrot.slane %v3492_v54, 4 }
 0x2c7   : > { %v3964_v46 = vsel %vm5676_vm2, %v4810_v0, %v3963_v26 }
 0x2c8   : > { %3765 = vrot.lane.b32.xlu1 %v3642_v2, %s5055_s12  ;;  %v3419_v2 = vrot.slane %v3417_v7, 4 }
 0x2c9   : > { %3166 = vrot.lane.b32.xlu0 %v3096_v47, %s5054_s11 }
 0x2ca   : > { %v3157_v28 = vpop.permute.xlu1 %3156  ;;  %v3420_v25 = vor.u32 %v3419_v2, %v3415_v22  ;;  %v6553_v22 = vld [vmem:[#allocation2 + $0x94] sm:$0xf] }
 0x2cb   : > { %3252 = vst.msk [vmem:[#allocation3 + $0x4] sm:$0xf] %vm3250_vm11, %v3157_v28  ;;  %v3159_v11 = vpop.permute.xlu0 %3158  ;;  %v3498_v28 = vsel %vm5188_vm4, %v3493_v9, %v3497_v17  ;;  %v4012_v7 = vrot.slane %v6553_v22, 5 }
 0x2cc   : > { %3813 = vst.msk [vmem:[#allocation3 + $0x4] sm:$0xf] %vm3811_vm13, %v3718_v53  ;;  %3753 = vrot.lane.b32.xlu2 %v3570_v13, %s5055_s12  ;;  %v4030_v53 = vsel %vm5676_vm2, %v4028_v49, %v4029_v48  ;;  %v3421_v13 = vrot.slane %v3420_v25, 4  ;;  %v3655_v48 = vrot.slane %v3653_v35, 5 }
 0x2cd   : > { %4150 = vst.msk [vmem:[#allocation3 + $0x4] sm:$0xf] %vm4148_vm14, %v4055_v52  ;;  %v3102_v52 = vld [vmem:[#allocation2 + $0x60] sm:$0xf]  ;;  %v4014_v9 = vrot.slane %v4012_v7, 4 }
 0x2ce   : > { %3253 = vst.msk [vmem:[#allocation3 + $0x8] sm:$0xf] %vm3250_vm11, %v3159_v11  ;;  %v3171_v63 = vpop.permute.xlu2 %3170  ;;  %v3644_v11 = vshrl.u32 %v3322_v12, 16 }
 0x2cf   : > { %3259 = vst.msk [vmem:[#allocation3 + $0x20] sm:$0xf] %vm3250_vm11, %v3171_v63 }
 0x2d0   : > { %4100 = vrot.lane.b32.xlu1 %v4027_v62, %s5056_s13  ;;  %v3425_v62 = vrot.slane %v3423_v14, 5  ;;  %v3646_v56 = vrot.slane %v3644_v11, 4 }
 0x2d1   : > { %3180 = vrot.lane.b32.xlu0 %v3103_v44, %s5054_s11 }
 0x2d2   : > { %v4053_v6 = vpop.permute.xlu1 %4052 }
 0x2d3   : > { %4149 = vst.msk [vmem:[#allocation3] sm:$0xf] %vm4148_vm14, %v4053_v6  ;;  %v3173_v3 = vpop.permute.xlu0 %3172  ;;  %v3426_v6 = vsel %vm5188_vm4, %v3421_v13, %v3425_v62 }
 0x2d4   : > { %3260 = vst.msk [vmem:[#allocation3 + $0x24] sm:$0xf] %vm3250_vm11, %v3173_v3  ;;  %4088 = vrot.lane.b32.xlu2 %v4006_v36, %s5056_s13  ;;  %v3575_v3 = vshll.u32 %v3313_v20, 16  ;;  %v3117_v36 = vld [vmem:[#allocation2 + $0xb8] sm:$0xf] }
 0x2d5   : > { %v3116_v20 = vld [vmem:[#allocation2 + $0xb4] sm:$0xf] }
 0x2d6   : > { %v3722_v57 = vpop.permute.xlu2 %3721 }
 0x2d8   : > { %3168 = vrot.lane.b32.xlu1 %v3097_v58, %s5054_s11  ;;  %v3650_v58 = vor.u32 %v3649_v29, %v3646_v56  ;;  %v3306_v29 = vld [vmem:[#allocation2 + $0x74] sm:$0x1] }
 0x2d9   : > { %3739 = vrot.lane.b32.xlu0 %v3488_v33, %s5055_s12  ;;  %v3577_v33 = vrot.slane %v3575_v3, 5  ;;  %v3519_v3 = vshll.u32 %v3306_v29, 16  ;;  %v2796_v29 = vld [vmem:[#allocation2 + $0xbc] sm:$0x1] }
 0x2da   : > { %v3161_v8 = vpop.permute.xlu1 %3160  ;;  %v4913_v40 = vld [vmem:[#allocation3] sm:$0xff]  ;;  %v3651_v49 = vrot.slane %v3650_v58, 4 }
 0x2db   : > { %3254 = vst.msk [vmem:[#allocation3 + $0xc] sm:$0xf] %vm3250_vm11, %v3161_v8  ;;  %v3732_v37 = vpop.permute.xlu0 %3731  ;;  %4895 = vmatmul.msk.bf16.vlgmr.msra.gmra.mxu0 %vm4313_vm15, %v4913_v40  ;;  %v3111_v8 = vld [vmem:[#allocation2 + $0x94] sm:$0xf]  ;;  %v3657_v40 = vshrl.u32 %v3323_v55, 16  ;;  %v3578_v30 = vor.u32 %v3577_v33, %v3574_v41 }
 0x2dc   : > { %3815 = vst.msk [vmem:[#allocation3 + $0xc] sm:$0xf] %vm3811_vm13, %v3722_v57  ;;  %4102 = vrot.lane.b32.xlu2 %v4030_v53, %s5056_s13  ;;  %v3314_v57 = vld [vmem:[#allocation2 + $0x94] sm:$0xf]  ;;  %v3876_v53 = vld [vmem:[#allocation2 + $0x98] sm:$0x1] }
 0x2dd   : > { %3820 = vst.msk [vmem:[#allocation3 + $0x20] sm:$0xf] %vm3811_vm13, %v3732_v37  ;;  %v3581_v5 = vshll.u32 %v3314_v57, 16  ;;  %v3656_v37 = vsel %vm5188_vm4, %v3651_v49, %v3655_v48  ;;  %v3579_v54 = vrot.slane %v3578_v30, 4  ;;  %v4015_v17 = vrot.slane %v3876_v53, 5 }
 0x2de   : > { %v4057_v47 = vpop.permute.xlu2 %4056  ;;  %v3585_v12 = vshrl.u32 %v3314_v57, 16  ;;  %v3521_v49 = vrot.slane %v3519_v3, 5  ;;  %v2795_v30 = vld [vmem:[#allocation2 + $0xb8] sm:$0xf]  ;;  %v2951_v3 = vrot.slane %v2796_v29, 5 }
 0x2df   : > { %v3583_v42 = vrot.slane %v3581_v5, 5 }
 0x2e0   : > { %3727 = vrot.lane.b32.xlu1 %v3416_v32, %s5055_s12  ;;  %v3986_v32 = vrot.slane %v3984_v23, 4  ;;  %v3587_v11 = vrot.slane %v3585_v12, 4 }
 0x2e1   : > { %4066 = vrot.lane.b32.xlu0 %v3967_v43, %s5056_s13  ;;  %v3659_v43 = vrot.slane %v3657_v40, 4  ;;  %v3584_v25 = vsel %vm5188_vm4, %v3579_v54, %v3583_v42  ;;  %v2794_v40 = vld [vmem:[#allocation2 + $0xb4] sm:$0xe]  ;;  %v3316_v54 = vld [vmem:[#allocation2 + $0x9c] sm:$0xf] }
 0x2e2   : > { %v3720_v50 = vpop.permute.xlu1 %3719  ;;  %v3599_v12 = vshll.u32 %v3316_v54, 16 }
 0x2e3   : > { %3814 = vst.msk [vmem:[#allocation3 + $0x8] sm:$0xf] %vm3811_vm13, %v3720_v50  ;;  %v4059_v24 = vpop.permute.xlu0 %4058  ;;  %v3660_v14 = vor.u32 %v3659_v43, %v3655_v48 }
 0x2e4   : > { %4151 = vst.msk [vmem:[#allocation3 + $0x8] sm:$0xf] %vm4148_vm14, %v4057_v47  ;;  %3178 = vrot.lane.b32.xlu2 %v3102_v52, %s5054_s11  ;;  %v3988_v52 = vsel %vm5676_vm2, %v3986_v32, %v3987_v10  ;;  %v4805_v32 = vrot.slane %v2794_v40, 9  ;;  %v2948_v10 = vrot.slane %v2795_v30, 5 }
 0x2e5   : > { %4152 = vst.msk [vmem:[#allocation3 + $0xc] sm:$0xf] %vm4148_vm14, %v4059_v24  ;;  %v3305_v24 = vld [vmem:[#allocation2 + $0x70] sm:$0xf]  ;;  %v3661_v13 = vrot.slane %v3660_v14, 4 }
 0x2e6   : > { %v4071_v15 = vpop.permute.xlu2 %4070  ;;  %v3509_v19 = vshll.u32 %v3305_v24, 16  ;;  %v3513_v39 = vshrl.u32 %v3305_v24, 16  ;;  %v3596_v24 = vshrl.u32 %v3316_v54, 16 }
 0x2e8   : > { %3741 = vrot.lane.b32.xlu1 %v3498_v28, %s5055_s12  ;;  %v3663_v28 = vshll.u32 %v3324_v34, 16  ;;  %v6582_v23 = vrot.slane %v3509_v19, 5  ;;  %v3866_v34 = vld [vmem:[#allocation2 + $0x70] sm:$0xf] }
 0x2e9   : > { %3194 = vrot.lane.b32.xlu0 %v3110_v16, %s5054_s11  ;;  %v4016_v16 = vsel %vm5676_vm2, %v4014_v9, %v4015_v17  ;;  %v3885_v9 = vld [vmem:[#allocation2 + $0xbc] sm:$0x1]  ;;  %v3865_v17 = vld [vmem:[#allocation2 + $0x6c] sm:$0xe] }
 0x2ea   : > { %v3734_v44 = vpop.permute.xlu1 %3733  ;;  %v3665_v62 = vrot.slane %v3663_v28, 5  ;;  %v4814_v28 = vrot.slane %v3865_v17, 9  ;;  %v3887_v17 = vld [vmem:[#allocation2 + $0xc4] sm:$0xf] }
 0x2eb   : > { %3821 = vst.msk [vmem:[#allocation3 + $0x24] sm:$0xf] %vm3811_vm13, %v3734_v44  ;;  %v3187_v63 = vpop.permute.xlu0 %3186  ;;  %v3515_v44 = vrot.slane %v3513_v39, 4  ;;  %v3598_v39 = vrot.slane %v3596_v24, 4 }
 0x2ec   : > { %4158 = vst.msk [vmem:[#allocation3 + $0x24] sm:$0xf] %vm4148_vm14, %v4071_v15  ;;  %v4914_v1 = vld [vmem:[#allocation3 + $0x8] sm:$0xff]  ;;  %3729 = vrot.lane.b32.xlu2 %v3426_v6, %s5055_s12  ;;  %v3315_v15 = vld [vmem:[#allocation2 + $0x98] sm:$0x1] }
 0x2ed   : > { %3267 = vst.msk [vmem:[#allocation3 + $0x40] sm:$0xf] %vm3250_vm11, %v3187_v63  ;;  %4896 = vmatmul.msk.bf16.gmra.mxu0 %vm4313_vm15, %v4914_v1  ;;  %v3588_v63 = vor.u32 %v3587_v11, %v3583_v42  ;;  %v3591_v55 = vshll.u32 %v3315_v15, 16  ;;  %v3666_v1 = vsel %vm5188_vm4, %v3661_v13, %v3665_v62  ;;  %v3883_v6 = vld [vmem:[#allocation2 + $0xb4] sm:$0xe]  ;;  %v3516_v45 = vor.u32 %v3515_v44, %v6582_v23 }
 0x2ee   : > { %v3748_v21 = vpop.permute.xlu2 %3747  ;;  %v4820_v0 = vrot.slane %v3883_v6, 9  ;;  %v3601_v11 = vrot.slane %v3599_v12, 5  ;;  %v3317_v13 = vld [vmem:[#allocation2 + $0xa0] sm:$0xf]  ;;  %v3326_v62 = vld [vmem:[#allocation2 + $0xc4] sm:$0xf] }
 0x2ef   : > { %3828 = vst.msk [vmem:[#allocation3 + $0x40] sm:$0xf] %vm3811_vm13, %v3748_v21  ;;  %v3593_v58 = vrot.slane %v3591_v55, 5  ;;  %v3605_v55 = vshll.u32 %v3317_v13, 16  ;;  %v3681_v6 = vshrl.u32 %v3326_v62, 16 }
 0x2f0   : > { %4076 = vrot.lane.b32.xlu1 %v3985_v59, %s5056_s13  ;;  %v3884_v59 = vld [vmem:[#allocation2 + $0xb8] sm:$0xf]  ;;  %v3325_v12 = vld [vmem:[#allocation2 + $0xc0] sm:$0xf] }
 0x2f1   : > { %3208 = vrot.lane.b32.xlu0 %v3117_v36, %s5054_s11  ;;  %v3589_v36 = vrot.slane %v3588_v63, 4  ;;  %v4033_v21 = vrot.slane %v3884_v59, 5  ;;  %v3602_v63 = vor.u32 %v3601_v11, %v3598_v39  ;;  %v3671_v39 = vshll.u32 %v3325_v12, 16 }
 0x2f2   : > { %v4069_v60 = vpop.permute.xlu1 %4068 }
 0x2f3   : > { %4157 = vst.msk [vmem:[#allocation3 + $0x20] sm:$0xf] %vm4148_vm14, %v4069_v60  ;;  %v3750_v38 = vpop.permute.xlu0 %3749  ;;  %v3517_v60 = vrot.slane %v3516_v45, 4  ;;  %v3594_v57 = vsel %vm5188_vm4, %v3589_v36, %v3593_v58  ;;  %v4035_v22 = vrot.slane %v4033_v21, 4  ;;  %v2950_v45 = vrot.slane %v2948_v10, 4 }
 0x2f4   : > { %4064 = vrot.lane.b32.xlu2 %v3964_v46, %s5056_s13  ;;  %v3874_v46 = vld [vmem:[#allocation2 + $0x90] sm:$0xe]  ;;  %v3603_v58 = vrot.slane %v3602_v63, 4 }
 0x2f5   : > { %v4817_v5 = vrot.slane %v3874_v46, 9 }
 0x2f6   : > { %v4087_v26 = vpop.permute.xlu2 %4086 }
 0x2f7   : > { %v4013_v42 = vsel %vm5676_vm2, %v4817_v5, %v4012_v7 }
 0x2f8   : > { %3196 = vrot.lane.b32.xlu1 %v3111_v8, %s5054_s11  ;;  %v3522_v8 = vsel %vm5188_vm4, %v3517_v60, %v3521_v49  ;;  %v2952_v49 = vsel %vm5676_vm2, %v2950_v45, %v2951_v3 }
 0x2f9   : > { %3767 = vrot.lane.b32.xlu0 %v3656_v37, %s5055_s12  ;;  %v3304_v37 = vld [vmem:[#allocation2 + $0x6c] sm:$0xf] }
 0x2fa   : > { %v3189_v2 = vpop.permute.xlu1 %3188  ;;  %v4917_v47 = vld [vmem:[#allocation3 + $0x20] sm:$0xff]  ;;  %v3500_v43 = vshrl.u32 %v3304_v37, 16 }
 0x2fb   : > { %3268 = vst.msk [vmem:[#allocation3 + $0x44] sm:$0xf] %vm3250_vm11, %v3189_v2  ;;  %v3163_v50 = vpop.permute.xlu0 %3162  ;;  %4899 = vmatmul.msk.bf16.vlgmr.msra.gmra.mxu1 %vm4313_vm15, %v4917_v47  ;;  %v3503_v2 = vshll.u32 %v3304_v37, 16  ;;  %v3105_v47 = vld [vmem:[#allocation2 + $0x70] sm:$0xf] }
 0x2fc   : > { %3829 = vst.msk [vmem:[#allocation3 + $0x44] sm:$0xf] %vm3811_vm13, %v3750_v38  ;;  %4078 = vrot.lane.b32.xlu2 %v3988_v52, %s5056_s13  ;;  %v4034_v38 = vsel %vm5676_vm2, %v4820_v0, %v4033_v21  ;;  %v4036_v52 = vrot.slane %v3885_v9, 5  ;;  %v3502_v7 = vrot.slane %v3500_v43, 4  ;;  %v3683_v21 = vrot.slane %v3681_v6, 4 }
 0x2fd   : > { %4166 = vst.msk [vmem:[#allocation3 + $0x44] sm:$0xf] %vm4148_vm14, %v4087_v26  ;;  %v3886_v9 = vld [vmem:[#allocation2 + $0xc0] sm:$0xe] }
 0x2fe   : > { %3255 = vst.msk [vmem:[#allocation3 + $0x10] sm:$0xf] %vm3250_vm11, %v3163_v50  ;;  %v3175_v61 = vpop.permute.xlu2 %3174  ;;  %v2949_v50 = vsel %vm5676_vm2, %v4805_v32, %v2948_v10 }
 0x2ff   : > { %3261 = vst.msk [vmem:[#allocation3 + $0x28] sm:$0xf] %vm3250_vm11, %v3175_v61 }
 0x300   : > { %3755 = vrot.lane.b32.xlu1 %v3584_v25, %s5055_s12  ;;  %v3505_v25 = vrot.slane %v3503_v2, 5 }
 0x301   : > { %4094 = vrot.lane.b32.xlu0 %v4016_v16, %s5056_s13  ;;  %v3991_v16 = vrot.slane %v3866_v34, 5 }
 0x302   : > { %v4085_v27 = vpop.permute.xlu1 %4084  ;;  %v3506_v44 = vor.u32 %v3505_v25, %v3502_v7  ;;  %v4040_v7 = vrot.slane %v3887_v17, 5 }
 0x303   : > { %4165 = vst.msk [vmem:[#allocation3 + $0x40] sm:$0xf] %vm4148_vm14, %v4085_v27  ;;  %v3177_v56 = vpop.permute.xlu0 %3176  ;;  %v4037_v27 = vsel %vm5676_vm2, %v4035_v22, %v4036_v52  ;;  %v3993_v40 = vrot.slane %v3991_v16, 4  ;;  %v4821_v52 = vrot.slane %v3886_v9, 9 }
 0x304   : > { %3262 = vst.msk [vmem:[#allocation3 + $0x2c] sm:$0xf] %vm3250_vm11, %v3177_v56  ;;  %3206 = vrot.lane.b32.xlu2 %v3116_v20, %s5054_s11  ;;  %v3992_v56 = vsel %vm5676_vm2, %v4814_v28, %v3991_v16  ;;  %v3113_v20 = vld [vmem:[#allocation2 + $0xa0] sm:$0xf]  ;;  %v3507_v59 = vrot.slane %v3506_v44, 4 }
 0x305   : > { %v3328_v28 = vld [vmem:[#allocation2 + $0xcc] sm:$0xf]  ;;  %v3112_v16 = vld [vmem:[#allocation2 + $0x9c] sm:$0xf] }
 0x306   : > { %v3726_v35 = vpop.permute.xlu2 %3725  ;;  %v3512_v60 = vsel %vm5188_vm4, %v3507_v59, %v6582_v23  ;;  %v3695_v44 = vshll.u32 %v3328_v28, 16 }
 0x308   : > { %3769 = vrot.lane.b32.xlu1 %v3666_v1, %s5055_s12  ;;  %v3677_v1 = vshll.u32 %v3326_v62, 16  ;;  %v4041_v62 = vsel %vm5676_vm2, %v4821_v52, %v4040_v7  ;;  %v3697_v3 = vrot.slane %v3695_v44, 5  ;;  %v3120_v52 = vld [vmem:[#allocation2 + $0xcc] sm:$0xf] }
 0x309   : > { %3182 = vrot.lane.b32.xlu0 %v3104_v31, %s5054_s11 }
 0x30a   : > { %v3165_v41 = vpop.permute.xlu1 %3164  ;;  %v4921_v33 = vld [vmem:[#allocation3 + $0x40] sm:$0xff]  ;;  %v6629_v0 = vrot.slane %v3677_v1, 5 }
 0x30b   : > { %3256 = vst.msk [vmem:[#allocation3 + $0x14] sm:$0xf] %vm3250_vm11, %v3165_v41  ;;  %v3736_v48 = vpop.permute.xlu0 %3735  ;;  %4903 = vmatmul.msk.bf16.vlgmr.msra.gmra.mxu2 %vm4313_vm15, %v4921_v33  ;;  %v3327_v33 = vld [vmem:[#allocation2 + $0xc8] sm:$0x1] }
 0x30c   : > { %3817 = vst.msk [vmem:[#allocation3 + $0x14] sm:$0xf] %vm3811_vm13, %v3726_v35  ;;  %3757 = vrot.lane.b32.xlu2 %v3594_v57, %s5055_s12  ;;  %v3607_v35 = vrot.slane %v3605_v55, 5  ;;  %v3867_v57 = vld [vmem:[#allocation2 + $0x74] sm:$0x1]  ;;  %v3684_v46 = vor.u32 %v3683_v21, %v6629_v0 }
 0x30d   : > { %3822 = vst.msk [vmem:[#allocation3 + $0x28] sm:$0xf] %vm3811_vm13, %v3736_v48  ;;  %v3609_v48 = vshrl.u32 %v3317_v13, 16  ;;  %v3994_v30 = vrot.slane %v3867_v57, 5  ;;  %v3878_v13 = vld [vmem:[#allocation2 + $0xa0] sm:$0xf] }
 0x30e   : > { %v4061_v4 = vpop.permute.xlu2 %4060  ;;  %v3685_v32 = vrot.slane %v3684_v46, 4  ;;  %v4019_v1 = vrot.slane %v3878_v13, 5  ;;  %v3119_v21 = vld [vmem:[#allocation2 + $0xc4] sm:$0xf] }
 0x30f   : > { %v3611_v23 = vrot.slane %v3609_v48, 4  ;;  %v3995_v54 = vsel %vm5676_vm2, %v3993_v40, %v3994_v30 }
 0x310   : > { %4104 = vrot.lane.b32.xlu1 %v4034_v38, %s5056_s13  ;;  %v3608_v38 = vsel %vm5188_vm4, %v3603_v58, %v3607_v35  ;;  %v3329_v58 = vld [vmem:[#allocation2 + $0xd0] sm:$0xf] }
 0x311   : > { %3745 = vrot.lane.b32.xlu0 %v3522_v8, %s5055_s12  ;;  %v3687_v8 = vshll.u32 %v3327_v33, 16  ;;  %v3612_v43 = vor.u32 %v3611_v23, %v3607_v35  ;;  %v3701_v57 = vshll.u32 %v3329_v58, 16 }
 0x312   : > { %v3724_v53 = vpop.permute.xlu1 %3723 }
 0x313   : > { %3816 = vst.msk [vmem:[#allocation3 + $0x10] sm:$0xf] %vm3811_vm13, %v3724_v53  ;;  %v4063_v26 = vpop.permute.xlu0 %4062  ;;  %v3318_v53 = vld [vmem:[#allocation2 + $0xa4] sm:$0x1]  ;;  %v3689_v10 = vrot.slane %v3687_v8, 5  ;;  %v4042_v8 = vrot.slane %v4040_v7, 4 }
 0x314   : > { %4153 = vst.msk [vmem:[#allocation3 + $0x10] sm:$0xf] %vm4148_vm14, %v4061_v4  ;;  %4092 = vrot.lane.b32.xlu2 %v4013_v42, %s5056_s13  ;;  %v3118_v42 = vld [vmem:[#allocation2 + $0xc0] sm:$0xf]  ;;  %v3615_v2 = vshll.u32 %v3318_v53, 16  ;;  %v3703_v23 = vrot.slane %v3701_v57, 5 }
 0x315   : > { %4154 = vst.msk [vmem:[#allocation3 + $0x14] sm:$0xf] %vm4148_vm14, %v4063_v26 }
 0x316   : > { %v4075_v14 = vpop.permute.xlu2 %4074  ;;  %v3617_v24 = vrot.slane %v3615_v2, 5  ;;  %v4021_v2 = vrot.slane %v4019_v1, 4 }
 0x318   : > { %3184 = vrot.lane.b32.xlu1 %v3105_v47, %s5054_s11  ;;  %v3690_v47 = vsel %vm5188_vm4, %v3685_v32, %v3689_v10  ;;  %v3705_v10 = vshrl.u32 %v3329_v58, 16 }
 0x319   : > { %3016 = vrot.lane.b32.xlu0 %v2949_v50, %s5053_s10  ;;  %v3613_v50 = vrot.slane %v3612_v43, 4  ;;  %v3891_v43 = vld [vmem:[#allocation2 + $0xd4] sm:$0x1] }
 0x31a   : > { %v3738_v19 = vpop.permute.xlu1 %3737 }
 0x31b   : > { %3823 = vst.msk [vmem:[#allocation3 + $0x2c] sm:$0xf] %vm3811_vm13, %v3738_v19  ;;  %v3191_v61 = vpop.permute.xlu0 %3190  ;;  %v3668_v19 = vshrl.u32 %v3325_v12, 16  ;;  %v3618_v11 = vsel %vm5188_vm4, %v3613_v50, %v3617_v24  ;;  %v3330_v50 = vld [vmem:[#allocation2 + $0xd4] sm:$0x1]  ;;  %v4050_v12 = vrot.slane %v3891_v43, 5 }
 0x31c   : > { %4160 = vst.msk [vmem:[#allocation3 + $0x2c] sm:$0xf] %vm4148_vm14, %v4075_v14  ;;  %v4915_v15 = vld [vmem:[#allocation3 + $0x10] sm:$0xff]  ;;  %4106 = vrot.lane.b32.xlu2 %v4037_v27, %s5056_s13  ;;  %v6656_v14 = vld [vmem:[#allocation2 + $0xc4] sm:$0xf]  ;;  %v3692_v27 = vshrl.u32 %v3328_v28, 16 }
 0x31d   : > { %3269 = vst.msk [vmem:[#allocation3 + $0x48] sm:$0xf] %vm3250_vm11, %v3191_v61  ;;  %4897 = vmatmul.msk.bf16.gmra.mxu0 %vm4313_vm15, %v4915_v15  ;;  %v3877_v61 = vld [vmem:[#allocation2 + $0x9c] sm:$0xe]  ;;  %v2955_v15 = vrot.slane %v6656_v14, 5  ;;  %v3670_v29 = vrot.slane %v3668_v19, 4 }
 0x31e   : > { %v3203_v31 = vpop.permute.xlu2 %3202  ;;  %v4818_v55 = vrot.slane %v3877_v61, 9  ;;  %v3694_v45 = vrot.slane %v3692_v27, 4  ;;  %v3711_v28 = vshll.u32 %v3330_v50, 16 }
 0x31f   : > { %3275 = vst.msk [vmem:[#allocation3 + $0x60] sm:$0xf] %vm3250_vm11, %v3203_v31  ;;  %v2957_v59 = vrot.slane %v2955_v15, 4 }
 0x320   : > { %4080 = vrot.lane.b32.xlu1 %v3992_v56, %s5056_s13  ;;  %v2799_v56 = vld [vmem:[#allocation2 + $0xc8] sm:$0x1]  ;;  %v4020_v33 = vsel %vm5676_vm2, %v4818_v55, %v4019_v1  ;;  %v3698_v48 = vor.u32 %v3697_v3, %v3694_v45  ;;  %v3713_v13 = vrot.slane %v3711_v28, 5 }
 0x321   : > { %3200 = vrot.lane.b32.xlu0 %v3113_v20, %s5054_s11  ;;  %v3673_v20 = vrot.slane %v3671_v39, 5  ;;  %v2958_v31 = vrot.slane %v2799_v56, 5 }
 0x322   : > { %v4073_v36 = vpop.permute.xlu1 %4072 }
 0x323   : > { %4159 = vst.msk [vmem:[#allocation3 + $0x28] sm:$0xf] %vm4148_vm14, %v4073_v36  ;;  %v3205_v41 = vpop.permute.xlu0 %3204 }
 0x324   : > { %3276 = vst.msk [vmem:[#allocation3 + $0x64] sm:$0xf] %vm3250_vm11, %v3205_v41  ;;  %3743 = vrot.lane.b32.xlu2 %v3512_v60, %s5055_s12  ;;  %v3674_v41 = vor.u32 %v3673_v20, %v3670_v29  ;;  %v3888_v60 = vld [vmem:[#allocation2 + $0xc8] sm:$0x1] }
 0x325   : > { %v4043_v40 = vrot.slane %v3888_v60, 5 }
 0x326   : > { %v3754_v5 = vpop.permute.xlu2 %3753 }
 0x327   : > { %v4044_v32 = vsel %vm5676_vm2, %v4042_v8, %v4043_v40 }
 0x328   : > { %3018 = vrot.lane.b32.xlu1 %v2952_v49, %s5053_s10  ;;  %v2959_v49 = vsel %vm5676_vm2, %v2957_v59, %v2958_v31 }
 0x329   : > { %3759 = vrot.lane.b32.xlu0 %v3608_v38, %s5055_s12  ;;  %v3675_v38 = vrot.slane %v3674_v41, 4 }
 0x32a   : > { %v3193_v4 = vpop.permute.xlu1 %3192  ;;  %v4918_v37 = vld [vmem:[#allocation3 + $0x28] sm:$0xff] }
 0x32b   : > { %3270 = vst.msk [vmem:[#allocation3 + $0x4c] sm:$0xf] %vm3250_vm11, %v3193_v4  ;;  %v3764_v26 = vpop.permute.xlu0 %3763  ;;  %4900 = vmatmul.msk.bf16.gmra.mxu1 %vm4313_vm15, %v4918_v37  ;;  %v6683_v37 = vld [vmem:[#allocation2 + $0xd0] sm:$0xf]  ;;  %v3680_v53 = vsel %vm5188_vm4, %v3675_v38, %v6629_v0  ;;  %v3707_v0 = vrot.slane %v3705_v10, 4 }
 0x32c   : > { %3831 = vst.msk [vmem:[#allocation3 + $0x4c] sm:$0xf] %vm3811_vm13, %v3754_v5  ;;  %4082 = vrot.lane.b32.xlu2 %v3995_v54, %s5056_s13  ;;  %v3699_v5 = vrot.slane %v3698_v48, 4 }
 0x32d   : > { %3836 = vst.msk [vmem:[#allocation3 + $0x60] sm:$0xf] %vm3811_vm13, %v3764_v26  ;;  %v3879_v26 = vld [vmem:[#allocation2 + $0xa4] sm:$0x1] }
 0x32e   : > { %v4089_v34 = vpop.permute.xlu2 %4088  ;;  %v3704_v54 = vsel %vm5188_vm4, %v3699_v5, %v3703_v23 }
 0x330   : > { %3210 = vrot.lane.b32.xlu1 %v3118_v42, %s5054_s11  ;;  %v4047_v42 = vrot.slane %v6683_v37, 5 }
 0x331   : > { %3773 = vrot.lane.b32.xlu0 %v3690_v47, %s5055_s12  ;;  %v4022_v47 = vrot.slane %v3879_v26, 5 }
 0x332   : > { %v3752_v22 = vpop.permute.xlu1 %3751  ;;  %v4049_v24 = vrot.slane %v4047_v42, 4 }
 0x333   : > { %3830 = vst.msk [vmem:[#allocation3 + $0x48] sm:$0xf] %vm3811_vm13, %v3752_v22  ;;  %v4091_v25 = vpop.permute.xlu0 %4090  ;;  %v4023_v7 = vsel %vm5676_vm2, %v4021_v2, %v4022_v47 }
 0x334   : > { %4167 = vst.msk [vmem:[#allocation3 + $0x48] sm:$0xf] %vm4148_vm14, %v4089_v34  ;;  %3198 = vrot.lane.b32.xlu2 %v3112_v16, %s5054_s11  ;;  %v2797_v16 = vld [vmem:[#allocation2 + $0xc0] sm:$0xe]  ;;  %v4051_v19 = vsel %vm5676_vm2, %v4049_v24, %v4050_v12 }
 0x335   : > { %4168 = vst.msk [vmem:[#allocation3 + $0x4c] sm:$0xf] %vm4148_vm14, %v4091_v25  ;;  %v3708_v25 = vor.u32 %v3707_v0, %v3703_v23  ;;  %v4806_v39 = vrot.slane %v2797_v16, 9 }
 0x336   : > { %v4103_v63 = vpop.permute.xlu2 %4102 }
 0x337   : > { %v3709_v61 = vrot.slane %v3708_v25, 4  ;;  %v2956_v44 = vsel %vm5676_vm2, %v4806_v39, %v2955_v15  ;;  %v3121_v15 = vld [vmem:[#allocation2 + $0xd0] sm:$0xf] }
 0x338   : > { %3761 = vrot.lane.b32.xlu1 %v3618_v11, %s5055_s12 }
 0x339   : > { %4108 = vrot.lane.b32.xlu0 %v4041_v62, %s5056_s13  ;;  %v3714_v56 = vsel %vm5188_vm4, %v3709_v61, %v3713_v13  ;;  %vm4456_vm4 = vcmask 31744  }
 0x33a   : > { %v3766_v6 = vpop.permute.xlu1 %3765 }
 0x33b   : > { %3837 = vst.msk [vmem:[#allocation3 + $0x64] sm:$0xf] %vm3811_vm13, %v3766_v6  ;;  %v3167_v36 = vpop.permute.xlu0 %3166  ;;  %v3889_v6 = vld [vmem:[#allocation2 + $0xcc] sm:$0xe] }
 0x33c   : > { %4174 = vst.msk [vmem:[#allocation3 + $0x64] sm:$0xf] %vm4148_vm14, %v4103_v63  ;;  %v4922_v35 = vld [vmem:[#allocation3 + $0x48] sm:$0xff]  ;;  %3212 = vrot.lane.b32.xlu2 %v3119_v21, %s5054_s11  ;;  %v4822_v59 = vrot.slane %v3889_v6, 9 }
 0x33d   : > { %3257 = vst.msk [vmem:[#allocation3 + $0x18] sm:$0xf] %vm3250_vm11, %v3167_v36  ;;  %4904 = vmatmul.msk.bf16.gmra.mxu2 %vm4313_vm15, %v4922_v35 }
 0x33e   : > { %v3179_v46 = vpop.permute.xlu2 %3178  ;;  %v4048_v48 = vsel %vm5676_vm2, %v4822_v59, %v4047_v42 }
 0x33f   : > { %3263 = vst.msk [vmem:[#allocation3 + $0x30] sm:$0xf] %vm3250_vm11, %v3179_v46 }
 0x340   : > { %4096 = vrot.lane.b32.xlu1 %v4020_v33, %s5056_s13 }
 0x341   : > { %3022 = vrot.lane.b32.xlu0 %v2959_v49, %s5053_s10 }
 0x342   : > { %v4101_v30 = vpop.permute.xlu1 %4100 }
 0x343   : > { %4173 = vst.msk [vmem:[#allocation3 + $0x60] sm:$0xf] %vm4148_vm14, %v4101_v30  ;;  %v3181_v4 = vpop.permute.xlu0 %3180 }
 0x344   : > { %3264 = vst.msk [vmem:[#allocation3 + $0x34] sm:$0xf] %vm3250_vm11, %v3181_v4  ;;  %3771 = vrot.lane.b32.xlu2 %v3680_v53, %s5055_s12 }
 0x346   : > { %v3730_v9 = vpop.permute.xlu2 %3729 }
 0x348   : > { %4110 = vrot.lane.b32.xlu1 %v4044_v32, %s5056_s13 }
 0x349   : > { %3775 = vrot.lane.b32.xlu0 %v3704_v54, %s5055_s12 }
 0x34a   : > { %v3169_v17 = vpop.permute.xlu1 %3168  ;;  %v4925_v34 = vld [vmem:[#allocation3 + $0x60] sm:$0xff] }
 0x34b   : > { %3258 = vst.msk [vmem:[#allocation3 + $0x1c] sm:$0xf] %vm3250_vm11, %v3169_v17  ;;  %v3740_v22 = vpop.permute.xlu0 %3739  ;;  %4907 = vmatmul.msk.bf16.vlgmr.msra.gmra.mxu3 %vm4313_vm15, %v4925_v34 }
 0x34c   : > { %3819 = vst.msk [vmem:[#allocation3 + $0x1c] sm:$0xf] %vm3811_vm13, %v3730_v9  ;;  %4098 = vrot.lane.b32.xlu2 %v4023_v7, %s5056_s13 }
 0x34d   : > { %3824 = vst.msk [vmem:[#allocation3 + $0x30] sm:$0xf] %vm3811_vm13, %v3740_v22 }
 0x34e   : > { %v4065_v11 = vpop.permute.xlu2 %4064 }
 0x350   : > { %3214 = vrot.lane.b32.xlu1 %v3120_v52, %s5054_s11 }
 0x351   : > { %4114 = vrot.lane.b32.xlu0 %v4051_v19, %s5056_s13 }
 0x352   : > { %v3728_v62 = vpop.permute.xlu1 %3727 }
 0x353   : > { %3818 = vst.msk [vmem:[#allocation3 + $0x18] sm:$0xf] %vm3811_vm13, %v3728_v62  ;;  %v4067_v27 = vpop.permute.xlu0 %4066 }
 0x354   : > { %4155 = vst.msk [vmem:[#allocation3 + $0x18] sm:$0xf] %vm4148_vm14, %v4065_v11  ;;  %3020 = vrot.lane.b32.xlu2 %v2956_v44, %s5053_s10 }
 0x355   : > { %4156 = vst.msk [vmem:[#allocation3 + $0x1c] sm:$0xf] %vm4148_vm14, %v4067_v27 }
 0x356   : > { %v4079_v20 = vpop.permute.xlu2 %4078 }
 0x358   : > { %3777 = vrot.lane.b32.xlu1 %v3714_v56, %s5055_s12  ;;  %v4375_v29 = vpop.f32.mrf.mxu0 }
 0x359   : > { %v4633_v63 = vpack.c.bf16 %v4375_v29, %v4375_v29  ;;  %v4530_v18 = vmul.f32 %v4375_v29, %v4375_v29  ;;  %v4457_v3 = vsel %vm4456_vm4, %v4375_v29, 0.0 }
 0x35a   : > { %v3742_v55 = vpop.permute.xlu1 %3741 }
 0x35b   : > { %3825 = vst.msk [vmem:[#allocation3 + $0x34] sm:$0xf] %vm3811_vm13, %v3742_v55  ;;  %v3195_v1 = vpop.permute.xlu0 %3194  ;;  %v4562_v60 = vsel %vm4456_vm4, %v4530_v18, 0.0 }
 0x35c   : > { %4665 = vst.msk [vmem:[%s5118_s14] sm:$0xf] %vm912_vm10, %v4633_v63  ;;  %v4916_v14 = vld [vmem:[#allocation3 + $0x18] sm:$0xff]  ;;  %3216 = vrot.lane.b32.xlu2 %v3121_v15, %s5054_s11 }
 0x35d   : > { %4162 = vst.msk [vmem:[#allocation3 + $0x34] sm:$0xf] %vm4148_vm14, %v4079_v20  ;;  %4898 = vmatmul.msk.bf16.gmra.mxu0 %vm4313_vm15, %v4916_v14 }
 0x35e   : > { %3271 = vst.msk [vmem:[#allocation3 + $0x50] sm:$0xf] %vm3250_vm11, %v3195_v1  ;;  %v3207_v45 = vpop.permute.xlu2 %3206 }
 0x35f   : > { %3277 = vst.msk [vmem:[#allocation3 + $0x68] sm:$0xf] %vm3250_vm11, %v3207_v45 }
 0x360   : > { %v4377_v31 = vpop.f32.mrf.mxu0 }
 0x361   : > { %v4458_v36 = vsel %vm4456_vm4, %v4377_v31, 0.0  ;;  %v4531_v58 = vmul.f32 %v4377_v31, %v4377_v31  ;;  %v4634_v35 = vpack.c.bf16 %v4377_v31, %v4377_v31 }
 0x362   : > { %v4077_v21 = vpop.permute.xlu1 %4076  ;;  %v4459_v41 = vadd.f32 %v4458_v36, %v4457_v3 }
 0x363   : > { %4161 = vst.msk [vmem:[#allocation3 + $0x30] sm:$0xf] %vm4148_vm14, %v4077_v21  ;;  %v3209_v33 = vpop.permute.xlu0 %3208  ;;  %v4563_v49 = vsel %vm4456_vm4, %v4531_v58, 0.0 }
 0x364   : > { %4666 = vst.msk [vmem:[%s5118_s14 + $0x4] sm:$0xf] %vm912_vm10, %v4634_v35  ;;  %v4564_v57 = vadd.f32 %v4563_v49, %v4562_v60  ;;  %4112 = vrot.lane.b32.xlu2 %v4048_v48, %s5056_s13 }
 0x365   : > { %3278 = vst.msk [vmem:[#allocation3 + $0x6c] sm:$0xf] %vm3250_vm11, %v3209_v33 }
 0x366   : > { %v3758_v38 = vpop.permute.xlu2 %3757 }
 0x36a   : > { %v3197_v46 = vpop.permute.xlu1 %3196  ;;  %v4919_v8 = vld [vmem:[#allocation3 + $0x30] sm:$0xff]  ;;  %v4380_v30 = vpop.f32.mrf.mxu0 }
 0x36b   : > { %3272 = vst.msk [vmem:[#allocation3 + $0x54] sm:$0xf] %vm3250_vm11, %v3197_v46  ;;  %v3768_v40 = vpop.permute.xlu0 %3767  ;;  %v4460_v5 = vsel %vm4456_vm4, %v4380_v30, 0.0  ;;  %v4532_v23 = vmul.f32 %v4380_v30, %v4380_v30  ;;  %v4635_v51 = vpack.c.bf16 %v4380_v30, %v4380_v30  ;;  %4901 = vmatmul.msk.bf16.gmra.mxu1 %vm4313_vm15, %v4919_v8 }
 0x36c   : > { %3833 = vst.msk [vmem:[#allocation3 + $0x54] sm:$0xf] %vm3811_vm13, %v3758_v38  ;;  %v4461_v4 = vadd.f32 %v4460_v5, %v4459_v41 }
 0x36d   : > { %3838 = vst.msk [vmem:[#allocation3 + $0x68] sm:$0xf] %vm3811_vm13, %v3768_v40  ;;  %v4565_v37 = vsel %vm4456_vm4, %v4532_v23, 0.0 }
 0x36e   : > { %4667 = vst.msk [vmem:[%s5118_s14 + $0x8] sm:$0xf] %vm912_vm10, %v4635_v51  ;;  %v4566_v53 = vadd.f32 %v4565_v37, %v4564_v57  ;;  %v4093_v32 = vpop.permute.xlu2 %4092 }
 0x372   : > { %v3756_v10 = vpop.permute.xlu1 %3755  ;;  %v4382_v54 = vpop.f32.mrf.mxu0 }
 0x373   : > { %3832 = vst.msk [vmem:[#allocation3 + $0x50] sm:$0xf] %vm3811_vm13, %v3756_v10  ;;  %v4095_v26 = vpop.permute.xlu0 %4094  ;;  %v4462_v42 = vsel %vm4456_vm4, %v4382_v54, 0.0  ;;  %v4533_v43 = vmul.f32 %v4382_v54, %v4382_v54  ;;  %v4636_v2 = vpack.c.bf16 %v4382_v54, %v4382_v54 }
 0x374   : > { %4169 = vst.msk [vmem:[#allocation3 + $0x50] sm:$0xf] %vm4148_vm14, %v4093_v32  ;;  %v4463_v47 = vadd.f32 %v4462_v42, %v4461_v4 }
 0x375   : > { %4170 = vst.msk [vmem:[#allocation3 + $0x54] sm:$0xf] %vm4148_vm14, %v4095_v26  ;;  %v4567_v9 = vsel %vm4456_vm4, %v4533_v43, 0.0 }
 0x376   : > { %4668 = vst.msk [vmem:[%s5118_s14 + $0xc] sm:$0xf] %vm912_vm10, %v4636_v2  ;;  %v4568_v0 = vadd.f32 %v4567_v9, %v4566_v53  ;;  %v4107_v34 = vpop.permute.xlu2 %4106 }
 0x378   : > { %v6757_v17 = vpop.f32.mrf.mxu1 }
 0x379   : > { %v4641_v50 = vpack.c.bf16 %v6757_v17, %v6757_v17 }
 0x37a   : > { %v3770_v24 = vpop.permute.xlu1 %3769 }
 0x37b   : > { %3839 = vst.msk [vmem:[#allocation3 + $0x6c] sm:$0xf] %vm3811_vm13, %v3770_v24  ;;  %v3183_v12 = vpop.permute.xlu0 %3182 }
 0x37c   : > { %4673 = vst.msk [vmem:[%s5118_s14 + $0x20] sm:$0xf] %vm912_vm10, %v4641_v50  ;;  %v4923_v22 = vld [vmem:[#allocation3 + $0x50] sm:$0xff] }
 0x37d   : > { %4176 = vst.msk [vmem:[#allocation3 + $0x6c] sm:$0xf] %vm4148_vm14, %v4107_v34  ;;  %4905 = vmatmul.msk.bf16.gmra.mxu2 %vm4313_vm15, %v4923_v22 }
 0x37e   : > { %3265 = vst.msk [vmem:[#allocation3 + $0x38] sm:$0xf] %vm3250_vm11, %v3183_v12  ;;  %v3744_v7 = vpop.permute.xlu2 %3743 }
 0x37f   : > { %3826 = vst.msk [vmem:[#allocation3 + $0x38] sm:$0xf] %vm3811_vm13, %v3744_v7 }
 0x380   : > { %v6767_v52 = vpop.f32.mrf.mxu1 }
 0x381   : > { %v4642_v25 = vpack.c.bf16 %v6767_v52, %v6767_v52 }
 0x382   : > { %v4105_v28 = vpop.permute.xlu1 %4104 }
 0x383   : > { %4175 = vst.msk [vmem:[#allocation3 + $0x68] sm:$0xf] %vm4148_vm14, %v4105_v28  ;;  %v3746_v16 = vpop.permute.xlu0 %3745 }
 0x384   : > { %4674 = vst.msk [vmem:[%s5118_s14 + $0x24] sm:$0xf] %vm912_vm10, %v4642_v25 }
 0x386   : > { %v4083_v19 = vpop.permute.xlu2 %4082 }
 0x38a   : > { %v3185_v39 = vpop.permute.xlu1 %3184  ;;  %v4926_v11 = vld [vmem:[#allocation3 + $0x68] sm:$0xff] }
 0x38b   : > { %3266 = vst.msk [vmem:[#allocation3 + $0x3c] sm:$0xf] %vm3250_vm11, %v3185_v39  ;;  %v3017_v61 = vpop.permute.xlu0 %3016  ;;  %4908 = vmatmul.msk.bf16.gmra.mxu3 %vm4313_vm15, %v4926_v11 }
 0x38c   : > { %3827 = vst.msk [vmem:[#allocation3 + $0x3c] sm:$0xf] %vm3811_vm13, %v3746_v16 }
 0x38d   : > { %4164 = vst.msk [vmem:[#allocation3 + $0x3c] sm:$0xf] %vm4148_vm14, %v4083_v19 }
 0x38e   : > { %3085 = vst.msk [vmem:[#allocation3 + $0x70] sm:$0xf] %vm3056_vm8, %v3017_v61  ;;  %v6780_v13 = vpop.f32.mrf.mxu2  ;;  %v3199_v27 = vpop.permute.xlu2 %3198 }
 0x38f   : > { %v4649_v62 = vpack.c.bf16 %v6780_v13, %v6780_v13  ;;  %3273 = vst.msk [vmem:[#allocation3 + $0x58] sm:$0xf] %vm3250_vm11, %v3199_v27 }
 0x391   : > { %4681 = vst.msk [vmem:[%s5118_s14 + $0x40] sm:$0xf] %vm912_vm10, %v4649_v62 }
 0x392   : > { %v4081_v44 = vpop.permute.xlu1 %4080 }
 0x393   : > { %4163 = vst.msk [vmem:[#allocation3 + $0x38] sm:$0xf] %vm4148_vm14, %v4081_v44  ;;  %v3201_v56 = vpop.permute.xlu0 %3200  ;;  %v4538_v44 = vmul.f32 %v6757_v17, %v6757_v17 }
 0x394   : > { %3274 = vst.msk [vmem:[#allocation3 + $0x5c] sm:$0xf] %vm3250_vm11, %v3201_v56 }
 0x396   : > { %v6789_v29 = vpop.f32.mrf.mxu2  ;;  %v3213_v63 = vpop.permute.xlu2 %3212 }
 0x397   : > { %v4650_v20 = vpack.c.bf16 %v6789_v29, %v6789_v29 }
 0x399   : > { %4682 = vst.msk [vmem:[%s5118_s14 + $0x44] sm:$0xf] %vm912_vm10, %v4650_v20 }
 0x39a   : > { %v3019_v55 = vpop.permute.xlu1 %3018  ;;  %v4920_v1 = vld [vmem:[#allocation3 + $0x38] sm:$0xff]  ;;  %v4385_v14 = vpop.f32.mrf.mxu0 }
 0x39b   : > { %3086 = vst.msk [vmem:[#allocation3 + $0x74] sm:$0xf] %vm3056_vm8, %v3019_v55  ;;  %v3760_v15 = vpop.permute.xlu0 %3759  ;;  %v4464_v6 = vsel %vm4456_vm4, %v4385_v14, 0.0  ;;  %v4534_v18 = vmul.f32 %v4385_v14, %v4385_v14  ;;  %v4637_v59 = vpack.c.bf16 %v4385_v14, %v4385_v14  ;;  %4902 = vmatmul.msk.bf16.gmra.mxu1 %vm4313_vm15, %v4920_v1  ;;  %v4472_v1 = vsel %vm4456_vm4, %v6757_v17, 0.0 }
 0x39c   : > { %3280 = vst.msk [vmem:[#allocation3 + $0x74] sm:$0xf] %vm3250_vm11, %v3213_v63  ;;  %v4465_v31 = vadd.f32 %v4464_v6, %v4463_v47  ;;  %v4539_v14 = vmul.f32 %v6767_v52, %v6767_v52 }
 0x39d   : > { %3834 = vst.msk [vmem:[#allocation3 + $0x58] sm:$0xf] %vm3811_vm13, %v3760_v15  ;;  %v4569_v45 = vsel %vm4456_vm4, %v4534_v18, 0.0 }
 0x39e   : > { %4669 = vst.msk [vmem:[%s5118_s14 + $0x10] sm:$0xf] %vm912_vm10, %v4637_v59  ;;  %v4570_v3 = vadd.f32 %v4569_v45, %v4568_v0  ;;  %v3772_v36 = vpop.permute.xlu2 %3771  ;;  %v4577_v59 = vsel %vm4456_vm4, %v4538_v44, 0.0 }
 0x3a2   : > { %v3211_v58 = vpop.permute.xlu1 %3210  ;;  %v4387_v35 = vpop.f32.mrf.mxu0 }
 0x3a3   : > { %3279 = vst.msk [vmem:[#allocation3 + $0x70] sm:$0xf] %vm3250_vm11, %v3211_v58  ;;  %v3774_v21 = vpop.permute.xlu0 %3773  ;;  %v4466_v41 = vsel %vm4456_vm4, %v4387_v35, 0.0  ;;  %v4535_v33 = vmul.f32 %v4387_v35, %v4387_v35  ;;  %v4638_v60 = vpack.c.bf16 %v4387_v35, %v4387_v35  ;;  %v4579_v58 = vsel %vm4456_vm4, %v4539_v14, 0.0 }
 0x3a4   : > { %3840 = vst.msk [vmem:[#allocation3 + $0x70] sm:$0xf] %vm3811_vm13, %v3772_v36  ;;  %v4467_v49 = vadd.f32 %v4466_v41, %v4465_v31  ;;  %v4474_v31 = vsel %vm4456_vm4, %v6767_v52, 0.0 }
 0x3a5   : > { %3841 = vst.msk [vmem:[#allocation3 + $0x74] sm:$0xf] %vm3811_vm13, %v3774_v21  ;;  %v4571_v48 = vsel %vm4456_vm4, %v4535_v33, 0.0 }
 0x3a6   : > { %4670 = vst.msk [vmem:[%s5118_s14 + $0x14] sm:$0xf] %vm912_vm10, %v4638_v60  ;;  %v4572_v57 = vadd.f32 %v4571_v48, %v4570_v3  ;;  %v4099_v46 = vpop.permute.xlu2 %4098 }
 0x3a8   : > { %v6810_v38 = vpop.f32.mrf.mxu1 }
 0x3a9   : > { %v4643_v8 = vpack.c.bf16 %v6810_v38, %v6810_v38  ;;  %v4540_v45 = vmul.f32 %v6810_v38, %v6810_v38  ;;  %v4476_v35 = vsel %vm4456_vm4, %v6810_v38, 0.0 }
 0x3aa   : > { %v3762_v40 = vpop.permute.xlu1 %3761 }
 0x3ab   : > { %3835 = vst.msk [vmem:[#allocation3 + $0x5c] sm:$0xf] %vm3811_vm13, %v3762_v40  ;;  %v4109_v30 = vpop.permute.xlu0 %4108 }
 0x3ac   : > { %4675 = vst.msk [vmem:[%s5118_s14 + $0x28] sm:$0xf] %vm912_vm10, %v4643_v8 }
 0x3ad   : > { %4172 = vst.msk [vmem:[#allocation3 + $0x5c] sm:$0xf] %vm4148_vm14, %v4099_v46 }
 0x3ae   : > { %4177 = vst.msk [vmem:[#allocation3 + $0x70] sm:$0xf] %vm4148_vm14, %v4109_v30  ;;  %v3021_v23 = vpop.permute.xlu2 %3020 }
 0x3af   : > { %3087 = vst.msk [vmem:[#allocation3 + $0x78] sm:$0xf] %vm3056_vm8, %v3021_v23 }
 0x3b0   : > { %v6819_v5 = vpop.f32.mrf.mxu1 }
 0x3b1   : > { %v4644_v51 = vpack.c.bf16 %v6819_v5, %v6819_v5  ;;  %v4541_v21 = vmul.f32 %v6819_v5, %v6819_v5  ;;  %v4478_v52 = vsel %vm4456_vm4, %v6819_v5, 0.0 }
 0x3b2   : > { %v4097_v4 = vpop.permute.xlu1 %4096 }
 0x3b3   : > { %4171 = vst.msk [vmem:[#allocation3 + $0x58] sm:$0xf] %vm4148_vm14, %v4097_v4  ;;  %v3023_v37 = vpop.permute.xlu0 %3022  ;;  %v4583_v8 = vsel %vm4456_vm4, %v4541_v21, 0.0 }
 0x3b4   : > { %4676 = vst.msk [vmem:[%s5118_s14 + $0x2c] sm:$0xf] %vm912_vm10, %v4644_v51 }
 0x3b5   : > { %3088 = vst.msk [vmem:[#allocation3 + $0x7c] sm:$0xf] %vm3056_vm8, %v3023_v37 }
 0x3b6   : > { %v3217_v53 = vpop.permute.xlu2 %3216 }
 0x3b7   : > { %3282 = vst.msk [vmem:[#allocation3 + $0x7c] sm:$0xf] %vm3250_vm11, %v3217_v53 }
 0x3ba   : > { %v4111_v32 = vpop.permute.xlu1 %4110  ;;  %v4924_v10 = vld [vmem:[#allocation3 + $0x58] sm:$0xff] }
 0x3bb   : > { %4178 = vst.msk [vmem:[#allocation3 + $0x74] sm:$0xf] %vm4148_vm14, %v4111_v32  ;;  %4906 = vmatmul.msk.bf16.gmra.mxu2 %vm4313_vm15, %v4924_v10  ;;  %v3776_v26 = vpop.permute.xlu0 %3775 }
 0x3be   : > { %v4113_v47 = vpop.permute.xlu2 %4112 }
 0x3c0   : > { %v6831_v54 = vpop.f32.mrf.mxu2 }
 0x3c1   : > { %v4651_v42 = vpack.c.bf16 %v6831_v54, %v6831_v54 }
 0x3c2   : > { %v3215_v43 = vpop.permute.xlu1 %3214  ;;  %v4927_v2 = vld [vmem:[#allocation3 + $0x70] sm:$0xff] }
 0x3c3   : > { %3281 = vst.msk [vmem:[#allocation3 + $0x78] sm:$0xf] %vm3250_vm11, %v3215_v43  ;;  %4909 = vmatmul.msk.bf16.gmra.mxu3 %vm4313_vm15, %v4927_v2  ;;  %v4115_v50 = vpop.permute.xlu0 %4114 }
 0x3c4   : > { %4683 = vst.msk [vmem:[%s5118_s14 + $0x48] sm:$0xf] %vm912_vm10, %v4651_v42 }
 0x3c5   : > { %3842 = vst.msk [vmem:[#allocation3 + $0x78] sm:$0xf] %vm3811_vm13, %v3776_v26 }
 0x3c6   : > { %4179 = vst.msk [vmem:[#allocation3 + $0x78] sm:$0xf] %vm4148_vm14, %v4113_v47 }
 0x3c8   : > { %v6841_v9 = vpop.f32.mrf.mxu2 }
 0x3c9   : > { %v4652_v0 = vpack.c.bf16 %v6841_v9, %v6841_v9 }
 0x3ca   : > { %v3778_v34 = vpop.permute.xlu1 %3777 }
 0x3cb   : > { %3843 = vst.msk [vmem:[#allocation3 + $0x7c] sm:$0xf] %vm3811_vm13, %v3778_v34 }
 0x3cc   : > { %4684 = vst.msk [vmem:[%s5118_s14 + $0x4c] sm:$0xf] %vm912_vm10, %v4652_v0 }
 0x3cd   : > { %4180 = vst.msk [vmem:[#allocation3 + $0x7c] sm:$0xf] %vm4148_vm14, %v4115_v50 }
 0x3ce   : > { %v6849_v24 = vpop.f32.mrf.mxu3 }
 0x3cf   : > { %v4657_v12 = vpack.c.bf16 %v6849_v24, %v6849_v24 }
 0x3d1   : > { %4689 = vst.msk [vmem:[%s5118_s14 + $0x60] sm:$0xf] %vm912_vm10, %v4657_v12 }
 0x3d4   : > { %v4928_v22 = vld [vmem:[#allocation3 + $0x78] sm:$0xff] }
 0x3d5   : > { %4910 = vmatmul.msk.bf16.gmra.mxu3 %vm4313_vm15, %v4928_v22 }
 0x3d6   : > { %v6856_v7 = vpop.f32.mrf.mxu3 }
 0x3d7   : > { %v4658_v25 = vpack.c.bf16 %v6856_v7, %v6856_v7 }
 0x3d9   : > { %4690 = vst.msk [vmem:[%s5118_s14 + $0x64] sm:$0xf] %vm912_vm10, %v4658_v25 }
 0x3da   : > { %v4390_v28 = vpop.f32.mrf.mxu0 }
 0x3db   : > { %v4468_v16 = vsel %vm4456_vm4, %v4390_v28, 0.0  ;;  %v4536_v19 = vmul.f32 %v4390_v28, %v4390_v28  ;;  %v4639_v39 = vpack.c.bf16 %v4390_v28, %v4390_v28 }
 0x3dc   : > { %v4469_v11 = vadd.f32 %v4468_v16, %v4467_v49  ;;  %v4581_v49 = vsel %vm4456_vm4, %v4540_v45, 0.0 }
 0x3dd   : > { %v4573_v61 = vsel %vm4456_vm4, %v4536_v19, 0.0  ;;  %4671 = vst.msk [vmem:[%s5118_s14 + $0x18] sm:$0xf] %vm912_vm10, %v4639_v39 }
 0x3de   : > { %v4574_v62 = vadd.f32 %v4573_v61, %v4572_v57  ;;  %v4546_v61 = vmul.f32 %v6780_v13, %v6780_v13 }
 0x3e2   : > { %v4392_v27 = vpop.f32.mrf.mxu0 }
 0x3e3   : > { %v4470_v56 = vsel %vm4456_vm4, %v4392_v27, 0.0  ;;  %v4537_v20 = vmul.f32 %v4392_v27, %v4392_v27  ;;  %v4640_v63 = vpack.c.bf16 %v4392_v27, %v4392_v27 }
 0x3e4   : > { %v4471_v55 = vadd.f32 %v4470_v56, %v4469_v11 }
 0x3e5   : > { %v4575_v15 = vsel %vm4456_vm4, %v4537_v20, 0.0  ;;  %4672 = vst.msk [vmem:[%s5118_s14 + $0x1c] sm:$0xf] %vm912_vm10, %v4640_v63  ;;  %v4488_v63 = vsel %vm4456_vm4, %v6780_v13, 0.0 }
 0x3e6   : > { %v4473_v6 = vadd.f32 %v4472_v1, %v4471_v55  ;;  %v4576_v18 = vadd.f32 %v4575_v15, %v4574_v62  ;;  %v4547_v55 = vmul.f32 %v6789_v29, %v6789_v29 }
 0x3e8   : > { %v4475_v3 = vadd.f32 %v4474_v31, %v4473_v6  ;;  %v4578_v17 = vadd.f32 %v4577_v59, %v4576_v18  ;;  %v4405_v36 = vpop.f32.mrf.mxu1  ;;  %v4593_v6 = vsel %vm4456_vm4, %v4546_v61, 0.0  ;;  %v4490_v18 = vsel %vm4456_vm4, %v6789_v29, 0.0 }
 0x3e9   : > { %v4645_v41 = vpack.c.bf16 %v4405_v36, %v4405_v36  ;;  %v4542_v48 = vmul.f32 %v4405_v36, %v4405_v36  ;;  %v4480_v38 = vsel %vm4456_vm4, %v4405_v36, 0.0  ;;  %v4548_v59 = vmul.f32 %v6831_v54, %v6831_v54 }
 0x3ea   : > { %v4580_v33 = vadd.f32 %v4579_v58, %v4578_v17  ;;  %v4477_v60 = vadd.f32 %v4476_v35, %v4475_v3  ;;  %v4595_v13 = vsel %vm4456_vm4, %v4547_v55, 0.0  ;;  %v4492_v3 = vsel %vm4456_vm4, %v6831_v54, 0.0 }
 0x3eb   : > { %4677 = vst.msk [vmem:[%s5118_s14 + $0x30] sm:$0xf] %vm912_vm10, %v4645_v41  ;;  %v4585_v23 = vsel %vm4456_vm4, %v4542_v48, 0.0  ;;  %v4549_v17 = vmul.f32 %v6841_v9, %v6841_v9  ;;  %v4597_v35 = vsel %vm4456_vm4, %v4548_v59, 0.0  ;;  %v4494_v29 = vsel %vm4456_vm4, %v6841_v9, 0.0 }
 0x3ec   : > { %v4479_v57 = vadd.f32 %v4478_v52, %v4477_v60  ;;  %v4582_v46 = vadd.f32 %v4581_v49, %v4580_v33 }
 0x3ed   : > { %v4599_v60 = vsel %vm4456_vm4, %v4549_v17, 0.0 }
 0x3ee   : > { %v4481_v40 = vadd.f32 %v4480_v38, %v4479_v57  ;;  %v4584_v30 = vadd.f32 %v4583_v8, %v4582_v46 }
 0x3f0   : > { %v4586_v51 = vadd.f32 %v4585_v23, %v4584_v30  ;;  %v4407_v4 = vpop.f32.mrf.mxu1 }
 0x3f1   : > { %v4482_v5 = vsel %vm4456_vm4, %v4407_v4, 0.0  ;;  %v4543_v37 = vmul.f32 %v4407_v4, %v4407_v4  ;;  %v4646_v53 = vpack.c.bf16 %v4407_v4, %v4407_v4 }
 0x3f2   : > { %v4483_v32 = vadd.f32 %v4482_v5, %v4481_v40 }
 0x3f3   : > { %v4587_v10 = vsel %vm4456_vm4, %v4543_v37, 0.0  ;;  %4678 = vst.msk [vmem:[%s5118_s14 + $0x34] sm:$0xf] %vm912_vm10, %v4646_v53 }
 0x3f4   : > { %v4588_v26 = vadd.f32 %v4587_v10, %v4586_v51  ;;  %v4554_v10 = vmul.f32 %v6849_v24, %v6849_v24 }
 0x400   : > { %v4425_v42 = vpop.f32.mrf.mxu2 }
 0x401   : > { %v4653_v43 = vpack.c.bf16 %v4425_v42, %v4425_v42  ;;  %v4550_v21 = vmul.f32 %v4425_v42, %v4425_v42  ;;  %v4496_v49 = vsel %vm4456_vm4, %v4425_v42, 0.0 }
 0x403   : > { %4685 = vst.msk [vmem:[%s5118_s14 + $0x50] sm:$0xf] %vm912_vm10, %v4653_v43  ;;  %v4601_v57 = vsel %vm4456_vm4, %v4550_v21, 0.0 }
 0x408   : > { %v4427_v2 = vpop.f32.mrf.mxu2 }
 0x409   : > { %v4654_v47 = vpack.c.bf16 %v4427_v2, %v4427_v2  ;;  %v4551_v52 = vmul.f32 %v4427_v2, %v4427_v2  ;;  %v4498_v46 = vsel %vm4456_vm4, %v4427_v2, 0.0 }
 0x40b   : > { %4686 = vst.msk [vmem:[%s5118_s14 + $0x54] sm:$0xf] %vm912_vm10, %v4654_v47  ;;  %v4603_v40 = vsel %vm4456_vm4, %v4551_v52, 0.0 }
 0x40e   : > { %v6902_v0 = vpop.f32.mrf.mxu3 }
 0x40f   : > { %v4659_v34 = vpack.c.bf16 %v6902_v0, %v6902_v0 }
 0x411   : > { %4691 = vst.msk [vmem:[%s5118_s14 + $0x68] sm:$0xf] %vm912_vm10, %v4659_v34 }
 0x416   : > { %v6908_v50 = vpop.f32.mrf.mxu3 }
 0x417   : > { %v4660_v12 = vpack.c.bf16 %v6908_v50, %v6908_v50 }
 0x418   : > { %v4410_v22 = vpop.f32.mrf.mxu1 }
 0x419   : > { %4692 = vst.msk [vmem:[%s5118_s14 + $0x6c] sm:$0xf] %vm912_vm10, %v4660_v12  ;;  %v4647_v25 = vpack.c.bf16 %v4410_v22, %v4410_v22  ;;  %v4544_v28 = vmul.f32 %v4410_v22, %v4410_v22  ;;  %v4484_v16 = vsel %vm4456_vm4, %v4410_v22, 0.0  ;;  %v4504_v12 = vsel %vm4456_vm4, %v6849_v24, 0.0 }
 0x41a   : > { %v4485_v39 = vadd.f32 %v4484_v16, %v4483_v32  ;;  %v4555_v22 = vmul.f32 %v6856_v7, %v6856_v7  ;;  %v4556_v24 = vmul.f32 %v6902_v0, %v6902_v0 }
 0x41b   : > { %4679 = vst.msk [vmem:[%s5118_s14 + $0x38] sm:$0xf] %vm912_vm10, %v4647_v25  ;;  %v4589_v19 = vsel %vm4456_vm4, %v4544_v28, 0.0 }
 0x41c   : > { %v4590_v56 = vadd.f32 %v4589_v19, %v4588_v26  ;;  %v4609_v19 = vsel %vm4456_vm4, %v4554_v10, 0.0  ;;  %v4613_v55 = vsel %vm4456_vm4, %v4556_v24, 0.0 }
 0x420   : > { %v4412_v11 = vpop.f32.mrf.mxu1 }
 0x421   : > { %v4486_v62 = vsel %vm4456_vm4, %v4412_v11, 0.0  ;;  %v4545_v27 = vmul.f32 %v4412_v11, %v4412_v11  ;;  %v4648_v44 = vpack.c.bf16 %v4412_v11, %v4412_v11 }
 0x422   : > { %v4487_v20 = vadd.f32 %v4486_v62, %v4485_v39  ;;  %v4506_v39 = vsel %vm4456_vm4, %v6856_v7, 0.0  ;;  %v4611_v62 = vsel %vm4456_vm4, %v4555_v22, 0.0  ;;  %v4510_v7 = vsel %vm4456_vm4, %v6908_v50, 0.0 }
 0x423   : > { %v4591_v1 = vsel %vm4456_vm4, %v4545_v27, 0.0  ;;  %4680 = vst.msk [vmem:[%s5118_s14 + $0x3c] sm:$0xf] %vm912_vm10, %v4648_v44  ;;  %v4508_v27 = vsel %vm4456_vm4, %v6902_v0, 0.0  ;;  %v4557_v44 = vmul.f32 %v6908_v50, %v6908_v50 }
 0x424   : > { %v4489_v14 = vadd.f32 %v4488_v63, %v4487_v20  ;;  %v4592_v15 = vadd.f32 %v4591_v1, %v4590_v56 }
 0x426   : > { %v4491_v31 = vadd.f32 %v4490_v18, %v4489_v14  ;;  %v4594_v45 = vadd.f32 %v4593_v6, %v4592_v15  ;;  %v4615_v6 = vsel %vm4456_vm4, %v4557_v44, 0.0 }
 0x428   : > { %v4493_v36 = vadd.f32 %v4492_v3, %v4491_v31  ;;  %v4596_v58 = vadd.f32 %v4595_v13, %v4594_v45 }
 0x42a   : > { %v4598_v41 = vadd.f32 %v4597_v35, %v4596_v58  ;;  %v4495_v33 = vadd.f32 %v4494_v29, %v4493_v36 }
 0x42c   : > { %v4497_v54 = vadd.f32 %v4496_v49, %v4495_v33  ;;  %v4600_v48 = vadd.f32 %v4599_v60, %v4598_v41 }
 0x42e   : > { %v4499_v8 = vadd.f32 %v4498_v46, %v4497_v54  ;;  %v4602_v38 = vadd.f32 %v4601_v57, %v4600_v48 }
 0x430   : > { %v4604_v9 = vadd.f32 %v4603_v40, %v4602_v38 }
 0x43e   : > { %v4430_v30 = vpop.f32.mrf.mxu2 }
 0x43f   : > { %v4655_v23 = vpack.c.bf16 %v4430_v30, %v4430_v30  ;;  %v4552_v51 = vmul.f32 %v4430_v30, %v4430_v30  ;;  %v4500_v4 = vsel %vm4456_vm4, %v4430_v30, 0.0 }
 0x440   : > { %v4501_v37 = vadd.f32 %v4500_v4, %v4499_v8 }
 0x441   : > { %4687 = vst.msk [vmem:[%s5118_s14 + $0x58] sm:$0xf] %vm912_vm10, %v4655_v23  ;;  %v4605_v5 = vsel %vm4456_vm4, %v4552_v51, 0.0 }
 0x442   : > { %v4606_v2 = vadd.f32 %v4605_v5, %v4604_v9 }
 0x446   : > { %v4432_v53 = vpop.f32.mrf.mxu2  ;;  %v4445_v32 = vpop.f32.mrf.mxu3 }
 0x447   : > { %v4502_v26 = vsel %vm4456_vm4, %v4432_v53, 0.0  ;;  %v4553_v42 = vmul.f32 %v4432_v53, %v4432_v53  ;;  %v4656_v43 = vpack.c.bf16 %v4432_v53, %v4432_v53  ;;  %v4661_v34 = vpack.c.bf16 %v4445_v32, %v4445_v32 }
 0x448   : > { %v4503_v47 = vadd.f32 %v4502_v26, %v4501_v37  ;;  %v4558_v18 = vmul.f32 %v4445_v32, %v4445_v32  ;;  %v4512_v31 = vsel %vm4456_vm4, %v4445_v32, 0.0  ;;  %v4455_v32 = vld [vmem:[%s7014_s7] sm:$0x1] }
 0x449   : > { %v4607_v25 = vsel %vm4456_vm4, %v4553_v42, 0.0  ;;  %4688 = vst.msk [vmem:[%s5118_s14 + $0x5c] sm:$0xf] %vm912_vm10, %v4656_v43  ;;  %v4529_v42 = vld [vmem:[%s7015_s8] sm:$0x1] }
 0x44a   : > { %v4505_v28 = vadd.f32 %v4504_v12, %v4503_v47  ;;  %v4608_v16 = vadd.f32 %v4607_v25, %v4606_v2  ;;  %4693 = vst.msk [vmem:[%s5118_s14 + $0x70] sm:$0xf] %vm912_vm10, %v4661_v34  ;;  %v4617_v3 = vsel %vm4456_vm4, %v4558_v18, 0.0 }
 0x44c   : > { %v4507_v11 = vadd.f32 %v4506_v39, %v4505_v28  ;;  %v4610_v61 = vadd.f32 %v4609_v19, %v4608_v16 }
 0x44e   : > { %v4612_v56 = vadd.f32 %v4611_v62, %v4610_v61  ;;  %v4509_v20 = vadd.f32 %v4508_v27, %v4507_v11  ;;  %v4447_v63 = vpop.f32.mrf.mxu3 }
 0x44f   : > { %v4662_v1 = vpack.c.bf16 %v4447_v63, %v4447_v63  ;;  %v4559_v17 = vmul.f32 %v4447_v63, %v4447_v63  ;;  %v4514_v58 = vsel %vm4456_vm4, %v4447_v63, 0.0 }
 0x450   : > { %v4511_v14 = vadd.f32 %v4510_v7, %v4509_v20  ;;  %v4614_v15 = vadd.f32 %v4613_v55, %v4612_v56 }
 0x451   : > { %4694 = vst.msk [vmem:[%s5118_s14 + $0x74] sm:$0xf] %vm912_vm10, %v4662_v1  ;;  %v4619_v21 = vsel %vm4456_vm4, %v4559_v17, 0.0 }
 0x452   : > { %v4616_v0 = vadd.f32 %v4615_v6, %v4614_v15  ;;  %v4513_v13 = vadd.f32 %v4512_v31, %v4511_v14 }
 0x454   : > { %v4618_v50 = vadd.f32 %v4617_v3, %v4616_v0  ;;  %v4515_v29 = vadd.f32 %v4514_v58, %v4513_v13 }
 0x456   : > { %v4620_v33 = vadd.f32 %v4619_v21, %v4618_v50 }
 0x458   : > { %v4450_v59 = vpop.f32.mrf.mxu3 }
 0x459   : > { %v4663_v45 = vpack.c.bf16 %v4450_v59, %v4450_v59  ;;  %v4560_v36 = vmul.f32 %v4450_v59, %v4450_v59  ;;  %v4516_v35 = vsel %vm4456_vm4, %v4450_v59, 0.0 }
 0x45a   : > { %v4517_v60 = vadd.f32 %v4516_v35, %v4515_v29 }
 0x45b   : > { %4695 = vst.msk [vmem:[%s5118_s14 + $0x78] sm:$0xf] %vm912_vm10, %v4663_v45  ;;  %v4621_v41 = vsel %vm4456_vm4, %v4560_v36, 0.0 }
 0x45c   : > { %v4622_v57 = vadd.f32 %v4621_v41, %v4620_v33 }
 0x460   : > { %v4452_v49 = vpop.f32.mrf.mxu3 }
 0x461   : > { %v4518_v52 = vsel %vm4456_vm4, %v4452_v49, 0.0  ;;  %v4561_v54 = vmul.f32 %v4452_v49, %v4452_v49  ;;  %v4664_v48 = vpack.c.bf16 %v4452_v49, %v4452_v49 }
 0x462   : > { %v4519_v46 = vadd.f32 %v4518_v52, %v4517_v60 }
 0x463   : > { %v4623_v8 = vsel %vm4456_vm4, %v4561_v54, 0.0  ;;  %4696 = vst.msk [vmem:[%s5118_s14 + $0x7c] sm:$0xf] %vm912_vm10, %v4664_v48 }
 0x464   : > { %v4520_v38 = vrot.slane %v4519_v46, 4  ;;  %v4624_v40 = vadd.f32 %v4623_v8, %v4622_v57 }
 0x466   : > { %v4521_v9 = vadd.f32 %v4520_v38, %v4519_v46  ;;  %v4625_v30 = vrot.slane %v4624_v40, 4 }
 0x468   : > { %v4522_v23 = vrot.slane %v4521_v9, 2  ;;  %v4626_v51 = vadd.f32 %v4625_v30, %v4624_v40 }
 0x46a   : > { %v4523_v4 = vadd.f32 %v4522_v23, %v4521_v9  ;;  %v4627_v5 = vrot.slane %v4626_v51, 2 }
 0x46c   : > { %v4524_v37 = vrot.slane %v4523_v4, 1  ;;  %v4628_v53 = vadd.f32 %v4627_v5, %v4626_v51 }
 0x46e   : > { %v4525_v10 = vadd.f32 %v4524_v37, %v4523_v4  ;;  %v4629_v26 = vrot.slane %v4628_v53, 1 }
 0x470   : > { %v4526_v43 = vadd.f32 %v4525_v10, %v4455_v32  ;;  %v4630_v2 = vadd.f32 %v4629_v26, %v4628_v53 }
 0x472   : > { %4528 = vst.msk [vmem:[%s7014_s7] sm:$0x1] %vm920_vm12, %v4526_v43  ;;  %v4631_v47 = vadd.f32 %v4630_v2, %v4529_v42 }
 0x474   : > { %4632 = vst.msk [vmem:[%s7015_s8] sm:$0x1] %vm920_vm12, %v4631_v47 }
 0x475 PF: > { %s19_s27 = sadd.s32 1, %s5045_s27  }
 0x476   : > { %p16_p5 = scmp.ge.s32.totalorder %s19_s27, 4  }
 0x478   :  { %18 = sbr.rel (!%p16_p5) target bundleno = 1 (0x1), region = 96 }

</bundles_post_ra>
